<compile_context>
chip_gen: v7x
topology: tpu7x:2x2x1
jax: 0.10.0
libtpu: 0.0.40
codegen_flags: <defaults>
</compile_context>

<pallas_src>
import functools
import math

import jax
import jax.numpy as jnp
from jax.experimental import pallas as pl
from jax.experimental.pallas import tpu as pltpu


# ----------------------------------------------------------------------------
# small helpers
# ----------------------------------------------------------------------------

def _const_spec(shape):
    """Full-array block with a constant index map (block stays resident across grid steps)."""
    shape = tuple(int(s) for s in shape)
    return pl.BlockSpec(shape, lambda *args: (0,) * len(shape))


def _layernorm(y, g, b, eps):
    mu = jnp.mean(y, axis=-1, keepdims=True)
    var = jnp.mean(jnp.square(y - mu), axis=-1, keepdims=True)
    return (y - mu) * jax.lax.rsqrt(var + eps) * g + b


def _block_diag_allowed(R, group):
    """(R, R) bool mask: allowed iff row and col fall in the same contiguous block of `group` rows.

    Built from iota + compares only (no vector integer division), statically unrolled over the
    R//group blocks -- pure VPU work, generated in-kernel (no HBM mask DMA).
    """
    rowv = jax.lax.broadcasted_iota(jnp.int32, (R, 1), 0)
    colv = jax.lax.broadcasted_iota(jnp.int32, (1, R), 1)
    allowed = None
    for g in range(R // group):
        lo, hi = g * group, (g + 1) * group
        term = ((rowv >= lo) & (rowv < hi)) & ((colv >= lo) & (colv < hi))
        allowed = term if allowed is None else (allowed | term)
    return allowed


def _softmax_rows(s):
    s = s - jnp.max(s, axis=-1, keepdims=True)
    p = jnp.exp(s)
    return p * pl.reciprocal(jnp.sum(p, axis=-1, keepdims=True), approx=True)


def _attn_block(x, allowed, wqkv_ref, bqkv_ref, wfc_ref, bfc_ref, g_ref, b_ref, *, n_heads, eps):
    """Fused MHAlayer.forward on a flattened 2-D activation with an explicit allowed-mask.

    Head split uses iota lane masks (no unaligned lane slices); masked positions get -1e9 so the
    per-block softmax matches the per-batch softmax of the reference exactly (exp underflows to 0).
    """
    R, D = x.shape
    Dh = D // n_heads
    scale = 1.0 / math.sqrt(Dh)

    q = jnp.dot(x, wqkv_ref[0], preferred_element_type=jnp.float32) + bqkv_ref[0]
    k = jnp.dot(x, wqkv_ref[1], preferred_element_type=jnp.float32) + bqkv_ref[1]
    v = jnp.dot(x, wqkv_ref[2], preferred_element_type=jnp.float32) + bqkv_ref[2]

    lane = jax.lax.broadcasted_iota(jnp.int32, (1, D), 1)
    out = jnp.zeros_like(q)
    for h in range(n_heads):                               # static unroll
        hm = ((lane >= h * Dh) & (lane < (h + 1) * Dh)).astype(jnp.float32)
        s = jax.lax.dot_general(q * hm, k, (((1,), (1,)), ((), ())),
                                preferred_element_type=jnp.float32) * scale
        s = jnp.where(allowed, s, -1e9)
        p = _softmax_rows(s)
        out = out + jnp.dot(p, v * hm, preferred_element_type=jnp.float32)

    y = jnp.dot(out, wfc_ref[...], preferred_element_type=jnp.float32) + bfc_ref[...] + x
    return _layernorm(y, g_ref[...], b_ref[...], eps)


def _gru_cell(x, h, wi_ref, wh_ref, b_ref):
    """PyTorch GRU cell.  wi:(3,I,H), wh:(3,H,H) gates (r,z,n); b:(6,1,H)=(b_ir,b_iz,b_in,b_hr,b_hz,b_hn)."""
    gi_r = jnp.dot(x, wi_ref[0], preferred_element_type=jnp.float32) + b_ref[0]
    gi_z = jnp.dot(x, wi_ref[1], preferred_element_type=jnp.float32) + b_ref[1]
    gi_n = jnp.dot(x, wi_ref[2], preferred_element_type=jnp.float32) + b_ref[2]
    gh_r = jnp.dot(h, wh_ref[0], preferred_element_type=jnp.float32) + b_ref[3]
    gh_z = jnp.dot(h, wh_ref[1], preferred_element_type=jnp.float32) + b_ref[4]
    gh_n = jnp.dot(h, wh_ref[2], preferred_element_type=jnp.float32) + b_ref[5]
    r = jax.nn.sigmoid(gi_r + gh_r)
    z = jax.nn.sigmoid(gi_z + gh_z)
    n = jnp.tanh(gi_n + r * gh_n)
    return (1.0 - z) * n + z * h


def _future_attn_halves(h0, h1, allowed, w_ref, b_ref, wfc_ref, bfc_ref,
                        lng_ref, lnb_ref, g60_ref, b60_ref, *, n_heads, eps, post_eps):
    """Fused Seq2Seq.future_attn_layer computed in per-GRU-layer 60-wide halves.

    The 120-wide q/k/v/fc weights were split at init into (in_half, out_half) blocks so the kernel
    never needs lane concatenation or unaligned lane slices.  Each attention head lies entirely in
    one half (asserted at init).  Returns the two new 60-wide hiddens after the outer LayerNorm(60).
    """
    B, H = h0.shape
    D = 2 * H
    Dh = D // n_heads
    heads_per_half = n_heads // 2
    scale = 1.0 / math.sqrt(Dh)

    def proj(p):
        a = (jnp.dot(h0, w_ref[p * 4 + 0], preferred_element_type=jnp.float32)
             + jnp.dot(h1, w_ref[p * 4 + 2], preferred_element_type=jnp.float32)
             + b_ref[p * 2 + 0])
        bb = (jnp.dot(h0, w_ref[p * 4 + 1], preferred_element_type=jnp.float32)
              + jnp.dot(h1, w_ref[p * 4 + 3], preferred_element_type=jnp.float32)
              + b_ref[p * 2 + 1])
        return a, bb

    qa, qb = proj(0)
    ka, kb = proj(1)
    va, vb = proj(2)

    lane = jax.lax.broadcasted_iota(jnp.int32, (1, H), 1)
    outs = []
    for (q, k, v) in ((qa, ka, va), (qb, kb, vb)):
        acc = jnp.zeros_like(q)
        for hh in range(heads_per_half):                    # static unroll
            hm = ((lane >= hh * Dh) & (lane < (hh + 1) * Dh)).astype(jnp.float32)
            s = jax.lax.dot_general(q * hm, k, (((1,), (1,)), ((), ())),
                                    preferred_element_type=jnp.float32) * scale
            s = jnp.where(allowed, s, -1e9)
            p = _softmax_rows(s)
            acc = acc + jnp.dot(p, v * hm, preferred_element_type=jnp.float32)
        outs.append(acc)
    out_a, out_b = outs

    # output projection + residual (residual = [h0 | h1] in halves)
    y_a = (jnp.dot(out_a, wfc_ref[0], preferred_element_type=jnp.float32)
           + jnp.dot(out_b, wfc_ref[2], preferred_element_type=jnp.float32)
           + bfc_ref[0] + h0)
    y_b = (jnp.dot(out_a, wfc_ref[1], preferred_element_type=jnp.float32)
           + jnp.dot(out_b, wfc_ref[3], preferred_element_type=jnp.float32)
           + bfc_ref[1] + h1)

    # inner MHAlayer LayerNorm over the full 2H features, combined from halves (eps = 1e-5)
    inv_d = 1.0 / D
    mu = (jnp.sum(y_a, axis=-1, keepdims=True) + jnp.sum(y_b, axis=-1, keepdims=True)) * inv_d
    var = (jnp.sum(jnp.square(y_a - mu), axis=-1, keepdims=True)
           + jnp.sum(jnp.square(y_b - mu), axis=-1, keepdims=True)) * inv_d
    rstd = jax.lax.rsqrt(var + eps)
    inter_a = (y_a - mu) * rstd * lng_ref[0] + lnb_ref[0]
    inter_b = (y_b - mu) * rstd * lng_ref[1] + lnb_ref[1]

    # outer Seq2Seq LayerNorm(60) epilogue: hidden = LN(hidden + interacted), per GRU layer
    def ln60(z):
        mu_z = jnp.mean(z, axis=-1, keepdims=True)
        var_z = jnp.mean(jnp.square(z - mu_z), axis=-1, keepdims=True)
        return (z - mu_z) * jax.lax.rsqrt(var_z + post_eps) * g60_ref[...] + b60_ref[...]

    return ln60(h0 + inter_a), ln60(h1 + inter_b)


# ----------------------------------------------------------------------------
# Pallas kernels
# ----------------------------------------------------------------------------

def _embed_kernel(x_ref, w_ref, pos_ref, g_ref, b_ref, o_ref, *, eps):
    """embed (no bias) + positional embedding + LayerNorm(eps=1e-6), fused."""
    y = jnp.dot(x_ref[...], w_ref[...], preferred_element_type=jnp.float32) + pos_ref[...]
    o_ref[...] = _layernorm(y, g_ref[...], b_ref[...], eps)


def _stmha_layer_kernel(x_ref, soc_ref,
                        twqkv, tbqkv, twfc, tbfc, tg, tb,
                        swqkv, sbqkv, swfc, sbfc, sg, sb,
                        w1, b1, w2, b2, fg, fb,
                        o_ref, *, n_heads, sl, mha_eps, ffn_eps):
    """Fused STMHAlayer: time-MHA + soc-MHA + FFN on one batch's (no*sl, D) activation.

    Row order inside a batch is (agent, timestep); both attentions are expressed as masked
    attention over all rows, so no reshape/transpose is needed between them.
    """
    x = x_ref[0]                                            # (R, D), R = no*sl
    R, _ = x.shape

    time_allowed = _block_diag_allowed(R, sl)               # same agent -> same contiguous sl-block
    x = _attn_block(x, time_allowed, twqkv, tbqkv, twfc, tbfc, tg, tb,
                    n_heads=n_heads, eps=mha_eps)

    soc_allowed = soc_ref[0] != 0.0                         # same timestep AND soc_graph edge
    x = _attn_block(x, soc_allowed, swqkv, sbqkv, swfc, sbfc, sg, sb,
                    n_heads=n_heads, eps=mha_eps)

    h = jnp.maximum(jnp.dot(x, w1[...], preferred_element_type=jnp.float32) + b1[...], 0.0)
    y = jnp.dot(h, w2[...], preferred_element_type=jnp.float32) + b2[...] + x
    o_ref[0] = _layernorm(y, fg[...], fb[...], ffn_eps)


def _rnn_encoder_kernel(x_ref, wi0, wh0, b0, wi1, wh1, b1, hfin_ref, h_scr):
    """Both RNN-encoder GRU layers fused over the sequence; only the final hidden is written out."""
    t = pl.program_id(0)

    @pl.when(t == 0)
    def _():
        h_scr[...] = jnp.zeros_like(h_scr)

    x = x_ref[0]                                            # (B, d_model)
    h0n = _gru_cell(x, h_scr[0], wi0, wh0, b0)
    h1n = _gru_cell(h0n, h_scr[1], wi1, wh1, b1)
    h_scr[0] = h0n
    h_scr[1] = h1n

    @pl.when(t == pl.num_programs(0) - 1)
    def _():
        hfin_ref[0] = h0n
        hfin_ref[1] = h1n


def _decode_loop_kernel(x0_ref, h0_ref,
                        wi0, wh0, b0, wi1, wh1, b1, wlin, blin,
                        fw, fb, fwfc, fbfc, flng, flnb, fg60, fb60,
                        preds_ref, dec_scr, hid_scr,
                        *, n_heads, n_agents, mha_eps, post_eps):
    """Whole autoregressive decode loop: grid=(pred_len,), weights resident, state in VMEM scratch.

    Each step: 2-cell GRU decoder + linear + tanh, write prediction row, then future-attention
    update of the hidden state (block-diagonal per batch over the n_agents rows).
    """
    t = pl.program_id(0)

    @pl.when(t == 0)
    def _():
        dec_scr[...] = x0_ref[...]
        hid_scr[...] = h0_ref[...]

    x = dec_scr[...]
    h0n = _gru_cell(x, hid_scr[0], wi0, wh0, b0)
    h1n = _gru_cell(h0n, hid_scr[1], wi1, wh1, b1)
    out = jnp.tanh(jnp.dot(h1n, wlin[...], preferred_element_type=jnp.float32) + blin[...])
    preds_ref[t] = out                                      # resident output block, 1 final writeback
    dec_scr[...] = out

    B, _ = h0n.shape
    allowed = _block_diag_allowed(B, n_agents)              # future_attn_mask is None -> per-batch
    new0, new1 = _future_attn_halves(h0n, h1n, allowed, fw, fb, fwfc, fbfc,
                                     flng, flnb, fg60, fb60,
                                     n_heads=n_heads, eps=mha_eps, post_eps=post_eps)
    hid_scr[0] = new0
    hid_scr[1] = new1


# ----------------------------------------------------------------------------
# kernel wrappers
# ----------------------------------------------------------------------------

def embed_apply(p, x_rows, bs):
    """x_rows: (bs*no, L, in_size) -> (bs, no*L, d_model), rows ordered (agent, timestep) per batch."""
    Brows, L, K = x_rows.shape
    D = p["embed_w"].shape[1]
    x2 = x_rows.reshape(Brows * L, K).astype(jnp.float32)
    pos = jnp.tile(p["pos_emb"][:L], (Brows, 1))            # (Brows*L, D)
    inputs = [x2, p["embed_w"], pos, p["ln_g"], p["ln_b"]]
    out = pl.pallas_call(
        functools.partial(_embed_kernel, eps=1e-6),
        out_shape=jax.ShapeDtypeStruct((Brows * L, D), jnp.float32),
        grid=(1,),
        in_specs=[_const_spec(a.shape) for a in inputs],
        out_specs=_const_spec((Brows * L, D)),
    )(*inputs)
    no = Brows // bs
    return out.reshape(bs, no * L, D)


def stmha_layer_apply(p, x, soc_big, *, n_heads, sl):
    """Fused STMHA layer.  x: (bs, no*sl, D); soc_big: (bs, no*sl, no*sl).  grid=(bs,) parallel."""
    bs, Rb, D = x.shape
    t, s, f = p["time"], p["soc"], p["ffn"]
    weights = [t["w_qkv"], t["b_qkv"], t["w_fc"], t["b_fc"], t["ln_g"], t["ln_b"],
               s["w_qkv"], s["b_qkv"], s["w_fc"], s["b_fc"], s["ln_g"], s["ln_b"],
               f["w1"], f["b1"], f["w2"], f["b2"], f["ln_g"], f["ln_b"]]
    in_specs = ([pl.BlockSpec((1, Rb, D), lambda b: (b, 0, 0)),
                 pl.BlockSpec((1, Rb, Rb), lambda b: (b, 0, 0))]
                + [_const_spec(w.shape) for w in weights])
    return pl.pallas_call(
        functools.partial(_stmha_layer_kernel, n_heads=n_heads, sl=sl,
                          mha_eps=1e-5, ffn_eps=1e-6),
        out_shape=jax.ShapeDtypeStruct((bs, Rb, D), jnp.float32),
        grid=(bs,),
        in_specs=in_specs,
        out_specs=pl.BlockSpec((1, Rb, D), lambda b: (b, 0, 0)),
        compiler_params=pltpu.CompilerParams(dimension_semantics=("parallel",)),
    )(x, soc_big, *weights)


def rnn_encoder_apply(p, seq_tbd):
    """2-layer GRU over the whole sequence (zero initial hidden).  seq_tbd: (T, B, D) -> (2, B, H)."""
    T, B, D = seq_tbd.shape
    H = p["l0"]["w_h"].shape[-1]
    weights = [p["l0"]["w_i"], p["l0"]["w_h"], p["l0"]["b"],
               p["l1"]["w_i"], p["l1"]["w_h"], p["l1"]["b"]]
    return pl.pallas_call(
        _rnn_encoder_kernel,
        out_shape=jax.ShapeDtypeStruct((2, B, H), jnp.float32),
        grid=(T,),
        in_specs=([pl.BlockSpec((1, B, D), lambda t: (t, 0, 0))]
                  + [_const_spec(w.shape) for w in weights]),
        out_specs=_const_spec((2, B, H)),
        scratch_shapes=[pltpu.VMEM((2, B, H), jnp.float32)],
        compiler_params=pltpu.CompilerParams(dimension_semantics=("arbitrary",)),
    )(seq_tbd.astype(jnp.float32), *weights)


def decode_loop_apply(p, x0, h0, *, pred_len, n_agents, n_heads):
    """Whole decode loop in one pallas_call.  x0: (B, out_size), h0: (2, B, H) -> (pred_len, B, out_size)."""
    B, out_size = x0.shape
    H = h0.shape[-1]
    fut = p["future"]
    weights = [p["l0"]["w_i"], p["l0"]["w_h"], p["l0"]["b"],
               p["l1"]["w_i"], p["l1"]["w_h"], p["l1"]["b"],
               p["w_lin"], p["b_lin"],
               fut["w_qkv"], fut["b_qkv"], fut["w_fc"], fut["b_fc"],
               fut["ln_g"], fut["ln_b"], fut["post_g"], fut["post_b"]]
    inputs = [x0.astype(jnp.float32), h0.astype(jnp.float32)] + weights
    return pl.pallas_call(
        functools.partial(_decode_loop_kernel, n_heads=n_heads, n_agents=n_agents,
                          mha_eps=1e-5, post_eps=1e-5),
        out_shape=jax.ShapeDtypeStruct((pred_len, B, out_size), jnp.float32),
        grid=(pred_len,),
        in_specs=[_const_spec(a.shape) for a in inputs],
        out_specs=_const_spec((pred_len, B, out_size)),
        scratch_shapes=[pltpu.VMEM((B, out_size), jnp.float32),
                        pltpu.VMEM((2, B, H), jnp.float32)],
        compiler_params=pltpu.CompilerParams(dimension_semantics=("arbitrary",)),
    )(*inputs)


# ----------------------------------------------------------------------------
# Parameter initialization (deterministic, fused layouts built directly on the host)
# ----------------------------------------------------------------------------

class ParamRng:
    def __init__(self, seed=0):
        self._key = jax.random.PRNGKey(seed)

    def next(self):
        self._key, sub = jax.random.split(self._key)
        return sub


def _uniform(rng, shape, bound):
    return jax.random.uniform(rng.next(), shape, jnp.float32, -bound, bound)


def init_linear(rng, d_in, d_out, bias=True):
    bound = 1.0 / math.sqrt(d_in)
    p = {"w": _uniform(rng, (d_in, d_out), bound)}           # stored transposed: (in, out)
    if bias:
        p["b"] = _uniform(rng, (d_out,), bound)
    return p


def init_layernorm(d):
    return {"g": jnp.ones((d,), jnp.float32), "b": jnp.zeros((d,), jnp.float32)}


def init_mha(rng, d_model):
    """MHAlayer params with the intentional double projection folded: W_eff = W@W, b_eff = b@W + b."""
    def eff():
        lin = init_linear(rng, d_model, d_model)
        w, b = lin["w"], lin["b"]
        return w @ w, b @ w + b
    wq, bq = eff()
    wk, bk = eff()
    wv, bv = eff()
    fc = init_linear(rng, d_model, d_model)
    ln = init_layernorm(d_model)
    return {
        "w_qkv": jnp.stack([wq, wk, wv], axis=0),              # (3, D, D)
        "b_qkv": jnp.stack([bq, bk, bv], axis=0)[:, None, :],  # (3, 1, D)
        "w_fc": fc["w"], "b_fc": fc["b"][None, :],
        "ln_g": ln["g"][None, :], "ln_b": ln["b"][None, :],
    }


def init_future_mha(rng, hs, n_heads):
    """Future-attention MHA (d_model = 2*hs) with weights pre-split into per-half blocks."""
    assert n_heads % 2 == 0 and (2 * hs) % n_heads == 0, "heads must tile the per-layer halves"
    base = init_mha(rng, 2 * hs)
    # flat index = proj*4 + in_half*2 + out_half
    w_qkv = base["w_qkv"].reshape(3, 2, hs, 2, hs).transpose(0, 1, 3, 2, 4).reshape(12, hs, hs)
    b_qkv = base["b_qkv"].reshape(3, 1, 2, hs).transpose(0, 2, 1, 3).reshape(6, 1, hs)
    w_fc = base["w_fc"].reshape(2, hs, 2, hs).transpose(0, 2, 1, 3).reshape(4, hs, hs)
    b_fc = base["b_fc"].reshape(1, 2, hs).transpose(1, 0, 2)           # (2, 1, hs)
    ln_g = base["ln_g"].reshape(1, 2, hs).transpose(1, 0, 2)
    ln_b = base["ln_b"].reshape(1, 2, hs).transpose(1, 0, 2)
    ln60 = init_layernorm(hs)                                           # single shared LayerNorm(60)
    return {"w_qkv": w_qkv, "b_qkv": b_qkv, "w_fc": w_fc, "b_fc": b_fc,
            "ln_g": ln_g, "ln_b": ln_b,
            "post_g": ln60["g"][None, :], "post_b": ln60["b"][None, :]}


def init_ff(rng, d_in, d_hidden):
    fc1 = init_linear(rng, d_in, d_hidden)
    fc2 = init_linear(rng, d_hidden, d_in)
    ln = init_layernorm(d_in)
    return {"w1": fc1["w"], "b1": fc1["b"][None, :],
            "w2": fc2["w"], "b2": fc2["b"][None, :],
            "ln_g": ln["g"][None, :], "ln_b": ln["b"][None, :]}


def init_gru_layer(rng, input_size, hidden):
    bound = 1.0 / math.sqrt(hidden)
    return {
        "w_i": _uniform(rng, (3, input_size, hidden), bound),   # gates (r, z, n)
        "w_h": _uniform(rng, (3, hidden, hidden), bound),
        "b": _uniform(rng, (6, 1, hidden), bound),              # (b_ir,b_iz,b_in,b_hr,b_hz,b_hn)
    }


def init_stmha_block(rng, in_size, n_layers, d_model, d_ffn, n_pos):
    embed = init_linear(rng, in_size, d_model, bias=False)
    ln = init_layernorm(d_model)
    return {
        "embed_w": embed["w"],
        "pos_emb": 0.1 * jax.random.normal(rng.next(), (n_pos, d_model), jnp.float32),
        "ln_g": ln["g"][None, :], "ln_b": ln["b"][None, :],
        "layers": [{"time": init_mha(rng, d_model),
                    "soc": init_mha(rng, d_model),
                    "ffn": init_ff(rng, d_model, d_ffn)} for _ in range(n_layers)],
    }


def init_seq2seq(rng, in_size, out_size, d_model, d_ffn, n_st_layers, n_heads, n_pos):
    h = out_size * 30
    dec_lin = init_linear(rng, h, out_size)
    # NOTE: transformer_decoder_ff params omitted -- that branch is dead (transformer_decoder=False).
    return {
        "input_encoder": init_stmha_block(rng, in_size, n_st_layers, d_model, d_ffn, n_pos),
        "rnn_encoder": {"l0": init_gru_layer(rng, d_model, h), "l1": init_gru_layer(rng, h, h)},
        "rnn_decoder": {"l0": init_gru_layer(rng, out_size, h), "l1": init_gru_layer(rng, h, h),
                        "w_lin": dec_lin["w"], "b_lin": dec_lin["b"][None, :],
                        "future": init_future_mha(rng, h, n_heads)},
    }


# ----------------------------------------------------------------------------
# Model forward (thin JAX glue around the fused Pallas kernels)
# ----------------------------------------------------------------------------

def seq2seq_forward(params, inp, soc_graph, *, pred_len, out_size, n_heads):
    bs, in_size, sl, no = inp.shape

    # 'bs is sl no -> (bs no) sl is'
    x_rows = jnp.transpose(inp, (0, 3, 2, 1)).reshape(bs * no, sl, in_size)

    # Expand the soc graph ONCE into the per-batch block-diagonal (no*sl, no*sl) mask shared by
    # every STMHA layer: allowed iff same timestep AND soc_graph[b, t, agent_row, agent_col] != 0.
    eye_s = jnp.eye(sl, dtype=jnp.float32)
    soc_big = jnp.einsum('blmn,lk->bmlnk', soc_graph.astype(jnp.float32), eye_s)
    soc_big = soc_big.reshape(bs, no * sl, no * sl)

    p_enc = params["input_encoder"]
    enc = embed_apply(p_enc, x_rows, bs)                       # (bs, no*sl, D)
    for lp in p_enc["layers"]:
        enc = stmha_layer_apply(lp, enc, soc_big, n_heads=n_heads, sl=sl)

    D = enc.shape[-1]
    enc_rows = enc.reshape(bs * no, sl, D)                     # back to '(bs no) sl hs'

    # The reference's transformer-decoder branch (dec_hidden mean/split + transformer_decoder_ff)
    # is dead code (transformer_decoder=False); removed at the Python level per the perf review.

    # RNN encoder (2-layer GRU, zero initial hidden), both layers fused over the whole sequence.
    seq_tbd = jnp.transpose(enc_rows, (1, 0, 2))
    hidden = rnn_encoder_apply(params["rnn_encoder"], seq_tbd)  # (2, bs*no, 60)

    # Fused autoregressive decode loop (tfr = 0 -> no teacher forcing).
    dec_input0 = x_rows[:, -1, :2]                              # last observed (x, y)
    preds = decode_loop_apply(params["rnn_decoder"], dec_input0, hidden,
                              pred_len=pred_len, n_agents=no, n_heads=n_heads)

    # (pred_len, bs*no, out_size) -> 'bs hs sl no'
    out = preds.transpose(1, 0, 2).reshape(bs, no, pred_len, out_size).transpose(0, 3, 2, 1)
    return out, None


# ----------------------------------------------------------------------------
# Main
# ----------------------------------------------------------------------------

if __name__ == "__main__":
    BS, IN_SIZE, SL, NV = 2, 4, 8, 4
    OUT_SIZE = 2                    # decoder GRU input size == out_size; input[..., :2] feeds it
    D_MODEL, D_FFN = 32, 64
    N_ST_LAYERS, N_HEADS = 2, 4
    N_POS = 16
    PRED_LEN = 4

    rng = ParamRng(seed=0)
    params = init_seq2seq(rng, IN_SIZE, OUT_SIZE, D_MODEL, D_FFN, N_ST_LAYERS, N_HEADS, N_POS)

    key = jax.random.PRNGKey(0)
    k1, k2 = jax.random.split(key)
    inp = jax.random.normal(k1, (BS, IN_SIZE, SL, NV), jnp.float32)
    soc = (jax.random.uniform(k2, (BS, SL, NV, NV)) > 0.3).astype(jnp.float32)
    soc = jnp.maximum(soc, jnp.eye(NV, dtype=jnp.float32)[None, None])   # self-connections

    fwd = jax.jit(functools.partial(seq2seq_forward,
                                    pred_len=PRED_LEN, out_size=OUT_SIZE, n_heads=N_HEADS))
    out, _ = fwd(params, inp, soc)
    out = jax.block_until_ready(out)
    assert out.shape == (BS, OUT_SIZE, PRED_LEN, NV), out.shape
    assert bool(jnp.all(jnp.isfinite(out)))
    # TODO(synk): dropout layers and np.random-based teacher forcing are inherently stochastic;
    # they are treated as identity / disabled (eval semantics, tfr=0).
    print("KERNEL_OK")
</pallas_src>

<mosaic_0001>
module attributes {stable_mosaic.version = 11 : i64} {
  func.func @_embed_kernel(%arg0: i32, %arg1: memref<64x4xf32, #tpu.memory_space<vmem>>, %arg2: memref<4x32xf32, #tpu.memory_space<vmem>>, %arg3: memref<64x32xf32, #tpu.memory_space<vmem>>, %arg4: memref<1x32xf32, #tpu.memory_space<vmem>>, %arg5: memref<1x32xf32, #tpu.memory_space<vmem>>, %arg6: memref<64x32xf32, #tpu.memory_space<vmem>>) attributes {dimension_semantics = [#tpu.dimension_semantics<arbitrary>], iteration_bounds = array<i64: 1>, scalar_prefetch = 0 : i64, scratch_operands = 0 : i64, tpu.core_type = #tpu.core_type<tc>, window_params = [{pipeline_mode = #tpu.pipeline_mode<synchronous>, transform_indices = @transform_0, window_bounds = array<i64: 64, 4>}, {pipeline_mode = #tpu.pipeline_mode<synchronous>, transform_indices = @transform_1, window_bounds = array<i64: 4, 32>}, {pipeline_mode = #tpu.pipeline_mode<synchronous>, transform_indices = @transform_2, window_bounds = array<i64: 64, 32>}, {pipeline_mode = #tpu.pipeline_mode<synchronous>, transform_indices = @transform_3, window_bounds = array<i64: 1, 32>}, {pipeline_mode = #tpu.pipeline_mode<synchronous>, transform_indices = @transform_4, window_bounds = array<i64: 1, 32>}, {pipeline_mode = #tpu.pipeline_mode<synchronous>, transform_indices = @transform_5, window_bounds = array<i64: 64, 32>}]} {
    %c0 = arith.constant 0 : index
    %c0_0 = arith.constant 0 : index
    %0 = vector.load %arg1[%c0, %c0_0] : memref<64x4xf32, #tpu.memory_space<vmem>>, vector<64x4xf32>
    %c0_1 = arith.constant 0 : index
    %c0_2 = arith.constant 0 : index
    %1 = vector.load %arg2[%c0_1, %c0_2] : memref<4x32xf32, #tpu.memory_space<vmem>>, vector<4x32xf32>
    %cst = arith.constant dense<0.000000e+00> : vector<64x32xf32>
    %2 = tpu.matmul %0, %1, %cst {dimension_numbers = #tpu.dot_dimension_numbers<[1], [0], [0], [1], [0, 0, 1, 1], [], []>} : vector<64x4xf32>, vector<4x32xf32>, vector<64x32xf32> -> vector<64x32xf32>
    %c0_3 = arith.constant 0 : index
    %c0_4 = arith.constant 0 : index
    %3 = vector.load %arg3[%c0_3, %c0_4] : memref<64x32xf32, #tpu.memory_space<vmem>>, vector<64x32xf32>
    %4 = arith.addf %2, %3 : vector<64x32xf32>
    %c0_5 = arith.constant 0 : index
    %c0_6 = arith.constant 0 : index
    %5 = vector.load %arg4[%c0_5, %c0_6] : memref<1x32xf32, #tpu.memory_space<vmem>>, vector<1x32xf32>
    %c0_7 = arith.constant 0 : index
    %c0_8 = arith.constant 0 : index
    %6 = vector.load %arg5[%c0_7, %c0_8] : memref<1x32xf32, #tpu.memory_space<vmem>>, vector<1x32xf32>
    %cst_9 = arith.constant dense<0.000000e+00> : vector<64xf32>
    %7 = vector.multi_reduction <add>, %4, %cst_9 [1] : vector<64x32xf32> to vector<64xf32>
    %8 = vector.shape_cast %7 : vector<64xf32> to vector<64x1xf32>
    %cst_10 = arith.constant 3.200000e+01 : f32
    %9 = vector.broadcast %cst_10 : f32 to vector<64x1xf32>
    %10 = arith.divf %8, %9 : vector<64x1xf32>
    %11 = vector.broadcast %10 : vector<64x1xf32> to vector<64x32xf32>
    %12 = arith.subf %4, %11 : vector<64x32xf32>
    %13 = arith.mulf %12, %12 : vector<64x32xf32>
    %cst_11 = arith.constant dense<0.000000e+00> : vector<64xf32>
    %14 = vector.multi_reduction <add>, %13, %cst_11 [1] : vector<64x32xf32> to vector<64xf32>
    %15 = vector.shape_cast %14 : vector<64xf32> to vector<64x1xf32>
    %cst_12 = arith.constant 3.200000e+01 : f32
    %16 = vector.broadcast %cst_12 : f32 to vector<64x1xf32>
    %17 = arith.divf %15, %16 : vector<64x1xf32>
    %18 = vector.broadcast %10 : vector<64x1xf32> to vector<64x32xf32>
    %19 = arith.subf %4, %18 : vector<64x32xf32>
    %cst_13 = arith.constant 9.99999997E-7 : f32
    %20 = vector.broadcast %cst_13 : f32 to vector<64x1xf32>
    %21 = arith.addf %17, %20 : vector<64x1xf32>
    %22 = math.rsqrt %21 : vector<64x1xf32>
    %23 = vector.broadcast %22 : vector<64x1xf32> to vector<64x32xf32>
    %24 = arith.mulf %19, %23 : vector<64x32xf32>
    %25 = vector.broadcast %5 : vector<1x32xf32> to vector<64x32xf32>
    %26 = arith.mulf %24, %25 : vector<64x32xf32>
    %27 = vector.broadcast %6 : vector<1x32xf32> to vector<64x32xf32>
    %28 = arith.addf %26, %27 : vector<64x32xf32>
    %c0_14 = arith.constant 0 : index
    %c0_15 = arith.constant 0 : index
    %29 = vector.load %arg6[%c0_14, %c0_15] : memref<64x32xf32, #tpu.memory_space<vmem>>, vector<64x32xf32>
    tpu.vector_store %arg6[%c0_14, %c0_15], %28 {strides = array<i32>} : memref<64x32xf32, #tpu.memory_space<vmem>>, vector<64x32xf32>,
    return
  }
  func.func @transform_0(%arg0: i32) -> (i32, i32) {
    %c0_i32 = arith.constant 0 : i32
    %c0_i32_0 = arith.constant 0 : i32
    %c0_i32_1 = arith.constant 0 : i32
    return %c0_i32, %c0_i32_0 : i32, i32
  }
  func.func @transform_1(%arg0: i32) -> (i32, i32) {
    %c0_i32 = arith.constant 0 : i32
    %c0_i32_0 = arith.constant 0 : i32
    %c0_i32_1 = arith.constant 0 : i32
    return %c0_i32, %c0_i32_0 : i32, i32
  }
  func.func @transform_2(%arg0: i32) -> (i32, i32) {
    %c0_i32 = arith.constant 0 : i32
    %c0_i32_0 = arith.constant 0 : i32
    %c0_i32_1 = arith.constant 0 : i32
    return %c0_i32, %c0_i32_0 : i32, i32
  }
  func.func @transform_3(%arg0: i32) -> (i32, i32) {
    %c0_i32 = arith.constant 0 : i32
    %c0_i32_0 = arith.constant 0 : i32
    %c0_i32_1 = arith.constant 0 : i32
    return %c0_i32, %c0_i32_0 : i32, i32
  }
  func.func @transform_4(%arg0: i32) -> (i32, i32) {
    %c0_i32 = arith.constant 0 : i32
    %c0_i32_0 = arith.constant 0 : i32
    %c0_i32_1 = arith.constant 0 : i32
    return %c0_i32, %c0_i32_0 : i32, i32
  }
  func.func @transform_5(%arg0: i32) -> (i32, i32) {
    %c0_i32 = arith.constant 0 : i32
    %c0_i32_0 = arith.constant 0 : i32
    %c0_i32_1 = arith.constant 0 : i32
    return %c0_i32, %c0_i32_0 : i32, i32
  }
}

module attributes {stable_mosaic.version = 11 : i64} {
  func.func @_rnn_encoder_kernel(%arg0: i32, %arg1: memref<1x8x32xf32, #tpu.memory_space<vmem>>, %arg2: memref<3x32x60xf32, #tpu.memory_space<vmem>>, %arg3: memref<3x60x60xf32, #tpu.memory_space<vmem>>, %arg4: memref<6x1x60xf32, #tpu.memory_space<vmem>>, %arg5: memref<3x60x60xf32, #tpu.memory_space<vmem>>, %arg6: memref<3x60x60xf32, #tpu.memory_space<vmem>>, %arg7: memref<6x1x60xf32, #tpu.memory_space<vmem>>, %arg8: memref<2x8x60xf32, #tpu.memory_space<vmem>>, %arg9: memref<2x8x60xf32, #tpu.memory_space<vmem>>) attributes {dimension_semantics = [#tpu.dimension_semantics<arbitrary>], iteration_bounds = array<i64: 8>, scalar_prefetch = 0 : i64, scratch_operands = 1 : i64, tpu.core_type = #tpu.core_type<tc>, window_params = [{transform_indices = @transform_0, window_bounds = array<i64: 1, 8, 32>}, {pipeline_mode = #tpu.pipeline_mode<synchronous>, transform_indices = @transform_1, window_bounds = array<i64: 3, 32, 60>}, {pipeline_mode = #tpu.pipeline_mode<synchronous>, transform_indices = @transform_2, window_bounds = array<i64: 3, 60, 60>}, {pipeline_mode = #tpu.pipeline_mode<synchronous>, transform_indices = @transform_3, window_bounds = array<i64: 6, 1, 60>}, {pipeline_mode = #tpu.pipeline_mode<synchronous>, transform_indices = @transform_4, window_bounds = array<i64: 3, 60, 60>}, {pipeline_mode = #tpu.pipeline_mode<synchronous>, transform_indices = @transform_5, window_bounds = array<i64: 3, 60, 60>}, {pipeline_mode = #tpu.pipeline_mode<synchronous>, transform_indices = @transform_6, window_bounds = array<i64: 6, 1, 60>}, {pipeline_mode = #tpu.pipeline_mode<synchronous>, transform_indices = @transform_7, window_bounds = array<i64: 2, 8, 60>}]} {
    %c0_i32 = arith.constant 0 : i32
    %0 = arith.cmpi eq, %arg0, %c0_i32 : i32
    %1 = arith.extui %0 : i1 to i32
    %c0_i32_0 = arith.constant 0 : i32
    %2 = arith.cmpi ne, %1, %c0_i32_0 : i32
    scf.if %2 {
      %cst_100 = arith.constant 0.000000e+00 : f32
      %142 = vector.broadcast %cst_100 : f32 to vector<2x8x60xf32>
      %c0_101 = arith.constant 0 : index
      %c0_102 = arith.constant 0 : index
      %c0_103 = arith.constant 0 : index
      %143 = vector.load %arg9[%c0_101, %c0_102, %c0_103] : memref<2x8x60xf32, #tpu.memory_space<vmem>>, vector<2x8x60xf32>
      tpu.vector_store %arg9[%c0_101, %c0_102, %c0_103], %142 {strides = array<i32>} : memref<2x8x60xf32, #tpu.memory_space<vmem>>, vector<2x8x60xf32>,
    } else {
    }
    %c0 = arith.constant 0 : index
    %c0_1 = arith.constant 0 : index
    %c0_2 = arith.constant 0 : index
    %3 = vector.load %arg1[%c0, %c0_1, %c0_2] : memref<1x8x32xf32, #tpu.memory_space<vmem>>, vector<1x8x32xf32>
    %4 = vector.shape_cast %3 : vector<1x8x32xf32> to vector<8x32xf32>
    %c0_3 = arith.constant 0 : index
    %c0_4 = arith.constant 0 : index
    %c0_5 = arith.constant 0 : index
    %5 = vector.load %arg9[%c0_3, %c0_4, %c0_5] : memref<2x8x60xf32, #tpu.memory_space<vmem>>, vector<1x8x60xf32>
    %6 = vector.shape_cast %5 : vector<1x8x60xf32> to vector<8x60xf32>
    %c0_6 = arith.constant 0 : index
    %c0_7 = arith.constant 0 : index
    %c0_8 = arith.constant 0 : index
    %7 = vector.load %arg2[%c0_6, %c0_7, %c0_8] : memref<3x32x60xf32, #tpu.memory_space<vmem>>, vector<1x32x60xf32>
    %8 = vector.shape_cast %7 : vector<1x32x60xf32> to vector<32x60xf32>
    %cst = arith.constant dense<0.000000e+00> : vector<8x60xf32>
    %9 = tpu.matmul %4, %8, %cst {dimension_numbers = #tpu.dot_dimension_numbers<[1], [0], [0], [1], [0, 0, 1, 1], [], []>} : vector<8x32xf32>, vector<32x60xf32>, vector<8x60xf32> -> vector<8x60xf32>
    %c0_9 = arith.constant 0 : index
    %c0_10 = arith.constant 0 : index
    %c0_11 = arith.constant 0 : index
    %10 = vector.load %arg4[%c0_9, %c0_10, %c0_11] : memref<6x1x60xf32, #tpu.memory_space<vmem>>, vector<1x1x60xf32>
    %11 = vector.shape_cast %10 : vector<1x1x60xf32> to vector<1x60xf32>
    %12 = vector.broadcast %11 : vector<1x60xf32> to vector<8x60xf32>
    %13 = arith.addf %9, %12 : vector<8x60xf32>
    %c1 = arith.constant 1 : index
    %c0_12 = arith.constant 0 : index
    %c0_13 = arith.constant 0 : index
    %14 = vector.load %arg2[%c1, %c0_12, %c0_13] : memref<3x32x60xf32, #tpu.memory_space<vmem>>, vector<1x32x60xf32>
    %15 = vector.shape_cast %14 : vector<1x32x60xf32> to vector<32x60xf32>
    %cst_14 = arith.constant dense<0.000000e+00> : vector<8x60xf32>
    %16 = tpu.matmul %4, %15, %cst_14 {dimension_numbers = #tpu.dot_dimension_numbers<[1], [0], [0], [1], [0, 0, 1, 1], [], []>} : vector<8x32xf32>, vector<32x60xf32>, vector<8x60xf32> -> vector<8x60xf32>
    %c1_15 = arith.constant 1 : index
    %c0_16 = arith.constant 0 : index
    %c0_17 = arith.constant 0 : index
    %17 = vector.load %arg4[%c1_15, %c0_16, %c0_17] : memref<6x1x60xf32, #tpu.memory_space<vmem>>, vector<1x1x60xf32>
    %18 = vector.shape_cast %17 : vector<1x1x60xf32> to vector<1x60xf32>
    %19 = vector.broadcast %18 : vector<1x60xf32> to vector<8x60xf32>
    %20 = arith.addf %16, %19 : vector<8x60xf32>
    %c2 = arith.constant 2 : index
    %c0_18 = arith.constant 0 : index
    %c0_19 = arith.constant 0 : index
    %21 = vector.load %arg2[%c2, %c0_18, %c0_19] : memref<3x32x60xf32, #tpu.memory_space<vmem>>, vector<1x32x60xf32>
    %22 = vector.shape_cast %21 : vector<1x32x60xf32> to vector<32x60xf32>
    %cst_20 = arith.constant dense<0.000000e+00> : vector<8x60xf32>
    %23 = tpu.matmul %4, %22, %cst_20 {dimension_numbers = #tpu.dot_dimension_numbers<[1], [0], [0], [1], [0, 0, 1, 1], [], []>} : vector<8x32xf32>, vector<32x60xf32>, vector<8x60xf32> -> vector<8x60xf32>
    %c2_21 = arith.constant 2 : index
    %c0_22 = arith.constant 0 : index
    %c0_23 = arith.constant 0 : index
    %24 = vector.load %arg4[%c2_21, %c0_22, %c0_23] : memref<6x1x60xf32, #tpu.memory_space<vmem>>, vector<1x1x60xf32>
    %25 = vector.shape_cast %24 : vector<1x1x60xf32> to vector<1x60xf32>
    %26 = vector.broadcast %25 : vector<1x60xf32> to vector<8x60xf32>
    %27 = arith.addf %23, %26 : vector<8x60xf32>
    %c0_24 = arith.constant 0 : index
    %c0_25 = arith.constant 0 : index
    %c0_26 = arith.constant 0 : index
    %28 = vector.load %arg3[%c0_24, %c0_25, %c0_26] : memref<3x60x60xf32, #tpu.memory_space<vmem>>, vector<1x60x60xf32>
    %29 = vector.shape_cast %28 : vector<1x60x60xf32> to vector<60x60xf32>
    %cst_27 = arith.constant dense<0.000000e+00> : vector<8x60xf32>
    %30 = tpu.matmul %6, %29, %cst_27 {dimension_numbers = #tpu.dot_dimension_numbers<[1], [0], [0], [1], [0, 0, 1, 1], [], []>} : vector<8x60xf32>, vector<60x60xf32>, vector<8x60xf32> -> vector<8x60xf32>
    %c3 = arith.constant 3 : index
    %c0_28 = arith.constant 0 : index
    %c0_29 = arith.constant 0 : index
    %31 = vector.load %arg4[%c3, %c0_28, %c0_29] : memref<6x1x60xf32, #tpu.memory_space<vmem>>, vector<1x1x60xf32>
    %32 = vector.shape_cast %31 : vector<1x1x60xf32> to vector<1x60xf32>
    %33 = vector.broadcast %32 : vector<1x60xf32> to vector<8x60xf32>
    %34 = arith.addf %30, %33 : vector<8x60xf32>
    %c1_30 = arith.constant 1 : index
    %c0_31 = arith.constant 0 : index
    %c0_32 = arith.constant 0 : index
    %35 = vector.load %arg3[%c1_30, %c0_31, %c0_32] : memref<3x60x60xf32, #tpu.memory_space<vmem>>, vector<1x60x60xf32>
    %36 = vector.shape_cast %35 : vector<1x60x60xf32> to vector<60x60xf32>
    %cst_33 = arith.constant dense<0.000000e+00> : vector<8x60xf32>
    %37 = tpu.matmul %6, %36, %cst_33 {dimension_numbers = #tpu.dot_dimension_numbers<[1], [0], [0], [1], [0, 0, 1, 1], [], []>} : vector<8x60xf32>, vector<60x60xf32>, vector<8x60xf32> -> vector<8x60xf32>
    %c4 = arith.constant 4 : index
    %c0_34 = arith.constant 0 : index
    %c0_35 = arith.constant 0 : index
    %38 = vector.load %arg4[%c4, %c0_34, %c0_35] : memref<6x1x60xf32, #tpu.memory_space<vmem>>, vector<1x1x60xf32>
    %39 = vector.shape_cast %38 : vector<1x1x60xf32> to vector<1x60xf32>
    %40 = vector.broadcast %39 : vector<1x60xf32> to vector<8x60xf32>
    %41 = arith.addf %37, %40 : vector<8x60xf32>
    %c2_36 = arith.constant 2 : index
    %c0_37 = arith.constant 0 : index
    %c0_38 = arith.constant 0 : index
    %42 = vector.load %arg3[%c2_36, %c0_37, %c0_38] : memref<3x60x60xf32, #tpu.memory_space<vmem>>, vector<1x60x60xf32>
    %43 = vector.shape_cast %42 : vector<1x60x60xf32> to vector<60x60xf32>
    %cst_39 = arith.constant dense<0.000000e+00> : vector<8x60xf32>
    %44 = tpu.matmul %6, %43, %cst_39 {dimension_numbers = #tpu.dot_dimension_numbers<[1], [0], [0], [1], [0, 0, 1, 1], [], []>} : vector<8x60xf32>, vector<60x60xf32>, vector<8x60xf32> -> vector<8x60xf32>
    %c5 = arith.constant 5 : index
    %c0_40 = arith.constant 0 : index
    %c0_41 = arith.constant 0 : index
    %45 = vector.load %arg4[%c5, %c0_40, %c0_41] : memref<6x1x60xf32, #tpu.memory_space<vmem>>, vector<1x1x60xf32>
    %46 = vector.shape_cast %45 : vector<1x1x60xf32> to vector<1x60xf32>
    %47 = vector.broadcast %46 : vector<1x60xf32> to vector<8x60xf32>
    %48 = arith.addf %44, %47 : vector<8x60xf32>
    %49 = arith.addf %13, %34 : vector<8x60xf32>
    %50 = arith.negf %49 : vector<8x60xf32>
    %51 = math.exp %50 : vector<8x60xf32>
    %cst_42 = arith.constant 1.000000e+00 : f32
    %52 = vector.broadcast %cst_42 : f32 to vector<8x60xf32>
    %53 = arith.addf %52, %51 : vector<8x60xf32>
    %54 = arith.divf %52, %53 : vector<8x60xf32>
    %55 = arith.addf %20, %41 : vector<8x60xf32>
    %56 = arith.negf %55 : vector<8x60xf32>
    %57 = math.exp %56 : vector<8x60xf32>
    %cst_43 = arith.constant 1.000000e+00 : f32
    %58 = vector.broadcast %cst_43 : f32 to vector<8x60xf32>
    %59 = arith.addf %58, %57 : vector<8x60xf32>
    %60 = arith.divf %58, %59 : vector<8x60xf32>
    %61 = arith.mulf %54, %48 : vector<8x60xf32>
    %62 = arith.addf %27, %61 : vector<8x60xf32>
    %63 = math.tanh %62 : vector<8x60xf32>
    %cst_44 = arith.constant 1.000000e+00 : f32
    %64 = vector.broadcast %cst_44 : f32 to vector<8x60xf32>
    %65 = arith.subf %64, %60 : vector<8x60xf32>
    %66 = arith.mulf %65, %63 : vector<8x60xf32>
    %67 = arith.mulf %60, %6 : vector<8x60xf32>
    %68 = arith.addf %66, %67 : vector<8x60xf32>
    %c1_45 = arith.constant 1 : index
    %c0_46 = arith.constant 0 : index
    %c0_47 = arith.constant 0 : index
    %69 = vector.load %arg9[%c1_45, %c0_46, %c0_47] : memref<2x8x60xf32, #tpu.memory_space<vmem>>, vector<1x8x60xf32>
    %70 = vector.shape_cast %69 : vector<1x8x60xf32> to vector<8x60xf32>
    %c0_48 = arith.constant 0 : index
    %c0_49 = arith.constant 0 : index
    %c0_50 = arith.constant 0 : index
    %71 = vector.load %arg5[%c0_48, %c0_49, %c0_50] : memref<3x60x60xf32, #tpu.memory_space<vmem>>, vector<1x60x60xf32>
    %72 = vector.shape_cast %71 : vector<1x60x60xf32> to vector<60x60xf32>
    %cst_51 = arith.constant dense<0.000000e+00> : vector<8x60xf32>
    %73 = tpu.matmul %68, %72, %cst_51 {dimension_numbers = #tpu.dot_dimension_numbers<[1], [0], [0], [1], [0, 0, 1, 1], [], []>} : vector<8x60xf32>, vector<60x60xf32>, vector<8x60xf32> -> vector<8x60xf32>
    %c0_52 = arith.constant 0 : index
    %c0_53 = arith.constant 0 : index
    %c0_54 = arith.constant 0 : index
    %74 = vector.load %arg7[%c0_52, %c0_53, %c0_54] : memref<6x1x60xf32, #tpu.memory_space<vmem>>, vector<1x1x60xf32>
    %75 = vector.shape_cast %74 : vector<1x1x60xf32> to vector<1x60xf32>
    %76 = vector.broadcast %75 : vector<1x60xf32> to vector<8x60xf32>
    %77 = arith.addf %73, %76 : vector<8x60xf32>
    %c1_55 = arith.constant 1 : index
    %c0_56 = arith.constant 0 : index
    %c0_57 = arith.constant 0 : index
    %78 = vector.load %arg5[%c1_55, %c0_56, %c0_57] : memref<3x60x60xf32, #tpu.memory_space<vmem>>, vector<1x60x60xf32>
    %79 = vector.shape_cast %78 : vector<1x60x60xf32> to vector<60x60xf32>
    %cst_58 = arith.constant dense<0.000000e+00> : vector<8x60xf32>
    %80 = tpu.matmul %68, %79, %cst_58 {dimension_numbers = #tpu.dot_dimension_numbers<[1], [0], [0], [1], [0, 0, 1, 1], [], []>} : vector<8x60xf32>, vector<60x60xf32>, vector<8x60xf32> -> vector<8x60xf32>
    %c1_59 = arith.constant 1 : index
    %c0_60 = arith.constant 0 : index
    %c0_61 = arith.constant 0 : index
    %81 = vector.load %arg7[%c1_59, %c0_60, %c0_61] : memref<6x1x60xf32, #tpu.memory_space<vmem>>, vector<1x1x60xf32>
    %82 = vector.shape_cast %81 : vector<1x1x60xf32> to vector<1x60xf32>
    %83 = vector.broadcast %82 : vector<1x60xf32> to vector<8x60xf32>
    %84 = arith.addf %80, %83 : vector<8x60xf32>
    %c2_62 = arith.constant 2 : index
    %c0_63 = arith.constant 0 : index
    %c0_64 = arith.constant 0 : index
    %85 = vector.load %arg5[%c2_62, %c0_63, %c0_64] : memref<3x60x60xf32, #tpu.memory_space<vmem>>, vector<1x60x60xf32>
    %86 = vector.shape_cast %85 : vector<1x60x60xf32> to vector<60x60xf32>
    %cst_65 = arith.constant dense<0.000000e+00> : vector<8x60xf32>
    %87 = tpu.matmul %68, %86, %cst_65 {dimension_numbers = #tpu.dot_dimension_numbers<[1], [0], [0], [1], [0, 0, 1, 1], [], []>} : vector<8x60xf32>, vector<60x60xf32>, vector<8x60xf32> -> vector<8x60xf32>
    %c2_66 = arith.constant 2 : index
    %c0_67 = arith.constant 0 : index
    %c0_68 = arith.constant 0 : index
    %88 = vector.load %arg7[%c2_66, %c0_67, %c0_68] : memref<6x1x60xf32, #tpu.memory_space<vmem>>, vector<1x1x60xf32>
    %89 = vector.shape_cast %88 : vector<1x1x60xf32> to vector<1x60xf32>
    %90 = vector.broadcast %89 : vector<1x60xf32> to vector<8x60xf32>
    %91 = arith.addf %87, %90 : vector<8x60xf32>
    %c0_69 = arith.constant 0 : index
    %c0_70 = arith.constant 0 : index
    %c0_71 = arith.constant 0 : index
    %92 = vector.load %arg6[%c0_69, %c0_70, %c0_71] : memref<3x60x60xf32, #tpu.memory_space<vmem>>, vector<1x60x60xf32>
    %93 = vector.shape_cast %92 : vector<1x60x60xf32> to vector<60x60xf32>
    %cst_72 = arith.constant dense<0.000000e+00> : vector<8x60xf32>
    %94 = tpu.matmul %70, %93, %cst_72 {dimension_numbers = #tpu.dot_dimension_numbers<[1], [0], [0], [1], [0, 0, 1, 1], [], []>} : vector<8x60xf32>, vector<60x60xf32>, vector<8x60xf32> -> vector<8x60xf32>
    %c3_73 = arith.constant 3 : index
    %c0_74 = arith.constant 0 : index
    %c0_75 = arith.constant 0 : index
    %95 = vector.load %arg7[%c3_73, %c0_74, %c0_75] : memref<6x1x60xf32, #tpu.memory_space<vmem>>, vector<1x1x60xf32>
    %96 = vector.shape_cast %95 : vector<1x1x60xf32> to vector<1x60xf32>
    %97 = vector.broadcast %96 : vector<1x60xf32> to vector<8x60xf32>
    %98 = arith.addf %94, %97 : vector<8x60xf32>
    %c1_76 = arith.constant 1 : index
    %c0_77 = arith.constant 0 : index
    %c0_78 = arith.constant 0 : index
    %99 = vector.load %arg6[%c1_76, %c0_77, %c0_78] : memref<3x60x60xf32, #tpu.memory_space<vmem>>, vector<1x60x60xf32>
    %100 = vector.shape_cast %99 : vector<1x60x60xf32> to vector<60x60xf32>
    %cst_79 = arith.constant dense<0.000000e+00> : vector<8x60xf32>
    %101 = tpu.matmul %70, %100, %cst_79 {dimension_numbers = #tpu.dot_dimension_numbers<[1], [0], [0], [1], [0, 0, 1, 1], [], []>} : vector<8x60xf32>, vector<60x60xf32>, vector<8x60xf32> -> vector<8x60xf32>
    %c4_80 = arith.constant 4 : index
    %c0_81 = arith.constant 0 : index
    %c0_82 = arith.constant 0 : index
    %102 = vector.load %arg7[%c4_80, %c0_81, %c0_82] : memref<6x1x60xf32, #tpu.memory_space<vmem>>, vector<1x1x60xf32>
    %103 = vector.shape_cast %102 : vector<1x1x60xf32> to vector<1x60xf32>
    %104 = vector.broadcast %103 : vector<1x60xf32> to vector<8x60xf32>
    %105 = arith.addf %101, %104 : vector<8x60xf32>
    %c2_83 = arith.constant 2 : index
    %c0_84 = arith.constant 0 : index
    %c0_85 = arith.constant 0 : index
    %106 = vector.load %arg6[%c2_83, %c0_84, %c0_85] : memref<3x60x60xf32, #tpu.memory_space<vmem>>, vector<1x60x60xf32>
    %107 = vector.shape_cast %106 : vector<1x60x60xf32> to vector<60x60xf32>
    %cst_86 = arith.constant dense<0.000000e+00> : vector<8x60xf32>
    %108 = tpu.matmul %70, %107, %cst_86 {dimension_numbers = #tpu.dot_dimension_numbers<[1], [0], [0], [1], [0, 0, 1, 1], [], []>} : vector<8x60xf32>, vector<60x60xf32>, vector<8x60xf32> -> vector<8x60xf32>
    %c5_87 = arith.constant 5 : index
    %c0_88 = arith.constant 0 : index
    %c0_89 = arith.constant 0 : index
    %109 = vector.load %arg7[%c5_87, %c0_88, %c0_89] : memref<6x1x60xf32, #tpu.memory_space<vmem>>, vector<1x1x60xf32>
    %110 = vector.shape_cast %109 : vector<1x1x60xf32> to vector<1x60xf32>
    %111 = vector.broadcast %110 : vector<1x60xf32> to vector<8x60xf32>
    %112 = arith.addf %108, %111 : vector<8x60xf32>
    %113 = arith.addf %77, %98 : vector<8x60xf32>
    %114 = arith.negf %113 : vector<8x60xf32>
    %115 = math.exp %114 : vector<8x60xf32>
    %cst_90 = arith.constant 1.000000e+00 : f32
    %116 = vector.broadcast %cst_90 : f32 to vector<8x60xf32>
    %117 = arith.addf %116, %115 : vector<8x60xf32>
    %118 = arith.divf %116, %117 : vector<8x60xf32>
    %119 = arith.addf %84, %105 : vector<8x60xf32>
    %120 = arith.negf %119 : vector<8x60xf32>
    %121 = math.exp %120 : vector<8x60xf32>
    %cst_91 = arith.constant 1.000000e+00 : f32
    %122 = vector.broadcast %cst_91 : f32 to vector<8x60xf32>
    %123 = arith.addf %122, %121 : vector<8x60xf32>
    %124 = arith.divf %122, %123 : vector<8x60xf32>
    %125 = arith.mulf %118, %112 : vector<8x60xf32>
    %126 = arith.addf %91, %125 : vector<8x60xf32>
    %127 = math.tanh %126 : vector<8x60xf32>
    %cst_92 = arith.constant 1.000000e+00 : f32
    %128 = vector.broadcast %cst_92 : f32 to vector<8x60xf32>
    %129 = arith.subf %128, %124 : vector<8x60xf32>
    %130 = arith.mulf %129, %127 : vector<8x60xf32>
    %131 = arith.mulf %124, %70 : vector<8x60xf32>
    %132 = arith.addf %130, %131 : vector<8x60xf32>
    %c0_93 = arith.constant 0 : index
    %c0_94 = arith.constant 0 : index
    %c0_95 = arith.constant 0 : index
    %133 = vector.load %arg9[%c0_93, %c0_94, %c0_95] : memref<2x8x60xf32, #tpu.memory_space<vmem>>, vector<1x8x60xf32>
    %134 = vector.shape_cast %133 : vector<1x8x60xf32> to vector<8x60xf32>
    %135 = vector.shape_cast %68 : vector<8x60xf32> to vector<1x8x60xf32>
    tpu.vector_store %arg9[%c0_93, %c0_94, %c0_95], %135 {strides = array<i32>} : memref<2x8x60xf32, #tpu.memory_space<vmem>>, vector<1x8x60xf32>,
    %c1_96 = arith.constant 1 : index
    %c0_97 = arith.constant 0 : index
    %c0_98 = arith.constant 0 : index
    %136 = vector.load %arg9[%c1_96, %c0_97, %c0_98] : memref<2x8x60xf32, #tpu.memory_space<vmem>>, vector<1x8x60xf32>
    %137 = vector.shape_cast %136 : vector<1x8x60xf32> to vector<8x60xf32>
    %138 = vector.shape_cast %132 : vector<8x60xf32> to vector<1x8x60xf32>
    tpu.vector_store %arg9[%c1_96, %c0_97, %c0_98], %138 {strides = array<i32>} : memref<2x8x60xf32, #tpu.memory_space<vmem>>, vector<1x8x60xf32>,
    %c7_i32 = arith.constant 7 : i32
    %139 = arith.cmpi eq, %arg0, %c7_i32 : i32
    %140 = arith.extui %139 : i1 to i32
    %c0_i32_99 = arith.constant 0 : i32
    %141 = arith.cmpi ne, %140, %c0_i32_99 : i32
    scf.if %141 {
      %c0_100 = arith.constant 0 : index
      %c0_101 = arith.constant 0 : index
      %c0_102 = arith.constant 0 : index
      %142 = vector.load %arg8[%c0_100, %c0_101, %c0_102] : memref<2x8x60xf32, #tpu.memory_space<vmem>>, vector<1x8x60xf32>
      %143 = vector.shape_cast %142 : vector<1x8x60xf32> to vector<8x60xf32>
      %144 = vector.shape_cast %68 : vector<8x60xf32> to vector<1x8x60xf32>
      tpu.vector_store %arg8[%c0_100, %c0_101, %c0_102], %144 {strides = array<i32>} : memref<2x8x60xf32, #tpu.memory_space<vmem>>, vector<1x8x60xf32>,
      %c1_103 = arith.constant 1 : index
      %c0_104 = arith.constant 0 : index
      %c0_105 = arith.constant 0 : index
      %145 = vector.load %arg8[%c1_103, %c0_104, %c0_105] : memref<2x8x60xf32, #tpu.memory_space<vmem>>, vector<1x8x60xf32>
      %146 = vector.shape_cast %145 : vector<1x8x60xf32> to vector<8x60xf32>
      %147 = vector.shape_cast %132 : vector<8x60xf32> to vector<1x8x60xf32>
      tpu.vector_store %arg8[%c1_103, %c0_104, %c0_105], %147 {strides = array<i32>} : memref<2x8x60xf32, #tpu.memory_space<vmem>>, vector<1x8x60xf32>,
    } else {
    }
    return
  }
  func.func @transform_0(%arg0: i32) -> (i32, i32, i32) {
    %c0_i32 = arith.constant 0 : i32
    %c0_i32_0 = arith.constant 0 : i32
    %c0_i32_1 = arith.constant 0 : i32
    return %arg0, %c0_i32, %c0_i32_0 : i32, i32, i32
  }
  func.func @transform_1(%arg0: i32) -> (i32, i32, i32) {
    %c0_i32 = arith.constant 0 : i32
    %c0_i32_0 = arith.constant 0 : i32
    %c0_i32_1 = arith.constant 0 : i32
    %c0_i32_2 = arith.constant 0 : i32
    return %c0_i32, %c0_i32_0, %c0_i32_1 : i32, i32, i32
  }
  func.func @transform_2(%arg0: i32) -> (i32, i32, i32) {
    %c0_i32 = arith.constant 0 : i32
    %c0_i32_0 = arith.constant 0 : i32
    %c0_i32_1 = arith.constant 0 : i32
    %c0_i32_2 = arith.constant 0 : i32
    return %c0_i32, %c0_i32_0, %c0_i32_1 : i32, i32, i32
  }
  func.func @transform_3(%arg0: i32) -> (i32, i32, i32) {
    %c0_i32 = arith.constant 0 : i32
    %c0_i32_0 = arith.constant 0 : i32
    %c0_i32_1 = arith.constant 0 : i32
    %c0_i32_2 = arith.constant 0 : i32
    return %c0_i32, %c0_i32_0, %c0_i32_1 : i32, i32, i32
  }
  func.func @transform_4(%arg0: i32) -> (i32, i32, i32) {
    %c0_i32 = arith.constant 0 : i32
    %c0_i32_0 = arith.constant 0 : i32
    %c0_i32_1 = arith.constant 0 : i32
    %c0_i32_2 = arith.constant 0 : i32
    return %c0_i32, %c0_i32_0, %c0_i32_1 : i32, i32, i32
  }
  func.func @transform_5(%arg0: i32) -> (i32, i32, i32) {
    %c0_i32 = arith.constant 0 : i32
    %c0_i32_0 = arith.constant 0 : i32
    %c0_i32_1 = arith.constant 0 : i32
    %c0_i32_2 = arith.constant 0 : i32
    return %c0_i32, %c0_i32_0, %c0_i32_1 : i32, i32, i32
  }
  func.func @transform_6(%arg0: i32) -> (i32, i32, i32) {
    %c0_i32 = arith.constant 0 : i32
    %c0_i32_0 = arith.constant 0 : i32
    %c0_i32_1 = arith.constant 0 : i32
    %c0_i32_2 = arith.constant 0 : i32
    return %c0_i32, %c0_i32_0, %c0_i32_1 : i32, i32, i32
  }
  func.func @transform_7(%arg0: i32) -> (i32, i32, i32) {
    %c0_i32 = arith.constant 0 : i32
    %c0_i32_0 = arith.constant 0 : i32
    %c0_i32_1 = arith.constant 0 : i32
    %c0_i32_2 = arith.constant 0 : i32
    return %c0_i32, %c0_i32_0, %c0_i32_1 : i32, i32, i32
  }
}

module attributes {stable_mosaic.version = 11 : i64} {
  func.func @_stmha_layer_kernel(%arg0: i32, %arg1: memref<1x32x32xf32, #tpu.memory_space<vmem>>, %arg2: memref<1x32x32xf32, #tpu.memory_space<vmem>>, %arg3: memref<3x32x32xf32, #tpu.memory_space<vmem>>, %arg4: memref<3x1x32xf32, #tpu.memory_space<vmem>>, %arg5: memref<32x32xf32, #tpu.memory_space<vmem>>, %arg6: memref<1x32xf32, #tpu.memory_space<vmem>>, %arg7: memref<1x32xf32, #tpu.memory_space<vmem>>, %arg8: memref<1x32xf32, #tpu.memory_space<vmem>>, %arg9: memref<3x32x32xf32, #tpu.memory_space<vmem>>, %arg10: memref<3x1x32xf32, #tpu.memory_space<vmem>>, %arg11: memref<32x32xf32, #tpu.memory_space<vmem>>, %arg12: memref<1x32xf32, #tpu.memory_space<vmem>>, %arg13: memref<1x32xf32, #tpu.memory_space<vmem>>, %arg14: memref<1x32xf32, #tpu.memory_space<vmem>>, %arg15: memref<32x64xf32, #tpu.memory_space<vmem>>, %arg16: memref<1x64xf32, #tpu.memory_space<vmem>>, %arg17: memref<64x32xf32, #tpu.memory_space<vmem>>, %arg18: memref<1x32xf32, #tpu.memory_space<vmem>>, %arg19: memref<1x32xf32, #tpu.memory_space<vmem>>, %arg20: memref<1x32xf32, #tpu.memory_space<vmem>>, %arg21: memref<1x32x32xf32, #tpu.memory_space<vmem>>) attributes {dimension_semantics = [#tpu.dimension_semantics<parallel>], iteration_bounds = array<i64: 2>, scalar_prefetch = 0 : i64, scratch_operands = 0 : i64, tpu.core_type = #tpu.core_type<tc>, window_params = [{transform_indices = @transform_0, window_bounds = array<i64: 1, 32, 32>}, {transform_indices = @transform_1, window_bounds = array<i64: 1, 32, 32>}, {pipeline_mode = #tpu.pipeline_mode<synchronous>, transform_indices = @transform_2, window_bounds = array<i64: 3, 32, 32>}, {pipeline_mode = #tpu.pipeline_mode<synchronous>, transform_indices = @transform_3, window_bounds = array<i64: 3, 1, 32>}, {pipeline_mode = #tpu.pipeline_mode<synchronous>, transform_indices = @transform_4, window_bounds = array<i64: 32, 32>}, {pipeline_mode = #tpu.pipeline_mode<synchronous>, transform_indices = @transform_5, window_bounds = array<i64: 1, 32>}, {pipeline_mode = #tpu.pipeline_mode<synchronous>, transform_indices = @transform_6, window_bounds = array<i64: 1, 32>}, {pipeline_mode = #tpu.pipeline_mode<synchronous>, transform_indices = @transform_7, window_bounds = array<i64: 1, 32>}, {pipeline_mode = #tpu.pipeline_mode<synchronous>, transform_indices = @transform_8, window_bounds = array<i64: 3, 32, 32>}, {pipeline_mode = #tpu.pipeline_mode<synchronous>, transform_indices = @transform_9, window_bounds = array<i64: 3, 1, 32>}, {pipeline_mode = #tpu.pipeline_mode<synchronous>, transform_indices = @transform_10, window_bounds = array<i64: 32, 32>}, {pipeline_mode = #tpu.pipeline_mode<synchronous>, transform_indices = @transform_11, window_bounds = array<i64: 1, 32>}, {pipeline_mode = #tpu.pipeline_mode<synchronous>, transform_indices = @transform_12, window_bounds = array<i64: 1, 32>}, {pipeline_mode = #tpu.pipeline_mode<synchronous>, transform_indices = @transform_13, window_bounds = array<i64: 1, 32>}, {pipeline_mode = #tpu.pipeline_mode<synchronous>, transform_indices = @transform_14, window_bounds = array<i64: 32, 64>}, {pipeline_mode = #tpu.pipeline_mode<synchronous>, transform_indices = @transform_15, window_bounds = array<i64: 1, 64>}, {pipeline_mode = #tpu.pipeline_mode<synchronous>, transform_indices = @transform_16, window_bounds = array<i64: 64, 32>}, {pipeline_mode = #tpu.pipeline_mode<synchronous>, transform_indices = @transform_17, window_bounds = array<i64: 1, 32>}, {pipeline_mode = #tpu.pipeline_mode<synchronous>, transform_indices = @transform_18, window_bounds = array<i64: 1, 32>}, {pipeline_mode = #tpu.pipeline_mode<synchronous>, transform_indices = @transform_19, window_bounds = array<i64: 1, 32>}, {transform_indices = @transform_20, window_bounds = array<i64: 1, 32, 32>}]} {
    %c0 = arith.constant 0 : index
    %c0_0 = arith.constant 0 : index
    %c0_1 = arith.constant 0 : index
    %0 = vector.load %arg1[%c0, %c0_0, %c0_1] : memref<1x32x32xf32, #tpu.memory_space<vmem>>, vector<1x32x32xf32>
    %1 = vector.shape_cast %0 : vector<1x32x32xf32> to vector<32x32xf32>
    %2 = tpu.iota {dimensions = array<i32: 0>} : vector<32x1xi32>
    %3 = tpu.iota {dimensions = array<i32: 1>} : vector<1x32xi32>
    %c0_i32 = arith.constant 0 : i32
    %4 = vector.broadcast %c0_i32 : i32 to vector<32x1xi32>
    %5 = arith.cmpi sge, %2, %4 : vector<32x1xi32>
    %c8_i32 = arith.constant 8 : i32
    %6 = vector.broadcast %c8_i32 : i32 to vector<32x1xi32>
    %7 = arith.cmpi slt, %2, %6 : vector<32x1xi32>
    %8 = arith.andi %5, %7 : vector<32x1xi1>
    %c0_i32_2 = arith.constant 0 : i32
    %9 = vector.broadcast %c0_i32_2 : i32 to vector<1x32xi32>
    %10 = arith.cmpi sge, %3, %9 : vector<1x32xi32>
    %c8_i32_3 = arith.constant 8 : i32
    %11 = vector.broadcast %c8_i32_3 : i32 to vector<1x32xi32>
    %12 = arith.cmpi slt, %3, %11 : vector<1x32xi32>
    %13 = arith.andi %10, %12 : vector<1x32xi1>
    %14 = vector.broadcast %8 : vector<32x1xi1> to vector<32x32xi1>
    %15 = vector.broadcast %13 : vector<1x32xi1> to vector<32x32xi1>
    %16 = arith.andi %14, %15 : vector<32x32xi1>
    %c8_i32_4 = arith.constant 8 : i32
    %17 = vector.broadcast %c8_i32_4 : i32 to vector<32x1xi32>
    %18 = arith.cmpi sge, %2, %17 : vector<32x1xi32>
    %c16_i32 = arith.constant 16 : i32
    %19 = vector.broadcast %c16_i32 : i32 to vector<32x1xi32>
    %20 = arith.cmpi slt, %2, %19 : vector<32x1xi32>
    %21 = arith.andi %18, %20 : vector<32x1xi1>
    %c8_i32_5 = arith.constant 8 : i32
    %22 = vector.broadcast %c8_i32_5 : i32 to vector<1x32xi32>
    %23 = arith.cmpi sge, %3, %22 : vector<1x32xi32>
    %c16_i32_6 = arith.constant 16 : i32
    %24 = vector.broadcast %c16_i32_6 : i32 to vector<1x32xi32>
    %25 = arith.cmpi slt, %3, %24 : vector<1x32xi32>
    %26 = arith.andi %23, %25 : vector<1x32xi1>
    %27 = vector.broadcast %21 : vector<32x1xi1> to vector<32x32xi1>
    %28 = vector.broadcast %26 : vector<1x32xi1> to vector<32x32xi1>
    %29 = arith.andi %27, %28 : vector<32x32xi1>
    %30 = arith.ori %16, %29 : vector<32x32xi1>
    %c16_i32_7 = arith.constant 16 : i32
    %31 = vector.broadcast %c16_i32_7 : i32 to vector<32x1xi32>
    %32 = arith.cmpi sge, %2, %31 : vector<32x1xi32>
    %c24_i32 = arith.constant 24 : i32
    %33 = vector.broadcast %c24_i32 : i32 to vector<32x1xi32>
    %34 = arith.cmpi slt, %2, %33 : vector<32x1xi32>
    %35 = arith.andi %32, %34 : vector<32x1xi1>
    %c16_i32_8 = arith.constant 16 : i32
    %36 = vector.broadcast %c16_i32_8 : i32 to vector<1x32xi32>
    %37 = arith.cmpi sge, %3, %36 : vector<1x32xi32>
    %c24_i32_9 = arith.constant 24 : i32
    %38 = vector.broadcast %c24_i32_9 : i32 to vector<1x32xi32>
    %39 = arith.cmpi slt, %3, %38 : vector<1x32xi32>
    %40 = arith.andi %37, %39 : vector<1x32xi1>
    %41 = vector.broadcast %35 : vector<32x1xi1> to vector<32x32xi1>
    %42 = vector.broadcast %40 : vector<1x32xi1> to vector<32x32xi1>
    %43 = arith.andi %41, %42 : vector<32x32xi1>
    %44 = arith.ori %30, %43 : vector<32x32xi1>
    %c24_i32_10 = arith.constant 24 : i32
    %45 = vector.broadcast %c24_i32_10 : i32 to vector<32x1xi32>
    %46 = arith.cmpi sge, %2, %45 : vector<32x1xi32>
    %c32_i32 = arith.constant 32 : i32
    %47 = vector.broadcast %c32_i32 : i32 to vector<32x1xi32>
    %48 = arith.cmpi slt, %2, %47 : vector<32x1xi32>
    %49 = arith.andi %46, %48 : vector<32x1xi1>
    %c24_i32_11 = arith.constant 24 : i32
    %50 = vector.broadcast %c24_i32_11 : i32 to vector<1x32xi32>
    %51 = arith.cmpi sge, %3, %50 : vector<1x32xi32>
    %c32_i32_12 = arith.constant 32 : i32
    %52 = vector.broadcast %c32_i32_12 : i32 to vector<1x32xi32>
    %53 = arith.cmpi slt, %3, %52 : vector<1x32xi32>
    %54 = arith.andi %51, %53 : vector<1x32xi1>
    %55 = vector.broadcast %49 : vector<32x1xi1> to vector<32x32xi1>
    %56 = vector.broadcast %54 : vector<1x32xi1> to vector<32x32xi1>
    %57 = arith.andi %55, %56 : vector<32x32xi1>
    %58 = arith.ori %44, %57 : vector<32x32xi1>
    %c0_13 = arith.constant 0 : index
    %c0_14 = arith.constant 0 : index
    %c0_15 = arith.constant 0 : index
    %59 = vector.load %arg3[%c0_13, %c0_14, %c0_15] : memref<3x32x32xf32, #tpu.memory_space<vmem>>, vector<1x32x32xf32>
    %60 = vector.shape_cast %59 : vector<1x32x32xf32> to vector<32x32xf32>
    %cst = arith.constant dense<0.000000e+00> : vector<32x32xf32>
    %61 = tpu.matmul %1, %60, %cst {dimension_numbers = #tpu.dot_dimension_numbers<[1], [0], [0], [1], [0, 0, 1, 1], [], []>} : vector<32x32xf32>, vector<32x32xf32>, vector<32x32xf32> -> vector<32x32xf32>
    %c0_16 = arith.constant 0 : index
    %c0_17 = arith.constant 0 : index
    %c0_18 = arith.constant 0 : index
    %62 = vector.load %arg4[%c0_16, %c0_17, %c0_18] : memref<3x1x32xf32, #tpu.memory_space<vmem>>, vector<1x1x32xf32>
    %63 = vector.shape_cast %62 : vector<1x1x32xf32> to vector<1x32xf32>
    %64 = vector.broadcast %63 : vector<1x32xf32> to vector<32x32xf32>
    %65 = arith.addf %61, %64 : vector<32x32xf32>
    %c1 = arith.constant 1 : index
    %c0_19 = arith.constant 0 : index
    %c0_20 = arith.constant 0 : index
    %66 = vector.load %arg3[%c1, %c0_19, %c0_20] : memref<3x32x32xf32, #tpu.memory_space<vmem>>, vector<1x32x32xf32>
    %67 = vector.shape_cast %66 : vector<1x32x32xf32> to vector<32x32xf32>
    %cst_21 = arith.constant dense<0.000000e+00> : vector<32x32xf32>
    %68 = tpu.matmul %1, %67, %cst_21 {dimension_numbers = #tpu.dot_dimension_numbers<[1], [0], [0], [1], [0, 0, 1, 1], [], []>} : vector<32x32xf32>, vector<32x32xf32>, vector<32x32xf32> -> vector<32x32xf32>
    %c1_22 = arith.constant 1 : index
    %c0_23 = arith.constant 0 : index
    %c0_24 = arith.constant 0 : index
    %69 = vector.load %arg4[%c1_22, %c0_23, %c0_24] : memref<3x1x32xf32, #tpu.memory_space<vmem>>, vector<1x1x32xf32>
    %70 = vector.shape_cast %69 : vector<1x1x32xf32> to vector<1x32xf32>
    %71 = vector.broadcast %70 : vector<1x32xf32> to vector<32x32xf32>
    %72 = arith.addf %68, %71 : vector<32x32xf32>
    %c2 = arith.constant 2 : index
    %c0_25 = arith.constant 0 : index
    %c0_26 = arith.constant 0 : index
    %73 = vector.load %arg3[%c2, %c0_25, %c0_26] : memref<3x32x32xf32, #tpu.memory_space<vmem>>, vector<1x32x32xf32>
    %74 = vector.shape_cast %73 : vector<1x32x32xf32> to vector<32x32xf32>
    %cst_27 = arith.constant dense<0.000000e+00> : vector<32x32xf32>
    %75 = tpu.matmul %1, %74, %cst_27 {dimension_numbers = #tpu.dot_dimension_numbers<[1], [0], [0], [1], [0, 0, 1, 1], [], []>} : vector<32x32xf32>, vector<32x32xf32>, vector<32x32xf32> -> vector<32x32xf32>
    %c2_28 = arith.constant 2 : index
    %c0_29 = arith.constant 0 : index
    %c0_30 = arith.constant 0 : index
    %76 = vector.load %arg4[%c2_28, %c0_29, %c0_30] : memref<3x1x32xf32, #tpu.memory_space<vmem>>, vector<1x1x32xf32>
    %77 = vector.shape_cast %76 : vector<1x1x32xf32> to vector<1x32xf32>
    %78 = vector.broadcast %77 : vector<1x32xf32> to vector<32x32xf32>
    %79 = arith.addf %75, %78 : vector<32x32xf32>
    %80 = tpu.iota {dimensions = array<i32: 1>} : vector<1x32xi32>
    %cst_31 = arith.constant 0.000000e+00 : f32
    %81 = vector.broadcast %cst_31 : f32 to vector<32x32xf32>
    %c0_i32_32 = arith.constant 0 : i32
    %82 = vector.broadcast %c0_i32_32 : i32 to vector<1x32xi32>
    %83 = arith.cmpi sge, %80, %82 : vector<1x32xi32>
    %c8_i32_33 = arith.constant 8 : i32
    %84 = vector.broadcast %c8_i32_33 : i32 to vector<1x32xi32>
    %85 = arith.cmpi slt, %80, %84 : vector<1x32xi32>
    %86 = arith.andi %83, %85 : vector<1x32xi1>
    %87 = arith.extui %86 : vector<1x32xi1> to vector<1x32xi32>
    %88 = arith.sitofp %87 : vector<1x32xi32> to vector<1x32xf32>
    %89 = vector.broadcast %88 : vector<1x32xf32> to vector<32x32xf32>
    %90 = arith.mulf %65, %89 : vector<32x32xf32>
    %cst_34 = arith.constant dense<0.000000e+00> : vector<32x32xf32>
    %91 = tpu.matmul %90, %72, %cst_34 {dimension_numbers = #tpu.dot_dimension_numbers<[1], [1], [0], [0], [0, 0, 1, 0], [], []>} : vector<32x32xf32>, vector<32x32xf32>, vector<32x32xf32> -> vector<32x32xf32>
    %cst_35 = arith.constant 0.353553385 : f32
    %92 = vector.broadcast %cst_35 : f32 to vector<32x32xf32>
    %93 = arith.mulf %91, %92 : vector<32x32xf32>
    %cst_36 = arith.constant -1.000000e+09 : f32
    %94 = vector.broadcast %cst_36 : f32 to vector<32x32xf32>
    %95 = arith.select %58, %93, %94 : vector<32x32xi1>, vector<32x32xf32>
    %cst_37 = arith.constant dense<0xFF800000> : vector<32xf32>
    %96 = vector.multi_reduction <maximumf>, %95, %cst_37 [1] : vector<32x32xf32> to vector<32xf32>
    %97 = vector.shape_cast %96 : vector<32xf32> to vector<32x1xf32>
    %98 = vector.broadcast %97 : vector<32x1xf32> to vector<32x32xf32>
    %99 = arith.subf %95, %98 : vector<32x32xf32>
    %100 = math.exp %99 : vector<32x32xf32>
    %cst_38 = arith.constant dense<0.000000e+00> : vector<32xf32>
    %101 = vector.multi_reduction <add>, %100, %cst_38 [1] : vector<32x32xf32> to vector<32xf32>
    %102 = vector.shape_cast %101 : vector<32xf32> to vector<32x1xf32>
    %103 = tpu.reciprocal %102 {approx = true} : vector<32x1xf32> -> vector<32x1xf32>
    %104 = vector.broadcast %103 : vector<32x1xf32> to vector<32x32xf32>
    %105 = arith.mulf %100, %104 : vector<32x32xf32>
    %106 = vector.broadcast %88 : vector<1x32xf32> to vector<32x32xf32>
    %107 = arith.mulf %79, %106 : vector<32x32xf32>
    %cst_39 = arith.constant dense<0.000000e+00> : vector<32x32xf32>
    %108 = tpu.matmul %105, %107, %cst_39 {dimension_numbers = #tpu.dot_dimension_numbers<[1], [0], [0], [1], [0, 0, 1, 1], [], []>} : vector<32x32xf32>, vector<32x32xf32>, vector<32x32xf32> -> vector<32x32xf32>
    %109 = arith.addf %81, %108 : vector<32x32xf32>
    %c8_i32_40 = arith.constant 8 : i32
    %110 = vector.broadcast %c8_i32_40 : i32 to vector<1x32xi32>
    %111 = arith.cmpi sge, %80, %110 : vector<1x32xi32>
    %c16_i32_41 = arith.constant 16 : i32
    %112 = vector.broadcast %c16_i32_41 : i32 to vector<1x32xi32>
    %113 = arith.cmpi slt, %80, %112 : vector<1x32xi32>
    %114 = arith.andi %111, %113 : vector<1x32xi1>
    %115 = arith.extui %114 : vector<1x32xi1> to vector<1x32xi32>
    %116 = arith.sitofp %115 : vector<1x32xi32> to vector<1x32xf32>
    %117 = vector.broadcast %116 : vector<1x32xf32> to vector<32x32xf32>
    %118 = arith.mulf %65, %117 : vector<32x32xf32>
    %cst_42 = arith.constant dense<0.000000e+00> : vector<32x32xf32>
    %119 = tpu.matmul %118, %72, %cst_42 {dimension_numbers = #tpu.dot_dimension_numbers<[1], [1], [0], [0], [0, 0, 1, 0], [], []>} : vector<32x32xf32>, vector<32x32xf32>, vector<32x32xf32> -> vector<32x32xf32>
    %cst_43 = arith.constant 0.353553385 : f32
    %120 = vector.broadcast %cst_43 : f32 to vector<32x32xf32>
    %121 = arith.mulf %119, %120 : vector<32x32xf32>
    %cst_44 = arith.constant -1.000000e+09 : f32
    %122 = vector.broadcast %cst_44 : f32 to vector<32x32xf32>
    %123 = arith.select %58, %121, %122 : vector<32x32xi1>, vector<32x32xf32>
    %cst_45 = arith.constant dense<0xFF800000> : vector<32xf32>
    %124 = vector.multi_reduction <maximumf>, %123, %cst_45 [1] : vector<32x32xf32> to vector<32xf32>
    %125 = vector.shape_cast %124 : vector<32xf32> to vector<32x1xf32>
    %126 = vector.broadcast %125 : vector<32x1xf32> to vector<32x32xf32>
    %127 = arith.subf %123, %126 : vector<32x32xf32>
    %128 = math.exp %127 : vector<32x32xf32>
    %cst_46 = arith.constant dense<0.000000e+00> : vector<32xf32>
    %129 = vector.multi_reduction <add>, %128, %cst_46 [1] : vector<32x32xf32> to vector<32xf32>
    %130 = vector.shape_cast %129 : vector<32xf32> to vector<32x1xf32>
    %131 = tpu.reciprocal %130 {approx = true} : vector<32x1xf32> -> vector<32x1xf32>
    %132 = vector.broadcast %131 : vector<32x1xf32> to vector<32x32xf32>
    %133 = arith.mulf %128, %132 : vector<32x32xf32>
    %134 = vector.broadcast %116 : vector<1x32xf32> to vector<32x32xf32>
    %135 = arith.mulf %79, %134 : vector<32x32xf32>
    %cst_47 = arith.constant dense<0.000000e+00> : vector<32x32xf32>
    %136 = tpu.matmul %133, %135, %cst_47 {dimension_numbers = #tpu.dot_dimension_numbers<[1], [0], [0], [1], [0, 0, 1, 1], [], []>} : vector<32x32xf32>, vector<32x32xf32>, vector<32x32xf32> -> vector<32x32xf32>
    %137 = arith.addf %109, %136 : vector<32x32xf32>
    %c16_i32_48 = arith.constant 16 : i32
    %138 = vector.broadcast %c16_i32_48 : i32 to vector<1x32xi32>
    %139 = arith.cmpi sge, %80, %138 : vector<1x32xi32>
    %c24_i32_49 = arith.constant 24 : i32
    %140 = vector.broadcast %c24_i32_49 : i32 to vector<1x32xi32>
    %141 = arith.cmpi slt, %80, %140 : vector<1x32xi32>
    %142 = arith.andi %139, %141 : vector<1x32xi1>
    %143 = arith.extui %142 : vector<1x32xi1> to vector<1x32xi32>
    %144 = arith.sitofp %143 : vector<1x32xi32> to vector<1x32xf32>
    %145 = vector.broadcast %144 : vector<1x32xf32> to vector<32x32xf32>
    %146 = arith.mulf %65, %145 : vector<32x32xf32>
    %cst_50 = arith.constant dense<0.000000e+00> : vector<32x32xf32>
    %147 = tpu.matmul %146, %72, %cst_50 {dimension_numbers = #tpu.dot_dimension_numbers<[1], [1], [0], [0], [0, 0, 1, 0], [], []>} : vector<32x32xf32>, vector<32x32xf32>, vector<32x32xf32> -> vector<32x32xf32>
    %cst_51 = arith.constant 0.353553385 : f32
    %148 = vector.broadcast %cst_51 : f32 to vector<32x32xf32>
    %149 = arith.mulf %147, %148 : vector<32x32xf32>
    %cst_52 = arith.constant -1.000000e+09 : f32
    %150 = vector.broadcast %cst_52 : f32 to vector<32x32xf32>
    %151 = arith.select %58, %149, %150 : vector<32x32xi1>, vector<32x32xf32>
    %cst_53 = arith.constant dense<0xFF800000> : vector<32xf32>
    %152 = vector.multi_reduction <maximumf>, %151, %cst_53 [1] : vector<32x32xf32> to vector<32xf32>
    %153 = vector.shape_cast %152 : vector<32xf32> to vector<32x1xf32>
    %154 = vector.broadcast %153 : vector<32x1xf32> to vector<32x32xf32>
    %155 = arith.subf %151, %154 : vector<32x32xf32>
    %156 = math.exp %155 : vector<32x32xf32>
    %cst_54 = arith.constant dense<0.000000e+00> : vector<32xf32>
    %157 = vector.multi_reduction <add>, %156, %cst_54 [1] : vector<32x32xf32> to vector<32xf32>
    %158 = vector.shape_cast %157 : vector<32xf32> to vector<32x1xf32>
    %159 = tpu.reciprocal %158 {approx = true} : vector<32x1xf32> -> vector<32x1xf32>
    %160 = vector.broadcast %159 : vector<32x1xf32> to vector<32x32xf32>
    %161 = arith.mulf %156, %160 : vector<32x32xf32>
    %162 = vector.broadcast %144 : vector<1x32xf32> to vector<32x32xf32>
    %163 = arith.mulf %79, %162 : vector<32x32xf32>
    %cst_55 = arith.constant dense<0.000000e+00> : vector<32x32xf32>
    %164 = tpu.matmul %161, %163, %cst_55 {dimension_numbers = #tpu.dot_dimension_numbers<[1], [0], [0], [1], [0, 0, 1, 1], [], []>} : vector<32x32xf32>, vector<32x32xf32>, vector<32x32xf32> -> vector<32x32xf32>
    %165 = arith.addf %137, %164 : vector<32x32xf32>
    %c24_i32_56 = arith.constant 24 : i32
    %166 = vector.broadcast %c24_i32_56 : i32 to vector<1x32xi32>
    %167 = arith.cmpi sge, %80, %166 : vector<1x32xi32>
    %c32_i32_57 = arith.constant 32 : i32
    %168 = vector.broadcast %c32_i32_57 : i32 to vector<1x32xi32>
    %169 = arith.cmpi slt, %80, %168 : vector<1x32xi32>
    %170 = arith.andi %167, %169 : vector<1x32xi1>
    %171 = arith.extui %170 : vector<1x32xi1> to vector<1x32xi32>
    %172 = arith.sitofp %171 : vector<1x32xi32> to vector<1x32xf32>
    %173 = vector.broadcast %172 : vector<1x32xf32> to vector<32x32xf32>
    %174 = arith.mulf %65, %173 : vector<32x32xf32>
    %cst_58 = arith.constant dense<0.000000e+00> : vector<32x32xf32>
    %175 = tpu.matmul %174, %72, %cst_58 {dimension_numbers = #tpu.dot_dimension_numbers<[1], [1], [0], [0], [0, 0, 1, 0], [], []>} : vector<32x32xf32>, vector<32x32xf32>, vector<32x32xf32> -> vector<32x32xf32>
    %cst_59 = arith.constant 0.353553385 : f32
    %176 = vector.broadcast %cst_59 : f32 to vector<32x32xf32>
    %177 = arith.mulf %175, %176 : vector<32x32xf32>
    %cst_60 = arith.constant -1.000000e+09 : f32
    %178 = vector.broadcast %cst_60 : f32 to vector<32x32xf32>
    %179 = arith.select %58, %177, %178 : vector<32x32xi1>, vector<32x32xf32>
    %cst_61 = arith.constant dense<0xFF800000> : vector<32xf32>
    %180 = vector.multi_reduction <maximumf>, %179, %cst_61 [1] : vector<32x32xf32> to vector<32xf32>
    %181 = vector.shape_cast %180 : vector<32xf32> to vector<32x1xf32>
    %182 = vector.broadcast %181 : vector<32x1xf32> to vector<32x32xf32>
    %183 = arith.subf %179, %182 : vector<32x32xf32>
    %184 = math.exp %183 : vector<32x32xf32>
    %cst_62 = arith.constant dense<0.000000e+00> : vector<32xf32>
    %185 = vector.multi_reduction <add>, %184, %cst_62 [1] : vector<32x32xf32> to vector<32xf32>
    %186 = vector.shape_cast %185 : vector<32xf32> to vector<32x1xf32>
    %187 = tpu.reciprocal %186 {approx = true} : vector<32x1xf32> -> vector<32x1xf32>
    %188 = vector.broadcast %187 : vector<32x1xf32> to vector<32x32xf32>
    %189 = arith.mulf %184, %188 : vector<32x32xf32>
    %190 = vector.broadcast %172 : vector<1x32xf32> to vector<32x32xf32>
    %191 = arith.mulf %79, %190 : vector<32x32xf32>
    %cst_63 = arith.constant dense<0.000000e+00> : vector<32x32xf32>
    %192 = tpu.matmul %189, %191, %cst_63 {dimension_numbers = #tpu.dot_dimension_numbers<[1], [0], [0], [1], [0, 0, 1, 1], [], []>} : vector<32x32xf32>, vector<32x32xf32>, vector<32x32xf32> -> vector<32x32xf32>
    %193 = arith.addf %165, %192 : vector<32x32xf32>
    %c0_64 = arith.constant 0 : index
    %c0_65 = arith.constant 0 : index
    %194 = vector.load %arg5[%c0_64, %c0_65] : memref<32x32xf32, #tpu.memory_space<vmem>>, vector<32x32xf32>
    %cst_66 = arith.constant dense<0.000000e+00> : vector<32x32xf32>
    %195 = tpu.matmul %193, %194, %cst_66 {dimension_numbers = #tpu.dot_dimension_numbers<[1], [0], [0], [1], [0, 0, 1, 1], [], []>} : vector<32x32xf32>, vector<32x32xf32>, vector<32x32xf32> -> vector<32x32xf32>
    %c0_67 = arith.constant 0 : index
    %c0_68 = arith.constant 0 : index
    %196 = vector.load %arg6[%c0_67, %c0_68] : memref<1x32xf32, #tpu.memory_space<vmem>>, vector<1x32xf32>
    %197 = vector.broadcast %196 : vector<1x32xf32> to vector<32x32xf32>
    %198 = arith.addf %195, %197 : vector<32x32xf32>
    %199 = arith.addf %198, %1 : vector<32x32xf32>
    %c0_69 = arith.constant 0 : index
    %c0_70 = arith.constant 0 : index
    %200 = vector.load %arg7[%c0_69, %c0_70] : memref<1x32xf32, #tpu.memory_space<vmem>>, vector<1x32xf32>
    %c0_71 = arith.constant 0 : index
    %c0_72 = arith.constant 0 : index
    %201 = vector.load %arg8[%c0_71, %c0_72] : memref<1x32xf32, #tpu.memory_space<vmem>>, vector<1x32xf32>
    %cst_73 = arith.constant dense<0.000000e+00> : vector<32xf32>
    %202 = vector.multi_reduction <add>, %199, %cst_73 [1] : vector<32x32xf32> to vector<32xf32>
    %203 = vector.shape_cast %202 : vector<32xf32> to vector<32x1xf32>
    %cst_74 = arith.constant 3.200000e+01 : f32
    %204 = vector.broadcast %cst_74 : f32 to vector<32x1xf32>
    %205 = arith.divf %203, %204 : vector<32x1xf32>
    %206 = vector.broadcast %205 : vector<32x1xf32> to vector<32x32xf32>
    %207 = arith.subf %199, %206 : vector<32x32xf32>
    %208 = arith.mulf %207, %207 : vector<32x32xf32>
    %cst_75 = arith.constant dense<0.000000e+00> : vector<32xf32>
    %209 = vector.multi_reduction <add>, %208, %cst_75 [1] : vector<32x32xf32> to vector<32xf32>
    %210 = vector.shape_cast %209 : vector<32xf32> to vector<32x1xf32>
    %cst_76 = arith.constant 3.200000e+01 : f32
    %211 = vector.broadcast %cst_76 : f32 to vector<32x1xf32>
    %212 = arith.divf %210, %211 : vector<32x1xf32>
    %213 = vector.broadcast %205 : vector<32x1xf32> to vector<32x32xf32>
    %214 = arith.subf %199, %213 : vector<32x32xf32>
    %cst_77 = arith.constant 9.99999974E-6 : f32
    %215 = vector.broadcast %cst_77 : f32 to vector<32x1xf32>
    %216 = arith.addf %212, %215 : vector<32x1xf32>
    %217 = math.rsqrt %216 : vector<32x1xf32>
    %218 = vector.broadcast %217 : vector<32x1xf32> to vector<32x32xf32>
    %219 = arith.mulf %214, %218 : vector<32x32xf32>
    %220 = vector.broadcast %200 : vector<1x32xf32> to vector<32x32xf32>
    %221 = arith.mulf %219, %220 : vector<32x32xf32>
    %222 = vector.broadcast %201 : vector<1x32xf32> to vector<32x32xf32>
    %223 = arith.addf %221, %222 : vector<32x32xf32>
    %c0_78 = arith.constant 0 : index
    %c0_79 = arith.constant 0 : index
    %c0_80 = arith.constant 0 : index
    %224 = vector.load %arg2[%c0_78, %c0_79, %c0_80] : memref<1x32x32xf32, #tpu.memory_space<vmem>>, vector<1x32x32xf32>
    %225 = vector.shape_cast %224 : vector<1x32x32xf32> to vector<32x32xf32>
    %cst_81 = arith.constant 0.000000e+00 : f32
    %226 = vector.broadcast %cst_81 : f32 to vector<32x32xf32>
    %227 = arith.cmpf one, %225, %226 : vector<32x32xf32>
    %c0_82 = arith.constant 0 : index
    %c0_83 = arith.constant 0 : index
    %c0_84 = arith.constant 0 : index
    %228 = vector.load %arg9[%c0_82, %c0_83, %c0_84] : memref<3x32x32xf32, #tpu.memory_space<vmem>>, vector<1x32x32xf32>
    %229 = vector.shape_cast %228 : vector<1x32x32xf32> to vector<32x32xf32>
    %cst_85 = arith.constant dense<0.000000e+00> : vector<32x32xf32>
    %230 = tpu.matmul %223, %229, %cst_85 {dimension_numbers = #tpu.dot_dimension_numbers<[1], [0], [0], [1], [0, 0, 1, 1], [], []>} : vector<32x32xf32>, vector<32x32xf32>, vector<32x32xf32> -> vector<32x32xf32>
    %c0_86 = arith.constant 0 : index
    %c0_87 = arith.constant 0 : index
    %c0_88 = arith.constant 0 : index
    %231 = vector.load %arg10[%c0_86, %c0_87, %c0_88] : memref<3x1x32xf32, #tpu.memory_space<vmem>>, vector<1x1x32xf32>
    %232 = vector.shape_cast %231 : vector<1x1x32xf32> to vector<1x32xf32>
    %233 = vector.broadcast %232 : vector<1x32xf32> to vector<32x32xf32>
    %234 = arith.addf %230, %233 : vector<32x32xf32>
    %c1_89 = arith.constant 1 : index
    %c0_90 = arith.constant 0 : index
    %c0_91 = arith.constant 0 : index
    %235 = vector.load %arg9[%c1_89, %c0_90, %c0_91] : memref<3x32x32xf32, #tpu.memory_space<vmem>>, vector<1x32x32xf32>
    %236 = vector.shape_cast %235 : vector<1x32x32xf32> to vector<32x32xf32>
    %cst_92 = arith.constant dense<0.000000e+00> : vector<32x32xf32>
    %237 = tpu.matmul %223, %236, %cst_92 {dimension_numbers = #tpu.dot_dimension_numbers<[1], [0], [0], [1], [0, 0, 1, 1], [], []>} : vector<32x32xf32>, vector<32x32xf32>, vector<32x32xf32> -> vector<32x32xf32>
    %c1_93 = arith.constant 1 : index
    %c0_94 = arith.constant 0 : index
    %c0_95 = arith.constant 0 : index
    %238 = vector.load %arg10[%c1_93, %c0_94, %c0_95] : memref<3x1x32xf32, #tpu.memory_space<vmem>>, vector<1x1x32xf32>
    %239 = vector.shape_cast %238 : vector<1x1x32xf32> to vector<1x32xf32>
    %240 = vector.broadcast %239 : vector<1x32xf32> to vector<32x32xf32>
    %241 = arith.addf %237, %240 : vector<32x32xf32>
    %c2_96 = arith.constant 2 : index
    %c0_97 = arith.constant 0 : index
    %c0_98 = arith.constant 0 : index
    %242 = vector.load %arg9[%c2_96, %c0_97, %c0_98] : memref<3x32x32xf32, #tpu.memory_space<vmem>>, vector<1x32x32xf32>
    %243 = vector.shape_cast %242 : vector<1x32x32xf32> to vector<32x32xf32>
    %cst_99 = arith.constant dense<0.000000e+00> : vector<32x32xf32>
    %244 = tpu.matmul %223, %243, %cst_99 {dimension_numbers = #tpu.dot_dimension_numbers<[1], [0], [0], [1], [0, 0, 1, 1], [], []>} : vector<32x32xf32>, vector<32x32xf32>, vector<32x32xf32> -> vector<32x32xf32>
    %c2_100 = arith.constant 2 : index
    %c0_101 = arith.constant 0 : index
    %c0_102 = arith.constant 0 : index
    %245 = vector.load %arg10[%c2_100, %c0_101, %c0_102] : memref<3x1x32xf32, #tpu.memory_space<vmem>>, vector<1x1x32xf32>
    %246 = vector.shape_cast %245 : vector<1x1x32xf32> to vector<1x32xf32>
    %247 = vector.broadcast %246 : vector<1x32xf32> to vector<32x32xf32>
    %248 = arith.addf %244, %247 : vector<32x32xf32>
    %249 = tpu.iota {dimensions = array<i32: 1>} : vector<1x32xi32>
    %cst_103 = arith.constant 0.000000e+00 : f32
    %250 = vector.broadcast %cst_103 : f32 to vector<32x32xf32>
    %c0_i32_104 = arith.constant 0 : i32
    %251 = vector.broadcast %c0_i32_104 : i32 to vector<1x32xi32>
    %252 = arith.cmpi sge, %249, %251 : vector<1x32xi32>
    %c8_i32_105 = arith.constant 8 : i32
    %253 = vector.broadcast %c8_i32_105 : i32 to vector<1x32xi32>
    %254 = arith.cmpi slt, %249, %253 : vector<1x32xi32>
    %255 = arith.andi %252, %254 : vector<1x32xi1>
    %256 = arith.extui %255 : vector<1x32xi1> to vector<1x32xi32>
    %257 = arith.sitofp %256 : vector<1x32xi32> to vector<1x32xf32>
    %258 = vector.broadcast %257 : vector<1x32xf32> to vector<32x32xf32>
    %259 = arith.mulf %234, %258 : vector<32x32xf32>
    %cst_106 = arith.constant dense<0.000000e+00> : vector<32x32xf32>
    %260 = tpu.matmul %259, %241, %cst_106 {dimension_numbers = #tpu.dot_dimension_numbers<[1], [1], [0], [0], [0, 0, 1, 0], [], []>} : vector<32x32xf32>, vector<32x32xf32>, vector<32x32xf32> -> vector<32x32xf32>
    %cst_107 = arith.constant 0.353553385 : f32
    %261 = vector.broadcast %cst_107 : f32 to vector<32x32xf32>
    %262 = arith.mulf %260, %261 : vector<32x32xf32>
    %cst_108 = arith.constant -1.000000e+09 : f32
    %263 = vector.broadcast %cst_108 : f32 to vector<32x32xf32>
    %264 = arith.select %227, %262, %263 : vector<32x32xi1>, vector<32x32xf32>
    %cst_109 = arith.constant dense<0xFF800000> : vector<32xf32>
    %265 = vector.multi_reduction <maximumf>, %264, %cst_109 [1] : vector<32x32xf32> to vector<32xf32>
    %266 = vector.shape_cast %265 : vector<32xf32> to vector<32x1xf32>
    %267 = vector.broadcast %266 : vector<32x1xf32> to vector<32x32xf32>
    %268 = arith.subf %264, %267 : vector<32x32xf32>
    %269 = math.exp %268 : vector<32x32xf32>
    %cst_110 = arith.constant dense<0.000000e+00> : vector<32xf32>
    %270 = vector.multi_reduction <add>, %269, %cst_110 [1] : vector<32x32xf32> to vector<32xf32>
    %271 = vector.shape_cast %270 : vector<32xf32> to vector<32x1xf32>
    %272 = tpu.reciprocal %271 {approx = true} : vector<32x1xf32> -> vector<32x1xf32>
    %273 = vector.broadcast %272 : vector<32x1xf32> to vector<32x32xf32>
    %274 = arith.mulf %269, %273 : vector<32x32xf32>
    %275 = vector.broadcast %257 : vector<1x32xf32> to vector<32x32xf32>
    %276 = arith.mulf %248, %275 : vector<32x32xf32>
    %cst_111 = arith.constant dense<0.000000e+00> : vector<32x32xf32>
    %277 = tpu.matmul %274, %276, %cst_111 {dimension_numbers = #tpu.dot_dimension_numbers<[1], [0], [0], [1], [0, 0, 1, 1], [], []>} : vector<32x32xf32>, vector<32x32xf32>, vector<32x32xf32> -> vector<32x32xf32>
    %278 = arith.addf %250, %277 : vector<32x32xf32>
    %c8_i32_112 = arith.constant 8 : i32
    %279 = vector.broadcast %c8_i32_112 : i32 to vector<1x32xi32>
    %280 = arith.cmpi sge, %249, %279 : vector<1x32xi32>
    %c16_i32_113 = arith.constant 16 : i32
    %281 = vector.broadcast %c16_i32_113 : i32 to vector<1x32xi32>
    %282 = arith.cmpi slt, %249, %281 : vector<1x32xi32>
    %283 = arith.andi %280, %282 : vector<1x32xi1>
    %284 = arith.extui %283 : vector<1x32xi1> to vector<1x32xi32>
    %285 = arith.sitofp %284 : vector<1x32xi32> to vector<1x32xf32>
    %286 = vector.broadcast %285 : vector<1x32xf32> to vector<32x32xf32>
    %287 = arith.mulf %234, %286 : vector<32x32xf32>
    %cst_114 = arith.constant dense<0.000000e+00> : vector<32x32xf32>
    %288 = tpu.matmul %287, %241, %cst_114 {dimension_numbers = #tpu.dot_dimension_numbers<[1], [1], [0], [0], [0, 0, 1, 0], [], []>} : vector<32x32xf32>, vector<32x32xf32>, vector<32x32xf32> -> vector<32x32xf32>
    %cst_115 = arith.constant 0.353553385 : f32
    %289 = vector.broadcast %cst_115 : f32 to vector<32x32xf32>
    %290 = arith.mulf %288, %289 : vector<32x32xf32>
    %cst_116 = arith.constant -1.000000e+09 : f32
    %291 = vector.broadcast %cst_116 : f32 to vector<32x32xf32>
    %292 = arith.select %227, %290, %291 : vector<32x32xi1>, vector<32x32xf32>
    %cst_117 = arith.constant dense<0xFF800000> : vector<32xf32>
    %293 = vector.multi_reduction <maximumf>, %292, %cst_117 [1] : vector<32x32xf32> to vector<32xf32>
    %294 = vector.shape_cast %293 : vector<32xf32> to vector<32x1xf32>
    %295 = vector.broadcast %294 : vector<32x1xf32> to vector<32x32xf32>
    %296 = arith.subf %292, %295 : vector<32x32xf32>
    %297 = math.exp %296 : vector<32x32xf32>
    %cst_118 = arith.constant dense<0.000000e+00> : vector<32xf32>
    %298 = vector.multi_reduction <add>, %297, %cst_118 [1] : vector<32x32xf32> to vector<32xf32>
    %299 = vector.shape_cast %298 : vector<32xf32> to vector<32x1xf32>
    %300 = tpu.reciprocal %299 {approx = true} : vector<32x1xf32> -> vector<32x1xf32>
    %301 = vector.broadcast %300 : vector<32x1xf32> to vector<32x32xf32>
    %302 = arith.mulf %297, %301 : vector<32x32xf32>
    %303 = vector.broadcast %285 : vector<1x32xf32> to vector<32x32xf32>
    %304 = arith.mulf %248, %303 : vector<32x32xf32>
    %cst_119 = arith.constant dense<0.000000e+00> : vector<32x32xf32>
    %305 = tpu.matmul %302, %304, %cst_119 {dimension_numbers = #tpu.dot_dimension_numbers<[1], [0], [0], [1], [0, 0, 1, 1], [], []>} : vector<32x32xf32>, vector<32x32xf32>, vector<32x32xf32> -> vector<32x32xf32>
    %306 = arith.addf %278, %305 : vector<32x32xf32>
    %c16_i32_120 = arith.constant 16 : i32
    %307 = vector.broadcast %c16_i32_120 : i32 to vector<1x32xi32>
    %308 = arith.cmpi sge, %249, %307 : vector<1x32xi32>
    %c24_i32_121 = arith.constant 24 : i32
    %309 = vector.broadcast %c24_i32_121 : i32 to vector<1x32xi32>
    %310 = arith.cmpi slt, %249, %309 : vector<1x32xi32>
    %311 = arith.andi %308, %310 : vector<1x32xi1>
    %312 = arith.extui %311 : vector<1x32xi1> to vector<1x32xi32>
    %313 = arith.sitofp %312 : vector<1x32xi32> to vector<1x32xf32>
    %314 = vector.broadcast %313 : vector<1x32xf32> to vector<32x32xf32>
    %315 = arith.mulf %234, %314 : vector<32x32xf32>
    %cst_122 = arith.constant dense<0.000000e+00> : vector<32x32xf32>
    %316 = tpu.matmul %315, %241, %cst_122 {dimension_numbers = #tpu.dot_dimension_numbers<[1], [1], [0], [0], [0, 0, 1, 0], [], []>} : vector<32x32xf32>, vector<32x32xf32>, vector<32x32xf32> -> vector<32x32xf32>
    %cst_123 = arith.constant 0.353553385 : f32
    %317 = vector.broadcast %cst_123 : f32 to vector<32x32xf32>
    %318 = arith.mulf %316, %317 : vector<32x32xf32>
    %cst_124 = arith.constant -1.000000e+09 : f32
    %319 = vector.broadcast %cst_124 : f32 to vector<32x32xf32>
    %320 = arith.select %227, %318, %319 : vector<32x32xi1>, vector<32x32xf32>
    %cst_125 = arith.constant dense<0xFF800000> : vector<32xf32>
    %321 = vector.multi_reduction <maximumf>, %320, %cst_125 [1] : vector<32x32xf32> to vector<32xf32>
    %322 = vector.shape_cast %321 : vector<32xf32> to vector<32x1xf32>
    %323 = vector.broadcast %322 : vector<32x1xf32> to vector<32x32xf32>
    %324 = arith.subf %320, %323 : vector<32x32xf32>
    %325 = math.exp %324 : vector<32x32xf32>
    %cst_126 = arith.constant dense<0.000000e+00> : vector<32xf32>
    %326 = vector.multi_reduction <add>, %325, %cst_126 [1] : vector<32x32xf32> to vector<32xf32>
    %327 = vector.shape_cast %326 : vector<32xf32> to vector<32x1xf32>
    %328 = tpu.reciprocal %327 {approx = true} : vector<32x1xf32> -> vector<32x1xf32>
    %329 = vector.broadcast %328 : vector<32x1xf32> to vector<32x32xf32>
    %330 = arith.mulf %325, %329 : vector<32x32xf32>
    %331 = vector.broadcast %313 : vector<1x32xf32> to vector<32x32xf32>
    %332 = arith.mulf %248, %331 : vector<32x32xf32>
    %cst_127 = arith.constant dense<0.000000e+00> : vector<32x32xf32>
    %333 = tpu.matmul %330, %332, %cst_127 {dimension_numbers = #tpu.dot_dimension_numbers<[1], [0], [0], [1], [0, 0, 1, 1], [], []>} : vector<32x32xf32>, vector<32x32xf32>, vector<32x32xf32> -> vector<32x32xf32>
    %334 = arith.addf %306, %333 : vector<32x32xf32>
    %c24_i32_128 = arith.constant 24 : i32
    %335 = vector.broadcast %c24_i32_128 : i32 to vector<1x32xi32>
    %336 = arith.cmpi sge, %249, %335 : vector<1x32xi32>
    %c32_i32_129 = arith.constant 32 : i32
    %337 = vector.broadcast %c32_i32_129 : i32 to vector<1x32xi32>
    %338 = arith.cmpi slt, %249, %337 : vector<1x32xi32>
    %339 = arith.andi %336, %338 : vector<1x32xi1>
    %340 = arith.extui %339 : vector<1x32xi1> to vector<1x32xi32>
    %341 = arith.sitofp %340 : vector<1x32xi32> to vector<1x32xf32>
    %342 = vector.broadcast %341 : vector<1x32xf32> to vector<32x32xf32>
    %343 = arith.mulf %234, %342 : vector<32x32xf32>
    %cst_130 = arith.constant dense<0.000000e+00> : vector<32x32xf32>
    %344 = tpu.matmul %343, %241, %cst_130 {dimension_numbers = #tpu.dot_dimension_numbers<[1], [1], [0], [0], [0, 0, 1, 0], [], []>} : vector<32x32xf32>, vector<32x32xf32>, vector<32x32xf32> -> vector<32x32xf32>
    %cst_131 = arith.constant 0.353553385 : f32
    %345 = vector.broadcast %cst_131 : f32 to vector<32x32xf32>
    %346 = arith.mulf %344, %345 : vector<32x32xf32>
    %cst_132 = arith.constant -1.000000e+09 : f32
    %347 = vector.broadcast %cst_132 : f32 to vector<32x32xf32>
    %348 = arith.select %227, %346, %347 : vector<32x32xi1>, vector<32x32xf32>
    %cst_133 = arith.constant dense<0xFF800000> : vector<32xf32>
    %349 = vector.multi_reduction <maximumf>, %348, %cst_133 [1] : vector<32x32xf32> to vector<32xf32>
    %350 = vector.shape_cast %349 : vector<32xf32> to vector<32x1xf32>
    %351 = vector.broadcast %350 : vector<32x1xf32> to vector<32x32xf32>
    %352 = arith.subf %348, %351 : vector<32x32xf32>
    %353 = math.exp %352 : vector<32x32xf32>
    %cst_134 = arith.constant dense<0.000000e+00> : vector<32xf32>
    %354 = vector.multi_reduction <add>, %353, %cst_134 [1] : vector<32x32xf32> to vector<32xf32>
    %355 = vector.shape_cast %354 : vector<32xf32> to vector<32x1xf32>
    %356 = tpu.reciprocal %355 {approx = true} : vector<32x1xf32> -> vector<32x1xf32>
    %357 = vector.broadcast %356 : vector<32x1xf32> to vector<32x32xf32>
    %358 = arith.mulf %353, %357 : vector<32x32xf32>
    %359 = vector.broadcast %341 : vector<1x32xf32> to vector<32x32xf32>
    %360 = arith.mulf %248, %359 : vector<32x32xf32>
    %cst_135 = arith.constant dense<0.000000e+00> : vector<32x32xf32>
    %361 = tpu.matmul %358, %360, %cst_135 {dimension_numbers = #tpu.dot_dimension_numbers<[1], [0], [0], [1], [0, 0, 1, 1], [], []>} : vector<32x32xf32>, vector<32x32xf32>, vector<32x32xf32> -> vector<32x32xf32>
    %362 = arith.addf %334, %361 : vector<32x32xf32>
    %c0_136 = arith.constant 0 : index
    %c0_137 = arith.constant 0 : index
    %363 = vector.load %arg11[%c0_136, %c0_137] : memref<32x32xf32, #tpu.memory_space<vmem>>, vector<32x32xf32>
    %cst_138 = arith.constant dense<0.000000e+00> : vector<32x32xf32>
    %364 = tpu.matmul %362, %363, %cst_138 {dimension_numbers = #tpu.dot_dimension_numbers<[1], [0], [0], [1], [0, 0, 1, 1], [], []>} : vector<32x32xf32>, vector<32x32xf32>, vector<32x32xf32> -> vector<32x32xf32>
    %c0_139 = arith.constant 0 : index
    %c0_140 = arith.constant 0 : index
    %365 = vector.load %arg12[%c0_139, %c0_140] : memref<1x32xf32, #tpu.memory_space<vmem>>, vector<1x32xf32>
    %366 = vector.broadcast %365 : vector<1x32xf32> to vector<32x32xf32>
    %367 = arith.addf %364, %366 : vector<32x32xf32>
    %368 = arith.addf %367, %223 : vector<32x32xf32>
    %c0_141 = arith.constant 0 : index
    %c0_142 = arith.constant 0 : index
    %369 = vector.load %arg13[%c0_141, %c0_142] : memref<1x32xf32, #tpu.memory_space<vmem>>, vector<1x32xf32>
    %c0_143 = arith.constant 0 : index
    %c0_144 = arith.constant 0 : index
    %370 = vector.load %arg14[%c0_143, %c0_144] : memref<1x32xf32, #tpu.memory_space<vmem>>, vector<1x32xf32>
    %cst_145 = arith.constant dense<0.000000e+00> : vector<32xf32>
    %371 = vector.multi_reduction <add>, %368, %cst_145 [1] : vector<32x32xf32> to vector<32xf32>
    %372 = vector.shape_cast %371 : vector<32xf32> to vector<32x1xf32>
    %cst_146 = arith.constant 3.200000e+01 : f32
    %373 = vector.broadcast %cst_146 : f32 to vector<32x1xf32>
    %374 = arith.divf %372, %373 : vector<32x1xf32>
    %375 = vector.broadcast %374 : vector<32x1xf32> to vector<32x32xf32>
    %376 = arith.subf %368, %375 : vector<32x32xf32>
    %377 = arith.mulf %376, %376 : vector<32x32xf32>
    %cst_147 = arith.constant dense<0.000000e+00> : vector<32xf32>
    %378 = vector.multi_reduction <add>, %377, %cst_147 [1] : vector<32x32xf32> to vector<32xf32>
    %379 = vector.shape_cast %378 : vector<32xf32> to vector<32x1xf32>
    %cst_148 = arith.constant 3.200000e+01 : f32
    %380 = vector.broadcast %cst_148 : f32 to vector<32x1xf32>
    %381 = arith.divf %379, %380 : vector<32x1xf32>
    %382 = vector.broadcast %374 : vector<32x1xf32> to vector<32x32xf32>
    %383 = arith.subf %368, %382 : vector<32x32xf32>
    %cst_149 = arith.constant 9.99999974E-6 : f32
    %384 = vector.broadcast %cst_149 : f32 to vector<32x1xf32>
    %385 = arith.addf %381, %384 : vector<32x1xf32>
    %386 = math.rsqrt %385 : vector<32x1xf32>
    %387 = vector.broadcast %386 : vector<32x1xf32> to vector<32x32xf32>
    %388 = arith.mulf %383, %387 : vector<32x32xf32>
    %389 = vector.broadcast %369 : vector<1x32xf32> to vector<32x32xf32>
    %390 = arith.mulf %388, %389 : vector<32x32xf32>
    %391 = vector.broadcast %370 : vector<1x32xf32> to vector<32x32xf32>
    %392 = arith.addf %390, %391 : vector<32x32xf32>
    %c0_150 = arith.constant 0 : index
    %c0_151 = arith.constant 0 : index
    %393 = vector.load %arg15[%c0_150, %c0_151] : memref<32x64xf32, #tpu.memory_space<vmem>>, vector<32x64xf32>
    %cst_152 = arith.constant dense<0.000000e+00> : vector<32x64xf32>
    %394 = tpu.matmul %392, %393, %cst_152 {dimension_numbers = #tpu.dot_dimension_numbers<[1], [0], [0], [1], [0, 0, 1, 1], [], []>} : vector<32x32xf32>, vector<32x64xf32>, vector<32x64xf32> -> vector<32x64xf32>
    %c0_153 = arith.constant 0 : index
    %c0_154 = arith.constant 0 : index
    %395 = vector.load %arg16[%c0_153, %c0_154] : memref<1x64xf32, #tpu.memory_space<vmem>>, vector<1x64xf32>
    %396 = vector.broadcast %395 : vector<1x64xf32> to vector<32x64xf32>
    %397 = arith.addf %394, %396 : vector<32x64xf32>
    %cst_155 = arith.constant 0.000000e+00 : f32
    %398 = vector.broadcast %cst_155 : f32 to vector<32x64xf32>
    %399 = arith.maximumf %397, %398 : vector<32x64xf32>
    %c0_156 = arith.constant 0 : index
    %c0_157 = arith.constant 0 : index
    %400 = vector.load %arg17[%c0_156, %c0_157] : memref<64x32xf32, #tpu.memory_space<vmem>>, vector<64x32xf32>
    %cst_158 = arith.constant dense<0.000000e+00> : vector<32x32xf32>
    %401 = tpu.matmul %399, %400, %cst_158 {dimension_numbers = #tpu.dot_dimension_numbers<[1], [0], [0], [1], [0, 0, 1, 1], [], []>} : vector<32x64xf32>, vector<64x32xf32>, vector<32x32xf32> -> vector<32x32xf32>
    %c0_159 = arith.constant 0 : index
    %c0_160 = arith.constant 0 : index
    %402 = vector.load %arg18[%c0_159, %c0_160] : memref<1x32xf32, #tpu.memory_space<vmem>>, vector<1x32xf32>
    %403 = vector.broadcast %402 : vector<1x32xf32> to vector<32x32xf32>
    %404 = arith.addf %401, %403 : vector<32x32xf32>
    %405 = arith.addf %404, %392 : vector<32x32xf32>
    %c0_161 = arith.constant 0 : index
    %c0_162 = arith.constant 0 : index
    %406 = vector.load %arg19[%c0_161, %c0_162] : memref<1x32xf32, #tpu.memory_space<vmem>>, vector<1x32xf32>
    %c0_163 = arith.constant 0 : index
    %c0_164 = arith.constant 0 : index
    %407 = vector.load %arg20[%c0_163, %c0_164] : memref<1x32xf32, #tpu.memory_space<vmem>>, vector<1x32xf32>
    %cst_165 = arith.constant dense<0.000000e+00> : vector<32xf32>
    %408 = vector.multi_reduction <add>, %405, %cst_165 [1] : vector<32x32xf32> to vector<32xf32>
    %409 = vector.shape_cast %408 : vector<32xf32> to vector<32x1xf32>
    %cst_166 = arith.constant 3.200000e+01 : f32
    %410 = vector.broadcast %cst_166 : f32 to vector<32x1xf32>
    %411 = arith.divf %409, %410 : vector<32x1xf32>
    %412 = vector.broadcast %411 : vector<32x1xf32> to vector<32x32xf32>
    %413 = arith.subf %405, %412 : vector<32x32xf32>
    %414 = arith.mulf %413, %413 : vector<32x32xf32>
    %cst_167 = arith.constant dense<0.000000e+00> : vector<32xf32>
    %415 = vector.multi_reduction <add>, %414, %cst_167 [1] : vector<32x32xf32> to vector<32xf32>
    %416 = vector.shape_cast %415 : vector<32xf32> to vector<32x1xf32>
    %cst_168 = arith.constant 3.200000e+01 : f32
    %417 = vector.broadcast %cst_168 : f32 to vector<32x1xf32>
    %418 = arith.divf %416, %417 : vector<32x1xf32>
    %419 = vector.broadcast %411 : vector<32x1xf32> to vector<32x32xf32>
    %420 = arith.subf %405, %419 : vector<32x32xf32>
    %cst_169 = arith.constant 9.99999997E-7 : f32
    %421 = vector.broadcast %cst_169 : f32 to vector<32x1xf32>
    %422 = arith.addf %418, %421 : vector<32x1xf32>
    %423 = math.rsqrt %422 : vector<32x1xf32>
    %424 = vector.broadcast %423 : vector<32x1xf32> to vector<32x32xf32>
    %425 = arith.mulf %420, %424 : vector<32x32xf32>
    %426 = vector.broadcast %406 : vector<1x32xf32> to vector<32x32xf32>
    %427 = arith.mulf %425, %426 : vector<32x32xf32>
    %428 = vector.broadcast %407 : vector<1x32xf32> to vector<32x32xf32>
    %429 = arith.addf %427, %428 : vector<32x32xf32>
    %c0_170 = arith.constant 0 : index
    %c0_171 = arith.constant 0 : index
    %c0_172 = arith.constant 0 : index
    %430 = vector.load %arg21[%c0_170, %c0_171, %c0_172] : memref<1x32x32xf32, #tpu.memory_space<vmem>>, vector<1x32x32xf32>
    %431 = vector.shape_cast %430 : vector<1x32x32xf32> to vector<32x32xf32>
    %432 = vector.shape_cast %429 : vector<32x32xf32> to vector<1x32x32xf32>
    tpu.vector_store %arg21[%c0_170, %c0_171, %c0_172], %432 {strides = array<i32>} : memref<1x32x32xf32, #tpu.memory_space<vmem>>, vector<1x32x32xf32>,
    return
  }
  func.func @transform_0(%arg0: i32) -> (i32, i32, i32) {
    %c0_i32 = arith.constant 0 : i32
    %c0_i32_0 = arith.constant 0 : i32
    %c0_i32_1 = arith.constant 0 : i32
    return %arg0, %c0_i32, %c0_i32_0 : i32, i32, i32
  }
  func.func @transform_1(%arg0: i32) -> (i32, i32, i32) {
    %c0_i32 = arith.constant 0 : i32
    %c0_i32_0 = arith.constant 0 : i32
    %c0_i32_1 = arith.constant 0 : i32
    return %arg0, %c0_i32, %c0_i32_0 : i32, i32, i32
  }
  func.func @transform_2(%arg0: i32) -> (i32, i32, i32) {
    %c0_i32 = arith.constant 0 : i32
    %c0_i32_0 = arith.constant 0 : i32
    %c0_i32_1 = arith.constant 0 : i32
    %c0_i32_2 = arith.constant 0 : i32
    return %c0_i32, %c0_i32_0, %c0_i32_1 : i32, i32, i32
  }
  func.func @transform_3(%arg0: i32) -> (i32, i32, i32) {
    %c0_i32 = arith.constant 0 : i32
    %c0_i32_0 = arith.constant 0 : i32
    %c0_i32_1 = arith.constant 0 : i32
    %c0_i32_2 = arith.constant 0 : i32
    return %c0_i32, %c0_i32_0, %c0_i32_1 : i32, i32, i32
  }
  func.func @transform_4(%arg0: i32) -> (i32, i32) {
    %c0_i32 = arith.constant 0 : i32
    %c0_i32_0 = arith.constant 0 : i32
    %c0_i32_1 = arith.constant 0 : i32
    return %c0_i32, %c0_i32_0 : i32, i32
  }
  func.func @transform_5(%arg0: i32) -> (i32, i32) {
    %c0_i32 = arith.constant 0 : i32
    %c0_i32_0 = arith.constant 0 : i32
    %c0_i32_1 = arith.constant 0 : i32
    return %c0_i32, %c0_i32_0 : i32, i32
  }
  func.func @transform_6(%arg0: i32) -> (i32, i32) {
    %c0_i32 = arith.constant 0 : i32
    %c0_i32_0 = arith.constant 0 : i32
    %c0_i32_1 = arith.constant 0 : i32
    return %c0_i32, %c0_i32_0 : i32, i32
  }
  func.func @transform_7(%arg0: i32) -> (i32, i32) {
    %c0_i32 = arith.constant 0 : i32
    %c0_i32_0 = arith.constant 0 : i32
    %c0_i32_1 = arith.constant 0 : i32
    return %c0_i32, %c0_i32_0 : i32, i32
  }
  func.func @transform_8(%arg0: i32) -> (i32, i32, i32) {
    %c0_i32 = arith.constant 0 : i32
    %c0_i32_0 = arith.constant 0 : i32
    %c0_i32_1 = arith.constant 0 : i32
    %c0_i32_2 = arith.constant 0 : i32
    return %c0_i32, %c0_i32_0, %c0_i32_1 : i32, i32, i32
  }
  func.func @transform_9(%arg0: i32) -> (i32, i32, i32) {
    %c0_i32 = arith.constant 0 : i32
    %c0_i32_0 = arith.constant 0 : i32
    %c0_i32_1 = arith.constant 0 : i32
    %c0_i32_2 = arith.constant 0 : i32
    return %c0_i32, %c0_i32_0, %c0_i32_1 : i32, i32, i32
  }
  func.func @transform_10(%arg0: i32) -> (i32, i32) {
    %c0_i32 = arith.constant 0 : i32
    %c0_i32_0 = arith.constant 0 : i32
    %c0_i32_1 = arith.constant 0 : i32
    return %c0_i32, %c0_i32_0 : i32, i32
  }
  func.func @transform_11(%arg0: i32) -> (i32, i32) {
    %c0_i32 = arith.constant 0 : i32
    %c0_i32_0 = arith.constant 0 : i32
    %c0_i32_1 = arith.constant 0 : i32
    return %c0_i32, %c0_i32_0 : i32, i32
  }
  func.func @transform_12(%arg0: i32) -> (i32, i32) {
    %c0_i32 = arith.constant 0 : i32
    %c0_i32_0 = arith.constant 0 : i32
    %c0_i32_1 = arith.constant 0 : i32
    return %c0_i32, %c0_i32_0 : i32, i32
  }
  func.func @transform_13(%arg0: i32) -> (i32, i32) {
    %c0_i32 = arith.constant 0 : i32
    %c0_i32_0 = arith.constant 0 : i32
    %c0_i32_1 = arith.constant 0 : i32
    return %c0_i32, %c0_i32_0 : i32, i32
  }
  func.func @transform_14(%arg0: i32) -> (i32, i32) {
    %c0_i32 = arith.constant 0 : i32
    %c0_i32_0 = arith.constant 0 : i32
    %c0_i32_1 = arith.constant 0 : i32
    return %c0_i32, %c0_i32_0 : i32, i32
  }
  func.func @transform_15(%arg0: i32) -> (i32, i32) {
    %c0_i32 = arith.constant 0 : i32
    %c0_i32_0 = arith.constant 0 : i32
    %c0_i32_1 = arith.constant 0 : i32
    return %c0_i32, %c0_i32_0 : i32, i32
  }
  func.func @transform_16(%arg0: i32) -> (i32, i32) {
    %c0_i32 = arith.constant 0 : i32
    %c0_i32_0 = arith.constant 0 : i32
    %c0_i32_1 = arith.constant 0 : i32
    return %c0_i32, %c0_i32_0 : i32, i32
  }
  func.func @transform_17(%arg0: i32) -> (i32, i32) {
    %c0_i32 = arith.constant 0 : i32
    %c0_i32_0 = arith.constant 0 : i32
    %c0_i32_1 = arith.constant 0 : i32
    return %c0_i32, %c0_i32_0 : i32, i32
  }
  func.func @transform_18(%arg0: i32) -> (i32, i32) {
    %c0_i32 = arith.constant 0 : i32
    %c0_i32_0 = arith.constant 0 : i32
    %c0_i32_1 = arith.constant 0 : i32
    return %c0_i32, %c0_i32_0 : i32, i32
  }
  func.func @transform_19(%arg0: i32) -> (i32, i32) {
    %c0_i32 = arith.constant 0 : i32
    %c0_i32_0 = arith.constant 0 : i32
    %c0_i32_1 = arith.constant 0 : i32
    return %c0_i32, %c0_i32_0 : i32, i32
  }
  func.func @transform_20(%arg0: i32) -> (i32, i32, i32) {
    %c0_i32 = arith.constant 0 : i32
    %c0_i32_0 = arith.constant 0 : i32
    %c0_i32_1 = arith.constant 0 : i32
    return %arg0, %c0_i32, %c0_i32_0 : i32, i32, i32
  }
}

module attributes {stable_mosaic.version = 11 : i64} {
  func.func @_stmha_layer_kernel(%arg0: i32, %arg1: memref<1x32x32xf32, #tpu.memory_space<vmem>>, %arg2: memref<1x32x32xf32, #tpu.memory_space<vmem>>, %arg3: memref<3x32x32xf32, #tpu.memory_space<vmem>>, %arg4: memref<3x1x32xf32, #tpu.memory_space<vmem>>, %arg5: memref<32x32xf32, #tpu.memory_space<vmem>>, %arg6: memref<1x32xf32, #tpu.memory_space<vmem>>, %arg7: memref<1x32xf32, #tpu.memory_space<vmem>>, %arg8: memref<1x32xf32, #tpu.memory_space<vmem>>, %arg9: memref<3x32x32xf32, #tpu.memory_space<vmem>>, %arg10: memref<3x1x32xf32, #tpu.memory_space<vmem>>, %arg11: memref<32x32xf32, #tpu.memory_space<vmem>>, %arg12: memref<1x32xf32, #tpu.memory_space<vmem>>, %arg13: memref<1x32xf32, #tpu.memory_space<vmem>>, %arg14: memref<1x32xf32, #tpu.memory_space<vmem>>, %arg15: memref<32x64xf32, #tpu.memory_space<vmem>>, %arg16: memref<1x64xf32, #tpu.memory_space<vmem>>, %arg17: memref<64x32xf32, #tpu.memory_space<vmem>>, %arg18: memref<1x32xf32, #tpu.memory_space<vmem>>, %arg19: memref<1x32xf32, #tpu.memory_space<vmem>>, %arg20: memref<1x32xf32, #tpu.memory_space<vmem>>, %arg21: memref<1x32x32xf32, #tpu.memory_space<vmem>>) attributes {dimension_semantics = [#tpu.dimension_semantics<parallel>], iteration_bounds = array<i64: 2>, scalar_prefetch = 0 : i64, scratch_operands = 0 : i64, tpu.core_type = #tpu.core_type<tc>, window_params = [{transform_indices = @transform_0, window_bounds = array<i64: 1, 32, 32>}, {transform_indices = @transform_1, window_bounds = array<i64: 1, 32, 32>}, {pipeline_mode = #tpu.pipeline_mode<synchronous>, transform_indices = @transform_2, window_bounds = array<i64: 3, 32, 32>}, {pipeline_mode = #tpu.pipeline_mode<synchronous>, transform_indices = @transform_3, window_bounds = array<i64: 3, 1, 32>}, {pipeline_mode = #tpu.pipeline_mode<synchronous>, transform_indices = @transform_4, window_bounds = array<i64: 32, 32>}, {pipeline_mode = #tpu.pipeline_mode<synchronous>, transform_indices = @transform_5, window_bounds = array<i64: 1, 32>}, {pipeline_mode = #tpu.pipeline_mode<synchronous>, transform_indices = @transform_6, window_bounds = array<i64: 1, 32>}, {pipeline_mode = #tpu.pipeline_mode<synchronous>, transform_indices = @transform_7, window_bounds = array<i64: 1, 32>}, {pipeline_mode = #tpu.pipeline_mode<synchronous>, transform_indices = @transform_8, window_bounds = array<i64: 3, 32, 32>}, {pipeline_mode = #tpu.pipeline_mode<synchronous>, transform_indices = @transform_9, window_bounds = array<i64: 3, 1, 32>}, {pipeline_mode = #tpu.pipeline_mode<synchronous>, transform_indices = @transform_10, window_bounds = array<i64: 32, 32>}, {pipeline_mode = #tpu.pipeline_mode<synchronous>, transform_indices = @transform_11, window_bounds = array<i64: 1, 32>}, {pipeline_mode = #tpu.pipeline_mode<synchronous>, transform_indices = @transform_12, window_bounds = array<i64: 1, 32>}, {pipeline_mode = #tpu.pipeline_mode<synchronous>, transform_indices = @transform_13, window_bounds = array<i64: 1, 32>}, {pipeline_mode = #tpu.pipeline_mode<synchronous>, transform_indices = @transform_14, window_bounds = array<i64: 32, 64>}, {pipeline_mode = #tpu.pipeline_mode<synchronous>, transform_indices = @transform_15, window_bounds = array<i64: 1, 64>}, {pipeline_mode = #tpu.pipeline_mode<synchronous>, transform_indices = @transform_16, window_bounds = array<i64: 64, 32>}, {pipeline_mode = #tpu.pipeline_mode<synchronous>, transform_indices = @transform_17, window_bounds = array<i64: 1, 32>}, {pipeline_mode = #tpu.pipeline_mode<synchronous>, transform_indices = @transform_18, window_bounds = array<i64: 1, 32>}, {pipeline_mode = #tpu.pipeline_mode<synchronous>, transform_indices = @transform_19, window_bounds = array<i64: 1, 32>}, {transform_indices = @transform_20, window_bounds = array<i64: 1, 32, 32>}]} {
    %c0 = arith.constant 0 : index
    %c0_0 = arith.constant 0 : index
    %c0_1 = arith.constant 0 : index
    %0 = vector.load %arg1[%c0, %c0_0, %c0_1] : memref<1x32x32xf32, #tpu.memory_space<vmem>>, vector<1x32x32xf32>
    %1 = vector.shape_cast %0 : vector<1x32x32xf32> to vector<32x32xf32>
    %2 = tpu.iota {dimensions = array<i32: 0>} : vector<32x1xi32>
    %3 = tpu.iota {dimensions = array<i32: 1>} : vector<1x32xi32>
    %c0_i32 = arith.constant 0 : i32
    %4 = vector.broadcast %c0_i32 : i32 to vector<32x1xi32>
    %5 = arith.cmpi sge, %2, %4 : vector<32x1xi32>
    %c8_i32 = arith.constant 8 : i32
    %6 = vector.broadcast %c8_i32 : i32 to vector<32x1xi32>
    %7 = arith.cmpi slt, %2, %6 : vector<32x1xi32>
    %8 = arith.andi %5, %7 : vector<32x1xi1>
    %c0_i32_2 = arith.constant 0 : i32
    %9 = vector.broadcast %c0_i32_2 : i32 to vector<1x32xi32>
    %10 = arith.cmpi sge, %3, %9 : vector<1x32xi32>
    %c8_i32_3 = arith.constant 8 : i32
    %11 = vector.broadcast %c8_i32_3 : i32 to vector<1x32xi32>
    %12 = arith.cmpi slt, %3, %11 : vector<1x32xi32>
    %13 = arith.andi %10, %12 : vector<1x32xi1>
    %14 = vector.broadcast %8 : vector<32x1xi1> to vector<32x32xi1>
    %15 = vector.broadcast %13 : vector<1x32xi1> to vector<32x32xi1>
    %16 = arith.andi %14, %15 : vector<32x32xi1>
    %c8_i32_4 = arith.constant 8 : i32
    %17 = vector.broadcast %c8_i32_4 : i32 to vector<32x1xi32>
    %18 = arith.cmpi sge, %2, %17 : vector<32x1xi32>
    %c16_i32 = arith.constant 16 : i32
    %19 = vector.broadcast %c16_i32 : i32 to vector<32x1xi32>
    %20 = arith.cmpi slt, %2, %19 : vector<32x1xi32>
    %21 = arith.andi %18, %20 : vector<32x1xi1>
    %c8_i32_5 = arith.constant 8 : i32
    %22 = vector.broadcast %c8_i32_5 : i32 to vector<1x32xi32>
    %23 = arith.cmpi sge, %3, %22 : vector<1x32xi32>
    %c16_i32_6 = arith.constant 16 : i32
    %24 = vector.broadcast %c16_i32_6 : i32 to vector<1x32xi32>
    %25 = arith.cmpi slt, %3, %24 : vector<1x32xi32>
    %26 = arith.andi %23, %25 : vector<1x32xi1>
    %27 = vector.broadcast %21 : vector<32x1xi1> to vector<32x32xi1>
    %28 = vector.broadcast %26 : vector<1x32xi1> to vector<32x32xi1>
    %29 = arith.andi %27, %28 : vector<32x32xi1>
    %30 = arith.ori %16, %29 : vector<32x32xi1>
    %c16_i32_7 = arith.constant 16 : i32
    %31 = vector.broadcast %c16_i32_7 : i32 to vector<32x1xi32>
    %32 = arith.cmpi sge, %2, %31 : vector<32x1xi32>
    %c24_i32 = arith.constant 24 : i32
    %33 = vector.broadcast %c24_i32 : i32 to vector<32x1xi32>
    %34 = arith.cmpi slt, %2, %33 : vector<32x1xi32>
    %35 = arith.andi %32, %34 : vector<32x1xi1>
    %c16_i32_8 = arith.constant 16 : i32
    %36 = vector.broadcast %c16_i32_8 : i32 to vector<1x32xi32>
    %37 = arith.cmpi sge, %3, %36 : vector<1x32xi32>
    %c24_i32_9 = arith.constant 24 : i32
    %38 = vector.broadcast %c24_i32_9 : i32 to vector<1x32xi32>
    %39 = arith.cmpi slt, %3, %38 : vector<1x32xi32>
    %40 = arith.andi %37, %39 : vector<1x32xi1>
    %41 = vector.broadcast %35 : vector<32x1xi1> to vector<32x32xi1>
    %42 = vector.broadcast %40 : vector<1x32xi1> to vector<32x32xi1>
    %43 = arith.andi %41, %42 : vector<32x32xi1>
    %44 = arith.ori %30, %43 : vector<32x32xi1>
    %c24_i32_10 = arith.constant 24 : i32
    %45 = vector.broadcast %c24_i32_10 : i32 to vector<32x1xi32>
    %46 = arith.cmpi sge, %2, %45 : vector<32x1xi32>
    %c32_i32 = arith.constant 32 : i32
    %47 = vector.broadcast %c32_i32 : i32 to vector<32x1xi32>
    %48 = arith.cmpi slt, %2, %47 : vector<32x1xi32>
    %49 = arith.andi %46, %48 : vector<32x1xi1>
    %c24_i32_11 = arith.constant 24 : i32
    %50 = vector.broadcast %c24_i32_11 : i32 to vector<1x32xi32>
    %51 = arith.cmpi sge, %3, %50 : vector<1x32xi32>
    %c32_i32_12 = arith.constant 32 : i32
    %52 = vector.broadcast %c32_i32_12 : i32 to vector<1x32xi32>
    %53 = arith.cmpi slt, %3, %52 : vector<1x32xi32>
    %54 = arith.andi %51, %53 : vector<1x32xi1>
    %55 = vector.broadcast %49 : vector<32x1xi1> to vector<32x32xi1>
    %56 = vector.broadcast %54 : vector<1x32xi1> to vector<32x32xi1>
    %57 = arith.andi %55, %56 : vector<32x32xi1>
    %58 = arith.ori %44, %57 : vector<32x32xi1>
    %c0_13 = arith.constant 0 : index
    %c0_14 = arith.constant 0 : index
    %c0_15 = arith.constant 0 : index
    %59 = vector.load %arg3[%c0_13, %c0_14, %c0_15] : memref<3x32x32xf32, #tpu.memory_space<vmem>>, vector<1x32x32xf32>
    %60 = vector.shape_cast %59 : vector<1x32x32xf32> to vector<32x32xf32>
    %cst = arith.constant dense<0.000000e+00> : vector<32x32xf32>
    %61 = tpu.matmul %1, %60, %cst {dimension_numbers = #tpu.dot_dimension_numbers<[1], [0], [0], [1], [0, 0, 1, 1], [], []>} : vector<32x32xf32>, vector<32x32xf32>, vector<32x32xf32> -> vector<32x32xf32>
    %c0_16 = arith.constant 0 : index
    %c0_17 = arith.constant 0 : index
    %c0_18 = arith.constant 0 : index
    %62 = vector.load %arg4[%c0_16, %c0_17, %c0_18] : memref<3x1x32xf32, #tpu.memory_space<vmem>>, vector<1x1x32xf32>
    %63 = vector.shape_cast %62 : vector<1x1x32xf32> to vector<1x32xf32>
    %64 = vector.broadcast %63 : vector<1x32xf32> to vector<32x32xf32>
    %65 = arith.addf %61, %64 : vector<32x32xf32>
    %c1 = arith.constant 1 : index
    %c0_19 = arith.constant 0 : index
    %c0_20 = arith.constant 0 : index
    %66 = vector.load %arg3[%c1, %c0_19, %c0_20] : memref<3x32x32xf32, #tpu.memory_space<vmem>>, vector<1x32x32xf32>
    %67 = vector.shape_cast %66 : vector<1x32x32xf32> to vector<32x32xf32>
    %cst_21 = arith.constant dense<0.000000e+00> : vector<32x32xf32>
    %68 = tpu.matmul %1, %67, %cst_21 {dimension_numbers = #tpu.dot_dimension_numbers<[1], [0], [0], [1], [0, 0, 1, 1], [], []>} : vector<32x32xf32>, vector<32x32xf32>, vector<32x32xf32> -> vector<32x32xf32>
    %c1_22 = arith.constant 1 : index
    %c0_23 = arith.constant 0 : index
    %c0_24 = arith.constant 0 : index
    %69 = vector.load %arg4[%c1_22, %c0_23, %c0_24] : memref<3x1x32xf32, #tpu.memory_space<vmem>>, vector<1x1x32xf32>
    %70 = vector.shape_cast %69 : vector<1x1x32xf32> to vector<1x32xf32>
    %71 = vector.broadcast %70 : vector<1x32xf32> to vector<32x32xf32>
    %72 = arith.addf %68, %71 : vector<32x32xf32>
    %c2 = arith.constant 2 : index
    %c0_25 = arith.constant 0 : index
    %c0_26 = arith.constant 0 : index
    %73 = vector.load %arg3[%c2, %c0_25, %c0_26] : memref<3x32x32xf32, #tpu.memory_space<vmem>>, vector<1x32x32xf32>
    %74 = vector.shape_cast %73 : vector<1x32x32xf32> to vector<32x32xf32>
    %cst_27 = arith.constant dense<0.000000e+00> : vector<32x32xf32>
    %75 = tpu.matmul %1, %74, %cst_27 {dimension_numbers = #tpu.dot_dimension_numbers<[1], [0], [0], [1], [0, 0, 1, 1], [], []>} : vector<32x32xf32>, vector<32x32xf32>, vector<32x32xf32> -> vector<32x32xf32>
    %c2_28 = arith.constant 2 : index
    %c0_29 = arith.constant 0 : index
    %c0_30 = arith.constant 0 : index
    %76 = vector.load %arg4[%c2_28, %c0_29, %c0_30] : memref<3x1x32xf32, #tpu.memory_space<vmem>>, vector<1x1x32xf32>
    %77 = vector.shape_cast %76 : vector<1x1x32xf32> to vector<1x32xf32>
    %78 = vector.broadcast %77 : vector<1x32xf32> to vector<32x32xf32>
    %79 = arith.addf %75, %78 : vector<32x32xf32>
    %80 = tpu.iota {dimensions = array<i32: 1>} : vector<1x32xi32>
    %cst_31 = arith.constant 0.000000e+00 : f32
    %81 = vector.broadcast %cst_31 : f32 to vector<32x32xf32>
    %c0_i32_32 = arith.constant 0 : i32
    %82 = vector.broadcast %c0_i32_32 : i32 to vector<1x32xi32>
    %83 = arith.cmpi sge, %80, %82 : vector<1x32xi32>
    %c8_i32_33 = arith.constant 8 : i32
    %84 = vector.broadcast %c8_i32_33 : i32 to vector<1x32xi32>
    %85 = arith.cmpi slt, %80, %84 : vector<1x32xi32>
    %86 = arith.andi %83, %85 : vector<1x32xi1>
    %87 = arith.extui %86 : vector<1x32xi1> to vector<1x32xi32>
    %88 = arith.sitofp %87 : vector<1x32xi32> to vector<1x32xf32>
    %89 = vector.broadcast %88 : vector<1x32xf32> to vector<32x32xf32>
    %90 = arith.mulf %65, %89 : vector<32x32xf32>
    %cst_34 = arith.constant dense<0.000000e+00> : vector<32x32xf32>
    %91 = tpu.matmul %90, %72, %cst_34 {dimension_numbers = #tpu.dot_dimension_numbers<[1], [1], [0], [0], [0, 0, 1, 0], [], []>} : vector<32x32xf32>, vector<32x32xf32>, vector<32x32xf32> -> vector<32x32xf32>
    %cst_35 = arith.constant 0.353553385 : f32
    %92 = vector.broadcast %cst_35 : f32 to vector<32x32xf32>
    %93 = arith.mulf %91, %92 : vector<32x32xf32>
    %cst_36 = arith.constant -1.000000e+09 : f32
    %94 = vector.broadcast %cst_36 : f32 to vector<32x32xf32>
    %95 = arith.select %58, %93, %94 : vector<32x32xi1>, vector<32x32xf32>
    %cst_37 = arith.constant dense<0xFF800000> : vector<32xf32>
    %96 = vector.multi_reduction <maximumf>, %95, %cst_37 [1] : vector<32x32xf32> to vector<32xf32>
    %97 = vector.shape_cast %96 : vector<32xf32> to vector<32x1xf32>
    %98 = vector.broadcast %97 : vector<32x1xf32> to vector<32x32xf32>
    %99 = arith.subf %95, %98 : vector<32x32xf32>
    %100 = math.exp %99 : vector<32x32xf32>
    %cst_38 = arith.constant dense<0.000000e+00> : vector<32xf32>
    %101 = vector.multi_reduction <add>, %100, %cst_38 [1] : vector<32x32xf32> to vector<32xf32>
    %102 = vector.shape_cast %101 : vector<32xf32> to vector<32x1xf32>
    %103 = tpu.reciprocal %102 {approx = true} : vector<32x1xf32> -> vector<32x1xf32>
    %104 = vector.broadcast %103 : vector<32x1xf32> to vector<32x32xf32>
    %105 = arith.mulf %100, %104 : vector<32x32xf32>
    %106 = vector.broadcast %88 : vector<1x32xf32> to vector<32x32xf32>
    %107 = arith.mulf %79, %106 : vector<32x32xf32>
    %cst_39 = arith.constant dense<0.000000e+00> : vector<32x32xf32>
    %108 = tpu.matmul %105, %107, %cst_39 {dimension_numbers = #tpu.dot_dimension_numbers<[1], [0], [0], [1], [0, 0, 1, 1], [], []>} : vector<32x32xf32>, vector<32x32xf32>, vector<32x32xf32> -> vector<32x32xf32>
    %109 = arith.addf %81, %108 : vector<32x32xf32>
    %c8_i32_40 = arith.constant 8 : i32
    %110 = vector.broadcast %c8_i32_40 : i32 to vector<1x32xi32>
    %111 = arith.cmpi sge, %80, %110 : vector<1x32xi32>
    %c16_i32_41 = arith.constant 16 : i32
    %112 = vector.broadcast %c16_i32_41 : i32 to vector<1x32xi32>
    %113 = arith.cmpi slt, %80, %112 : vector<1x32xi32>
    %114 = arith.andi %111, %113 : vector<1x32xi1>
    %115 = arith.extui %114 : vector<1x32xi1> to vector<1x32xi32>
    %116 = arith.sitofp %115 : vector<1x32xi32> to vector<1x32xf32>
    %117 = vector.broadcast %116 : vector<1x32xf32> to vector<32x32xf32>
    %118 = arith.mulf %65, %117 : vector<32x32xf32>
    %cst_42 = arith.constant dense<0.000000e+00> : vector<32x32xf32>
    %119 = tpu.matmul %118, %72, %cst_42 {dimension_numbers = #tpu.dot_dimension_numbers<[1], [1], [0], [0], [0, 0, 1, 0], [], []>} : vector<32x32xf32>, vector<32x32xf32>, vector<32x32xf32> -> vector<32x32xf32>
    %cst_43 = arith.constant 0.353553385 : f32
    %120 = vector.broadcast %cst_43 : f32 to vector<32x32xf32>
    %121 = arith.mulf %119, %120 : vector<32x32xf32>
    %cst_44 = arith.constant -1.000000e+09 : f32
    %122 = vector.broadcast %cst_44 : f32 to vector<32x32xf32>
    %123 = arith.select %58, %121, %122 : vector<32x32xi1>, vector<32x32xf32>
    %cst_45 = arith.constant dense<0xFF800000> : vector<32xf32>
    %124 = vector.multi_reduction <maximumf>, %123, %cst_45 [1] : vector<32x32xf32> to vector<32xf32>
    %125 = vector.shape_cast %124 : vector<32xf32> to vector<32x1xf32>
    %126 = vector.broadcast %125 : vector<32x1xf32> to vector<32x32xf32>
    %127 = arith.subf %123, %126 : vector<32x32xf32>
    %128 = math.exp %127 : vector<32x32xf32>
    %cst_46 = arith.constant dense<0.000000e+00> : vector<32xf32>
    %129 = vector.multi_reduction <add>, %128, %cst_46 [1] : vector<32x32xf32> to vector<32xf32>
    %130 = vector.shape_cast %129 : vector<32xf32> to vector<32x1xf32>
    %131 = tpu.reciprocal %130 {approx = true} : vector<32x1xf32> -> vector<32x1xf32>
    %132 = vector.broadcast %131 : vector<32x1xf32> to vector<32x32xf32>
    %133 = arith.mulf %128, %132 : vector<32x32xf32>
    %134 = vector.broadcast %116 : vector<1x32xf32> to vector<32x32xf32>
    %135 = arith.mulf %79, %134 : vector<32x32xf32>
    %cst_47 = arith.constant dense<0.000000e+00> : vector<32x32xf32>
    %136 = tpu.matmul %133, %135, %cst_47 {dimension_numbers = #tpu.dot_dimension_numbers<[1], [0], [0], [1], [0, 0, 1, 1], [], []>} : vector<32x32xf32>, vector<32x32xf32>, vector<32x32xf32> -> vector<32x32xf32>
    %137 = arith.addf %109, %136 : vector<32x32xf32>
    %c16_i32_48 = arith.constant 16 : i32
    %138 = vector.broadcast %c16_i32_48 : i32 to vector<1x32xi32>
    %139 = arith.cmpi sge, %80, %138 : vector<1x32xi32>
    %c24_i32_49 = arith.constant 24 : i32
    %140 = vector.broadcast %c24_i32_49 : i32 to vector<1x32xi32>
    %141 = arith.cmpi slt, %80, %140 : vector<1x32xi32>
    %142 = arith.andi %139, %141 : vector<1x32xi1>
    %143 = arith.extui %142 : vector<1x32xi1> to vector<1x32xi32>
    %144 = arith.sitofp %143 : vector<1x32xi32> to vector<1x32xf32>
    %145 = vector.broadcast %144 : vector<1x32xf32> to vector<32x32xf32>
    %146 = arith.mulf %65, %145 : vector<32x32xf32>
    %cst_50 = arith.constant dense<0.000000e+00> : vector<32x32xf32>
    %147 = tpu.matmul %146, %72, %cst_50 {dimension_numbers = #tpu.dot_dimension_numbers<[1], [1], [0], [0], [0, 0, 1, 0], [], []>} : vector<32x32xf32>, vector<32x32xf32>, vector<32x32xf32> -> vector<32x32xf32>
    %cst_51 = arith.constant 0.353553385 : f32
    %148 = vector.broadcast %cst_51 : f32 to vector<32x32xf32>
    %149 = arith.mulf %147, %148 : vector<32x32xf32>
    %cst_52 = arith.constant -1.000000e+09 : f32
    %150 = vector.broadcast %cst_52 : f32 to vector<32x32xf32>
    %151 = arith.select %58, %149, %150 : vector<32x32xi1>, vector<32x32xf32>
    %cst_53 = arith.constant dense<0xFF800000> : vector<32xf32>
    %152 = vector.multi_reduction <maximumf>, %151, %cst_53 [1] : vector<32x32xf32> to vector<32xf32>
    %153 = vector.shape_cast %152 : vector<32xf32> to vector<32x1xf32>
    %154 = vector.broadcast %153 : vector<32x1xf32> to vector<32x32xf32>
    %155 = arith.subf %151, %154 : vector<32x32xf32>
    %156 = math.exp %155 : vector<32x32xf32>
    %cst_54 = arith.constant dense<0.000000e+00> : vector<32xf32>
    %157 = vector.multi_reduction <add>, %156, %cst_54 [1] : vector<32x32xf32> to vector<32xf32>
    %158 = vector.shape_cast %157 : vector<32xf32> to vector<32x1xf32>
    %159 = tpu.reciprocal %158 {approx = true} : vector<32x1xf32> -> vector<32x1xf32>
    %160 = vector.broadcast %159 : vector<32x1xf32> to vector<32x32xf32>
    %161 = arith.mulf %156, %160 : vector<32x32xf32>
    %162 = vector.broadcast %144 : vector<1x32xf32> to vector<32x32xf32>
    %163 = arith.mulf %79, %162 : vector<32x32xf32>
    %cst_55 = arith.constant dense<0.000000e+00> : vector<32x32xf32>
    %164 = tpu.matmul %161, %163, %cst_55 {dimension_numbers = #tpu.dot_dimension_numbers<[1], [0], [0], [1], [0, 0, 1, 1], [], []>} : vector<32x32xf32>, vector<32x32xf32>, vector<32x32xf32> -> vector<32x32xf32>
    %165 = arith.addf %137, %164 : vector<32x32xf32>
    %c24_i32_56 = arith.constant 24 : i32
    %166 = vector.broadcast %c24_i32_56 : i32 to vector<1x32xi32>
    %167 = arith.cmpi sge, %80, %166 : vector<1x32xi32>
    %c32_i32_57 = arith.constant 32 : i32
    %168 = vector.broadcast %c32_i32_57 : i32 to vector<1x32xi32>
    %169 = arith.cmpi slt, %80, %168 : vector<1x32xi32>
    %170 = arith.andi %167, %169 : vector<1x32xi1>
    %171 = arith.extui %170 : vector<1x32xi1> to vector<1x32xi32>
    %172 = arith.sitofp %171 : vector<1x32xi32> to vector<1x32xf32>
    %173 = vector.broadcast %172 : vector<1x32xf32> to vector<32x32xf32>
    %174 = arith.mulf %65, %173 : vector<32x32xf32>
    %cst_58 = arith.constant dense<0.000000e+00> : vector<32x32xf32>
    %175 = tpu.matmul %174, %72, %cst_58 {dimension_numbers = #tpu.dot_dimension_numbers<[1], [1], [0], [0], [0, 0, 1, 0], [], []>} : vector<32x32xf32>, vector<32x32xf32>, vector<32x32xf32> -> vector<32x32xf32>
    %cst_59 = arith.constant 0.353553385 : f32
    %176 = vector.broadcast %cst_59 : f32 to vector<32x32xf32>
    %177 = arith.mulf %175, %176 : vector<32x32xf32>
    %cst_60 = arith.constant -1.000000e+09 : f32
    %178 = vector.broadcast %cst_60 : f32 to vector<32x32xf32>
    %179 = arith.select %58, %177, %178 : vector<32x32xi1>, vector<32x32xf32>
    %cst_61 = arith.constant dense<0xFF800000> : vector<32xf32>
    %180 = vector.multi_reduction <maximumf>, %179, %cst_61 [1] : vector<32x32xf32> to vector<32xf32>
    %181 = vector.shape_cast %180 : vector<32xf32> to vector<32x1xf32>
    %182 = vector.broadcast %181 : vector<32x1xf32> to vector<32x32xf32>
    %183 = arith.subf %179, %182 : vector<32x32xf32>
    %184 = math.exp %183 : vector<32x32xf32>
    %cst_62 = arith.constant dense<0.000000e+00> : vector<32xf32>
    %185 = vector.multi_reduction <add>, %184, %cst_62 [1] : vector<32x32xf32> to vector<32xf32>
    %186 = vector.shape_cast %185 : vector<32xf32> to vector<32x1xf32>
    %187 = tpu.reciprocal %186 {approx = true} : vector<32x1xf32> -> vector<32x1xf32>
    %188 = vector.broadcast %187 : vector<32x1xf32> to vector<32x32xf32>
    %189 = arith.mulf %184, %188 : vector<32x32xf32>
    %190 = vector.broadcast %172 : vector<1x32xf32> to vector<32x32xf32>
    %191 = arith.mulf %79, %190 : vector<32x32xf32>
    %cst_63 = arith.constant dense<0.000000e+00> : vector<32x32xf32>
    %192 = tpu.matmul %189, %191, %cst_63 {dimension_numbers = #tpu.dot_dimension_numbers<[1], [0], [0], [1], [0, 0, 1, 1], [], []>} : vector<32x32xf32>, vector<32x32xf32>, vector<32x32xf32> -> vector<32x32xf32>
    %193 = arith.addf %165, %192 : vector<32x32xf32>
    %c0_64 = arith.constant 0 : index
    %c0_65 = arith.constant 0 : index
    %194 = vector.load %arg5[%c0_64, %c0_65] : memref<32x32xf32, #tpu.memory_space<vmem>>, vector<32x32xf32>
    %cst_66 = arith.constant dense<0.000000e+00> : vector<32x32xf32>
    %195 = tpu.matmul %193, %194, %cst_66 {dimension_numbers = #tpu.dot_dimension_numbers<[1], [0], [0], [1], [0, 0, 1, 1], [], []>} : vector<32x32xf32>, vector<32x32xf32>, vector<32x32xf32> -> vector<32x32xf32>
    %c0_67 = arith.constant 0 : index
    %c0_68 = arith.constant 0 : index
    %196 = vector.load %arg6[%c0_67, %c0_68] : memref<1x32xf32, #tpu.memory_space<vmem>>, vector<1x32xf32>
    %197 = vector.broadcast %196 : vector<1x32xf32> to vector<32x32xf32>
    %198 = arith.addf %195, %197 : vector<32x32xf32>
    %199 = arith.addf %198, %1 : vector<32x32xf32>
    %c0_69 = arith.constant 0 : index
    %c0_70 = arith.constant 0 : index
    %200 = vector.load %arg7[%c0_69, %c0_70] : memref<1x32xf32, #tpu.memory_space<vmem>>, vector<1x32xf32>
    %c0_71 = arith.constant 0 : index
    %c0_72 = arith.constant 0 : index
    %201 = vector.load %arg8[%c0_71, %c0_72] : memref<1x32xf32, #tpu.memory_space<vmem>>, vector<1x32xf32>
    %cst_73 = arith.constant dense<0.000000e+00> : vector<32xf32>
    %202 = vector.multi_reduction <add>, %199, %cst_73 [1] : vector<32x32xf32> to vector<32xf32>
    %203 = vector.shape_cast %202 : vector<32xf32> to vector<32x1xf32>
    %cst_74 = arith.constant 3.200000e+01 : f32
    %204 = vector.broadcast %cst_74 : f32 to vector<32x1xf32>
    %205 = arith.divf %203, %204 : vector<32x1xf32>
    %206 = vector.broadcast %205 : vector<32x1xf32> to vector<32x32xf32>
    %207 = arith.subf %199, %206 : vector<32x32xf32>
    %208 = arith.mulf %207, %207 : vector<32x32xf32>
    %cst_75 = arith.constant dense<0.000000e+00> : vector<32xf32>
    %209 = vector.multi_reduction <add>, %208, %cst_75 [1] : vector<32x32xf32> to vector<32xf32>
    %210 = vector.shape_cast %209 : vector<32xf32> to vector<32x1xf32>
    %cst_76 = arith.constant 3.200000e+01 : f32
    %211 = vector.broadcast %cst_76 : f32 to vector<32x1xf32>
    %212 = arith.divf %210, %211 : vector<32x1xf32>
    %213 = vector.broadcast %205 : vector<32x1xf32> to vector<32x32xf32>
    %214 = arith.subf %199, %213 : vector<32x32xf32>
    %cst_77 = arith.constant 9.99999974E-6 : f32
    %215 = vector.broadcast %cst_77 : f32 to vector<32x1xf32>
    %216 = arith.addf %212, %215 : vector<32x1xf32>
    %217 = math.rsqrt %216 : vector<32x1xf32>
    %218 = vector.broadcast %217 : vector<32x1xf32> to vector<32x32xf32>
    %219 = arith.mulf %214, %218 : vector<32x32xf32>
    %220 = vector.broadcast %200 : vector<1x32xf32> to vector<32x32xf32>
    %221 = arith.mulf %219, %220 : vector<32x32xf32>
    %222 = vector.broadcast %201 : vector<1x32xf32> to vector<32x32xf32>
    %223 = arith.addf %221, %222 : vector<32x32xf32>
    %c0_78 = arith.constant 0 : index
    %c0_79 = arith.constant 0 : index
    %c0_80 = arith.constant 0 : index
    %224 = vector.load %arg2[%c0_78, %c0_79, %c0_80] : memref<1x32x32xf32, #tpu.memory_space<vmem>>, vector<1x32x32xf32>
    %225 = vector.shape_cast %224 : vector<1x32x32xf32> to vector<32x32xf32>
    %cst_81 = arith.constant 0.000000e+00 : f32
    %226 = vector.broadcast %cst_81 : f32 to vector<32x32xf32>
    %227 = arith.cmpf one, %225, %226 : vector<32x32xf32>
    %c0_82 = arith.constant 0 : index
    %c0_83 = arith.constant 0 : index
    %c0_84 = arith.constant 0 : index
    %228 = vector.load %arg9[%c0_82, %c0_83, %c0_84] : memref<3x32x32xf32, #tpu.memory_space<vmem>>, vector<1x32x32xf32>
    %229 = vector.shape_cast %228 : vector<1x32x32xf32> to vector<32x32xf32>
    %cst_85 = arith.constant dense<0.000000e+00> : vector<32x32xf32>
    %230 = tpu.matmul %223, %229, %cst_85 {dimension_numbers = #tpu.dot_dimension_numbers<[1], [0], [0], [1], [0, 0, 1, 1], [], []>} : vector<32x32xf32>, vector<32x32xf32>, vector<32x32xf32> -> vector<32x32xf32>
    %c0_86 = arith.constant 0 : index
    %c0_87 = arith.constant 0 : index
    %c0_88 = arith.constant 0 : index
    %231 = vector.load %arg10[%c0_86, %c0_87, %c0_88] : memref<3x1x32xf32, #tpu.memory_space<vmem>>, vector<1x1x32xf32>
    %232 = vector.shape_cast %231 : vector<1x1x32xf32> to vector<1x32xf32>
    %233 = vector.broadcast %232 : vector<1x32xf32> to vector<32x32xf32>
    %234 = arith.addf %230, %233 : vector<32x32xf32>
    %c1_89 = arith.constant 1 : index
    %c0_90 = arith.constant 0 : index
    %c0_91 = arith.constant 0 : index
    %235 = vector.load %arg9[%c1_89, %c0_90, %c0_91] : memref<3x32x32xf32, #tpu.memory_space<vmem>>, vector<1x32x32xf32>
    %236 = vector.shape_cast %235 : vector<1x32x32xf32> to vector<32x32xf32>
    %cst_92 = arith.constant dense<0.000000e+00> : vector<32x32xf32>
    %237 = tpu.matmul %223, %236, %cst_92 {dimension_numbers = #tpu.dot_dimension_numbers<[1], [0], [0], [1], [0, 0, 1, 1], [], []>} : vector<32x32xf32>, vector<32x32xf32>, vector<32x32xf32> -> vector<32x32xf32>
    %c1_93 = arith.constant 1 : index
    %c0_94 = arith.constant 0 : index
    %c0_95 = arith.constant 0 : index
    %238 = vector.load %arg10[%c1_93, %c0_94, %c0_95] : memref<3x1x32xf32, #tpu.memory_space<vmem>>, vector<1x1x32xf32>
    %239 = vector.shape_cast %238 : vector<1x1x32xf32> to vector<1x32xf32>
    %240 = vector.broadcast %239 : vector<1x32xf32> to vector<32x32xf32>
    %241 = arith.addf %237, %240 : vector<32x32xf32>
    %c2_96 = arith.constant 2 : index
    %c0_97 = arith.constant 0 : index
    %c0_98 = arith.constant 0 : index
    %242 = vector.load %arg9[%c2_96, %c0_97, %c0_98] : memref<3x32x32xf32, #tpu.memory_space<vmem>>, vector<1x32x32xf32>
    %243 = vector.shape_cast %242 : vector<1x32x32xf32> to vector<32x32xf32>
    %cst_99 = arith.constant dense<0.000000e+00> : vector<32x32xf32>
    %244 = tpu.matmul %223, %243, %cst_99 {dimension_numbers = #tpu.dot_dimension_numbers<[1], [0], [0], [1], [0, 0, 1, 1], [], []>} : vector<32x32xf32>, vector<32x32xf32>, vector<32x32xf32> -> vector<32x32xf32>
    %c2_100 = arith.constant 2 : index
    %c0_101 = arith.constant 0 : index
    %c0_102 = arith.constant 0 : index
    %245 = vector.load %arg10[%c2_100, %c0_101, %c0_102] : memref<3x1x32xf32, #tpu.memory_space<vmem>>, vector<1x1x32xf32>
    %246 = vector.shape_cast %245 : vector<1x1x32xf32> to vector<1x32xf32>
    %247 = vector.broadcast %246 : vector<1x32xf32> to vector<32x32xf32>
    %248 = arith.addf %244, %247 : vector<32x32xf32>
    %249 = tpu.iota {dimensions = array<i32: 1>} : vector<1x32xi32>
    %cst_103 = arith.constant 0.000000e+00 : f32
    %250 = vector.broadcast %cst_103 : f32 to vector<32x32xf32>
    %c0_i32_104 = arith.constant 0 : i32
    %251 = vector.broadcast %c0_i32_104 : i32 to vector<1x32xi32>
    %252 = arith.cmpi sge, %249, %251 : vector<1x32xi32>
    %c8_i32_105 = arith.constant 8 : i32
    %253 = vector.broadcast %c8_i32_105 : i32 to vector<1x32xi32>
    %254 = arith.cmpi slt, %249, %253 : vector<1x32xi32>
    %255 = arith.andi %252, %254 : vector<1x32xi1>
    %256 = arith.extui %255 : vector<1x32xi1> to vector<1x32xi32>
    %257 = arith.sitofp %256 : vector<1x32xi32> to vector<1x32xf32>
    %258 = vector.broadcast %257 : vector<1x32xf32> to vector<32x32xf32>
    %259 = arith.mulf %234, %258 : vector<32x32xf32>
    %cst_106 = arith.constant dense<0.000000e+00> : vector<32x32xf32>
    %260 = tpu.matmul %259, %241, %cst_106 {dimension_numbers = #tpu.dot_dimension_numbers<[1], [1], [0], [0], [0, 0, 1, 0], [], []>} : vector<32x32xf32>, vector<32x32xf32>, vector<32x32xf32> -> vector<32x32xf32>
    %cst_107 = arith.constant 0.353553385 : f32
    %261 = vector.broadcast %cst_107 : f32 to vector<32x32xf32>
    %262 = arith.mulf %260, %261 : vector<32x32xf32>
    %cst_108 = arith.constant -1.000000e+09 : f32
    %263 = vector.broadcast %cst_108 : f32 to vector<32x32xf32>
    %264 = arith.select %227, %262, %263 : vector<32x32xi1>, vector<32x32xf32>
    %cst_109 = arith.constant dense<0xFF800000> : vector<32xf32>
    %265 = vector.multi_reduction <maximumf>, %264, %cst_109 [1] : vector<32x32xf32> to vector<32xf32>
    %266 = vector.shape_cast %265 : vector<32xf32> to vector<32x1xf32>
    %267 = vector.broadcast %266 : vector<32x1xf32> to vector<32x32xf32>
    %268 = arith.subf %264, %267 : vector<32x32xf32>
    %269 = math.exp %268 : vector<32x32xf32>
    %cst_110 = arith.constant dense<0.000000e+00> : vector<32xf32>
    %270 = vector.multi_reduction <add>, %269, %cst_110 [1] : vector<32x32xf32> to vector<32xf32>
    %271 = vector.shape_cast %270 : vector<32xf32> to vector<32x1xf32>
    %272 = tpu.reciprocal %271 {approx = true} : vector<32x1xf32> -> vector<32x1xf32>
    %273 = vector.broadcast %272 : vector<32x1xf32> to vector<32x32xf32>
    %274 = arith.mulf %269, %273 : vector<32x32xf32>
    %275 = vector.broadcast %257 : vector<1x32xf32> to vector<32x32xf32>
    %276 = arith.mulf %248, %275 : vector<32x32xf32>
    %cst_111 = arith.constant dense<0.000000e+00> : vector<32x32xf32>
    %277 = tpu.matmul %274, %276, %cst_111 {dimension_numbers = #tpu.dot_dimension_numbers<[1], [0], [0], [1], [0, 0, 1, 1], [], []>} : vector<32x32xf32>, vector<32x32xf32>, vector<32x32xf32> -> vector<32x32xf32>
    %278 = arith.addf %250, %277 : vector<32x32xf32>
    %c8_i32_112 = arith.constant 8 : i32
    %279 = vector.broadcast %c8_i32_112 : i32 to vector<1x32xi32>
    %280 = arith.cmpi sge, %249, %279 : vector<1x32xi32>
    %c16_i32_113 = arith.constant 16 : i32
    %281 = vector.broadcast %c16_i32_113 : i32 to vector<1x32xi32>
    %282 = arith.cmpi slt, %249, %281 : vector<1x32xi32>
    %283 = arith.andi %280, %282 : vector<1x32xi1>
    %284 = arith.extui %283 : vector<1x32xi1> to vector<1x32xi32>
    %285 = arith.sitofp %284 : vector<1x32xi32> to vector<1x32xf32>
    %286 = vector.broadcast %285 : vector<1x32xf32> to vector<32x32xf32>
    %287 = arith.mulf %234, %286 : vector<32x32xf32>
    %cst_114 = arith.constant dense<0.000000e+00> : vector<32x32xf32>
    %288 = tpu.matmul %287, %241, %cst_114 {dimension_numbers = #tpu.dot_dimension_numbers<[1], [1], [0], [0], [0, 0, 1, 0], [], []>} : vector<32x32xf32>, vector<32x32xf32>, vector<32x32xf32> -> vector<32x32xf32>
    %cst_115 = arith.constant 0.353553385 : f32
    %289 = vector.broadcast %cst_115 : f32 to vector<32x32xf32>
    %290 = arith.mulf %288, %289 : vector<32x32xf32>
    %cst_116 = arith.constant -1.000000e+09 : f32
    %291 = vector.broadcast %cst_116 : f32 to vector<32x32xf32>
    %292 = arith.select %227, %290, %291 : vector<32x32xi1>, vector<32x32xf32>
    %cst_117 = arith.constant dense<0xFF800000> : vector<32xf32>
    %293 = vector.multi_reduction <maximumf>, %292, %cst_117 [1] : vector<32x32xf32> to vector<32xf32>
    %294 = vector.shape_cast %293 : vector<32xf32> to vector<32x1xf32>
    %295 = vector.broadcast %294 : vector<32x1xf32> to vector<32x32xf32>
    %296 = arith.subf %292, %295 : vector<32x32xf32>
    %297 = math.exp %296 : vector<32x32xf32>
    %cst_118 = arith.constant dense<0.000000e+00> : vector<32xf32>
    %298 = vector.multi_reduction <add>, %297, %cst_118 [1] : vector<32x32xf32> to vector<32xf32>
    %299 = vector.shape_cast %298 : vector<32xf32> to vector<32x1xf32>
    %300 = tpu.reciprocal %299 {approx = true} : vector<32x1xf32> -> vector<32x1xf32>
    %301 = vector.broadcast %300 : vector<32x1xf32> to vector<32x32xf32>
    %302 = arith.mulf %297, %301 : vector<32x32xf32>
    %303 = vector.broadcast %285 : vector<1x32xf32> to vector<32x32xf32>
    %304 = arith.mulf %248, %303 : vector<32x32xf32>
    %cst_119 = arith.constant dense<0.000000e+00> : vector<32x32xf32>
    %305 = tpu.matmul %302, %304, %cst_119 {dimension_numbers = #tpu.dot_dimension_numbers<[1], [0], [0], [1], [0, 0, 1, 1], [], []>} : vector<32x32xf32>, vector<32x32xf32>, vector<32x32xf32> -> vector<32x32xf32>
    %306 = arith.addf %278, %305 : vector<32x32xf32>
    %c16_i32_120 = arith.constant 16 : i32
    %307 = vector.broadcast %c16_i32_120 : i32 to vector<1x32xi32>
    %308 = arith.cmpi sge, %249, %307 : vector<1x32xi32>
    %c24_i32_121 = arith.constant 24 : i32
    %309 = vector.broadcast %c24_i32_121 : i32 to vector<1x32xi32>
    %310 = arith.cmpi slt, %249, %309 : vector<1x32xi32>
    %311 = arith.andi %308, %310 : vector<1x32xi1>
    %312 = arith.extui %311 : vector<1x32xi1> to vector<1x32xi32>
    %313 = arith.sitofp %312 : vector<1x32xi32> to vector<1x32xf32>
    %314 = vector.broadcast %313 : vector<1x32xf32> to vector<32x32xf32>
    %315 = arith.mulf %234, %314 : vector<32x32xf32>
    %cst_122 = arith.constant dense<0.000000e+00> : vector<32x32xf32>
    %316 = tpu.matmul %315, %241, %cst_122 {dimension_numbers = #tpu.dot_dimension_numbers<[1], [1], [0], [0], [0, 0, 1, 0], [], []>} : vector<32x32xf32>, vector<32x32xf32>, vector<32x32xf32> -> vector<32x32xf32>
    %cst_123 = arith.constant 0.353553385 : f32
    %317 = vector.broadcast %cst_123 : f32 to vector<32x32xf32>
    %318 = arith.mulf %316, %317 : vector<32x32xf32>
    %cst_124 = arith.constant -1.000000e+09 : f32
    %319 = vector.broadcast %cst_124 : f32 to vector<32x32xf32>
    %320 = arith.select %227, %318, %319 : vector<32x32xi1>, vector<32x32xf32>
    %cst_125 = arith.constant dense<0xFF800000> : vector<32xf32>
    %321 = vector.multi_reduction <maximumf>, %320, %cst_125 [1] : vector<32x32xf32> to vector<32xf32>
    %322 = vector.shape_cast %321 : vector<32xf32> to vector<32x1xf32>
    %323 = vector.broadcast %322 : vector<32x1xf32> to vector<32x32xf32>
    %324 = arith.subf %320, %323 : vector<32x32xf32>
    %325 = math.exp %324 : vector<32x32xf32>
    %cst_126 = arith.constant dense<0.000000e+00> : vector<32xf32>
    %326 = vector.multi_reduction <add>, %325, %cst_126 [1] : vector<32x32xf32> to vector<32xf32>
    %327 = vector.shape_cast %326 : vector<32xf32> to vector<32x1xf32>
    %328 = tpu.reciprocal %327 {approx = true} : vector<32x1xf32> -> vector<32x1xf32>
    %329 = vector.broadcast %328 : vector<32x1xf32> to vector<32x32xf32>
    %330 = arith.mulf %325, %329 : vector<32x32xf32>
    %331 = vector.broadcast %313 : vector<1x32xf32> to vector<32x32xf32>
    %332 = arith.mulf %248, %331 : vector<32x32xf32>
    %cst_127 = arith.constant dense<0.000000e+00> : vector<32x32xf32>
    %333 = tpu.matmul %330, %332, %cst_127 {dimension_numbers = #tpu.dot_dimension_numbers<[1], [0], [0], [1], [0, 0, 1, 1], [], []>} : vector<32x32xf32>, vector<32x32xf32>, vector<32x32xf32> -> vector<32x32xf32>
    %334 = arith.addf %306, %333 : vector<32x32xf32>
    %c24_i32_128 = arith.constant 24 : i32
    %335 = vector.broadcast %c24_i32_128 : i32 to vector<1x32xi32>
    %336 = arith.cmpi sge, %249, %335 : vector<1x32xi32>
    %c32_i32_129 = arith.constant 32 : i32
    %337 = vector.broadcast %c32_i32_129 : i32 to vector<1x32xi32>
    %338 = arith.cmpi slt, %249, %337 : vector<1x32xi32>
    %339 = arith.andi %336, %338 : vector<1x32xi1>
    %340 = arith.extui %339 : vector<1x32xi1> to vector<1x32xi32>
    %341 = arith.sitofp %340 : vector<1x32xi32> to vector<1x32xf32>
    %342 = vector.broadcast %341 : vector<1x32xf32> to vector<32x32xf32>
    %343 = arith.mulf %234, %342 : vector<32x32xf32>
    %cst_130 = arith.constant dense<0.000000e+00> : vector<32x32xf32>
    %344 = tpu.matmul %343, %241, %cst_130 {dimension_numbers = #tpu.dot_dimension_numbers<[1], [1], [0], [0], [0, 0, 1, 0], [], []>} : vector<32x32xf32>, vector<32x32xf32>, vector<32x32xf32> -> vector<32x32xf32>
    %cst_131 = arith.constant 0.353553385 : f32
    %345 = vector.broadcast %cst_131 : f32 to vector<32x32xf32>
    %346 = arith.mulf %344, %345 : vector<32x32xf32>
    %cst_132 = arith.constant -1.000000e+09 : f32
    %347 = vector.broadcast %cst_132 : f32 to vector<32x32xf32>
    %348 = arith.select %227, %346, %347 : vector<32x32xi1>, vector<32x32xf32>
    %cst_133 = arith.constant dense<0xFF800000> : vector<32xf32>
    %349 = vector.multi_reduction <maximumf>, %348, %cst_133 [1] : vector<32x32xf32> to vector<32xf32>
    %350 = vector.shape_cast %349 : vector<32xf32> to vector<32x1xf32>
    %351 = vector.broadcast %350 : vector<32x1xf32> to vector<32x32xf32>
    %352 = arith.subf %348, %351 : vector<32x32xf32>
    %353 = math.exp %352 : vector<32x32xf32>
    %cst_134 = arith.constant dense<0.000000e+00> : vector<32xf32>
    %354 = vector.multi_reduction <add>, %353, %cst_134 [1] : vector<32x32xf32> to vector<32xf32>
    %355 = vector.shape_cast %354 : vector<32xf32> to vector<32x1xf32>
    %356 = tpu.reciprocal %355 {approx = true} : vector<32x1xf32> -> vector<32x1xf32>
    %357 = vector.broadcast %356 : vector<32x1xf32> to vector<32x32xf32>
    %358 = arith.mulf %353, %357 : vector<32x32xf32>
    %359 = vector.broadcast %341 : vector<1x32xf32> to vector<32x32xf32>
    %360 = arith.mulf %248, %359 : vector<32x32xf32>
    %cst_135 = arith.constant dense<0.000000e+00> : vector<32x32xf32>
    %361 = tpu.matmul %358, %360, %cst_135 {dimension_numbers = #tpu.dot_dimension_numbers<[1], [0], [0], [1], [0, 0, 1, 1], [], []>} : vector<32x32xf32>, vector<32x32xf32>, vector<32x32xf32> -> vector<32x32xf32>
    %362 = arith.addf %334, %361 : vector<32x32xf32>
    %c0_136 = arith.constant 0 : index
    %c0_137 = arith.constant 0 : index
    %363 = vector.load %arg11[%c0_136, %c0_137] : memref<32x32xf32, #tpu.memory_space<vmem>>, vector<32x32xf32>
    %cst_138 = arith.constant dense<0.000000e+00> : vector<32x32xf32>
    %364 = tpu.matmul %362, %363, %cst_138 {dimension_numbers = #tpu.dot_dimension_numbers<[1], [0], [0], [1], [0, 0, 1, 1], [], []>} : vector<32x32xf32>, vector<32x32xf32>, vector<32x32xf32> -> vector<32x32xf32>
    %c0_139 = arith.constant 0 : index
    %c0_140 = arith.constant 0 : index
    %365 = vector.load %arg12[%c0_139, %c0_140] : memref<1x32xf32, #tpu.memory_space<vmem>>, vector<1x32xf32>
    %366 = vector.broadcast %365 : vector<1x32xf32> to vector<32x32xf32>
    %367 = arith.addf %364, %366 : vector<32x32xf32>
    %368 = arith.addf %367, %223 : vector<32x32xf32>
    %c0_141 = arith.constant 0 : index
    %c0_142 = arith.constant 0 : index
    %369 = vector.load %arg13[%c0_141, %c0_142] : memref<1x32xf32, #tpu.memory_space<vmem>>, vector<1x32xf32>
    %c0_143 = arith.constant 0 : index
    %c0_144 = arith.constant 0 : index
    %370 = vector.load %arg14[%c0_143, %c0_144] : memref<1x32xf32, #tpu.memory_space<vmem>>, vector<1x32xf32>
    %cst_145 = arith.constant dense<0.000000e+00> : vector<32xf32>
    %371 = vector.multi_reduction <add>, %368, %cst_145 [1] : vector<32x32xf32> to vector<32xf32>
    %372 = vector.shape_cast %371 : vector<32xf32> to vector<32x1xf32>
    %cst_146 = arith.constant 3.200000e+01 : f32
    %373 = vector.broadcast %cst_146 : f32 to vector<32x1xf32>
    %374 = arith.divf %372, %373 : vector<32x1xf32>
    %375 = vector.broadcast %374 : vector<32x1xf32> to vector<32x32xf32>
    %376 = arith.subf %368, %375 : vector<32x32xf32>
    %377 = arith.mulf %376, %376 : vector<32x32xf32>
    %cst_147 = arith.constant dense<0.000000e+00> : vector<32xf32>
    %378 = vector.multi_reduction <add>, %377, %cst_147 [1] : vector<32x32xf32> to vector<32xf32>
    %379 = vector.shape_cast %378 : vector<32xf32> to vector<32x1xf32>
    %cst_148 = arith.constant 3.200000e+01 : f32
    %380 = vector.broadcast %cst_148 : f32 to vector<32x1xf32>
    %381 = arith.divf %379, %380 : vector<32x1xf32>
    %382 = vector.broadcast %374 : vector<32x1xf32> to vector<32x32xf32>
    %383 = arith.subf %368, %382 : vector<32x32xf32>
    %cst_149 = arith.constant 9.99999974E-6 : f32
    %384 = vector.broadcast %cst_149 : f32 to vector<32x1xf32>
    %385 = arith.addf %381, %384 : vector<32x1xf32>
    %386 = math.rsqrt %385 : vector<32x1xf32>
    %387 = vector.broadcast %386 : vector<32x1xf32> to vector<32x32xf32>
    %388 = arith.mulf %383, %387 : vector<32x32xf32>
    %389 = vector.broadcast %369 : vector<1x32xf32> to vector<32x32xf32>
    %390 = arith.mulf %388, %389 : vector<32x32xf32>
    %391 = vector.broadcast %370 : vector<1x32xf32> to vector<32x32xf32>
    %392 = arith.addf %390, %391 : vector<32x32xf32>
    %c0_150 = arith.constant 0 : index
    %c0_151 = arith.constant 0 : index
    %393 = vector.load %arg15[%c0_150, %c0_151] : memref<32x64xf32, #tpu.memory_space<vmem>>, vector<32x64xf32>
    %cst_152 = arith.constant dense<0.000000e+00> : vector<32x64xf32>
    %394 = tpu.matmul %392, %393, %cst_152 {dimension_numbers = #tpu.dot_dimension_numbers<[1], [0], [0], [1], [0, 0, 1, 1], [], []>} : vector<32x32xf32>, vector<32x64xf32>, vector<32x64xf32> -> vector<32x64xf32>
    %c0_153 = arith.constant 0 : index
    %c0_154 = arith.constant 0 : index
    %395 = vector.load %arg16[%c0_153, %c0_154] : memref<1x64xf32, #tpu.memory_space<vmem>>, vector<1x64xf32>
    %396 = vector.broadcast %395 : vector<1x64xf32> to vector<32x64xf32>
    %397 = arith.addf %394, %396 : vector<32x64xf32>
    %cst_155 = arith.constant 0.000000e+00 : f32
    %398 = vector.broadcast %cst_155 : f32 to vector<32x64xf32>
    %399 = arith.maximumf %397, %398 : vector<32x64xf32>
    %c0_156 = arith.constant 0 : index
    %c0_157 = arith.constant 0 : index
    %400 = vector.load %arg17[%c0_156, %c0_157] : memref<64x32xf32, #tpu.memory_space<vmem>>, vector<64x32xf32>
    %cst_158 = arith.constant dense<0.000000e+00> : vector<32x32xf32>
    %401 = tpu.matmul %399, %400, %cst_158 {dimension_numbers = #tpu.dot_dimension_numbers<[1], [0], [0], [1], [0, 0, 1, 1], [], []>} : vector<32x64xf32>, vector<64x32xf32>, vector<32x32xf32> -> vector<32x32xf32>
    %c0_159 = arith.constant 0 : index
    %c0_160 = arith.constant 0 : index
    %402 = vector.load %arg18[%c0_159, %c0_160] : memref<1x32xf32, #tpu.memory_space<vmem>>, vector<1x32xf32>
    %403 = vector.broadcast %402 : vector<1x32xf32> to vector<32x32xf32>
    %404 = arith.addf %401, %403 : vector<32x32xf32>
    %405 = arith.addf %404, %392 : vector<32x32xf32>
    %c0_161 = arith.constant 0 : index
    %c0_162 = arith.constant 0 : index
    %406 = vector.load %arg19[%c0_161, %c0_162] : memref<1x32xf32, #tpu.memory_space<vmem>>, vector<1x32xf32>
    %c0_163 = arith.constant 0 : index
    %c0_164 = arith.constant 0 : index
    %407 = vector.load %arg20[%c0_163, %c0_164] : memref<1x32xf32, #tpu.memory_space<vmem>>, vector<1x32xf32>
    %cst_165 = arith.constant dense<0.000000e+00> : vector<32xf32>
    %408 = vector.multi_reduction <add>, %405, %cst_165 [1] : vector<32x32xf32> to vector<32xf32>
    %409 = vector.shape_cast %408 : vector<32xf32> to vector<32x1xf32>
    %cst_166 = arith.constant 3.200000e+01 : f32
    %410 = vector.broadcast %cst_166 : f32 to vector<32x1xf32>
    %411 = arith.divf %409, %410 : vector<32x1xf32>
    %412 = vector.broadcast %411 : vector<32x1xf32> to vector<32x32xf32>
    %413 = arith.subf %405, %412 : vector<32x32xf32>
    %414 = arith.mulf %413, %413 : vector<32x32xf32>
    %cst_167 = arith.constant dense<0.000000e+00> : vector<32xf32>
    %415 = vector.multi_reduction <add>, %414, %cst_167 [1] : vector<32x32xf32> to vector<32xf32>
    %416 = vector.shape_cast %415 : vector<32xf32> to vector<32x1xf32>
    %cst_168 = arith.constant 3.200000e+01 : f32
    %417 = vector.broadcast %cst_168 : f32 to vector<32x1xf32>
    %418 = arith.divf %416, %417 : vector<32x1xf32>
    %419 = vector.broadcast %411 : vector<32x1xf32> to vector<32x32xf32>
    %420 = arith.subf %405, %419 : vector<32x32xf32>
    %cst_169 = arith.constant 9.99999997E-7 : f32
    %421 = vector.broadcast %cst_169 : f32 to vector<32x1xf32>
    %422 = arith.addf %418, %421 : vector<32x1xf32>
    %423 = math.rsqrt %422 : vector<32x1xf32>
    %424 = vector.broadcast %423 : vector<32x1xf32> to vector<32x32xf32>
    %425 = arith.mulf %420, %424 : vector<32x32xf32>
    %426 = vector.broadcast %406 : vector<1x32xf32> to vector<32x32xf32>
    %427 = arith.mulf %425, %426 : vector<32x32xf32>
    %428 = vector.broadcast %407 : vector<1x32xf32> to vector<32x32xf32>
    %429 = arith.addf %427, %428 : vector<32x32xf32>
    %c0_170 = arith.constant 0 : index
    %c0_171 = arith.constant 0 : index
    %c0_172 = arith.constant 0 : index
    %430 = vector.load %arg21[%c0_170, %c0_171, %c0_172] : memref<1x32x32xf32, #tpu.memory_space<vmem>>, vector<1x32x32xf32>
    %431 = vector.shape_cast %430 : vector<1x32x32xf32> to vector<32x32xf32>
    %432 = vector.shape_cast %429 : vector<32x32xf32> to vector<1x32x32xf32>
    tpu.vector_store %arg21[%c0_170, %c0_171, %c0_172], %432 {strides = array<i32>} : memref<1x32x32xf32, #tpu.memory_space<vmem>>, vector<1x32x32xf32>,
    return
  }
  func.func @transform_0(%arg0: i32) -> (i32, i32, i32) {
    %c0_i32 = arith.constant 0 : i32
    %c0_i32_0 = arith.constant 0 : i32
    %c0_i32_1 = arith.constant 0 : i32
    return %arg0, %c0_i32, %c0_i32_0 : i32, i32, i32
  }
  func.func @transform_1(%arg0: i32) -> (i32, i32, i32) {
    %c0_i32 = arith.constant 0 : i32
    %c0_i32_0 = arith.constant 0 : i32
    %c0_i32_1 = arith.constant 0 : i32
    return %arg0, %c0_i32, %c0_i32_0 : i32, i32, i32
  }
  func.func @transform_2(%arg0: i32) -> (i32, i32, i32) {
    %c0_i32 = arith.constant 0 : i32
    %c0_i32_0 = arith.constant 0 : i32
    %c0_i32_1 = arith.constant 0 : i32
    %c0_i32_2 = arith.constant 0 : i32
    return %c0_i32, %c0_i32_0, %c0_i32_1 : i32, i32, i32
  }
  func.func @transform_3(%arg0: i32) -> (i32, i32, i32) {
    %c0_i32 = arith.constant 0 : i32
    %c0_i32_0 = arith.constant 0 : i32
    %c0_i32_1 = arith.constant 0 : i32
    %c0_i32_2 = arith.constant 0 : i32
    return %c0_i32, %c0_i32_0, %c0_i32_1 : i32, i32, i32
  }
  func.func @transform_4(%arg0: i32) -> (i32, i32) {
    %c0_i32 = arith.constant 0 : i32
    %c0_i32_0 = arith.constant 0 : i32
    %c0_i32_1 = arith.constant 0 : i32
    return %c0_i32, %c0_i32_0 : i32, i32
  }
  func.func @transform_5(%arg0: i32) -> (i32, i32) {
    %c0_i32 = arith.constant 0 : i32
    %c0_i32_0 = arith.constant 0 : i32
    %c0_i32_1 = arith.constant 0 : i32
    return %c0_i32, %c0_i32_0 : i32, i32
  }
  func.func @transform_6(%arg0: i32) -> (i32, i32) {
    %c0_i32 = arith.constant 0 : i32
    %c0_i32_0 = arith.constant 0 : i32
    %c0_i32_1 = arith.constant 0 : i32
    return %c0_i32, %c0_i32_0 : i32, i32
  }
  func.func @transform_7(%arg0: i32) -> (i32, i32) {
    %c0_i32 = arith.constant 0 : i32
    %c0_i32_0 = arith.constant 0 : i32
    %c0_i32_1 = arith.constant 0 : i32
    return %c0_i32, %c0_i32_0 : i32, i32
  }
  func.func @transform_8(%arg0: i32) -> (i32, i32, i32) {
    %c0_i32 = arith.constant 0 : i32
    %c0_i32_0 = arith.constant 0 : i32
    %c0_i32_1 = arith.constant 0 : i32
    %c0_i32_2 = arith.constant 0 : i32
    return %c0_i32, %c0_i32_0, %c0_i32_1 : i32, i32, i32
  }
  func.func @transform_9(%arg0: i32) -> (i32, i32, i32) {
    %c0_i32 = arith.constant 0 : i32
    %c0_i32_0 = arith.constant 0 : i32
    %c0_i32_1 = arith.constant 0 : i32
    %c0_i32_2 = arith.constant 0 : i32
    return %c0_i32, %c0_i32_0, %c0_i32_1 : i32, i32, i32
  }
  func.func @transform_10(%arg0: i32) -> (i32, i32) {
    %c0_i32 = arith.constant 0 : i32
    %c0_i32_0 = arith.constant 0 : i32
    %c0_i32_1 = arith.constant 0 : i32
    return %c0_i32, %c0_i32_0 : i32, i32
  }
  func.func @transform_11(%arg0: i32) -> (i32, i32) {
    %c0_i32 = arith.constant 0 : i32
    %c0_i32_0 = arith.constant 0 : i32
    %c0_i32_1 = arith.constant 0 : i32
    return %c0_i32, %c0_i32_0 : i32, i32
  }
  func.func @transform_12(%arg0: i32) -> (i32, i32) {
    %c0_i32 = arith.constant 0 : i32
    %c0_i32_0 = arith.constant 0 : i32
    %c0_i32_1 = arith.constant 0 : i32
    return %c0_i32, %c0_i32_0 : i32, i32
  }
  func.func @transform_13(%arg0: i32) -> (i32, i32) {
    %c0_i32 = arith.constant 0 : i32
    %c0_i32_0 = arith.constant 0 : i32
    %c0_i32_1 = arith.constant 0 : i32
    return %c0_i32, %c0_i32_0 : i32, i32
  }
  func.func @transform_14(%arg0: i32) -> (i32, i32) {
    %c0_i32 = arith.constant 0 : i32
    %c0_i32_0 = arith.constant 0 : i32
    %c0_i32_1 = arith.constant 0 : i32
    return %c0_i32, %c0_i32_0 : i32, i32
  }
  func.func @transform_15(%arg0: i32) -> (i32, i32) {
    %c0_i32 = arith.constant 0 : i32
    %c0_i32_0 = arith.constant 0 : i32
    %c0_i32_1 = arith.constant 0 : i32
    return %c0_i32, %c0_i32_0 : i32, i32
  }
  func.func @transform_16(%arg0: i32) -> (i32, i32) {
    %c0_i32 = arith.constant 0 : i32
    %c0_i32_0 = arith.constant 0 : i32
    %c0_i32_1 = arith.constant 0 : i32
    return %c0_i32, %c0_i32_0 : i32, i32
  }
  func.func @transform_17(%arg0: i32) -> (i32, i32) {
    %c0_i32 = arith.constant 0 : i32
    %c0_i32_0 = arith.constant 0 : i32
    %c0_i32_1 = arith.constant 0 : i32
    return %c0_i32, %c0_i32_0 : i32, i32
  }
  func.func @transform_18(%arg0: i32) -> (i32, i32) {
    %c0_i32 = arith.constant 0 : i32
    %c0_i32_0 = arith.constant 0 : i32
    %c0_i32_1 = arith.constant 0 : i32
    return %c0_i32, %c0_i32_0 : i32, i32
  }
  func.func @transform_19(%arg0: i32) -> (i32, i32) {
    %c0_i32 = arith.constant 0 : i32
    %c0_i32_0 = arith.constant 0 : i32
    %c0_i32_1 = arith.constant 0 : i32
    return %c0_i32, %c0_i32_0 : i32, i32
  }
  func.func @transform_20(%arg0: i32) -> (i32, i32, i32) {
    %c0_i32 = arith.constant 0 : i32
    %c0_i32_0 = arith.constant 0 : i32
    %c0_i32_1 = arith.constant 0 : i32
    return %arg0, %c0_i32, %c0_i32_0 : i32, i32, i32
  }
}

module attributes {stable_mosaic.version = 11 : i64} {
  func.func @_decode_loop_kernel(%arg0: i32, %arg1: memref<8x2xf32, #tpu.memory_space<vmem>>, %arg2: memref<2x8x60xf32, #tpu.memory_space<vmem>>, %arg3: memref<3x2x60xf32, #tpu.memory_space<vmem>>, %arg4: memref<3x60x60xf32, #tpu.memory_space<vmem>>, %arg5: memref<6x1x60xf32, #tpu.memory_space<vmem>>, %arg6: memref<3x60x60xf32, #tpu.memory_space<vmem>>, %arg7: memref<3x60x60xf32, #tpu.memory_space<vmem>>, %arg8: memref<6x1x60xf32, #tpu.memory_space<vmem>>, %arg9: memref<60x2xf32, #tpu.memory_space<vmem>>, %arg10: memref<1x2xf32, #tpu.memory_space<vmem>>, %arg11: memref<12x60x60xf32, #tpu.memory_space<vmem>>, %arg12: memref<6x1x60xf32, #tpu.memory_space<vmem>>, %arg13: memref<4x60x60xf32, #tpu.memory_space<vmem>>, %arg14: memref<2x1x60xf32, #tpu.memory_space<vmem>>, %arg15: memref<2x1x60xf32, #tpu.memory_space<vmem>>, %arg16: memref<2x1x60xf32, #tpu.memory_space<vmem>>, %arg17: memref<1x60xf32, #tpu.memory_space<vmem>>, %arg18: memref<1x60xf32, #tpu.memory_space<vmem>>, %arg19: memref<4x8x2xf32, #tpu.memory_space<vmem>>, %arg20: memref<8x2xf32, #tpu.memory_space<vmem>>, %arg21: memref<2x8x60xf32, #tpu.memory_space<vmem>>) attributes {dimension_semantics = [#tpu.dimension_semantics<arbitrary>], iteration_bounds = array<i64: 4>, scalar_prefetch = 0 : i64, scratch_operands = 2 : i64, tpu.core_type = #tpu.core_type<tc>, window_params = [{pipeline_mode = #tpu.pipeline_mode<synchronous>, transform_indices = @transform_0, window_bounds = array<i64: 8, 2>}, {pipeline_mode = #tpu.pipeline_mode<synchronous>, transform_indices = @transform_1, window_bounds = array<i64: 2, 8, 60>}, {pipeline_mode = #tpu.pipeline_mode<synchronous>, transform_indices = @transform_2, window_bounds = array<i64: 3, 2, 60>}, {pipeline_mode = #tpu.pipeline_mode<synchronous>, transform_indices = @transform_3, window_bounds = array<i64: 3, 60, 60>}, {pipeline_mode = #tpu.pipeline_mode<synchronous>, transform_indices = @transform_4, window_bounds = array<i64: 6, 1, 60>}, {pipeline_mode = #tpu.pipeline_mode<synchronous>, transform_indices = @transform_5, window_bounds = array<i64: 3, 60, 60>}, {pipeline_mode = #tpu.pipeline_mode<synchronous>, transform_indices = @transform_6, window_bounds = array<i64: 3, 60, 60>}, {pipeline_mode = #tpu.pipeline_mode<synchronous>, transform_indices = @transform_7, window_bounds = array<i64: 6, 1, 60>}, {pipeline_mode = #tpu.pipeline_mode<synchronous>, transform_indices = @transform_8, window_bounds = array<i64: 60, 2>}, {pipeline_mode = #tpu.pipeline_mode<synchronous>, transform_indices = @transform_9, window_bounds = array<i64: 1, 2>}, {pipeline_mode = #tpu.pipeline_mode<synchronous>, transform_indices = @transform_10, window_bounds = array<i64: 12, 60, 60>}, {pipeline_mode = #tpu.pipeline_mode<synchronous>, transform_indices = @transform_11, window_bounds = array<i64: 6, 1, 60>}, {pipeline_mode = #tpu.pipeline_mode<synchronous>, transform_indices = @transform_12, window_bounds = array<i64: 4, 60, 60>}, {pipeline_mode = #tpu.pipeline_mode<synchronous>, transform_indices = @transform_13, window_bounds = array<i64: 2, 1, 60>}, {pipeline_mode = #tpu.pipeline_mode<synchronous>, transform_indices = @transform_14, window_bounds = array<i64: 2, 1, 60>}, {pipeline_mode = #tpu.pipeline_mode<synchronous>, transform_indices = @transform_15, window_bounds = array<i64: 2, 1, 60>}, {pipeline_mode = #tpu.pipeline_mode<synchronous>, transform_indices = @transform_16, window_bounds = array<i64: 1, 60>}, {pipeline_mode = #tpu.pipeline_mode<synchronous>, transform_indices = @transform_17, window_bounds = array<i64: 1, 60>}, {pipeline_mode = #tpu.pipeline_mode<synchronous>, transform_indices = @transform_18, window_bounds = array<i64: 4, 8, 2>}]} {
    %c0_i32 = arith.constant 0 : i32
    %0 = arith.cmpi eq, %arg0, %c0_i32 : i32
    %1 = arith.extui %0 : i1 to i32
    %c0_i32_0 = arith.constant 0 : i32
    %2 = arith.cmpi ne, %1, %c0_i32_0 : i32
    scf.if %2 {
      %c0_264 = arith.constant 0 : index
      %c0_265 = arith.constant 0 : index
      %480 = vector.load %arg1[%c0_264, %c0_265] : memref<8x2xf32, #tpu.memory_space<vmem>>, vector<8x2xf32>
      %c0_266 = arith.constant 0 : index
      %c0_267 = arith.constant 0 : index
      %481 = vector.load %arg20[%c0_266, %c0_267] : memref<8x2xf32, #tpu.memory_space<vmem>>, vector<8x2xf32>
      tpu.vector_store %arg20[%c0_266, %c0_267], %480 {strides = array<i32>} : memref<8x2xf32, #tpu.memory_space<vmem>>, vector<8x2xf32>,
      %c0_268 = arith.constant 0 : index
      %c0_269 = arith.constant 0 : index
      %c0_270 = arith.constant 0 : index
      %482 = vector.load %arg2[%c0_268, %c0_269, %c0_270] : memref<2x8x60xf32, #tpu.memory_space<vmem>>, vector<2x8x60xf32>
      %c0_271 = arith.constant 0 : index
      %c0_272 = arith.constant 0 : index
      %c0_273 = arith.constant 0 : index
      %483 = vector.load %arg21[%c0_271, %c0_272, %c0_273] : memref<2x8x60xf32, #tpu.memory_space<vmem>>, vector<2x8x60xf32>
      tpu.vector_store %arg21[%c0_271, %c0_272, %c0_273], %482 {strides = array<i32>} : memref<2x8x60xf32, #tpu.memory_space<vmem>>, vector<2x8x60xf32>,
    } else {
    }
    %c0 = arith.constant 0 : index
    %c0_1 = arith.constant 0 : index
    %3 = vector.load %arg20[%c0, %c0_1] : memref<8x2xf32, #tpu.memory_space<vmem>>, vector<8x2xf32>
    %c0_2 = arith.constant 0 : index
    %c0_3 = arith.constant 0 : index
    %c0_4 = arith.constant 0 : index
    %4 = vector.load %arg21[%c0_2, %c0_3, %c0_4] : memref<2x8x60xf32, #tpu.memory_space<vmem>>, vector<1x8x60xf32>
    %5 = vector.shape_cast %4 : vector<1x8x60xf32> to vector<8x60xf32>
    %c0_5 = arith.constant 0 : index
    %c0_6 = arith.constant 0 : index
    %c0_7 = arith.constant 0 : index
    %6 = vector.load %arg3[%c0_5, %c0_6, %c0_7] : memref<3x2x60xf32, #tpu.memory_space<vmem>>, vector<1x2x60xf32>
    %7 = vector.shape_cast %6 : vector<1x2x60xf32> to vector<2x60xf32>
    %cst = arith.constant dense<0.000000e+00> : vector<8x60xf32>
    %8 = tpu.matmul %3, %7, %cst {dimension_numbers = #tpu.dot_dimension_numbers<[1], [0], [0], [1], [0, 0, 1, 1], [], []>} : vector<8x2xf32>, vector<2x60xf32>, vector<8x60xf32> -> vector<8x60xf32>
    %c0_8 = arith.constant 0 : index
    %c0_9 = arith.constant 0 : index
    %c0_10 = arith.constant 0 : index
    %9 = vector.load %arg5[%c0_8, %c0_9, %c0_10] : memref<6x1x60xf32, #tpu.memory_space<vmem>>, vector<1x1x60xf32>
    %10 = vector.shape_cast %9 : vector<1x1x60xf32> to vector<1x60xf32>
    %11 = vector.broadcast %10 : vector<1x60xf32> to vector<8x60xf32>
    %12 = arith.addf %8, %11 : vector<8x60xf32>
    %c1 = arith.constant 1 : index
    %c0_11 = arith.constant 0 : index
    %c0_12 = arith.constant 0 : index
    %13 = vector.load %arg3[%c1, %c0_11, %c0_12] : memref<3x2x60xf32, #tpu.memory_space<vmem>>, vector<1x2x60xf32>
    %14 = vector.shape_cast %13 : vector<1x2x60xf32> to vector<2x60xf32>
    %cst_13 = arith.constant dense<0.000000e+00> : vector<8x60xf32>
    %15 = tpu.matmul %3, %14, %cst_13 {dimension_numbers = #tpu.dot_dimension_numbers<[1], [0], [0], [1], [0, 0, 1, 1], [], []>} : vector<8x2xf32>, vector<2x60xf32>, vector<8x60xf32> -> vector<8x60xf32>
    %c1_14 = arith.constant 1 : index
    %c0_15 = arith.constant 0 : index
    %c0_16 = arith.constant 0 : index
    %16 = vector.load %arg5[%c1_14, %c0_15, %c0_16] : memref<6x1x60xf32, #tpu.memory_space<vmem>>, vector<1x1x60xf32>
    %17 = vector.shape_cast %16 : vector<1x1x60xf32> to vector<1x60xf32>
    %18 = vector.broadcast %17 : vector<1x60xf32> to vector<8x60xf32>
    %19 = arith.addf %15, %18 : vector<8x60xf32>
    %c2 = arith.constant 2 : index
    %c0_17 = arith.constant 0 : index
    %c0_18 = arith.constant 0 : index
    %20 = vector.load %arg3[%c2, %c0_17, %c0_18] : memref<3x2x60xf32, #tpu.memory_space<vmem>>, vector<1x2x60xf32>
    %21 = vector.shape_cast %20 : vector<1x2x60xf32> to vector<2x60xf32>
    %cst_19 = arith.constant dense<0.000000e+00> : vector<8x60xf32>
    %22 = tpu.matmul %3, %21, %cst_19 {dimension_numbers = #tpu.dot_dimension_numbers<[1], [0], [0], [1], [0, 0, 1, 1], [], []>} : vector<8x2xf32>, vector<2x60xf32>, vector<8x60xf32> -> vector<8x60xf32>
    %c2_20 = arith.constant 2 : index
    %c0_21 = arith.constant 0 : index
    %c0_22 = arith.constant 0 : index
    %23 = vector.load %arg5[%c2_20, %c0_21, %c0_22] : memref<6x1x60xf32, #tpu.memory_space<vmem>>, vector<1x1x60xf32>
    %24 = vector.shape_cast %23 : vector<1x1x60xf32> to vector<1x60xf32>
    %25 = vector.broadcast %24 : vector<1x60xf32> to vector<8x60xf32>
    %26 = arith.addf %22, %25 : vector<8x60xf32>
    %c0_23 = arith.constant 0 : index
    %c0_24 = arith.constant 0 : index
    %c0_25 = arith.constant 0 : index
    %27 = vector.load %arg4[%c0_23, %c0_24, %c0_25] : memref<3x60x60xf32, #tpu.memory_space<vmem>>, vector<1x60x60xf32>
    %28 = vector.shape_cast %27 : vector<1x60x60xf32> to vector<60x60xf32>
    %cst_26 = arith.constant dense<0.000000e+00> : vector<8x60xf32>
    %29 = tpu.matmul %5, %28, %cst_26 {dimension_numbers = #tpu.dot_dimension_numbers<[1], [0], [0], [1], [0, 0, 1, 1], [], []>} : vector<8x60xf32>, vector<60x60xf32>, vector<8x60xf32> -> vector<8x60xf32>
    %c3 = arith.constant 3 : index
    %c0_27 = arith.constant 0 : index
    %c0_28 = arith.constant 0 : index
    %30 = vector.load %arg5[%c3, %c0_27, %c0_28] : memref<6x1x60xf32, #tpu.memory_space<vmem>>, vector<1x1x60xf32>
    %31 = vector.shape_cast %30 : vector<1x1x60xf32> to vector<1x60xf32>
    %32 = vector.broadcast %31 : vector<1x60xf32> to vector<8x60xf32>
    %33 = arith.addf %29, %32 : vector<8x60xf32>
    %c1_29 = arith.constant 1 : index
    %c0_30 = arith.constant 0 : index
    %c0_31 = arith.constant 0 : index
    %34 = vector.load %arg4[%c1_29, %c0_30, %c0_31] : memref<3x60x60xf32, #tpu.memory_space<vmem>>, vector<1x60x60xf32>
    %35 = vector.shape_cast %34 : vector<1x60x60xf32> to vector<60x60xf32>
    %cst_32 = arith.constant dense<0.000000e+00> : vector<8x60xf32>
    %36 = tpu.matmul %5, %35, %cst_32 {dimension_numbers = #tpu.dot_dimension_numbers<[1], [0], [0], [1], [0, 0, 1, 1], [], []>} : vector<8x60xf32>, vector<60x60xf32>, vector<8x60xf32> -> vector<8x60xf32>
    %c4 = arith.constant 4 : index
    %c0_33 = arith.constant 0 : index
    %c0_34 = arith.constant 0 : index
    %37 = vector.load %arg5[%c4, %c0_33, %c0_34] : memref<6x1x60xf32, #tpu.memory_space<vmem>>, vector<1x1x60xf32>
    %38 = vector.shape_cast %37 : vector<1x1x60xf32> to vector<1x60xf32>
    %39 = vector.broadcast %38 : vector<1x60xf32> to vector<8x60xf32>
    %40 = arith.addf %36, %39 : vector<8x60xf32>
    %c2_35 = arith.constant 2 : index
    %c0_36 = arith.constant 0 : index
    %c0_37 = arith.constant 0 : index
    %41 = vector.load %arg4[%c2_35, %c0_36, %c0_37] : memref<3x60x60xf32, #tpu.memory_space<vmem>>, vector<1x60x60xf32>
    %42 = vector.shape_cast %41 : vector<1x60x60xf32> to vector<60x60xf32>
    %cst_38 = arith.constant dense<0.000000e+00> : vector<8x60xf32>
    %43 = tpu.matmul %5, %42, %cst_38 {dimension_numbers = #tpu.dot_dimension_numbers<[1], [0], [0], [1], [0, 0, 1, 1], [], []>} : vector<8x60xf32>, vector<60x60xf32>, vector<8x60xf32> -> vector<8x60xf32>
    %c5 = arith.constant 5 : index
    %c0_39 = arith.constant 0 : index
    %c0_40 = arith.constant 0 : index
    %44 = vector.load %arg5[%c5, %c0_39, %c0_40] : memref<6x1x60xf32, #tpu.memory_space<vmem>>, vector<1x1x60xf32>
    %45 = vector.shape_cast %44 : vector<1x1x60xf32> to vector<1x60xf32>
    %46 = vector.broadcast %45 : vector<1x60xf32> to vector<8x60xf32>
    %47 = arith.addf %43, %46 : vector<8x60xf32>
    %48 = arith.addf %12, %33 : vector<8x60xf32>
    %49 = arith.negf %48 : vector<8x60xf32>
    %50 = math.exp %49 : vector<8x60xf32>
    %cst_41 = arith.constant 1.000000e+00 : f32
    %51 = vector.broadcast %cst_41 : f32 to vector<8x60xf32>
    %52 = arith.addf %51, %50 : vector<8x60xf32>
    %53 = arith.divf %51, %52 : vector<8x60xf32>
    %54 = arith.addf %19, %40 : vector<8x60xf32>
    %55 = arith.negf %54 : vector<8x60xf32>
    %56 = math.exp %55 : vector<8x60xf32>
    %cst_42 = arith.constant 1.000000e+00 : f32
    %57 = vector.broadcast %cst_42 : f32 to vector<8x60xf32>
    %58 = arith.addf %57, %56 : vector<8x60xf32>
    %59 = arith.divf %57, %58 : vector<8x60xf32>
    %60 = arith.mulf %53, %47 : vector<8x60xf32>
    %61 = arith.addf %26, %60 : vector<8x60xf32>
    %62 = math.tanh %61 : vector<8x60xf32>
    %cst_43 = arith.constant 1.000000e+00 : f32
    %63 = vector.broadcast %cst_43 : f32 to vector<8x60xf32>
    %64 = arith.subf %63, %59 : vector<8x60xf32>
    %65 = arith.mulf %64, %62 : vector<8x60xf32>
    %66 = arith.mulf %59, %5 : vector<8x60xf32>
    %67 = arith.addf %65, %66 : vector<8x60xf32>
    %c1_44 = arith.constant 1 : index
    %c0_45 = arith.constant 0 : index
    %c0_46 = arith.constant 0 : index
    %68 = vector.load %arg21[%c1_44, %c0_45, %c0_46] : memref<2x8x60xf32, #tpu.memory_space<vmem>>, vector<1x8x60xf32>
    %69 = vector.shape_cast %68 : vector<1x8x60xf32> to vector<8x60xf32>
    %c0_47 = arith.constant 0 : index
    %c0_48 = arith.constant 0 : index
    %c0_49 = arith.constant 0 : index
    %70 = vector.load %arg6[%c0_47, %c0_48, %c0_49] : memref<3x60x60xf32, #tpu.memory_space<vmem>>, vector<1x60x60xf32>
    %71 = vector.shape_cast %70 : vector<1x60x60xf32> to vector<60x60xf32>
    %cst_50 = arith.constant dense<0.000000e+00> : vector<8x60xf32>
    %72 = tpu.matmul %67, %71, %cst_50 {dimension_numbers = #tpu.dot_dimension_numbers<[1], [0], [0], [1], [0, 0, 1, 1], [], []>} : vector<8x60xf32>, vector<60x60xf32>, vector<8x60xf32> -> vector<8x60xf32>
    %c0_51 = arith.constant 0 : index
    %c0_52 = arith.constant 0 : index
    %c0_53 = arith.constant 0 : index
    %73 = vector.load %arg8[%c0_51, %c0_52, %c0_53] : memref<6x1x60xf32, #tpu.memory_space<vmem>>, vector<1x1x60xf32>
    %74 = vector.shape_cast %73 : vector<1x1x60xf32> to vector<1x60xf32>
    %75 = vector.broadcast %74 : vector<1x60xf32> to vector<8x60xf32>
    %76 = arith.addf %72, %75 : vector<8x60xf32>
    %c1_54 = arith.constant 1 : index
    %c0_55 = arith.constant 0 : index
    %c0_56 = arith.constant 0 : index
    %77 = vector.load %arg6[%c1_54, %c0_55, %c0_56] : memref<3x60x60xf32, #tpu.memory_space<vmem>>, vector<1x60x60xf32>
    %78 = vector.shape_cast %77 : vector<1x60x60xf32> to vector<60x60xf32>
    %cst_57 = arith.constant dense<0.000000e+00> : vector<8x60xf32>
    %79 = tpu.matmul %67, %78, %cst_57 {dimension_numbers = #tpu.dot_dimension_numbers<[1], [0], [0], [1], [0, 0, 1, 1], [], []>} : vector<8x60xf32>, vector<60x60xf32>, vector<8x60xf32> -> vector<8x60xf32>
    %c1_58 = arith.constant 1 : index
    %c0_59 = arith.constant 0 : index
    %c0_60 = arith.constant 0 : index
    %80 = vector.load %arg8[%c1_58, %c0_59, %c0_60] : memref<6x1x60xf32, #tpu.memory_space<vmem>>, vector<1x1x60xf32>
    %81 = vector.shape_cast %80 : vector<1x1x60xf32> to vector<1x60xf32>
    %82 = vector.broadcast %81 : vector<1x60xf32> to vector<8x60xf32>
    %83 = arith.addf %79, %82 : vector<8x60xf32>
    %c2_61 = arith.constant 2 : index
    %c0_62 = arith.constant 0 : index
    %c0_63 = arith.constant 0 : index
    %84 = vector.load %arg6[%c2_61, %c0_62, %c0_63] : memref<3x60x60xf32, #tpu.memory_space<vmem>>, vector<1x60x60xf32>
    %85 = vector.shape_cast %84 : vector<1x60x60xf32> to vector<60x60xf32>
    %cst_64 = arith.constant dense<0.000000e+00> : vector<8x60xf32>
    %86 = tpu.matmul %67, %85, %cst_64 {dimension_numbers = #tpu.dot_dimension_numbers<[1], [0], [0], [1], [0, 0, 1, 1], [], []>} : vector<8x60xf32>, vector<60x60xf32>, vector<8x60xf32> -> vector<8x60xf32>
    %c2_65 = arith.constant 2 : index
    %c0_66 = arith.constant 0 : index
    %c0_67 = arith.constant 0 : index
    %87 = vector.load %arg8[%c2_65, %c0_66, %c0_67] : memref<6x1x60xf32, #tpu.memory_space<vmem>>, vector<1x1x60xf32>
    %88 = vector.shape_cast %87 : vector<1x1x60xf32> to vector<1x60xf32>
    %89 = vector.broadcast %88 : vector<1x60xf32> to vector<8x60xf32>
    %90 = arith.addf %86, %89 : vector<8x60xf32>
    %c0_68 = arith.constant 0 : index
    %c0_69 = arith.constant 0 : index
    %c0_70 = arith.constant 0 : index
    %91 = vector.load %arg7[%c0_68, %c0_69, %c0_70] : memref<3x60x60xf32, #tpu.memory_space<vmem>>, vector<1x60x60xf32>
    %92 = vector.shape_cast %91 : vector<1x60x60xf32> to vector<60x60xf32>
    %cst_71 = arith.constant dense<0.000000e+00> : vector<8x60xf32>
    %93 = tpu.matmul %69, %92, %cst_71 {dimension_numbers = #tpu.dot_dimension_numbers<[1], [0], [0], [1], [0, 0, 1, 1], [], []>} : vector<8x60xf32>, vector<60x60xf32>, vector<8x60xf32> -> vector<8x60xf32>
    %c3_72 = arith.constant 3 : index
    %c0_73 = arith.constant 0 : index
    %c0_74 = arith.constant 0 : index
    %94 = vector.load %arg8[%c3_72, %c0_73, %c0_74] : memref<6x1x60xf32, #tpu.memory_space<vmem>>, vector<1x1x60xf32>
    %95 = vector.shape_cast %94 : vector<1x1x60xf32> to vector<1x60xf32>
    %96 = vector.broadcast %95 : vector<1x60xf32> to vector<8x60xf32>
    %97 = arith.addf %93, %96 : vector<8x60xf32>
    %c1_75 = arith.constant 1 : index
    %c0_76 = arith.constant 0 : index
    %c0_77 = arith.constant 0 : index
    %98 = vector.load %arg7[%c1_75, %c0_76, %c0_77] : memref<3x60x60xf32, #tpu.memory_space<vmem>>, vector<1x60x60xf32>
    %99 = vector.shape_cast %98 : vector<1x60x60xf32> to vector<60x60xf32>
    %cst_78 = arith.constant dense<0.000000e+00> : vector<8x60xf32>
    %100 = tpu.matmul %69, %99, %cst_78 {dimension_numbers = #tpu.dot_dimension_numbers<[1], [0], [0], [1], [0, 0, 1, 1], [], []>} : vector<8x60xf32>, vector<60x60xf32>, vector<8x60xf32> -> vector<8x60xf32>
    %c4_79 = arith.constant 4 : index
    %c0_80 = arith.constant 0 : index
    %c0_81 = arith.constant 0 : index
    %101 = vector.load %arg8[%c4_79, %c0_80, %c0_81] : memref<6x1x60xf32, #tpu.memory_space<vmem>>, vector<1x1x60xf32>
    %102 = vector.shape_cast %101 : vector<1x1x60xf32> to vector<1x60xf32>
    %103 = vector.broadcast %102 : vector<1x60xf32> to vector<8x60xf32>
    %104 = arith.addf %100, %103 : vector<8x60xf32>
    %c2_82 = arith.constant 2 : index
    %c0_83 = arith.constant 0 : index
    %c0_84 = arith.constant 0 : index
    %105 = vector.load %arg7[%c2_82, %c0_83, %c0_84] : memref<3x60x60xf32, #tpu.memory_space<vmem>>, vector<1x60x60xf32>
    %106 = vector.shape_cast %105 : vector<1x60x60xf32> to vector<60x60xf32>
    %cst_85 = arith.constant dense<0.000000e+00> : vector<8x60xf32>
    %107 = tpu.matmul %69, %106, %cst_85 {dimension_numbers = #tpu.dot_dimension_numbers<[1], [0], [0], [1], [0, 0, 1, 1], [], []>} : vector<8x60xf32>, vector<60x60xf32>, vector<8x60xf32> -> vector<8x60xf32>
    %c5_86 = arith.constant 5 : index
    %c0_87 = arith.constant 0 : index
    %c0_88 = arith.constant 0 : index
    %108 = vector.load %arg8[%c5_86, %c0_87, %c0_88] : memref<6x1x60xf32, #tpu.memory_space<vmem>>, vector<1x1x60xf32>
    %109 = vector.shape_cast %108 : vector<1x1x60xf32> to vector<1x60xf32>
    %110 = vector.broadcast %109 : vector<1x60xf32> to vector<8x60xf32>
    %111 = arith.addf %107, %110 : vector<8x60xf32>
    %112 = arith.addf %76, %97 : vector<8x60xf32>
    %113 = arith.negf %112 : vector<8x60xf32>
    %114 = math.exp %113 : vector<8x60xf32>
    %cst_89 = arith.constant 1.000000e+00 : f32
    %115 = vector.broadcast %cst_89 : f32 to vector<8x60xf32>
    %116 = arith.addf %115, %114 : vector<8x60xf32>
    %117 = arith.divf %115, %116 : vector<8x60xf32>
    %118 = arith.addf %83, %104 : vector<8x60xf32>
    %119 = arith.negf %118 : vector<8x60xf32>
    %120 = math.exp %119 : vector<8x60xf32>
    %cst_90 = arith.constant 1.000000e+00 : f32
    %121 = vector.broadcast %cst_90 : f32 to vector<8x60xf32>
    %122 = arith.addf %121, %120 : vector<8x60xf32>
    %123 = arith.divf %121, %122 : vector<8x60xf32>
    %124 = arith.mulf %117, %111 : vector<8x60xf32>
    %125 = arith.addf %90, %124 : vector<8x60xf32>
    %126 = math.tanh %125 : vector<8x60xf32>
    %cst_91 = arith.constant 1.000000e+00 : f32
    %127 = vector.broadcast %cst_91 : f32 to vector<8x60xf32>
    %128 = arith.subf %127, %123 : vector<8x60xf32>
    %129 = arith.mulf %128, %126 : vector<8x60xf32>
    %130 = arith.mulf %123, %69 : vector<8x60xf32>
    %131 = arith.addf %129, %130 : vector<8x60xf32>
    %c0_92 = arith.constant 0 : index
    %c0_93 = arith.constant 0 : index
    %132 = vector.load %arg9[%c0_92, %c0_93] : memref<60x2xf32, #tpu.memory_space<vmem>>, vector<60x2xf32>
    %cst_94 = arith.constant dense<0.000000e+00> : vector<8x2xf32>
    %133 = tpu.matmul %131, %132, %cst_94 {dimension_numbers = #tpu.dot_dimension_numbers<[1], [0], [0], [1], [0, 0, 1, 1], [], []>} : vector<8x60xf32>, vector<60x2xf32>, vector<8x2xf32> -> vector<8x2xf32>
    %c0_95 = arith.constant 0 : index
    %c0_96 = arith.constant 0 : index
    %134 = vector.load %arg10[%c0_95, %c0_96] : memref<1x2xf32, #tpu.memory_space<vmem>>, vector<1x2xf32>
    %135 = vector.broadcast %134 : vector<1x2xf32> to vector<8x2xf32>
    %136 = arith.addf %133, %135 : vector<8x2xf32>
    %137 = math.tanh %136 : vector<8x2xf32>
    %138 = arith.index_cast %arg0 : i32 to index
    %c0_97 = arith.constant 0 : index
    %c0_98 = arith.constant 0 : index
    %139 = vector.load %arg19[%138, %c0_97, %c0_98] : memref<4x8x2xf32, #tpu.memory_space<vmem>>, vector<1x8x2xf32>
    %140 = vector.shape_cast %139 : vector<1x8x2xf32> to vector<8x2xf32>
    %141 = vector.shape_cast %137 : vector<8x2xf32> to vector<1x8x2xf32>
    tpu.vector_store %arg19[%138, %c0_97, %c0_98], %141 {strides = array<i32>} : memref<4x8x2xf32, #tpu.memory_space<vmem>>, vector<1x8x2xf32>,
    %c0_99 = arith.constant 0 : index
    %c0_100 = arith.constant 0 : index
    %142 = vector.load %arg20[%c0_99, %c0_100] : memref<8x2xf32, #tpu.memory_space<vmem>>, vector<8x2xf32>
    tpu.vector_store %arg20[%c0_99, %c0_100], %137 {strides = array<i32>} : memref<8x2xf32, #tpu.memory_space<vmem>>, vector<8x2xf32>,
    %143 = tpu.iota {dimensions = array<i32: 0>} : vector<8x1xi32>
    %144 = tpu.iota {dimensions = array<i32: 1>} : vector<1x8xi32>
    %c0_i32_101 = arith.constant 0 : i32
    %145 = vector.broadcast %c0_i32_101 : i32 to vector<8x1xi32>
    %146 = arith.cmpi sge, %143, %145 : vector<8x1xi32>
    %c4_i32 = arith.constant 4 : i32
    %147 = vector.broadcast %c4_i32 : i32 to vector<8x1xi32>
    %148 = arith.cmpi slt, %143, %147 : vector<8x1xi32>
    %149 = arith.andi %146, %148 : vector<8x1xi1>
    %c0_i32_102 = arith.constant 0 : i32
    %150 = vector.broadcast %c0_i32_102 : i32 to vector<1x8xi32>
    %151 = arith.cmpi sge, %144, %150 : vector<1x8xi32>
    %c4_i32_103 = arith.constant 4 : i32
    %152 = vector.broadcast %c4_i32_103 : i32 to vector<1x8xi32>
    %153 = arith.cmpi slt, %144, %152 : vector<1x8xi32>
    %154 = arith.andi %151, %153 : vector<1x8xi1>
    %155 = vector.broadcast %149 : vector<8x1xi1> to vector<8x8xi1>
    %156 = vector.broadcast %154 : vector<1x8xi1> to vector<8x8xi1>
    %157 = arith.andi %155, %156 : vector<8x8xi1>
    %c4_i32_104 = arith.constant 4 : i32
    %158 = vector.broadcast %c4_i32_104 : i32 to vector<8x1xi32>
    %159 = arith.cmpi sge, %143, %158 : vector<8x1xi32>
    %c8_i32 = arith.constant 8 : i32
    %160 = vector.broadcast %c8_i32 : i32 to vector<8x1xi32>
    %161 = arith.cmpi slt, %143, %160 : vector<8x1xi32>
    %162 = arith.andi %159, %161 : vector<8x1xi1>
    %c4_i32_105 = arith.constant 4 : i32
    %163 = vector.broadcast %c4_i32_105 : i32 to vector<1x8xi32>
    %164 = arith.cmpi sge, %144, %163 : vector<1x8xi32>
    %c8_i32_106 = arith.constant 8 : i32
    %165 = vector.broadcast %c8_i32_106 : i32 to vector<1x8xi32>
    %166 = arith.cmpi slt, %144, %165 : vector<1x8xi32>
    %167 = arith.andi %164, %166 : vector<1x8xi1>
    %168 = vector.broadcast %162 : vector<8x1xi1> to vector<8x8xi1>
    %169 = vector.broadcast %167 : vector<1x8xi1> to vector<8x8xi1>
    %170 = arith.andi %168, %169 : vector<8x8xi1>
    %171 = arith.ori %157, %170 : vector<8x8xi1>
    %c0_107 = arith.constant 0 : index
    %c0_108 = arith.constant 0 : index
    %c0_109 = arith.constant 0 : index
    %172 = vector.load %arg11[%c0_107, %c0_108, %c0_109] : memref<12x60x60xf32, #tpu.memory_space<vmem>>, vector<1x60x60xf32>
    %173 = vector.shape_cast %172 : vector<1x60x60xf32> to vector<60x60xf32>
    %cst_110 = arith.constant dense<0.000000e+00> : vector<8x60xf32>
    %174 = tpu.matmul %67, %173, %cst_110 {dimension_numbers = #tpu.dot_dimension_numbers<[1], [0], [0], [1], [0, 0, 1, 1], [], []>} : vector<8x60xf32>, vector<60x60xf32>, vector<8x60xf32> -> vector<8x60xf32>
    %c2_111 = arith.constant 2 : index
    %c0_112 = arith.constant 0 : index
    %c0_113 = arith.constant 0 : index
    %175 = vector.load %arg11[%c2_111, %c0_112, %c0_113] : memref<12x60x60xf32, #tpu.memory_space<vmem>>, vector<1x60x60xf32>
    %176 = vector.shape_cast %175 : vector<1x60x60xf32> to vector<60x60xf32>
    %cst_114 = arith.constant dense<0.000000e+00> : vector<8x60xf32>
    %177 = tpu.matmul %131, %176, %cst_114 {dimension_numbers = #tpu.dot_dimension_numbers<[1], [0], [0], [1], [0, 0, 1, 1], [], []>} : vector<8x60xf32>, vector<60x60xf32>, vector<8x60xf32> -> vector<8x60xf32>
    %178 = arith.addf %174, %177 : vector<8x60xf32>
    %c0_115 = arith.constant 0 : index
    %c0_116 = arith.constant 0 : index
    %c0_117 = arith.constant 0 : index
    %179 = vector.load %arg12[%c0_115, %c0_116, %c0_117] : memref<6x1x60xf32, #tpu.memory_space<vmem>>, vector<1x1x60xf32>
    %180 = vector.shape_cast %179 : vector<1x1x60xf32> to vector<1x60xf32>
    %181 = vector.broadcast %180 : vector<1x60xf32> to vector<8x60xf32>
    %182 = arith.addf %178, %181 : vector<8x60xf32>
    %c1_118 = arith.constant 1 : index
    %c0_119 = arith.constant 0 : index
    %c0_120 = arith.constant 0 : index
    %183 = vector.load %arg11[%c1_118, %c0_119, %c0_120] : memref<12x60x60xf32, #tpu.memory_space<vmem>>, vector<1x60x60xf32>
    %184 = vector.shape_cast %183 : vector<1x60x60xf32> to vector<60x60xf32>
    %cst_121 = arith.constant dense<0.000000e+00> : vector<8x60xf32>
    %185 = tpu.matmul %67, %184, %cst_121 {dimension_numbers = #tpu.dot_dimension_numbers<[1], [0], [0], [1], [0, 0, 1, 1], [], []>} : vector<8x60xf32>, vector<60x60xf32>, vector<8x60xf32> -> vector<8x60xf32>
    %c3_122 = arith.constant 3 : index
    %c0_123 = arith.constant 0 : index
    %c0_124 = arith.constant 0 : index
    %186 = vector.load %arg11[%c3_122, %c0_123, %c0_124] : memref<12x60x60xf32, #tpu.memory_space<vmem>>, vector<1x60x60xf32>
    %187 = vector.shape_cast %186 : vector<1x60x60xf32> to vector<60x60xf32>
    %cst_125 = arith.constant dense<0.000000e+00> : vector<8x60xf32>
    %188 = tpu.matmul %131, %187, %cst_125 {dimension_numbers = #tpu.dot_dimension_numbers<[1], [0], [0], [1], [0, 0, 1, 1], [], []>} : vector<8x60xf32>, vector<60x60xf32>, vector<8x60xf32> -> vector<8x60xf32>
    %189 = arith.addf %185, %188 : vector<8x60xf32>
    %c1_126 = arith.constant 1 : index
    %c0_127 = arith.constant 0 : index
    %c0_128 = arith.constant 0 : index
    %190 = vector.load %arg12[%c1_126, %c0_127, %c0_128] : memref<6x1x60xf32, #tpu.memory_space<vmem>>, vector<1x1x60xf32>
    %191 = vector.shape_cast %190 : vector<1x1x60xf32> to vector<1x60xf32>
    %192 = vector.broadcast %191 : vector<1x60xf32> to vector<8x60xf32>
    %193 = arith.addf %189, %192 : vector<8x60xf32>
    %c4_129 = arith.constant 4 : index
    %c0_130 = arith.constant 0 : index
    %c0_131 = arith.constant 0 : index
    %194 = vector.load %arg11[%c4_129, %c0_130, %c0_131] : memref<12x60x60xf32, #tpu.memory_space<vmem>>, vector<1x60x60xf32>
    %195 = vector.shape_cast %194 : vector<1x60x60xf32> to vector<60x60xf32>
    %cst_132 = arith.constant dense<0.000000e+00> : vector<8x60xf32>
    %196 = tpu.matmul %67, %195, %cst_132 {dimension_numbers = #tpu.dot_dimension_numbers<[1], [0], [0], [1], [0, 0, 1, 1], [], []>} : vector<8x60xf32>, vector<60x60xf32>, vector<8x60xf32> -> vector<8x60xf32>
    %c6 = arith.constant 6 : index
    %c0_133 = arith.constant 0 : index
    %c0_134 = arith.constant 0 : index
    %197 = vector.load %arg11[%c6, %c0_133, %c0_134] : memref<12x60x60xf32, #tpu.memory_space<vmem>>, vector<1x60x60xf32>
    %198 = vector.shape_cast %197 : vector<1x60x60xf32> to vector<60x60xf32>
    %cst_135 = arith.constant dense<0.000000e+00> : vector<8x60xf32>
    %199 = tpu.matmul %131, %198, %cst_135 {dimension_numbers = #tpu.dot_dimension_numbers<[1], [0], [0], [1], [0, 0, 1, 1], [], []>} : vector<8x60xf32>, vector<60x60xf32>, vector<8x60xf32> -> vector<8x60xf32>
    %200 = arith.addf %196, %199 : vector<8x60xf32>
    %c2_136 = arith.constant 2 : index
    %c0_137 = arith.constant 0 : index
    %c0_138 = arith.constant 0 : index
    %201 = vector.load %arg12[%c2_136, %c0_137, %c0_138] : memref<6x1x60xf32, #tpu.memory_space<vmem>>, vector<1x1x60xf32>
    %202 = vector.shape_cast %201 : vector<1x1x60xf32> to vector<1x60xf32>
    %203 = vector.broadcast %202 : vector<1x60xf32> to vector<8x60xf32>
    %204 = arith.addf %200, %203 : vector<8x60xf32>
    %c5_139 = arith.constant 5 : index
    %c0_140 = arith.constant 0 : index
    %c0_141 = arith.constant 0 : index
    %205 = vector.load %arg11[%c5_139, %c0_140, %c0_141] : memref<12x60x60xf32, #tpu.memory_space<vmem>>, vector<1x60x60xf32>
    %206 = vector.shape_cast %205 : vector<1x60x60xf32> to vector<60x60xf32>
    %cst_142 = arith.constant dense<0.000000e+00> : vector<8x60xf32>
    %207 = tpu.matmul %67, %206, %cst_142 {dimension_numbers = #tpu.dot_dimension_numbers<[1], [0], [0], [1], [0, 0, 1, 1], [], []>} : vector<8x60xf32>, vector<60x60xf32>, vector<8x60xf32> -> vector<8x60xf32>
    %c7 = arith.constant 7 : index
    %c0_143 = arith.constant 0 : index
    %c0_144 = arith.constant 0 : index
    %208 = vector.load %arg11[%c7, %c0_143, %c0_144] : memref<12x60x60xf32, #tpu.memory_space<vmem>>, vector<1x60x60xf32>
    %209 = vector.shape_cast %208 : vector<1x60x60xf32> to vector<60x60xf32>
    %cst_145 = arith.constant dense<0.000000e+00> : vector<8x60xf32>
    %210 = tpu.matmul %131, %209, %cst_145 {dimension_numbers = #tpu.dot_dimension_numbers<[1], [0], [0], [1], [0, 0, 1, 1], [], []>} : vector<8x60xf32>, vector<60x60xf32>, vector<8x60xf32> -> vector<8x60xf32>
    %211 = arith.addf %207, %210 : vector<8x60xf32>
    %c3_146 = arith.constant 3 : index
    %c0_147 = arith.constant 0 : index
    %c0_148 = arith.constant 0 : index
    %212 = vector.load %arg12[%c3_146, %c0_147, %c0_148] : memref<6x1x60xf32, #tpu.memory_space<vmem>>, vector<1x1x60xf32>
    %213 = vector.shape_cast %212 : vector<1x1x60xf32> to vector<1x60xf32>
    %214 = vector.broadcast %213 : vector<1x60xf32> to vector<8x60xf32>
    %215 = arith.addf %211, %214 : vector<8x60xf32>
    %c8 = arith.constant 8 : index
    %c0_149 = arith.constant 0 : index
    %c0_150 = arith.constant 0 : index
    %216 = vector.load %arg11[%c8, %c0_149, %c0_150] : memref<12x60x60xf32, #tpu.memory_space<vmem>>, vector<1x60x60xf32>
    %217 = vector.shape_cast %216 : vector<1x60x60xf32> to vector<60x60xf32>
    %cst_151 = arith.constant dense<0.000000e+00> : vector<8x60xf32>
    %218 = tpu.matmul %67, %217, %cst_151 {dimension_numbers = #tpu.dot_dimension_numbers<[1], [0], [0], [1], [0, 0, 1, 1], [], []>} : vector<8x60xf32>, vector<60x60xf32>, vector<8x60xf32> -> vector<8x60xf32>
    %c10 = arith.constant 10 : index
    %c0_152 = arith.constant 0 : index
    %c0_153 = arith.constant 0 : index
    %219 = vector.load %arg11[%c10, %c0_152, %c0_153] : memref<12x60x60xf32, #tpu.memory_space<vmem>>, vector<1x60x60xf32>
    %220 = vector.shape_cast %219 : vector<1x60x60xf32> to vector<60x60xf32>
    %cst_154 = arith.constant dense<0.000000e+00> : vector<8x60xf32>
    %221 = tpu.matmul %131, %220, %cst_154 {dimension_numbers = #tpu.dot_dimension_numbers<[1], [0], [0], [1], [0, 0, 1, 1], [], []>} : vector<8x60xf32>, vector<60x60xf32>, vector<8x60xf32> -> vector<8x60xf32>
    %222 = arith.addf %218, %221 : vector<8x60xf32>
    %c4_155 = arith.constant 4 : index
    %c0_156 = arith.constant 0 : index
    %c0_157 = arith.constant 0 : index
    %223 = vector.load %arg12[%c4_155, %c0_156, %c0_157] : memref<6x1x60xf32, #tpu.memory_space<vmem>>, vector<1x1x60xf32>
    %224 = vector.shape_cast %223 : vector<1x1x60xf32> to vector<1x60xf32>
    %225 = vector.broadcast %224 : vector<1x60xf32> to vector<8x60xf32>
    %226 = arith.addf %222, %225 : vector<8x60xf32>
    %c9 = arith.constant 9 : index
    %c0_158 = arith.constant 0 : index
    %c0_159 = arith.constant 0 : index
    %227 = vector.load %arg11[%c9, %c0_158, %c0_159] : memref<12x60x60xf32, #tpu.memory_space<vmem>>, vector<1x60x60xf32>
    %228 = vector.shape_cast %227 : vector<1x60x60xf32> to vector<60x60xf32>
    %cst_160 = arith.constant dense<0.000000e+00> : vector<8x60xf32>
    %229 = tpu.matmul %67, %228, %cst_160 {dimension_numbers = #tpu.dot_dimension_numbers<[1], [0], [0], [1], [0, 0, 1, 1], [], []>} : vector<8x60xf32>, vector<60x60xf32>, vector<8x60xf32> -> vector<8x60xf32>
    %c11 = arith.constant 11 : index
    %c0_161 = arith.constant 0 : index
    %c0_162 = arith.constant 0 : index
    %230 = vector.load %arg11[%c11, %c0_161, %c0_162] : memref<12x60x60xf32, #tpu.memory_space<vmem>>, vector<1x60x60xf32>
    %231 = vector.shape_cast %230 : vector<1x60x60xf32> to vector<60x60xf32>
    %cst_163 = arith.constant dense<0.000000e+00> : vector<8x60xf32>
    %232 = tpu.matmul %131, %231, %cst_163 {dimension_numbers = #tpu.dot_dimension_numbers<[1], [0], [0], [1], [0, 0, 1, 1], [], []>} : vector<8x60xf32>, vector<60x60xf32>, vector<8x60xf32> -> vector<8x60xf32>
    %233 = arith.addf %229, %232 : vector<8x60xf32>
    %c5_164 = arith.constant 5 : index
    %c0_165 = arith.constant 0 : index
    %c0_166 = arith.constant 0 : index
    %234 = vector.load %arg12[%c5_164, %c0_165, %c0_166] : memref<6x1x60xf32, #tpu.memory_space<vmem>>, vector<1x1x60xf32>
    %235 = vector.shape_cast %234 : vector<1x1x60xf32> to vector<1x60xf32>
    %236 = vector.broadcast %235 : vector<1x60xf32> to vector<8x60xf32>
    %237 = arith.addf %233, %236 : vector<8x60xf32>
    %238 = tpu.iota {dimensions = array<i32: 1>} : vector<1x60xi32>
    %cst_167 = arith.constant 0.000000e+00 : f32
    %239 = vector.broadcast %cst_167 : f32 to vector<8x60xf32>
    %c0_i32_168 = arith.constant 0 : i32
    %240 = vector.broadcast %c0_i32_168 : i32 to vector<1x60xi32>
    %241 = arith.cmpi sge, %238, %240 : vector<1x60xi32>
    %c30_i32 = arith.constant 30 : i32
    %242 = vector.broadcast %c30_i32 : i32 to vector<1x60xi32>
    %243 = arith.cmpi slt, %238, %242 : vector<1x60xi32>
    %244 = arith.andi %241, %243 : vector<1x60xi1>
    %245 = arith.extui %244 : vector<1x60xi1> to vector<1x60xi32>
    %246 = arith.sitofp %245 : vector<1x60xi32> to vector<1x60xf32>
    %247 = vector.broadcast %246 : vector<1x60xf32> to vector<8x60xf32>
    %248 = arith.mulf %182, %247 : vector<8x60xf32>
    %cst_169 = arith.constant dense<0.000000e+00> : vector<8x8xf32>
    %249 = tpu.matmul %248, %204, %cst_169 {dimension_numbers = #tpu.dot_dimension_numbers<[1], [1], [0], [0], [0, 0, 1, 0], [], []>} : vector<8x60xf32>, vector<8x60xf32>, vector<8x8xf32> -> vector<8x8xf32>
    %cst_170 = arith.constant 0.182574183 : f32
    %250 = vector.broadcast %cst_170 : f32 to vector<8x8xf32>
    %251 = arith.mulf %249, %250 : vector<8x8xf32>
    %cst_171 = arith.constant -1.000000e+09 : f32
    %252 = vector.broadcast %cst_171 : f32 to vector<8x8xf32>
    %253 = arith.select %171, %251, %252 : vector<8x8xi1>, vector<8x8xf32>
    %cst_172 = arith.constant dense<0xFF800000> : vector<8xf32>
    %254 = vector.multi_reduction <maximumf>, %253, %cst_172 [1] : vector<8x8xf32> to vector<8xf32>
    %255 = vector.shape_cast %254 : vector<8xf32> to vector<8x1xf32>
    %256 = vector.broadcast %255 : vector<8x1xf32> to vector<8x8xf32>
    %257 = arith.subf %253, %256 : vector<8x8xf32>
    %258 = math.exp %257 : vector<8x8xf32>
    %cst_173 = arith.constant dense<0.000000e+00> : vector<8xf32>
    %259 = vector.multi_reduction <add>, %258, %cst_173 [1] : vector<8x8xf32> to vector<8xf32>
    %260 = vector.shape_cast %259 : vector<8xf32> to vector<8x1xf32>
    %261 = tpu.reciprocal %260 {approx = true} : vector<8x1xf32> -> vector<8x1xf32>
    %262 = vector.broadcast %261 : vector<8x1xf32> to vector<8x8xf32>
    %263 = arith.mulf %258, %262 : vector<8x8xf32>
    %264 = vector.broadcast %246 : vector<1x60xf32> to vector<8x60xf32>
    %265 = arith.mulf %226, %264 : vector<8x60xf32>
    %cst_174 = arith.constant dense<0.000000e+00> : vector<8x60xf32>
    %266 = tpu.matmul %263, %265, %cst_174 {dimension_numbers = #tpu.dot_dimension_numbers<[1], [0], [0], [1], [0, 0, 1, 1], [], []>} : vector<8x8xf32>, vector<8x60xf32>, vector<8x60xf32> -> vector<8x60xf32>
    %267 = arith.addf %239, %266 : vector<8x60xf32>
    %c30_i32_175 = arith.constant 30 : i32
    %268 = vector.broadcast %c30_i32_175 : i32 to vector<1x60xi32>
    %269 = arith.cmpi sge, %238, %268 : vector<1x60xi32>
    %c60_i32 = arith.constant 60 : i32
    %270 = vector.broadcast %c60_i32 : i32 to vector<1x60xi32>
    %271 = arith.cmpi slt, %238, %270 : vector<1x60xi32>
    %272 = arith.andi %269, %271 : vector<1x60xi1>
    %273 = arith.extui %272 : vector<1x60xi1> to vector<1x60xi32>
    %274 = arith.sitofp %273 : vector<1x60xi32> to vector<1x60xf32>
    %275 = vector.broadcast %274 : vector<1x60xf32> to vector<8x60xf32>
    %276 = arith.mulf %182, %275 : vector<8x60xf32>
    %cst_176 = arith.constant dense<0.000000e+00> : vector<8x8xf32>
    %277 = tpu.matmul %276, %204, %cst_176 {dimension_numbers = #tpu.dot_dimension_numbers<[1], [1], [0], [0], [0, 0, 1, 0], [], []>} : vector<8x60xf32>, vector<8x60xf32>, vector<8x8xf32> -> vector<8x8xf32>
    %cst_177 = arith.constant 0.182574183 : f32
    %278 = vector.broadcast %cst_177 : f32 to vector<8x8xf32>
    %279 = arith.mulf %277, %278 : vector<8x8xf32>
    %cst_178 = arith.constant -1.000000e+09 : f32
    %280 = vector.broadcast %cst_178 : f32 to vector<8x8xf32>
    %281 = arith.select %171, %279, %280 : vector<8x8xi1>, vector<8x8xf32>
    %cst_179 = arith.constant dense<0xFF800000> : vector<8xf32>
    %282 = vector.multi_reduction <maximumf>, %281, %cst_179 [1] : vector<8x8xf32> to vector<8xf32>
    %283 = vector.shape_cast %282 : vector<8xf32> to vector<8x1xf32>
    %284 = vector.broadcast %283 : vector<8x1xf32> to vector<8x8xf32>
    %285 = arith.subf %281, %284 : vector<8x8xf32>
    %286 = math.exp %285 : vector<8x8xf32>
    %cst_180 = arith.constant dense<0.000000e+00> : vector<8xf32>
    %287 = vector.multi_reduction <add>, %286, %cst_180 [1] : vector<8x8xf32> to vector<8xf32>
    %288 = vector.shape_cast %287 : vector<8xf32> to vector<8x1xf32>
    %289 = tpu.reciprocal %288 {approx = true} : vector<8x1xf32> -> vector<8x1xf32>
    %290 = vector.broadcast %289 : vector<8x1xf32> to vector<8x8xf32>
    %291 = arith.mulf %286, %290 : vector<8x8xf32>
    %292 = vector.broadcast %274 : vector<1x60xf32> to vector<8x60xf32>
    %293 = arith.mulf %226, %292 : vector<8x60xf32>
    %cst_181 = arith.constant dense<0.000000e+00> : vector<8x60xf32>
    %294 = tpu.matmul %291, %293, %cst_181 {dimension_numbers = #tpu.dot_dimension_numbers<[1], [0], [0], [1], [0, 0, 1, 1], [], []>} : vector<8x8xf32>, vector<8x60xf32>, vector<8x60xf32> -> vector<8x60xf32>
    %295 = arith.addf %267, %294 : vector<8x60xf32>
    %cst_182 = arith.constant 0.000000e+00 : f32
    %296 = vector.broadcast %cst_182 : f32 to vector<8x60xf32>
    %c0_i32_183 = arith.constant 0 : i32
    %297 = vector.broadcast %c0_i32_183 : i32 to vector<1x60xi32>
    %298 = arith.cmpi sge, %238, %297 : vector<1x60xi32>
    %c30_i32_184 = arith.constant 30 : i32
    %299 = vector.broadcast %c30_i32_184 : i32 to vector<1x60xi32>
    %300 = arith.cmpi slt, %238, %299 : vector<1x60xi32>
    %301 = arith.andi %298, %300 : vector<1x60xi1>
    %302 = arith.extui %301 : vector<1x60xi1> to vector<1x60xi32>
    %303 = arith.sitofp %302 : vector<1x60xi32> to vector<1x60xf32>
    %304 = vector.broadcast %303 : vector<1x60xf32> to vector<8x60xf32>
    %305 = arith.mulf %193, %304 : vector<8x60xf32>
    %cst_185 = arith.constant dense<0.000000e+00> : vector<8x8xf32>
    %306 = tpu.matmul %305, %215, %cst_185 {dimension_numbers = #tpu.dot_dimension_numbers<[1], [1], [0], [0], [0, 0, 1, 0], [], []>} : vector<8x60xf32>, vector<8x60xf32>, vector<8x8xf32> -> vector<8x8xf32>
    %cst_186 = arith.constant 0.182574183 : f32
    %307 = vector.broadcast %cst_186 : f32 to vector<8x8xf32>
    %308 = arith.mulf %306, %307 : vector<8x8xf32>
    %cst_187 = arith.constant -1.000000e+09 : f32
    %309 = vector.broadcast %cst_187 : f32 to vector<8x8xf32>
    %310 = arith.select %171, %308, %309 : vector<8x8xi1>, vector<8x8xf32>
    %cst_188 = arith.constant dense<0xFF800000> : vector<8xf32>
    %311 = vector.multi_reduction <maximumf>, %310, %cst_188 [1] : vector<8x8xf32> to vector<8xf32>
    %312 = vector.shape_cast %311 : vector<8xf32> to vector<8x1xf32>
    %313 = vector.broadcast %312 : vector<8x1xf32> to vector<8x8xf32>
    %314 = arith.subf %310, %313 : vector<8x8xf32>
    %315 = math.exp %314 : vector<8x8xf32>
    %cst_189 = arith.constant dense<0.000000e+00> : vector<8xf32>
    %316 = vector.multi_reduction <add>, %315, %cst_189 [1] : vector<8x8xf32> to vector<8xf32>
    %317 = vector.shape_cast %316 : vector<8xf32> to vector<8x1xf32>
    %318 = tpu.reciprocal %317 {approx = true} : vector<8x1xf32> -> vector<8x1xf32>
    %319 = vector.broadcast %318 : vector<8x1xf32> to vector<8x8xf32>
    %320 = arith.mulf %315, %319 : vector<8x8xf32>
    %321 = vector.broadcast %303 : vector<1x60xf32> to vector<8x60xf32>
    %322 = arith.mulf %237, %321 : vector<8x60xf32>
    %cst_190 = arith.constant dense<0.000000e+00> : vector<8x60xf32>
    %323 = tpu.matmul %320, %322, %cst_190 {dimension_numbers = #tpu.dot_dimension_numbers<[1], [0], [0], [1], [0, 0, 1, 1], [], []>} : vector<8x8xf32>, vector<8x60xf32>, vector<8x60xf32> -> vector<8x60xf32>
    %324 = arith.addf %296, %323 : vector<8x60xf32>
    %c30_i32_191 = arith.constant 30 : i32
    %325 = vector.broadcast %c30_i32_191 : i32 to vector<1x60xi32>
    %326 = arith.cmpi sge, %238, %325 : vector<1x60xi32>
    %c60_i32_192 = arith.constant 60 : i32
    %327 = vector.broadcast %c60_i32_192 : i32 to vector<1x60xi32>
    %328 = arith.cmpi slt, %238, %327 : vector<1x60xi32>
    %329 = arith.andi %326, %328 : vector<1x60xi1>
    %330 = arith.extui %329 : vector<1x60xi1> to vector<1x60xi32>
    %331 = arith.sitofp %330 : vector<1x60xi32> to vector<1x60xf32>
    %332 = vector.broadcast %331 : vector<1x60xf32> to vector<8x60xf32>
    %333 = arith.mulf %193, %332 : vector<8x60xf32>
    %cst_193 = arith.constant dense<0.000000e+00> : vector<8x8xf32>
    %334 = tpu.matmul %333, %215, %cst_193 {dimension_numbers = #tpu.dot_dimension_numbers<[1], [1], [0], [0], [0, 0, 1, 0], [], []>} : vector<8x60xf32>, vector<8x60xf32>, vector<8x8xf32> -> vector<8x8xf32>
    %cst_194 = arith.constant 0.182574183 : f32
    %335 = vector.broadcast %cst_194 : f32 to vector<8x8xf32>
    %336 = arith.mulf %334, %335 : vector<8x8xf32>
    %cst_195 = arith.constant -1.000000e+09 : f32
    %337 = vector.broadcast %cst_195 : f32 to vector<8x8xf32>
    %338 = arith.select %171, %336, %337 : vector<8x8xi1>, vector<8x8xf32>
    %cst_196 = arith.constant dense<0xFF800000> : vector<8xf32>
    %339 = vector.multi_reduction <maximumf>, %338, %cst_196 [1] : vector<8x8xf32> to vector<8xf32>
    %340 = vector.shape_cast %339 : vector<8xf32> to vector<8x1xf32>
    %341 = vector.broadcast %340 : vector<8x1xf32> to vector<8x8xf32>
    %342 = arith.subf %338, %341 : vector<8x8xf32>
    %343 = math.exp %342 : vector<8x8xf32>
    %cst_197 = arith.constant dense<0.000000e+00> : vector<8xf32>
    %344 = vector.multi_reduction <add>, %343, %cst_197 [1] : vector<8x8xf32> to vector<8xf32>
    %345 = vector.shape_cast %344 : vector<8xf32> to vector<8x1xf32>
    %346 = tpu.reciprocal %345 {approx = true} : vector<8x1xf32> -> vector<8x1xf32>
    %347 = vector.broadcast %346 : vector<8x1xf32> to vector<8x8xf32>
    %348 = arith.mulf %343, %347 : vector<8x8xf32>
    %349 = vector.broadcast %331 : vector<1x60xf32> to vector<8x60xf32>
    %350 = arith.mulf %237, %349 : vector<8x60xf32>
    %cst_198 = arith.constant dense<0.000000e+00> : vector<8x60xf32>
    %351 = tpu.matmul %348, %350, %cst_198 {dimension_numbers = #tpu.dot_dimension_numbers<[1], [0], [0], [1], [0, 0, 1, 1], [], []>} : vector<8x8xf32>, vector<8x60xf32>, vector<8x60xf32> -> vector<8x60xf32>
    %352 = arith.addf %324, %351 : vector<8x60xf32>
    %c0_199 = arith.constant 0 : index
    %c0_200 = arith.constant 0 : index
    %c0_201 = arith.constant 0 : index
    %353 = vector.load %arg13[%c0_199, %c0_200, %c0_201] : memref<4x60x60xf32, #tpu.memory_space<vmem>>, vector<1x60x60xf32>
    %354 = vector.shape_cast %353 : vector<1x60x60xf32> to vector<60x60xf32>
    %cst_202 = arith.constant dense<0.000000e+00> : vector<8x60xf32>
    %355 = tpu.matmul %295, %354, %cst_202 {dimension_numbers = #tpu.dot_dimension_numbers<[1], [0], [0], [1], [0, 0, 1, 1], [], []>} : vector<8x60xf32>, vector<60x60xf32>, vector<8x60xf32> -> vector<8x60xf32>
    %c2_203 = arith.constant 2 : index
    %c0_204 = arith.constant 0 : index
    %c0_205 = arith.constant 0 : index
    %356 = vector.load %arg13[%c2_203, %c0_204, %c0_205] : memref<4x60x60xf32, #tpu.memory_space<vmem>>, vector<1x60x60xf32>
    %357 = vector.shape_cast %356 : vector<1x60x60xf32> to vector<60x60xf32>
    %cst_206 = arith.constant dense<0.000000e+00> : vector<8x60xf32>
    %358 = tpu.matmul %352, %357, %cst_206 {dimension_numbers = #tpu.dot_dimension_numbers<[1], [0], [0], [1], [0, 0, 1, 1], [], []>} : vector<8x60xf32>, vector<60x60xf32>, vector<8x60xf32> -> vector<8x60xf32>
    %359 = arith.addf %355, %358 : vector<8x60xf32>
    %c0_207 = arith.constant 0 : index
    %c0_208 = arith.constant 0 : index
    %c0_209 = arith.constant 0 : index
    %360 = vector.load %arg14[%c0_207, %c0_208, %c0_209] : memref<2x1x60xf32, #tpu.memory_space<vmem>>, vector<1x1x60xf32>
    %361 = vector.shape_cast %360 : vector<1x1x60xf32> to vector<1x60xf32>
    %362 = vector.broadcast %361 : vector<1x60xf32> to vector<8x60xf32>
    %363 = arith.addf %359, %362 : vector<8x60xf32>
    %364 = arith.addf %363, %67 : vector<8x60xf32>
    %c1_210 = arith.constant 1 : index
    %c0_211 = arith.constant 0 : index
    %c0_212 = arith.constant 0 : index
    %365 = vector.load %arg13[%c1_210, %c0_211, %c0_212] : memref<4x60x60xf32, #tpu.memory_space<vmem>>, vector<1x60x60xf32>
    %366 = vector.shape_cast %365 : vector<1x60x60xf32> to vector<60x60xf32>
    %cst_213 = arith.constant dense<0.000000e+00> : vector<8x60xf32>
    %367 = tpu.matmul %295, %366, %cst_213 {dimension_numbers = #tpu.dot_dimension_numbers<[1], [0], [0], [1], [0, 0, 1, 1], [], []>} : vector<8x60xf32>, vector<60x60xf32>, vector<8x60xf32> -> vector<8x60xf32>
    %c3_214 = arith.constant 3 : index
    %c0_215 = arith.constant 0 : index
    %c0_216 = arith.constant 0 : index
    %368 = vector.load %arg13[%c3_214, %c0_215, %c0_216] : memref<4x60x60xf32, #tpu.memory_space<vmem>>, vector<1x60x60xf32>
    %369 = vector.shape_cast %368 : vector<1x60x60xf32> to vector<60x60xf32>
    %cst_217 = arith.constant dense<0.000000e+00> : vector<8x60xf32>
    %370 = tpu.matmul %352, %369, %cst_217 {dimension_numbers = #tpu.dot_dimension_numbers<[1], [0], [0], [1], [0, 0, 1, 1], [], []>} : vector<8x60xf32>, vector<60x60xf32>, vector<8x60xf32> -> vector<8x60xf32>
    %371 = arith.addf %367, %370 : vector<8x60xf32>
    %c1_218 = arith.constant 1 : index
    %c0_219 = arith.constant 0 : index
    %c0_220 = arith.constant 0 : index
    %372 = vector.load %arg14[%c1_218, %c0_219, %c0_220] : memref<2x1x60xf32, #tpu.memory_space<vmem>>, vector<1x1x60xf32>
    %373 = vector.shape_cast %372 : vector<1x1x60xf32> to vector<1x60xf32>
    %374 = vector.broadcast %373 : vector<1x60xf32> to vector<8x60xf32>
    %375 = arith.addf %371, %374 : vector<8x60xf32>
    %376 = arith.addf %375, %131 : vector<8x60xf32>
    %cst_221 = arith.constant dense<0.000000e+00> : vector<8xf32>
    %377 = vector.multi_reduction <add>, %364, %cst_221 [1] : vector<8x60xf32> to vector<8xf32>
    %378 = vector.shape_cast %377 : vector<8xf32> to vector<8x1xf32>
    %cst_222 = arith.constant dense<0.000000e+00> : vector<8xf32>
    %379 = vector.multi_reduction <add>, %376, %cst_222 [1] : vector<8x60xf32> to vector<8xf32>
    %380 = vector.shape_cast %379 : vector<8xf32> to vector<8x1xf32>
    %381 = arith.addf %378, %380 : vector<8x1xf32>
    %cst_223 = arith.constant 0.00833333377 : f32
    %382 = vector.broadcast %cst_223 : f32 to vector<8x1xf32>
    %383 = arith.mulf %381, %382 : vector<8x1xf32>
    %384 = vector.broadcast %383 : vector<8x1xf32> to vector<8x60xf32>
    %385 = arith.subf %364, %384 : vector<8x60xf32>
    %386 = arith.mulf %385, %385 : vector<8x60xf32>
    %cst_224 = arith.constant dense<0.000000e+00> : vector<8xf32>
    %387 = vector.multi_reduction <add>, %386, %cst_224 [1] : vector<8x60xf32> to vector<8xf32>
    %388 = vector.shape_cast %387 : vector<8xf32> to vector<8x1xf32>
    %389 = vector.broadcast %383 : vector<8x1xf32> to vector<8x60xf32>
    %390 = arith.subf %376, %389 : vector<8x60xf32>
    %391 = arith.mulf %390, %390 : vector<8x60xf32>
    %cst_225 = arith.constant dense<0.000000e+00> : vector<8xf32>
    %392 = vector.multi_reduction <add>, %391, %cst_225 [1] : vector<8x60xf32> to vector<8xf32>
    %393 = vector.shape_cast %392 : vector<8xf32> to vector<8x1xf32>
    %394 = arith.addf %388, %393 : vector<8x1xf32>
    %cst_226 = arith.constant 0.00833333377 : f32
    %395 = vector.broadcast %cst_226 : f32 to vector<8x1xf32>
    %396 = arith.mulf %394, %395 : vector<8x1xf32>
    %cst_227 = arith.constant 9.99999974E-6 : f32
    %397 = vector.broadcast %cst_227 : f32 to vector<8x1xf32>
    %398 = arith.addf %396, %397 : vector<8x1xf32>
    %399 = math.rsqrt %398 : vector<8x1xf32>
    %400 = vector.broadcast %383 : vector<8x1xf32> to vector<8x60xf32>
    %401 = arith.subf %364, %400 : vector<8x60xf32>
    %402 = vector.broadcast %399 : vector<8x1xf32> to vector<8x60xf32>
    %403 = arith.mulf %401, %402 : vector<8x60xf32>
    %c0_228 = arith.constant 0 : index
    %c0_229 = arith.constant 0 : index
    %c0_230 = arith.constant 0 : index
    %404 = vector.load %arg15[%c0_228, %c0_229, %c0_230] : memref<2x1x60xf32, #tpu.memory_space<vmem>>, vector<1x1x60xf32>
    %405 = vector.shape_cast %404 : vector<1x1x60xf32> to vector<1x60xf32>
    %406 = vector.broadcast %405 : vector<1x60xf32> to vector<8x60xf32>
    %407 = arith.mulf %403, %406 : vector<8x60xf32>
    %c0_231 = arith.constant 0 : index
    %c0_232 = arith.constant 0 : index
    %c0_233 = arith.constant 0 : index
    %408 = vector.load %arg16[%c0_231, %c0_232, %c0_233] : memref<2x1x60xf32, #tpu.memory_space<vmem>>, vector<1x1x60xf32>
    %409 = vector.shape_cast %408 : vector<1x1x60xf32> to vector<1x60xf32>
    %410 = vector.broadcast %409 : vector<1x60xf32> to vector<8x60xf32>
    %411 = arith.addf %407, %410 : vector<8x60xf32>
    %412 = vector.broadcast %383 : vector<8x1xf32> to vector<8x60xf32>
    %413 = arith.subf %376, %412 : vector<8x60xf32>
    %414 = vector.broadcast %399 : vector<8x1xf32> to vector<8x60xf32>
    %415 = arith.mulf %413, %414 : vector<8x60xf32>
    %c1_234 = arith.constant 1 : index
    %c0_235 = arith.constant 0 : index
    %c0_236 = arith.constant 0 : index
    %416 = vector.load %arg15[%c1_234, %c0_235, %c0_236] : memref<2x1x60xf32, #tpu.memory_space<vmem>>, vector<1x1x60xf32>
    %417 = vector.shape_cast %416 : vector<1x1x60xf32> to vector<1x60xf32>
    %418 = vector.broadcast %417 : vector<1x60xf32> to vector<8x60xf32>
    %419 = arith.mulf %415, %418 : vector<8x60xf32>
    %c1_237 = arith.constant 1 : index
    %c0_238 = arith.constant 0 : index
    %c0_239 = arith.constant 0 : index
    %420 = vector.load %arg16[%c1_237, %c0_238, %c0_239] : memref<2x1x60xf32, #tpu.memory_space<vmem>>, vector<1x1x60xf32>
    %421 = vector.shape_cast %420 : vector<1x1x60xf32> to vector<1x60xf32>
    %422 = vector.broadcast %421 : vector<1x60xf32> to vector<8x60xf32>
    %423 = arith.addf %419, %422 : vector<8x60xf32>
    %424 = arith.addf %67, %411 : vector<8x60xf32>
    %cst_240 = arith.constant dense<0.000000e+00> : vector<8xf32>
    %425 = vector.multi_reduction <add>, %424, %cst_240 [1] : vector<8x60xf32> to vector<8xf32>
    %426 = vector.shape_cast %425 : vector<8xf32> to vector<8x1xf32>
    %cst_241 = arith.constant 6.000000e+01 : f32
    %427 = vector.broadcast %cst_241 : f32 to vector<8x1xf32>
    %428 = arith.divf %426, %427 : vector<8x1xf32>
    %429 = vector.broadcast %428 : vector<8x1xf32> to vector<8x60xf32>
    %430 = arith.subf %424, %429 : vector<8x60xf32>
    %431 = arith.mulf %430, %430 : vector<8x60xf32>
    %cst_242 = arith.constant dense<0.000000e+00> : vector<8xf32>
    %432 = vector.multi_reduction <add>, %431, %cst_242 [1] : vector<8x60xf32> to vector<8xf32>
    %433 = vector.shape_cast %432 : vector<8xf32> to vector<8x1xf32>
    %cst_243 = arith.constant 6.000000e+01 : f32
    %434 = vector.broadcast %cst_243 : f32 to vector<8x1xf32>
    %435 = arith.divf %433, %434 : vector<8x1xf32>
    %436 = vector.broadcast %428 : vector<8x1xf32> to vector<8x60xf32>
    %437 = arith.subf %424, %436 : vector<8x60xf32>
    %cst_244 = arith.constant 9.99999974E-6 : f32
    %438 = vector.broadcast %cst_244 : f32 to vector<8x1xf32>
    %439 = arith.addf %435, %438 : vector<8x1xf32>
    %440 = math.rsqrt %439 : vector<8x1xf32>
    %441 = vector.broadcast %440 : vector<8x1xf32> to vector<8x60xf32>
    %442 = arith.mulf %437, %441 : vector<8x60xf32>
    %c0_245 = arith.constant 0 : index
    %c0_246 = arith.constant 0 : index
    %443 = vector.load %arg17[%c0_245, %c0_246] : memref<1x60xf32, #tpu.memory_space<vmem>>, vector<1x60xf32>
    %444 = vector.broadcast %443 : vector<1x60xf32> to vector<8x60xf32>
    %445 = arith.mulf %442, %444 : vector<8x60xf32>
    %c0_247 = arith.constant 0 : index
    %c0_248 = arith.constant 0 : index
    %446 = vector.load %arg18[%c0_247, %c0_248] : memref<1x60xf32, #tpu.memory_space<vmem>>, vector<1x60xf32>
    %447 = vector.broadcast %446 : vector<1x60xf32> to vector<8x60xf32>
    %448 = arith.addf %445, %447 : vector<8x60xf32>
    %449 = arith.addf %131, %423 : vector<8x60xf32>
    %cst_249 = arith.constant dense<0.000000e+00> : vector<8xf32>
    %450 = vector.multi_reduction <add>, %449, %cst_249 [1] : vector<8x60xf32> to vector<8xf32>
    %451 = vector.shape_cast %450 : vector<8xf32> to vector<8x1xf32>
    %cst_250 = arith.constant 6.000000e+01 : f32
    %452 = vector.broadcast %cst_250 : f32 to vector<8x1xf32>
    %453 = arith.divf %451, %452 : vector<8x1xf32>
    %454 = vector.broadcast %453 : vector<8x1xf32> to vector<8x60xf32>
    %455 = arith.subf %449, %454 : vector<8x60xf32>
    %456 = arith.mulf %455, %455 : vector<8x60xf32>
    %cst_251 = arith.constant dense<0.000000e+00> : vector<8xf32>
    %457 = vector.multi_reduction <add>, %456, %cst_251 [1] : vector<8x60xf32> to vector<8xf32>
    %458 = vector.shape_cast %457 : vector<8xf32> to vector<8x1xf32>
    %cst_252 = arith.constant 6.000000e+01 : f32
    %459 = vector.broadcast %cst_252 : f32 to vector<8x1xf32>
    %460 = arith.divf %458, %459 : vector<8x1xf32>
    %461 = vector.broadcast %453 : vector<8x1xf32> to vector<8x60xf32>
    %462 = arith.subf %449, %461 : vector<8x60xf32>
    %cst_253 = arith.constant 9.99999974E-6 : f32
    %463 = vector.broadcast %cst_253 : f32 to vector<8x1xf32>
    %464 = arith.addf %460, %463 : vector<8x1xf32>
    %465 = math.rsqrt %464 : vector<8x1xf32>
    %466 = vector.broadcast %465 : vector<8x1xf32> to vector<8x60xf32>
    %467 = arith.mulf %462, %466 : vector<8x60xf32>
    %c0_254 = arith.constant 0 : index
    %c0_255 = arith.constant 0 : index
    %468 = vector.load %arg17[%c0_254, %c0_255] : memref<1x60xf32, #tpu.memory_space<vmem>>, vector<1x60xf32>
    %469 = vector.broadcast %468 : vector<1x60xf32> to vector<8x60xf32>
    %470 = arith.mulf %467, %469 : vector<8x60xf32>
    %c0_256 = arith.constant 0 : index
    %c0_257 = arith.constant 0 : index
    %471 = vector.load %arg18[%c0_256, %c0_257] : memref<1x60xf32, #tpu.memory_space<vmem>>, vector<1x60xf32>
    %472 = vector.broadcast %471 : vector<1x60xf32> to vector<8x60xf32>
    %473 = arith.addf %470, %472 : vector<8x60xf32>
    %c0_258 = arith.constant 0 : index
    %c0_259 = arith.constant 0 : index
    %c0_260 = arith.constant 0 : index
    %474 = vector.load %arg21[%c0_258, %c0_259, %c0_260] : memref<2x8x60xf32, #tpu.memory_space<vmem>>, vector<1x8x60xf32>
    %475 = vector.shape_cast %474 : vector<1x8x60xf32> to vector<8x60xf32>
    %476 = vector.shape_cast %448 : vector<8x60xf32> to vector<1x8x60xf32>
    tpu.vector_store %arg21[%c0_258, %c0_259, %c0_260], %476 {strides = array<i32>} : memref<2x8x60xf32, #tpu.memory_space<vmem>>, vector<1x8x60xf32>,
    %c1_261 = arith.constant 1 : index
    %c0_262 = arith.constant 0 : index
    %c0_263 = arith.constant 0 : index
    %477 = vector.load %arg21[%c1_261, %c0_262, %c0_263] : memref<2x8x60xf32, #tpu.memory_space<vmem>>, vector<1x8x60xf32>
    %478 = vector.shape_cast %477 : vector<1x8x60xf32> to vector<8x60xf32>
    %479 = vector.shape_cast %473 : vector<8x60xf32> to vector<1x8x60xf32>
    tpu.vector_store %arg21[%c1_261, %c0_262, %c0_263], %479 {strides = array<i32>} : memref<2x8x60xf32, #tpu.memory_space<vmem>>, vector<1x8x60xf32>,
    return
  }
  func.func @transform_0(%arg0: i32) -> (i32, i32) {
    %c0_i32 = arith.constant 0 : i32
    %c0_i32_0 = arith.constant 0 : i32
    %c0_i32_1 = arith.constant 0 : i32
    return %c0_i32, %c0_i32_0 : i32, i32
  }
  func.func @transform_1(%arg0: i32) -> (i32, i32, i32) {
    %c0_i32 = arith.constant 0 : i32
    %c0_i32_0 = arith.constant 0 : i32
    %c0_i32_1 = arith.constant 0 : i32
    %c0_i32_2 = arith.constant 0 : i32
    return %c0_i32, %c0_i32_0, %c0_i32_1 : i32, i32, i32
  }
  func.func @transform_2(%arg0: i32) -> (i32, i32, i32) {
    %c0_i32 = arith.constant 0 : i32
    %c0_i32_0 = arith.constant 0 : i32
    %c0_i32_1 = arith.constant 0 : i32
    %c0_i32_2 = arith.constant 0 : i32
    return %c0_i32, %c0_i32_0, %c0_i32_1 : i32, i32, i32
  }
  func.func @transform_3(%arg0: i32) -> (i32, i32, i32) {
    %c0_i32 = arith.constant 0 : i32
    %c0_i32_0 = arith.constant 0 : i32
    %c0_i32_1 = arith.constant 0 : i32
    %c0_i32_2 = arith.constant 0 : i32
    return %c0_i32, %c0_i32_0, %c0_i32_1 : i32, i32, i32
  }
  func.func @transform_4(%arg0: i32) -> (i32, i32, i32) {
    %c0_i32 = arith.constant 0 : i32
    %c0_i32_0 = arith.constant 0 : i32
    %c0_i32_1 = arith.constant 0 : i32
    %c0_i32_2 = arith.constant 0 : i32
    return %c0_i32, %c0_i32_0, %c0_i32_1 : i32, i32, i32
  }
  func.func @transform_5(%arg0: i32) -> (i32, i32, i32) {
    %c0_i32 = arith.constant 0 : i32
    %c0_i32_0 = arith.constant 0 : i32
    %c0_i32_1 = arith.constant 0 : i32
    %c0_i32_2 = arith.constant 0 : i32
    return %c0_i32, %c0_i32_0, %c0_i32_1 : i32, i32, i32
  }
  func.func @transform_6(%arg0: i32) -> (i32, i32, i32) {
    %c0_i32 = arith.constant 0 : i32
    %c0_i32_0 = arith.constant 0 : i32
    %c0_i32_1 = arith.constant 0 : i32
    %c0_i32_2 = arith.constant 0 : i32
    return %c0_i32, %c0_i32_0, %c0_i32_1 : i32, i32, i32
  }
  func.func @transform_7(%arg0: i32) -> (i32, i32, i32) {
    %c0_i32 = arith.constant 0 : i32
    %c0_i32_0 = arith.constant 0 : i32
    %c0_i32_1 = arith.constant 0 : i32
    %c0_i32_2 = arith.constant 0 : i32
    return %c0_i32, %c0_i32_0, %c0_i32_1 : i32, i32, i32
  }
  func.func @transform_8(%arg0: i32) -> (i32, i32) {
    %c0_i32 = arith.constant 0 : i32
    %c0_i32_0 = arith.constant 0 : i32
    %c0_i32_1 = arith.constant 0 : i32
    return %c0_i32, %c0_i32_0 : i32, i32
  }
  func.func @transform_9(%arg0: i32) -> (i32, i32) {
    %c0_i32 = arith.constant 0 : i32
    %c0_i32_0 = arith.constant 0 : i32
    %c0_i32_1 = arith.constant 0 : i32
    return %c0_i32, %c0_i32_0 : i32, i32
  }
  func.func @transform_10(%arg0: i32) -> (i32, i32, i32) {
    %c0_i32 = arith.constant 0 : i32
    %c0_i32_0 = arith.constant 0 : i32
    %c0_i32_1 = arith.constant 0 : i32
    %c0_i32_2 = arith.constant 0 : i32
    return %c0_i32, %c0_i32_0, %c0_i32_1 : i32, i32, i32
  }
  func.func @transform_11(%arg0: i32) -> (i32, i32, i32) {
    %c0_i32 = arith.constant 0 : i32
    %c0_i32_0 = arith.constant 0 : i32
    %c0_i32_1 = arith.constant 0 : i32
    %c0_i32_2 = arith.constant 0 : i32
    return %c0_i32, %c0_i32_0, %c0_i32_1 : i32, i32, i32
  }
  func.func @transform_12(%arg0: i32) -> (i32, i32, i32) {
    %c0_i32 = arith.constant 0 : i32
    %c0_i32_0 = arith.constant 0 : i32
    %c0_i32_1 = arith.constant 0 : i32
    %c0_i32_2 = arith.constant 0 : i32
    return %c0_i32, %c0_i32_0, %c0_i32_1 : i32, i32, i32
  }
  func.func @transform_13(%arg0: i32) -> (i32, i32, i32) {
    %c0_i32 = arith.constant 0 : i32
    %c0_i32_0 = arith.constant 0 : i32
    %c0_i32_1 = arith.constant 0 : i32
    %c0_i32_2 = arith.constant 0 : i32
    return %c0_i32, %c0_i32_0, %c0_i32_1 : i32, i32, i32
  }
  func.func @transform_14(%arg0: i32) -> (i32, i32, i32) {
    %c0_i32 = arith.constant 0 : i32
    %c0_i32_0 = arith.constant 0 : i32
    %c0_i32_1 = arith.constant 0 : i32
    %c0_i32_2 = arith.constant 0 : i32
    return %c0_i32, %c0_i32_0, %c0_i32_1 : i32, i32, i32
  }
  func.func @transform_15(%arg0: i32) -> (i32, i32, i32) {
    %c0_i32 = arith.constant 0 : i32
    %c0_i32_0 = arith.constant 0 : i32
    %c0_i32_1 = arith.constant 0 : i32
    %c0_i32_2 = arith.constant 0 : i32
    return %c0_i32, %c0_i32_0, %c0_i32_1 : i32, i32, i32
  }
  func.func @transform_16(%arg0: i32) -> (i32, i32) {
    %c0_i32 = arith.constant 0 : i32
    %c0_i32_0 = arith.constant 0 : i32
    %c0_i32_1 = arith.constant 0 : i32
    return %c0_i32, %c0_i32_0 : i32, i32
  }
  func.func @transform_17(%arg0: i32) -> (i32, i32) {
    %c0_i32 = arith.constant 0 : i32
    %c0_i32_0 = arith.constant 0 : i32
    %c0_i32_1 = arith.constant 0 : i32
    return %c0_i32, %c0_i32_0 : i32, i32
  }
  func.func @transform_18(%arg0: i32) -> (i32, i32, i32) {
    %c0_i32 = arith.constant 0 : i32
    %c0_i32_0 = arith.constant 0 : i32
    %c0_i32_1 = arith.constant 0 : i32
    %c0_i32_2 = arith.constant 0 : i32
    return %c0_i32, %c0_i32_0, %c0_i32_1 : i32, i32, i32
  }
}

</mosaic_0001>

<bundles_post_ra>
// kernel: seq2seq_forward.5
= control target key start
LH: loop header
LB: loop body
LE: loop exit
PB: predicated region body
PF: predicated region fallthrough
CT: control target
= control target key end

     0   :  { %vm62_vm0 = vcmask 1043456   ;;  %vm37_vm1 = vcmask 31744   ;;  %vm173_vm2 = vcmask 261120   ;;  %s554_s1 = inlined_call_operand.vmem [shape: f32[4,32], index: 1, kind: input, shape index: {}]   ;;  %s555_s0 = inlined_call_operand.vmem [shape: f32[64,4], index: 0, kind: input, shape index: {}]   ;;  %s556_s2 = inlined_call_operand.vmem [shape: f32[64,32], index: 2, kind: input, shape index: {}]   ;;  %s557_s3 = inlined_call_operand.vmem [shape: f32[1,32], index: 3, kind: input, shape index: {}]   ;;  %s558_s4 = inlined_call_operand.vmem [shape: f32[1,32], index: 4, kind: input, shape index: {}]   ;;  %s559_s5 = inlined_call_operand.vmem [shape: f32[64,32], index: 5, kind: output, shape index: {}]  }
   0x1   :  { %v28_v0 = vld [vmem:[%s554_s1] sm:$0xf]  ;;  %v21_v3 = vld [vmem:[%s555_s0 + $0x8] sm:$0xff]  ;;  %v22_v5 = vld [vmem:[%s555_s0 + $0x10] sm:$0xff] }
   0x2   :  { %v20_v1 = vld [vmem:[%s555_s0] sm:$0xff]  ;;  %339 = vmatprep.subr.msk.mxu0 %vm62_vm0, %v28_v0  ;;  %353 = vmatprep.subr.msk.mxu1 %vm62_vm0, %v28_v0  ;;  %v25_v4 = vld [vmem:[%s555_s0 + $0x28] sm:$0xff]  ;;  %v26_v6 = vld [vmem:[%s555_s0 + $0x30] sm:$0xff] }
   0x3   :  { %v24_v2 = vld [vmem:[%s555_s0 + $0x20] sm:$0xff]  ;;  %340 = vmatpush3.msk.msra.mxu0 %vm62_vm0, %v28_v0  ;;  %354 = vmatpush3.msk.msra.mxu1 %vm62_vm0, %v28_v0  ;;  %v23_v7 = vld [vmem:[%s555_s0 + $0x18] sm:$0xff]  ;;  %v30_v9 = vld [vmem:[%s556_s2 + $0x8] sm:$0xff] }
   0x4   :  { %341 = vmatprep.mubr.msk.f32.mxu0 %vm37_vm1, %v20_v1  ;;  %347 = vmatprep.mubr.msk.f32.mxu1 %vm37_vm1, %v24_v2  ;;  %v27_v8 = vld [vmem:[%s555_s0 + $0x38] sm:$0xff]  ;;  %v34_v10 = vld [vmem:[%s556_s2 + $0x28] sm:$0xff]  ;;  %v29_v13 = vld [vmem:[%s556_s2] sm:$0xff] }
   0x5   :  { %342 = vmatmul.mubr.msk.f32.vlgmr.msra.gmra.mrb[0].mxu0 %vm37_vm1, %v21_v3  ;;  %348 = vmatmul.mubr.msk.f32.vlgmr.msra.gmra.mrb[0].mxu1 %vm37_vm1, %v25_v4  ;;  %v32_v18 = vld [vmem:[%s556_s2 + $0x18] sm:$0xff]  ;;  %v31_v22 = vld [vmem:[%s556_s2 + $0x10] sm:$0xff]  ;;  %v33_v23 = vld [vmem:[%s556_s2 + $0x20] sm:$0xff] }
   0x6   :  { %344 = vmatprep.mubr.msk.f32.mxu0 %vm37_vm1, %v22_v5  ;;  %350 = vmatprep.mubr.msk.f32.mxu1 %vm37_vm1, %v26_v6  ;;  %v36_v30 = vld [vmem:[%s556_s2 + $0x38] sm:$0xff]  ;;  %v35_v31 = vld [vmem:[%s556_s2 + $0x30] sm:$0xff] }
   0x9   :  { %345 = vmatmul.mubr.msk.f32.gmra.mrb[2].mxu0 %vm37_vm1, %v23_v7  ;;  %351 = vmatmul.mubr.msk.f32.gmra.mrb[2].mxu1 %vm37_vm1, %v27_v8 }
  0xd8   :  { %v343_v11 = vpop.f32.mrb[0].mxu0  ;;  %v349_v12 = vpop.f32.mrb[0].mxu1 }
  0xd9   :  { %v138_v14 = vadd.f32 %v343_v11, %v30_v9  ;;  %v158_v15 = vadd.f32 %v349_v12, %v34_v10  ;;  %v132_v16 = vpop.f32.mrb[1].mxu0  ;;  %v152_v17 = vpop.f32.mrb[1].mxu1 }
  0xda   :  { %v133_v19 = vadd.f32 %v132_v16, %v29_v13  ;;  %v153_v32 = vadd.f32 %v152_v17, %v33_v23 }
  0xdb   :  { %v189_v20 = vsel %vm173_vm2, %v158_v15, 0.0  ;;  %v177_v21 = vsel %vm173_vm2, %v138_v14, 0.0 }
  0xdc   :  { %190 = vadd.xlane.f32.xlu1 %v189_v20  ;;  %178 = vadd.xlane.f32.xlu0 %v177_v21  ;;  %v346_v24 = vpop.f32.mrb[2].mxu0  ;;  %v352_v25 = vpop.f32.mrb[2].mxu1  ;;  %v174_v34 = vsel %vm173_vm2, %v133_v19, 0.0  ;;  %v186_v38 = vsel %vm173_vm2, %v153_v32, 0.0 }
  0xdd   :  { %v148_v26 = vadd.f32 %v346_v24, %v32_v18  ;;  %v142_v27 = vpop.f32.mrb[3].mxu0  ;;  %v162_v28 = vpop.f32.mrb[3].mxu1  ;;  %v168_v35 = vadd.f32 %v352_v25, %v36_v30 }
  0xde   :  { %v143_v29 = vadd.f32 %v142_v27, %v31_v22  ;;  %v163_v36 = vadd.f32 %v162_v28, %v35_v31 }
  0xdf   :  { %v183_v33 = vsel %vm173_vm2, %v148_v26, 0.0  ;;  %v195_v39 = vsel %vm173_vm2, %v168_v35, 0.0 }
  0xe0   :  { %184 = vadd.xlane.f32.xlu1 %v183_v33  ;;  %175 = vadd.xlane.f32.xlu0 %v174_v34  ;;  %v180_v37 = vsel %vm173_vm2, %v143_v29, 0.0  ;;  %v192_v40 = vsel %vm173_vm2, %v163_v36, 0.0 }
  0xe4   :  { %181 = vadd.xlane.f32.xlu1 %v180_v37  ;;  %187 = vadd.xlane.f32.xlu0 %v186_v38  ;;  %v328_v37 = vld [vmem:[%s557_s3] ss:$0 sm:$0xff] }
  0xe8   :  { %196 = vadd.xlane.f32.xlu1 %v195_v39  ;;  %193 = vadd.xlane.f32.xlu0 %v192_v40 }
 0x169   :  { %v191_v41 = vpop.xlane.xlu1 %190  ;;  %v179_v42 = vpop.xlane.xlu0 %178 }
 0x16a   :  { %v204_v43 = vmul.f32 0.03125, %v191_v41  ;;  %v200_v44 = vmul.f32 0.03125, %v179_v42  ;;  %v329_v42 = vld [vmem:[%s558_s4] ss:$0 sm:$0xff] }
 0x16c   :  { %v468_v45 = vsub.f32 %v158_v15, %v204_v43  ;;  %v470_v46 = vsub.f32 %v138_v14, %v200_v44 }
 0x16d   :  { %v185_v47 = vpop.xlane.xlu1 %184  ;;  %v176_v48 = vpop.xlane.xlu0 %175 }
 0x16e   :  { %v202_v49 = vmul.f32 0.03125, %v185_v47  ;;  %v199_v50 = vmul.f32 0.03125, %v176_v48  ;;  %v216_v51 = vmul.f32 %v470_v46, %v470_v46  ;;  %v220_v55 = vmul.f32 %v468_v45, %v468_v45 }
 0x170   :  { %v474_v52 = vsub.f32 %v148_v26, %v202_v49  ;;  %v476_v53 = vsub.f32 %v133_v19, %v199_v50  ;;  %v226_v54 = vsel %vm173_vm2, %v216_v51, 0.0  ;;  %v238_v0 = vsel %vm173_vm2, %v220_v55, 0.0 }
 0x171   :  { %227 = vadd.xlane.f32.xlu1 %v226_v54  ;;  %v182_v56 = vpop.xlane.xlu1 %181  ;;  %v188_v57 = vpop.xlane.xlu0 %187 }
 0x172   :  { %v201_v58 = vmul.f32 0.03125, %v182_v56  ;;  %v203_v59 = vmul.f32 0.03125, %v188_v57  ;;  %v215_v60 = vmul.f32 %v476_v53, %v476_v53  ;;  %v218_v61 = vmul.f32 %v474_v52, %v474_v52 }
 0x174   :  { %v485_v62 = vsub.f32 %v143_v29, %v201_v58  ;;  %v487_v63 = vsub.f32 %v153_v32, %v203_v59  ;;  %v223_v1 = vsel %vm173_vm2, %v215_v60, 0.0  ;;  %v232_v7 = vsel %vm173_vm2, %v218_v61, 0.0 }
 0x175   :  { %239 = vadd.xlane.f32.xlu1 %v238_v0  ;;  %v197_v2 = vpop.xlane.xlu1 %196  ;;  %224 = vadd.xlane.f32.xlu0 %v223_v1  ;;  %v194_v3 = vpop.xlane.xlu0 %193 }
 0x176   :  { %v206_v4 = vmul.f32 0.03125, %v197_v2  ;;  %v205_v5 = vmul.f32 0.03125, %v194_v3  ;;  %v219_v6 = vmul.f32 %v487_v63, %v487_v63  ;;  %v217_v11 = vmul.f32 %v485_v62, %v485_v62 }
 0x178   :  { %v494_v8 = vsub.f32 %v168_v35, %v206_v4  ;;  %v496_v9 = vsub.f32 %v163_v36, %v205_v5  ;;  %v235_v10 = vsel %vm173_vm2, %v219_v6, 0.0  ;;  %v229_v14 = vsel %vm173_vm2, %v217_v11, 0.0 }
 0x179   :  { %233 = vadd.xlane.f32.xlu1 %v232_v7  ;;  %236 = vadd.xlane.f32.xlu0 %v235_v10 }
 0x17a   :  { %v222_v12 = vmul.f32 %v494_v8, %v494_v8  ;;  %v221_v15 = vmul.f32 %v496_v9, %v496_v9 }
 0x17c   :  { %v244_v13 = vsel %vm173_vm2, %v222_v12, 0.0  ;;  %v241_v16 = vsel %vm173_vm2, %v221_v15, 0.0 }
 0x17d   :  { %245 = vadd.xlane.f32.xlu1 %v244_v13  ;;  %230 = vadd.xlane.f32.xlu0 %v229_v14 }
 0x181   :  { %242 = vadd.xlane.f32.xlu0 %v241_v16 }
 0x1fe   :  { %v228_v17 = vpop.xlane.xlu1 %227 }
 0x1ff   :  { %v248_v18 = vmul.f32 0.03125, %v228_v17 }
 0x201   :  { %v256_v19 = vadd.f32 1e-06, %v248_v18 }
 0x202   :  { %v240_v20 = vpop.xlane.xlu1 %239  ;;  %v225_v21 = vpop.xlane.xlu0 %224 }
 0x203   :  { %355 = vrsqrt.f32 %v256_v19  ;;  %v252_v22 = vmul.f32 0.03125, %v240_v20  ;;  %v247_v23 = vmul.f32 0.03125, %v225_v21 }
 0x205   :  { %v260_v24 = vadd.f32 1e-06, %v252_v22  ;;  %v255_v25 = vadd.f32 1e-06, %v247_v23 }
 0x206   :  { %v234_v26 = vpop.xlane.xlu1 %233  ;;  %v237_v27 = vpop.xlane.xlu0 %236 }
 0x207   :  { %357 = vrsqrt.f32 %v260_v24  ;;  %v250_v28 = vmul.f32 0.03125, %v234_v26  ;;  %v251_v29 = vmul.f32 0.03125, %v237_v27 }
 0x208   :  { %359 = vrsqrt.f32 %v255_v25 }
 0x209   :  { %v258_v30 = vadd.f32 1e-06, %v250_v28  ;;  %v259_v31 = vadd.f32 1e-06, %v251_v29 }
 0x20a   :  { %v246_v32 = vpop.xlane.xlu1 %245  ;;  %v231_v33 = vpop.xlane.xlu0 %230 }
 0x20b   :  { %361 = vrsqrt.f32 %v258_v30  ;;  %v254_v34 = vmul.f32 0.03125, %v246_v32  ;;  %v249_v35 = vmul.f32 0.03125, %v231_v33 }
 0x20c   :  { %363 = vrsqrt.f32 %v259_v31 }
 0x20d   :  { %v356_v36 = vpop.eup %355  ;;  %v262_v38 = vadd.f32 1e-06, %v254_v34  ;;  %v257_v39 = vadd.f32 1e-06, %v249_v35 }
 0x20e   :  { %v272_v40 = vmul.f32 %v356_v36, %v470_v46  ;;  %v243_v41 = vpop.xlane.xlu0 %242 }
 0x20f   :  { %365 = vrsqrt.f32 %v262_v38  ;;  %v253_v43 = vmul.f32 0.03125, %v243_v41 }
 0x210   :  { %v286_v44 = vmul.f32 %v328_v37, %v272_v40  ;;  %367 = vrsqrt.f32 %v257_v39 }
 0x211   :  { %v358_v47 = vpop.eup %357  ;;  %v261_v48 = vadd.f32 1e-06, %v253_v43 }
 0x212   :  { %v360_v49 = vpop.eup %359  ;;  %v300_v50 = vadd.f32 %v329_v42, %v286_v44  ;;  %v276_v51 = vmul.f32 %v358_v47, %v468_v45 }
 0x213   :  { %v271_v54 = vmul.f32 %v360_v49, %v476_v53  ;;  %369 = vrsqrt.f32 %v261_v48 }
 0x214   :  { %308 = vst.msk [vmem:[%s559_s5 + $0x8] sm:$0xff] %vm173_vm2, %v300_v50  ;;  %v290_v46 = vmul.f32 %v328_v37, %v276_v51 }
 0x215   :  { %v362_v55 = vpop.eup %361  ;;  %v285_v56 = vmul.f32 %v328_v37, %v271_v54 }
 0x216   :  { %v364_v57 = vpop.eup %363  ;;  %v304_v58 = vadd.f32 %v329_v42, %v290_v46  ;;  %v274_v59 = vmul.f32 %v362_v55, %v474_v52 }
 0x217   :  { %v299_v60 = vadd.f32 %v329_v42, %v285_v56  ;;  %v275_v61 = vmul.f32 %v364_v57, %v487_v63 }
 0x218   :  { %312 = vst.msk [vmem:[%s559_s5 + $0x28] sm:$0xff] %vm173_vm2, %v304_v58  ;;  %v288_v45 = vmul.f32 %v328_v37, %v274_v59 }
 0x219   :  { %v366_v53 = vpop.eup %365  ;;  %307 = vst.msk [vmem:[%s559_s5] sm:$0xff] %vm173_vm2, %v299_v60  ;;  %v289_v0 = vmul.f32 %v328_v37, %v275_v61 }
 0x21a   :  { %v368_v1 = vpop.eup %367  ;;  %v302_v2 = vadd.f32 %v329_v42, %v288_v45  ;;  %v278_v52 = vmul.f32 %v366_v53, %v494_v8 }
 0x21b   :  { %v303_v3 = vadd.f32 %v329_v42, %v289_v0  ;;  %v273_v63 = vmul.f32 %v368_v1, %v485_v62 }
 0x21c   :  { %310 = vst.msk [vmem:[%s559_s5 + $0x18] sm:$0xff] %vm173_vm2, %v302_v2  ;;  %v292_v4 = vmul.f32 %v328_v37, %v278_v52 }
 0x21d   :  { %v370_v5 = vpop.eup %369  ;;  %311 = vst.msk [vmem:[%s559_s5 + $0x20] sm:$0xff] %vm173_vm2, %v303_v3  ;;  %v287_v6 = vmul.f32 %v328_v37, %v273_v63 }
 0x21e   :  { %v306_v7 = vadd.f32 %v329_v42, %v292_v4  ;;  %v277_v10 = vmul.f32 %v370_v5, %v496_v9 }
 0x21f   :  { %v301_v8 = vadd.f32 %v329_v42, %v287_v6 }
 0x220   :  { %314 = vst.msk [vmem:[%s559_s5 + $0x38] sm:$0xff] %vm173_vm2, %v306_v7  ;;  %v291_v62 = vmul.f32 %v328_v37, %v277_v10 }
 0x221   :  { %309 = vst.msk [vmem:[%s559_s5 + $0x10] sm:$0xff] %vm173_vm2, %v301_v8 }
 0x222   :  { %v305_v11 = vadd.f32 %v329_v42, %v291_v62 }
 0x224   :  { %313 = vst.msk [vmem:[%s559_s5 + $0x30] sm:$0xff] %vm173_vm2, %v305_v11 }

// kernel: seq2seq_forward.8
= control target key start
LH: loop header
LB: loop body
LE: loop exit
PB: predicated region body
PF: predicated region fallthrough
CT: control target
= control target key end

     0   :  { %s2069_s24 = smov 0   ;;  %s2509_s0 = inlined_call_operand.vmem [shape: f32[8,8,32], index: 0, kind: input, shape index: {}]   ;;  %s2510_s1 = inlined_call_operand.vmem [shape: f32[3,32,60], index: 1, kind: input, shape index: {}]   ;;  %s2511_s2 = inlined_call_operand.vmem [shape: f32[3,60,60], index: 2, kind: input, shape index: {}]   ;;  %s2512_s3 = inlined_call_operand.vmem [shape: f32[6,1,60], index: 3, kind: input, shape index: {}]   ;;  %s2513_s4 = inlined_call_operand.vmem [shape: f32[3,60,60], index: 4, kind: input, shape index: {}]   ;;  %s2514_s5 = inlined_call_operand.vmem [shape: f32[3,60,60], index: 5, kind: input, shape index: {}]   ;;  %s2515_s6 = inlined_call_operand.vmem [shape: f32[6,1,60], index: 6, kind: input, shape index: {}]   ;;  %s2516_s7 = inlined_call_operand.vmem [shape: f32[2,8,60], index: 7, kind: output, shape index: {}]  }
   0x1 LB: > { %s2075_s25 = sadd.s32 4294967295, %s2022_s24   ;;  %p1422_p0 = scmp.ge.s32.totalorder %s2022_s24, 1  ;;  %s2022_s24 = sphi %s2069_s24, %s17_s24  }
   0x2   : > { %p231_p1 = scmp.lt.s32.totalorder %s2022_s24, 9 }
   0x4   : > { %p232_p2 = pnand %p1422_p0, %p231_p1 }
   0x5   : > { %p257_p3 = scmp.lt.s32.totalorder (!%p232_p2), %s2075_s25, 7  ;;  %p1424_p4 = scmp.ne.s32.totalorder (!%p232_p2), %s2075_s25, 0 }
   0x6   : > { %235 = sbr.rel (%p232_p2) target bundleno = 606 (0x25e), region = 48 }
   0xd   : > { %s258_s26 = scalar_select %p257_p3, %s2075_s25, 7 }
   0xe   : > { %264 = sbr.rel (%p1424_p4) target bundleno = 21 (0x15), region = 52  ;;  %vm265_vm0 = vcmask (!%p1424_p4), 490496   ;;  %v2024_v0 = vmov (!%p1424_p4), 0.0  }
   0xf   : > { %s1423_s27 = sshll.u32 %s258_s26, 3  ;;  %266 = vst.msk [vmem:[#allocation2] sm:$0xff] (!%p1424_p4), %vm265_vm0, %v2024_v0  ;;  %267 = vst.msk [vmem:[#allocation2 + $0x8] sm:$0xff] (!%p1424_p4), %vm265_vm0, %v2024_v0 }
  0x10   : > { %s2084_s30 = scalar_lea.vmem %s2509_s0, %s1423_s27 }
  0x15 PF: > { %v270_v1 = vld [vmem:[%s2510_s1] sm:$0xff]  ;;  %v271_v2 = vld [vmem:[%s2510_s1 + $0x8] sm:$0xff]  ;;  %v2025_v4 = vmov 0.0|0.0   ;;  %v272_v7 = vld [vmem:[%s2510_s1 + $0x10] sm:$0xff]  ;;  %vm2026_vm1 = vmmov 0   ;;  %v2027_v12 = vmov 0.0  }
  0x16   : > { %v1427_v3 = vld [vmem:[%s2510_s1 + $0x20] sm:$0xff]  ;;  %1832 = vmatprep.subr.bf16.mxu0 %v2025_v4  ;;  %v1833_v5 = vpack.c.bf16 %v271_v2, %v270_v1  ;;  %1838 = vmatprep.subr.bf16.mxu1 %v2025_v4  ;;  %v1428_v6 = vld [vmem:[%s2510_s1 + $0x28] sm:$0xff]  ;;  %v273_v8 = vld [vmem:[%s2510_s1 + $0x18] sm:$0xff]  ;;  %vm281_vm2 = vcmask 261120   ;;  %vm541_vm3 = vcmask 1043456   ;;  %vm2028_vm4 = vmmov 1  }
  0x17   : > { %v1839_v9 = vpack.c.bf16 %v1428_v6, %v1427_v3  ;;  %v1429_v10 = vld [vmem:[%s2510_s1 + $0x30] sm:$0xff]  ;;  %v1430_v11 = vld [vmem:[%s2510_s1 + $0x38] sm:$0xff]  ;;  %1636 = vmatprep.mubr.msk.f32.mxu0 %vm2026_vm1, %v2027_v12  ;;  %1647 = vmatprep.mubr.msk.f32.mxu1 %vm2026_vm1, %v2027_v12  ;;  %v1836_v13 = vpack.c.bf16 %v273_v8, %v272_v7  ;;  %v1434_v15 = vld [vmem:[%s2510_s1 + $0x40] sm:$0xff]  ;;  %vm537_vm6 = vcmask 490496   ;;  %p1528_p5 = scmp.ne.s32.totalorder %s2075_s25, 7 }
  0x18   : > { %1834 = vmatpush3.bf16.msra.mxu0 %v1833_v5  ;;  %v1842_v14 = vpack.c.bf16 %v1430_v11, %v1429_v10  ;;  %v1435_v16 = vld [vmem:[%s2510_s1 + $0x48] sm:$0xff]  ;;  %v1445_v17 = vld [vmem:[%s2511_s2 + $0x40] sm:$0xff]  ;;  %v1436_v22 = vld [vmem:[%s2510_s1 + $0x50] sm:$0xff] }
  0x19   : > { %1840 = vmatpush3.bf16.msra.mxu1 %v1839_v9  ;;  %1835 = vmatprep.subr.bf16.mxu0 %v2025_v4  ;;  %v1446_v18 = vld [vmem:[%s2511_s2 + $0x48] sm:$0xff]  ;;  %v268_v19 = vld [vmem:[%s2084_s30] sm:$0xff]  ;;  %v1845_v20 = vpack.c.bf16 %v1435_v16, %v1434_v15  ;;  %v1437_v23 = vld [vmem:[%s2510_s1 + $0x58] sm:$0xff] }
  0x1a   : > { %1841 = vmatprep.subr.bf16.mxu1 %v2025_v4  ;;  %v1864_v21 = vpack.c.bf16 %v1446_v18, %v1445_v17  ;;  %v1447_v24 = vld [vmem:[%s2511_s2 + $0x50] sm:$0xff]  ;;  %v1448_v25 = vld [vmem:[%s2511_s2 + $0x58] sm:$0xff]  ;;  %v1848_v26 = vpack.c.bf16 %v1437_v23, %v1436_v22  ;;  %v521_v28 = vld [vmem:[%s2511_s2] sm:$0xff] }
  0x1b   : > { %v1867_v27 = vpack.c.bf16 %v1448_v25, %v1447_v24  ;;  %v522_v29 = vld [vmem:[%s2511_s2 + $0x8] sm:$0xff]  ;;  %v1449_v30 = vld [vmem:[%s2511_s2 + $0x60] sm:$0xff]  ;;  %v523_v34 = vld [vmem:[%s2511_s2 + $0x10] sm:$0xff] }
  0x1c   : > { %1837 = vmatpush3.bf16.msra.mxu0 %v1836_v13  ;;  %v1450_v31 = vld [vmem:[%s2511_s2 + $0x68] sm:$0xff]  ;;  %v1851_v32 = vpack.c.bf16 %v522_v29, %v521_v28  ;;  %v524_v35 = vld [vmem:[%s2511_s2 + $0x18] sm:$0xff]  ;;  %v1451_v36 = vld [vmem:[%s2511_s2 + $0x70] sm:$0xff] }
  0x1d   : > { %1843 = vmatpush3.bf16.msra.mxu1 %v1842_v14  ;;  %1844 = vmatprep.subr.bf16.mxu0 %v2025_v4  ;;  %v1870_v33 = vpack.c.bf16 %v1450_v31, %v1449_v30  ;;  %v1452_v37 = vld [vmem:[%s2511_s2 + $0x78] sm:$0xf]  ;;  %v1854_v38 = vpack.c.bf16 %v524_v35, %v523_v34  ;;  %v525_v40 = vld [vmem:[%s2511_s2 + $0x20] sm:$0xff]  ;;  %v526_v41 = vld [vmem:[%s2511_s2 + $0x28] sm:$0xff] }
  0x1e   : > { %1863 = vmatprep.subr.bf16.mxu1 %v2025_v4  ;;  %v1873_v39 = vpack.c.bf16 %v1452_v37, %v1451_v36  ;;  %vm2191_vm5 = vmpackc.low %vm541_vm3, %vm2028_vm4  ;;  %v1457_v43 = vld [vmem:[%s2511_s2 + $0x80] sm:$0xff]  ;;  %v1458_v44 = vld [vmem:[%s2511_s2 + $0x88] sm:$0xff]  ;;  %v1857_v45 = vpack.c.bf16 %v526_v41, %v525_v40 }
  0x1f   : > { %1637 = vmatmul.mubr.msk.f32.vlgmr.msra.gmra.mrb[0].mxu0 %vm281_vm2, %v268_v19  ;;  %v2204_v46 = vld [vmem:[#allocation2] sm:$0xff]  ;;  %v527_v47 = vld [vmem:[%s2511_s2 + $0x30] sm:$0xff]  ;;  %v528_v48 = vld [vmem:[%s2511_s2 + $0x38] sm:$0xf]  ;;  %v1877_v49 = vpack.c.bf16 %v1458_v44, %v1457_v43 }
  0x20   : > { %1846 = vmatpush3.bf16.msra.mxu0 %v1845_v20  ;;  %1648 = vmatmul.mubr.msk.f32.vlgmr.msra.gmra.mrb[0].mxu1 %vm281_vm2, %v268_v19  ;;  %v1459_v50 = vld [vmem:[%s2511_s2 + $0x90] sm:$0xff]  ;;  %v1460_v51 = vld [vmem:[%s2511_s2 + $0x98] sm:$0xff]  ;;  %v1860_v52 = vpack.c.bf16 %v528_v48, %v527_v47  ;;  %v1461_v54 = vld [vmem:[%s2511_s2 + $0xa0] sm:$0xff] }
  0x21   : > { %1865 = vmatpush3.bf16.msra.mxu1 %v1864_v21  ;;  %1847 = vmatprep.subr.bf16.mxu0 %v2025_v4  ;;  %v1880_v53 = vpack.c.bf16 %v1460_v51, %v1459_v50  ;;  %v1462_v55 = vld [vmem:[%s2511_s2 + $0xa8] sm:$0xff]  ;;  %v1463_v57 = vld [vmem:[%s2511_s2 + $0xb0] sm:$0xff]  ;;  %v1464_v58 = vld [vmem:[%s2511_s2 + $0xb8] sm:$0xf] }
  0x22   : > { %1866 = vmatprep.subr.bf16.mxu1 %v2025_v4  ;;  %1658 = vmatprep.mubr.msk.f32.mxu0 %vm2026_vm1, %v2027_v12  ;;  %v1883_v56 = vpack.c.bf16 %v1462_v55, %v1461_v54  ;;  %v1886_v59 = vpack.c.bf16 %v1464_v58, %v1463_v57  ;;  %v818_v60 = vld [vmem:[%s2513_s4] sm:$0xff]  ;;  %v819_v61 = vld [vmem:[%s2513_s4 + $0x8] sm:$0xff]  ;;  %v820_v2 = vld [vmem:[%s2513_s4 + $0x10] sm:$0xff] }
  0x23   : > { %1696 = vmatprep.mubr.msk.f32.mxu1 %vm2026_vm1, %v2027_v12  ;;  %v1474_v62 = vld [vmem:[%s2513_s4 + $0x40] sm:$0xff]  ;;  %v1890_v63 = vpack.c.bf16 %v819_v61, %v818_v60  ;;  %v1475_v0 = vld [vmem:[%s2513_s4 + $0x48] sm:$0xff]  ;;  %v821_v3 = vld [vmem:[%s2513_s4 + $0x18] sm:$0xff] }
  0x24   : > { %1849 = vmatpush3.bf16.msra.mxu0 %v1848_v26  ;;  %v1903_v1 = vpack.c.bf16 %v1475_v0, %v1474_v62  ;;  %v1476_v5 = vld [vmem:[%s2513_s4 + $0x50] sm:$0xff]  ;;  %v1893_v6 = vpack.c.bf16 %v821_v3, %v820_v2  ;;  %v1477_v7 = vld [vmem:[%s2513_s4 + $0x58] sm:$0xff]  ;;  %v822_v8 = vld [vmem:[%s2513_s4 + $0x20] sm:$0xff] }
  0x25   : > { %1868 = vmatpush3.bf16.msra.mxu1 %v1867_v27  ;;  %1850 = vmatprep.subr.bf16.mxu0 %v2025_v4  ;;  %v823_v9 = vld [vmem:[%s2513_s4 + $0x28] sm:$0xff]  ;;  %v1906_v10 = vpack.c.bf16 %v1477_v7, %v1476_v5  ;;  %v1478_v11 = vld [vmem:[%s2513_s4 + $0x60] sm:$0xff]  ;;  %v824_v16 = vld [vmem:[%s2513_s4 + $0x30] sm:$0xff] }
  0x26   : > { %1869 = vmatprep.subr.bf16.mxu1 %v2025_v4  ;;  %v1479_v13 = vld [vmem:[%s2513_s4 + $0x68] sm:$0xff]  ;;  %v1896_v14 = vpack.c.bf16 %v823_v9, %v822_v8  ;;  %v825_v17 = vld [vmem:[%s2513_s4 + $0x38] sm:$0xf]  ;;  %v1480_v18 = vld [vmem:[%s2513_s4 + $0x70] sm:$0xff] }
  0x27   : > { %1659 = vmatmul.mubr.msk.f32.vlgmr.msra.gmra.mrb[2].mxu0 %vm281_vm2, %v268_v19  ;;  %v1909_v15 = vpack.c.bf16 %v1479_v13, %v1478_v11  ;;  %v1481_v19 = vld [vmem:[%s2513_s4 + $0x78] sm:$0xf]  ;;  %v1899_v20 = vpack.c.bf16 %v825_v17, %v824_v16  ;;  %v1425_v26 = vld [vmem:[%s2512_s3] ss:$0 sm:$0xff]  ;;  %v1442_v27 = vld [vmem:[%s2512_s3 + $0x3] ss:$0 sm:$0xff] }
  0x28   : > { %1852 = vmatpush3.bf16.msra.mxu0 %v1851_v32  ;;  %1677 = vmatprep.mubr.msk.f32.mxu0 %vm2026_vm1, %v2027_v12  ;;  %v1912_v21 = vpack.c.bf16 %v1481_v19, %v1480_v18  ;;  %v1432_v28 = vld [vmem:[%s2512_s3 + $0x1] ss:$0 sm:$0xff]  ;;  %v1454_v29 = vld [vmem:[%s2512_s3 + $0x4] ss:$0 sm:$0xff]  ;;  %v1967_v30 = vadd.f32 %v1442_v27, %v1425_v26  ;;  %v1466_v44 = vld [vmem:[%s2512_s3 + $0x5] ss:$0 sm:$0xff] }
  0x29   : > { %1871 = vmatpush3.bf16.msra.mxu1 %v1870_v33  ;;  %1853 = vmatprep.subr.bf16.mxu0 %v2025_v4  ;;  %v1969_v31 = vadd.f32 %v1454_v29, %v1432_v28  ;;  %v1439_v48 = vld [vmem:[%s2512_s3 + $0x2] ss:$0 sm:$0xff]  ;;  %v1503_v58 = vld [vmem:[%s2514_s5 + $0x48] sm:$0xff]  ;;  %v1488_v0 = vld [vmem:[%s2513_s4 + $0x90] sm:$0xff] }
  0x2a   : > { %1872 = vmatprep.subr.bf16.mxu1 %v2025_v4  ;;  %v1486_v54 = vld [vmem:[%s2513_s4 + $0x80] sm:$0xff]  ;;  %v1489_v2 = vld [vmem:[%s2513_s4 + $0x98] sm:$0xff]  ;;  %v1504_v3 = vld [vmem:[%s2514_s5 + $0x50] sm:$0xff] }
  0x2b   : > { %v1502_v57 = vld [vmem:[%s2514_s5 + $0x40] sm:$0xff]  ;;  %v1919_v5 = vpack.c.bf16 %v1489_v2, %v1488_v0  ;;  %v1491_v8 = vld [vmem:[%s2513_s4 + $0xa8] sm:$0xff]  ;;  %v1508_v16 = vld [vmem:[%s2514_s5 + $0x70] sm:$0xff] }
  0x2c   : > { %1855 = vmatpush3.bf16.msra.mxu0 %v1854_v38  ;;  %v1490_v7 = vld [vmem:[%s2513_s4 + $0xa0] sm:$0xff]  ;;  %v1509_v17 = vld [vmem:[%s2514_s5 + $0x78] sm:$0xf]  ;;  %v1091_v26 = vld [vmem:[%s2514_s5 + $0x10] sm:$0xff] }
  0x2d   : > { %1875 = vmatpush3.bf16.msk.msra.mxu1 %vm2191_vm5, %v1873_v39  ;;  %1856 = vmatprep.subr.bf16.mxu0 %v2025_v4  ;;  %v1506_v9 = vld [vmem:[%s2514_s5 + $0x60] sm:$0xff]  ;;  %v1922_v11 = vpack.c.bf16 %v1491_v8, %v1490_v7  ;;  %v1951_v19 = vpack.c.bf16 %v1509_v17, %v1508_v16  ;;  %v1092_v27 = vld [vmem:[%s2514_s5 + $0x18] sm:$0xff]  ;;  %v1516_v29 = vld [vmem:[%s2514_s5 + $0x90] sm:$0xff] }
  0x2e   : > { %1876 = vmatprep.subr.bf16.mxu1 %v2025_v4  ;;  %v1483_v42 = vld [vmem:[%s2515_s6 + $0x1] ss:$0 sm:$0xff]  ;;  %v1523_v2 = vld [vmem:[%s2515_s6 + $0x5] ss:$0 sm:$0xff] }
  0x30   : > { %1858 = vmatpush3.bf16.msra.mxu0 %v1857_v45  ;;  %1697 = vmatmul.mubr.msk.f32.vlgmr.msra.gmra.mrb[0].mxu1 %vm537_vm6, %v2204_v46 }
  0x31   : > { %1859 = vmatprep.subr.bf16.mxu0 %v2025_v4  ;;  %1878 = vmatpush3.bf16.msra.mxu1 %v1877_v49 }
  0x32   : > { %1879 = vmatprep.subr.bf16.mxu1 %v2025_v4  ;;  %1715 = vmatprep.mubr.msk.f32.mxu1 %vm2026_vm1, %v2027_v12 }
  0x34   : > { %1862 = vmatpush3.bf16.msk.msra.mxu0 %vm2191_vm5, %v1860_v52 }
  0x35   : > { %1881 = vmatpush3.bf16.msra.mxu1 %v1880_v53  ;;  %1889 = vmatprep.subr.bf16.mxu0 %v2025_v4 }
  0x36   : > { %1882 = vmatprep.subr.bf16.mxu1 %v2025_v4 }
  0x37   : > { %1678 = vmatmul.mubr.msk.f32.vlgmr.msra.gmra.mrb[0].mxu0 %vm537_vm6, %v2204_v46 }
  0x38   : > { %1734 = vmatprep.mubr.msk.f32.mxu0 %vm2026_vm1, %v2027_v12  ;;  %1891 = vmatpush3.bf16.msra.mxu0 %v1890_v63  ;;  %v1942_v63 = vpack.c.bf16 %v1503_v58, %v1502_v57 }
  0x39   : > { %1884 = vmatpush3.bf16.msra.mxu1 %v1883_v56  ;;  %1892 = vmatprep.subr.bf16.mxu0 %v2025_v4  ;;  %v1487_v56 = vld [vmem:[%s2513_s4 + $0x88] sm:$0xff] }
  0x3a   : > { %1885 = vmatprep.subr.bf16.mxu1 %v2025_v4  ;;  %v1916_v62 = vpack.c.bf16 %v1487_v56, %v1486_v54 }
  0x3c   : > { %1894 = vmatpush3.bf16.msra.mxu0 %v1893_v6 }
  0x3d   : > { %1888 = vmatpush3.bf16.msk.msra.mxu1 %vm2191_vm5, %v1886_v59  ;;  %1895 = vmatprep.subr.bf16.mxu0 %v2025_v4 }
  0x3e   : > { %1902 = vmatprep.subr.bf16.mxu1 %v2025_v4 }
  0x40   : > { %1716 = vmatmul.mubr.msk.f32.vlgmr.msra.gmra.mrb[2].mxu1 %vm537_vm6, %v2204_v46  ;;  %1897 = vmatpush3.bf16.msra.mxu0 %v1896_v14  ;;  %v1492_v14 = vld [vmem:[%s2513_s4 + $0xb0] sm:$0xff] }
  0x41   : > { %1753 = vmatprep.mubr.msk.f32.mxu1 %vm2026_vm1, %v2027_v12  ;;  %1904 = vmatpush3.bf16.msra.mxu1 %v1903_v1 }
  0x42   : > { %1905 = vmatprep.subr.bf16.mxu1 %v2025_v4  ;;  %1898 = vmatprep.subr.bf16.mxu0 %v2025_v4 }
  0x44   : > { %1901 = vmatpush3.bf16.msk.msra.mxu0 %vm2191_vm5, %v1899_v20  ;;  %v1089_v20 = vld [vmem:[%s2514_s5] sm:$0xff] }
  0x45   : > { %1907 = vmatpush3.bf16.msra.mxu1 %v1906_v10  ;;  %1915 = vmatprep.subr.bf16.mxu0 %v2025_v4  ;;  %v1507_v10 = vld [vmem:[%s2514_s5 + $0x68] sm:$0xff] }
  0x46   : > { %1908 = vmatprep.subr.bf16.mxu1 %v2025_v4  ;;  %v1948_v13 = vpack.c.bf16 %v1507_v10, %v1506_v9 }
  0x49   : > { %1910 = vmatpush3.bf16.msra.mxu1 %v1909_v15  ;;  %v1493_v15 = vld [vmem:[%s2513_s4 + $0xb8] sm:$0xf] }
  0x4a   : > { %1911 = vmatprep.subr.bf16.mxu1 %v2025_v4  ;;  %v1925_v18 = vpack.c.bf16 %v1493_v15, %v1492_v14 }
  0x4d   : > { %1914 = vmatpush3.bf16.msk.msra.mxu1 %vm2191_vm5, %v1912_v21  ;;  %v1090_v21 = vld [vmem:[%s2514_s5 + $0x8] sm:$0xff] }
  0x4e   : > { %1941 = vmatprep.subr.bf16.mxu1 %v2025_v4 }
  0xfa   : > { %v517_v22 = vpop.f32.mrb[2].mxu0 }
  0xfb   : > { %v1660_v23 = vpop.f32.mrb[3].mxu0  ;;  %v518_v50 = vadd.f32 %v1439_v48, %v517_v22  ;;  %v1514_v22 = vld [vmem:[%s2514_s5 + $0x80] sm:$0xff] }
  0xfc   : > { %v1515_v23 = vld [vmem:[%s2514_s5 + $0x88] sm:$0xff] }
  0xfd   : > { %v1955_v28 = vpack.c.bf16 %v1515_v23, %v1514_v22 }
 0x103   : > { %v701_v24 = vpop.f32.mrb[0].mxu1 }
 0x104   : > { %v1698_v25 = vpop.f32.mrb[1].mxu1  ;;  %v1970_v36 = vadd.f32 %v1969_v31, %v701_v24  ;;  %v2414_v24 = vld [vmem:[#allocation2 + $0x8] sm:$0xff]  ;;  %v1932_v31 = vpack.c.bf16 %v1092_v27, %v1091_v26 }
 0x105   : > { %v1929_v25 = vpack.c.bf16 %v1090_v21, %v1089_v20 }
 0x106   : > { %v1470_v37 = vmul.f32 -1.442695, %v1970_v36  ;;  %v1519_v36 = vld [vmem:[%s2514_s5 + $0xa8] sm:$0xff] }
 0x10a   : > { %v611_v32 = vpop.f32.mrb[0].mxu0 }
 0x10b   : > { %v1968_v33 = vadd.f32 %v1967_v30, %v611_v32  ;;  %v1679_v34 = vpop.f32.mrb[1].mxu0  ;;  %v1517_v30 = vld [vmem:[%s2514_s5 + $0x98] sm:$0xff]  ;;  %v1093_v32 = vld [vmem:[%s2514_s5 + $0x20] sm:$0xff] }
 0x10c   : > { %v1958_v34 = vpack.c.bf16 %v1517_v30, %v1516_v29 }
 0x10d   : > { %v1469_v35 = vmul.f32 -1.442695, %v1968_v33  ;;  %v1094_v33 = vld [vmem:[%s2514_s5 + $0x28] sm:$0xff] }
 0x10f   : > { %1996 = vpow2.f32 %v1469_v35  ;;  %v1518_v35 = vld [vmem:[%s2514_s5 + $0xa0] sm:$0xff] }
 0x110   : > { %1998 = vpow2.f32 %v1470_v37  ;;  %v1935_v37 = vpack.c.bf16 %v1094_v33, %v1093_v32 }
 0x113   : > { %v791_v38 = vpop.f32.mrb[2].mxu1 }
 0x114   : > { %v1717_v39 = vpop.f32.mrb[3].mxu1  ;;  %v792_v47 = vadd.f32 %v1466_v44, %v791_v38  ;;  %v1095_v38 = vld [vmem:[%s2514_s5 + $0x30] sm:$0xff] }
 0x115   : > { %v1096_v39 = vld [vmem:[%s2514_s5 + $0x38] sm:$0xf] }
 0x119   : > { %v1997_v40 = vpop.eup %1996 }
 0x11a   : > { %v799_v41 = vadd.f32 1.0, %v1997_v40  ;;  %v1999_v43 = vpop.eup %1998  ;;  %v1961_v40 = vpack.c.bf16 %v1519_v36, %v1518_v35 }
 0x11b   : > { %v806_v45 = vadd.f32 1.0, %v1999_v43  ;;  %v1938_v43 = vpack.c.bf16 %v1096_v39, %v1095_v38 }
 0x11c   : > { %2000 = vrcp.f32 %v799_v41  ;;  %v1521_v41 = vld [vmem:[%s2514_s5 + $0xb8] sm:$0xf] }
 0x11d   : > { %2002 = vrcp.f32 %v806_v45 }
 0x126   : > { %v2001_v49 = vpop.eup %2000 }
 0x127   : > { %v809_v51 = vmul.f32 %v2001_v49, %v792_v47  ;;  %v2003_v53 = vpop.eup %2002 }
 0x128   : > { %v812_v55 = vsub.f32 1.0, %v2003_v53  ;;  %v814_v61 = vmul.f32 %v2003_v53, %v2204_v46  ;;  %v1505_v46 = vld [vmem:[%s2514_s5 + $0x58] sm:$0xff] }
 0x129   : > { %v810_v52 = vadd.f32 %v809_v51, %v518_v50  ;;  %v1945_v6 = vpack.c.bf16 %v1505_v46, %v1504_v3  ;;  %v1499_v50 = vld [vmem:[%s2515_s6 + $0x3] ss:$0 sm:$0xff]  ;;  %v1511_v51 = vld [vmem:[%s2515_s6 + $0x4] ss:$0 sm:$0xff] }
 0x12a   : > { %v1973_v53 = vadd.f32 %v1511_v51, %v1483_v42 }
 0x12b   : > { %2004 = vtanh.f32 %v810_v52 }
 0x135   : > { %v2005_v59 = vpop.eup %2004 }
 0x136   : > { %v813_v60 = vmul.f32 %v2005_v59, %v812_v55 }
 0x138   : > { %v2347_v1 = vadd.f32 %v814_v61, %v813_v60 }
 0x13a   : > { %1735 = vmatmul.mubr.msk.f32.vlgmr.msra.gmra.mrb[4].mxu0 %vm537_vm6, %v2347_v1  ;;  %1382 = vst.msk [vmem:[#allocation2] sm:$0xff] %vm537_vm6, %v2347_v1  ;;  %1754 = vmatmul.mubr.msk.f32.vlgmr.msra.gmra.mrb[4].mxu1 %vm537_vm6, %v2347_v1  ;;  %1388 = vst.msk [vmem:[%s2516_s7] sm:$0xff] (!%p1528_p5), %vm537_vm6, %v2347_v1 }
 0x13b   : > { %1917 = vmatpush3.bf16.msra.mxu0 %v1916_v62  ;;  %1943 = vmatpush3.bf16.msra.mxu1 %v1942_v63 }
 0x13c   : > { %1918 = vmatprep.subr.bf16.mxu0 %v2025_v4  ;;  %1944 = vmatprep.subr.bf16.mxu1 %v2025_v4 }
 0x13d   : > { %1772 = vmatprep.mubr.msk.f32.mxu0 %vm2026_vm1, %v2027_v12  ;;  %1810 = vmatprep.mubr.msk.f32.mxu1 %vm2026_vm1, %v2027_v12 }
 0x13f   : > { %1920 = vmatpush3.bf16.msra.mxu0 %v1919_v5  ;;  %1946 = vmatpush3.bf16.msra.mxu1 %v1945_v6  ;;  %v1495_v5 = vld [vmem:[%s2515_s6 + $0x2] ss:$0 sm:$0xff] }
 0x140   : > { %1921 = vmatprep.subr.bf16.mxu0 %v2025_v4  ;;  %1947 = vmatprep.subr.bf16.mxu1 %v2025_v4 }
 0x143   : > { %1923 = vmatpush3.bf16.msra.mxu0 %v1922_v11  ;;  %1949 = vmatpush3.bf16.msra.mxu1 %v1948_v13 }
 0x144   : > { %1924 = vmatprep.subr.bf16.mxu0 %v2025_v4  ;;  %1950 = vmatprep.subr.bf16.mxu1 %v2025_v4 }
 0x147   : > { %1927 = vmatpush3.bf16.msk.msra.mxu0 %vm2191_vm5, %v1925_v18  ;;  %1953 = vmatpush3.bf16.msk.msra.mxu1 %vm2191_vm5, %v1951_v19 }
 0x148   : > { %1928 = vmatprep.subr.bf16.mxu0 %v2025_v4  ;;  %1954 = vmatprep.subr.bf16.mxu1 %v2025_v4 }
 0x14a   : > { %1773 = vmatmul.mubr.msk.f32.vlgmr.msra.gmra.mrb[6].mxu0 %vm537_vm6, %v2347_v1  ;;  %1811 = vmatmul.mubr.msk.f32.vlgmr.msra.gmra.mrb[4].mxu1 %vm537_vm6, %v2414_v24 }
 0x14b   : > { %1930 = vmatpush3.bf16.msra.mxu0 %v1929_v25  ;;  %1791 = vmatprep.mubr.msk.f32.mxu0 %vm2026_vm1, %v2027_v12 }
 0x14c   : > { %1931 = vmatprep.subr.bf16.mxu0 %v2025_v4  ;;  %1956 = vmatpush3.bf16.msra.mxu1 %v1955_v28 }
 0x14d   : > { %1957 = vmatprep.subr.bf16.mxu1 %v2025_v4  ;;  %1829 = vmatprep.mubr.msk.f32.mxu1 %vm2026_vm1, %v2027_v12  ;;  %v1520_v12 = vld [vmem:[%s2514_s5 + $0xb0] sm:$0xff] }
 0x14e   : > { %v1964_v44 = vpack.c.bf16 %v1521_v41, %v1520_v12 }
 0x14f   : > { %1933 = vmatpush3.bf16.msra.mxu0 %v1932_v31 }
 0x150   : > { %1934 = vmatprep.subr.bf16.mxu0 %v2025_v4  ;;  %1959 = vmatpush3.bf16.msra.mxu1 %v1958_v34 }
 0x151   : > { %1960 = vmatprep.subr.bf16.mxu1 %v2025_v4 }
 0x153   : > { %1936 = vmatpush3.bf16.msra.mxu0 %v1935_v37 }
 0x154   : > { %1937 = vmatprep.subr.bf16.mxu0 %v2025_v4  ;;  %1962 = vmatpush3.bf16.msra.mxu1 %v1961_v40 }
 0x155   : > { %1963 = vmatprep.subr.bf16.mxu1 %v2025_v4  ;;  %v1471_v4 = vld [vmem:[%s2515_s6] ss:$0 sm:$0xff] }
 0x156   : > { %v1971_v52 = vadd.f32 %v1499_v50, %v1471_v4 }
 0x157   : > { %1940 = vmatpush3.bf16.msk.msra.mxu0 %vm2191_vm5, %v1938_v43 }
 0x158   : > { %1966 = vmatpush3.bf16.msk.msra.mxu1 %vm2191_vm5, %v1964_v44 }
 0x15a   : > { %1792 = vmatmul.mubr.msk.f32.vlgmr.msra.gmra.mrb[4].mxu0 %vm537_vm6, %v2414_v24 }
 0x15b   : > { %1830 = vmatmul.mubr.msk.f32.vlgmr.msra.gmra.mrb[6].mxu1 %vm537_vm6, %v2414_v24 }
 0x21d   : > { %v1085_v45 = vpop.f32.mrb[6].mxu0  ;;  %v1267_v47 = vpop.f32.mrb[4].mxu1 }
 0x21e   : > { %v1774_v48 = vpop.f32.mrb[7].mxu0  ;;  %v1812_v49 = vpop.f32.mrb[5].mxu1  ;;  %v1974_v60 = vadd.f32 %v1973_v53, %v1267_v47  ;;  %v1086_v7 = vadd.f32 %v1495_v5, %v1085_v45 }
 0x220   : > { %v1527_v61 = vmul.f32 -1.442695, %v1974_v60 }
 0x22d   : > { %v1177_v54 = vpop.f32.mrb[4].mxu0 }
 0x22e   : > { %v1972_v55 = vadd.f32 %v1971_v52, %v1177_v54  ;;  %v1793_v56 = vpop.f32.mrb[5].mxu0  ;;  %v1357_v57 = vpop.f32.mrb[6].mxu1 }
 0x22f   : > { %v1831_v58 = vpop.f32.mrb[7].mxu1  ;;  %v1358_v46 = vadd.f32 %v1523_v2, %v1357_v57 }
 0x230   : > { %v1526_v59 = vmul.f32 -1.442695, %v1972_v55 }
 0x232   : > { %2006 = vpow2.f32 %v1526_v59 }
 0x233   : > { %2008 = vpow2.f32 %v1527_v61 }
 0x23c   : > { %v2007_v62 = vpop.eup %2006 }
 0x23d   : > { %v1365_v63 = vadd.f32 1.0, %v2007_v62  ;;  %v2009_v0 = vpop.eup %2008 }
 0x23e   : > { %v1372_v3 = vadd.f32 1.0, %v2009_v0 }
 0x23f   : > { %2010 = vrcp.f32 %v1365_v63 }
 0x240   : > { %2012 = vrcp.f32 %v1372_v3 }
 0x249   : > { %v2011_v6 = vpop.eup %2010 }
 0x24a   : > { %v1375_v8 = vmul.f32 %v2011_v6, %v1358_v46  ;;  %v2013_v10 = vpop.eup %2012 }
 0x24b   : > { %v1378_v11 = vsub.f32 1.0, %v2013_v10  ;;  %v1380_v14 = vmul.f32 %v2013_v10, %v2414_v24 }
 0x24c   : > { %v1376_v9 = vadd.f32 %v1375_v8, %v1086_v7 }
 0x24e   : > { %2014 = vtanh.f32 %v1376_v9 }
 0x257   : > { %1387 = sbr.rel (%p1528_p5) target bundleno = 606 (0x25e), region = 56 }
 0x258   : > { %v2015_v13 = vpop.eup %2014 }
 0x259   : > { %v1379_v15 = vmul.f32 %v2015_v13, %v1378_v11 }
 0x25b   : > { %v1381_v16 = vadd.f32 %v1380_v14, %v1379_v15 }
 0x25d   : > { %1383 = vst.msk [vmem:[#allocation2 + $0x8] sm:$0xff] %vm537_vm6, %v1381_v16  ;;  %1529 = vst.msk [vmem:[%s2516_s7 + $0x8] sm:$0xff] (!%p1528_p5), %vm537_vm6, %v1381_v16 }
 0x25e PF: > { %s17_s24 = sadd.s32 1, %s2022_s24  }
 0x25f   : > { %p14_p6 = scmp.ge.s32.totalorder %s17_s24, 10  }
 0x261   :  { %16 = sbr.rel (!%p14_p6) target bundleno = 1 (0x1), region = 102 }

// kernel: seq2seq_forward.6
= control target key start
LH: loop header
LB: loop body
LE: loop exit
PB: predicated region body
PF: predicated region fallthrough
CT: control target
= control target key end

     0   :  { %s6654_s0 = inlined_call_operand.vmem [shape: f32[2,32,32], index: 0, kind: input, shape index: {}]   ;;  %s6655_s1 = inlined_call_operand.vmem [shape: f32[2,32,32], index: 1, kind: input, shape index: {}]   ;;  %s6656_s2 = inlined_call_operand.vmem [shape: f32[3,32,32], index: 2, kind: input, shape index: {}]   ;;  %s6657_s3 = inlined_call_operand.vmem [shape: f32[3,1,32], index: 3, kind: input, shape index: {}]   ;;  %s6658_s4 = inlined_call_operand.vmem [shape: f32[32,32], index: 4, kind: input, shape index: {}]   ;;  %s6659_s5 = inlined_call_operand.vmem [shape: f32[1,32], index: 5, kind: input, shape index: {}]   ;;  %s6660_s6 = inlined_call_operand.vmem [shape: f32[1,32], index: 6, kind: input, shape index: {}]   ;;  %s6661_s7 = inlined_call_operand.vmem [shape: f32[1,32], index: 7, kind: input, shape index: {}]   ;;  %s6662_s8 = inlined_call_operand.vmem [shape: f32[3,32,32], index: 8, kind: input, shape index: {}]   ;;  %s6663_s9 = inlined_call_operand.vmem [shape: f32[3,1,32], index: 9, kind: input, shape index: {}]   ;;  %s6664_s10 = inlined_call_operand.vmem [shape: f32[32,32], index: 10, kind: input, shape index: {}]   ;;  %s6665_s11 = inlined_call_operand.vmem [shape: f32[1,32], index: 11, kind: input, shape index: {}]   ;;  %s6666_s12 = inlined_call_operand.vmem [shape: f32[1,32], index: 12, kind: input, shape index: {}]   ;;  %s6667_s13 = inlined_call_operand.vmem [shape: f32[1,32], index: 13, kind: input, shape index: {}]   ;;  %s6668_s14 = inlined_call_operand.vmem [shape: f32[32,64], index: 14, kind: input, shape index: {}]   ;;  %s6669_s15 = inlined_call_operand.vmem [shape: f32[1,64], index: 15, kind: input, shape index: {}]   ;;  %s6670_s16 = inlined_call_operand.vmem [shape: f32[64,32], index: 16, kind: input, shape index: {}]   ;;  %s6671_s17 = inlined_call_operand.vmem [shape: f32[1,32], index: 17, kind: input, shape index: {}]   ;;  %s6672_s18 = inlined_call_operand.vmem [shape: f32[1,32], index: 18, kind: input, shape index: {}]   ;;  %s6673_s19 = inlined_call_operand.vmem [shape: f32[1,32], index: 19, kind: input, shape index: {}]   ;;  %s6674_s20 = inlined_call_operand.vmem [shape: f32[2,32,32], index: 20, kind: output, shape index: {}]  }
   0x1   :  { %6679 = sst [smem:[#allocation2_spill]] %s6654_s0 }
   0x2   :  { %6680 = sst [smem:[#allocation3_spill]] %s6655_s1  ;;  %s5552_s1 = smov 0  }
   0x3   :  { %6681 = sst [smem:[#allocation4_spill]] %s6656_s2 }
   0x4   :  { %6682 = sst [smem:[#allocation5_spill]] %s6657_s3 }
   0x5   :  { %6683 = sst [smem:[#allocation6_spill]] %s6658_s4 }
   0x6 LB: > { %s4229_s22 = sadd.s32 4294967295, %s5444_s1   ;;  %p4233_p0 = scmp.ge.s32.totalorder %s5444_s1, 1  ;;  %s5444_s1 = sphi %s5552_s1, %s30_s1  }
   0x7   : > { %p572_p1 = scmp.lt.s32.totalorder %s5444_s1, 3 }
   0x9   : > { %p573_p2 = pnand %p4233_p0, %p572_p1 }
   0xa   : > { %s6684_s2 = sld [smem:[#allocation4_spill]] (!%p573_p2)  ;;  %p635_p3 = scmp.lt.s32.totalorder (!%p573_p2), %s4229_s22, 1  ;;  %vm800_vm0 = vcmask (!%p573_p2), 261120   ;;  %v659_v22 = vlaneseq (!%p573_p2)  ;;  %v5446_v32 = vmov (!%p573_p2), 0.0  }
   0xb   : > { %576 = sbr.rel (%p573_p2) target bundleno = 3864 (0xf18), region = 100  ;;  %s6685_s21 = sld [smem:[#allocation2_spill]] (!%p573_p2)  ;;  %vm5661_vm5 = vmpackc.low (!%p573_p2), %vm800_vm0, %vm800_vm0 }
   0xc   : > { %v5634_v23 = vand.u32 (!%p573_p2), 127, %v659_v22  ;;  %s6686_s28 = sld [smem:[#allocation5_spill]] (!%p573_p2)  ;;  %s6695_s24 = sld [smem:[#allocation6_spill]] (!%p573_p2) }
   0xd   : > { %s6696_s3 = sld [smem:[#allocation3_spill]] (!%p573_p2) }
   0xe   : > { %vm702_vm1 = vcmp.ge.s32.totalorder (!%p573_p2), %v5634_v23, 8  ;;  %vm703_vm2 = vcmp.lt.s32.totalorder (!%p573_p2), %v5634_v23, 16  ;;  %vm674_vm3 = vcmp.lt.s32.totalorder (!%p573_p2), %v5634_v23, 8  ;;  %vm735_vm6 = vcmp.ge.s32.totalorder (!%p573_p2), %v5634_v23, 16 }
   0xf   : > { %vm5642_vm4 = vmand (!%p573_p2), %vm702_vm1, %vm703_vm2  ;;  %v5652_v33 = vsel (!%p573_p2), %vm674_vm3, 1.0, %v5446_v32  ;;  %vm736_vm7 = vcmp.lt.s32.totalorder (!%p573_p2), %v5634_v23, 24  ;;  %vm768_vm9 = vcmp.ge.s32.totalorder (!%p573_p2), %v5634_v23, 24  ;;  %vm769_vm10 = vcmp.lt.s32.totalorder (!%p573_p2), %v5634_v23, 32 }
  0x10   : > { %v4245_v0 = vld [vmem:[%s6684_s2 + $0x20] sm:$0xff] (!%p573_p2)  ;;  %v4246_v1 = vld [vmem:[%s6684_s2 + $0x28] sm:$0xff] (!%p573_p2)  ;;  %v4247_v2 = vld [vmem:[%s6684_s2 + $0x30] sm:$0xff] (!%p573_p2)  ;;  %v5657_v34 = vsel (!%p573_p2), %vm5642_vm4, 1.0, %v5446_v32  ;;  %vm3982_vm1 = vcmask (!%p573_p2), 523264  }
  0x11   : > { %v5013_v3 = vpack.c.bf16 (!%p573_p2), %v4246_v1, %v4245_v0  ;;  %v4248_v4 = vld [vmem:[%s6684_s2 + $0x38] sm:$0xff] (!%p573_p2)  ;;  %v789_v5 = vld [vmem:[%s6684_s2] sm:$0xff] (!%p573_p2)  ;;  %v790_v6 = vld [vmem:[%s6684_s2 + $0x8] sm:$0xff] (!%p573_p2) }
  0x12   : > { %v5017_v7 = vpack.c.bf16 %v4248_v4, %v4247_v2  ;;  %s6698_s22 = smov (!%p635_p3, %s4229_s22), 1  ;;  %v5005_v8 = vpack.c.bf16 %v790_v6, %v789_v5  ;;  %v791_v9 = vld [vmem:[%s6684_s2 + $0x10] sm:$0xff]  ;;  %v792_v10 = vld [vmem:[%s6684_s2 + $0x18] sm:$0xff]  ;;  %v4255_v12 = vld [vmem:[%s6684_s2 + $0x40] sm:$0xff] }
  0x13   : > { %5014 = vmatprep.subr.bf16.mxu1 %v5013_v3  ;;  %v5009_v11 = vpack.c.bf16 %v792_v10, %v791_v9  ;;  %v4256_v13 = vld [vmem:[%s6684_s2 + $0x48] sm:$0xff]  ;;  %s5590_s29 = sshll.u32 %s6698_s22, 5  ;;  %v4257_v16 = vld [vmem:[%s6684_s2 + $0x50] sm:$0xff]  ;;  %v4258_v17 = vld [vmem:[%s6684_s2 + $0x58] sm:$0xff] }
  0x14   : > { %5016 = vmatpush3.bf16.msra.mxu1 %v5013_v3  ;;  %5006 = vmatprep.subr.bf16.mxu0 %v5005_v8  ;;  %s639_s23 = scalar_lea.vmem %s6685_s21, %s5590_s29  ;;  %v5021_v15 = vpack.c.bf16 %v4256_v13, %v4255_v12  ;;  %v5025_v20 = vpack.c.bf16 %v4258_v17, %v4257_v16  ;;  %v4250_v24 = vld [vmem:[%s6686_s28 + $0x1] ss:$0 sm:$0xff]  ;;  %v4240_v27 = vld [vmem:[%s6686_s28] ss:$0 sm:$0xff]  ;;  %v4260_v47 = vld [vmem:[%s6686_s28 + $0x2] ss:$0 sm:$0xff]  ;;  %s644_s26 = scalar_lea.vmem %s6696_s3, %s5590_s29 }
  0x15   : > { %5018 = vmatprep.subr.bf16.mxu1 %v5017_v7  ;;  %5008 = vmatpush3.bf16.msra.mxu0 %v5005_v8  ;;  %v5596_v14 = vld [vmem:[%s639_s23] sm:$0xff]  ;;  %v5608_v18 = vld [vmem:[%s639_s23 + $0x8] sm:$0xff]  ;;  %v5610_v19 = vld [vmem:[%s639_s23 + $0x10] sm:$0xff]  ;;  %s649_s0 = scalar_lea.vmem %s6674_s20, %s5590_s29 }
  0x16   : > { %5010 = vmatprep.subr.bf16.mxu0 %v5009_v11  ;;  %4655 = vmatprep.mubr.msk.f32.mxu1 %vm800_vm0, %v5596_v14  ;;  %v5616_v21 = vld [vmem:[%s639_s23 + $0x18] sm:$0xff]  ;;  %vm5723_vm8 = vmand %vm735_vm6, %vm736_vm7  ;;  %v6297_v36 = vld [vmem:[%s644_s26] sm:$0xff] }
  0x17   : > { %4641 = vmatprep.mubr.msk.f32.mxu0 %vm800_vm0, %v5596_v14  ;;  %vm5770_vm11 = vmand %vm768_vm9, %vm769_vm10  ;;  %vm2325_vm13 = vcmp.ne.f32.partialorder %v6297_v36, 0.0 }
  0x18   : > { %5020 = vmatpush3.bf16.msra.mxu1 %v5017_v7  ;;  %v5737_v7 = vsel %vm5723_vm8, 1.0, %v5446_v32 }
  0x19   : > { %5012 = vmatpush3.bf16.msra.mxu0 %v5009_v11 }
  0x1a   : > { %5022 = vmatprep.subr.bf16.mxu0 %v5021_v15 }
  0x1b   : > { %4656 = vmatmul.mubr.msk.f32.vlgmr.msra.gmra.mrb[0].mxu1 %vm800_vm0, %v5608_v18 }
  0x1c   : > { %4658 = vmatprep.mubr.msk.f32.mxu1 %vm800_vm0, %v5610_v19  ;;  %4642 = vmatmul.mubr.msk.f32.vlgmr.msra.gmra.mrb[0].mxu0 %vm800_vm0, %v5608_v18 }
  0x1d   : > { %4644 = vmatprep.mubr.msk.f32.mxu0 %vm800_vm0, %v5610_v19  ;;  %5024 = vmatpush3.bf16.msra.mxu0 %v5021_v15 }
  0x1e   : > { %5026 = vmatprep.subr.bf16.mxu0 %v5025_v20 }
  0x1f   : > { %4659 = vmatmul.mubr.msk.f32.gmra.mrb[2].mxu1 %vm800_vm0, %v5616_v21 }
  0x20   : > { %4645 = vmatmul.mubr.msk.f32.gmra.mrb[2].mxu0 %vm800_vm0, %v5616_v21 }
  0x21   : > { %5028 = vmatpush3.bf16.msra.mxu0 %v5025_v20  ;;  %4669 = vmatprep.mubr.msk.f32.mxu0 %vm800_vm0, %v5596_v14  ;;  %v5779_v20 = vsel %vm5770_vm11, 1.0, %v5446_v32 }
  0x24   : > { %4670 = vmatmul.mubr.msk.f32.vlgmr.msra.gmra.mrb[4].mxu0 %vm800_vm0, %v5608_v18 }
  0x25   : > { %4672 = vmatprep.mubr.msk.f32.mxu0 %vm800_vm0, %v5610_v19 }
  0x28   : > { %4673 = vmatmul.mubr.msk.f32.gmra.mrb[6].mxu0 %vm800_vm0, %v5616_v21 }
  0xee   : > { %v4657_v26 = vpop.f32.mrb[0].mxu1 }
  0xef   : > { %v983_v28 = vadd.f32 %v4657_v26, %v4250_v24  ;;  %v977_v29 = vpop.f32.mrb[1].mxu1  ;;  %v4643_v30 = vpop.f32.mrb[0].mxu0 }
  0xf0   : > { %v978_v31 = vadd.f32 %v4250_v24, %v977_v29  ;;  %v879_v35 = vpop.f32.mrb[1].mxu0  ;;  %v885_v56 = vadd.f32 %v4643_v30, %v4240_v27 }
  0xf1   : > { %v5665_v37 = vadd.f32 %v4240_v27, %v879_v35 }
  0xf2   : > { %v5667_v38 = vpack.c.bf16 %v983_v28, %v978_v31  ;;  %v4660_v39 = vpop.f32.mrb[2].mxu1  ;;  %v1096_v63 = vmul.f32 %v5652_v33, %v885_v56  ;;  %v1266_v0 = vmul.f32 %v5657_v34, %v885_v56  ;;  %v1618_v16 = vmul.f32 %v5737_v7, %v885_v56 }
  0xf3   : > { %v993_v40 = vadd.f32 %v4660_v39, %v4250_v24  ;;  %v987_v41 = vpop.f32.mrb[3].mxu1  ;;  %v4646_v42 = vpop.f32.mrb[2].mxu0  ;;  %v1095_v43 = vmul.f32 %v5652_v33, %v5665_v37  ;;  %v1265_v44 = vmul.f32 %v5657_v34, %v5665_v37  ;;  %v1617_v12 = vmul.f32 %v5737_v7, %v5665_v37 }
  0xf4   : > { %5031 = vmatprep.subr.msk.bf16.mxu1 %vm5661_vm5, %v5667_v38  ;;  %5043 = vmatprep.subr.msk.bf16.mxu0 %vm5661_vm5, %v5667_v38  ;;  %v988_v45 = vadd.f32 %v4250_v24, %v987_v41  ;;  %v889_v46 = vpop.f32.mrb[3].mxu0  ;;  %v895_v62 = vadd.f32 %v4646_v42, %v4240_v27  ;;  %v1876_v24 = vmul.f32 %v5779_v20, %v5665_v37 }
  0xf5   : > { %5034 = vmatpush3.bf16.xpose.msk.msra.mxu1 %vm5661_vm5, %v5667_v38  ;;  %5046 = vmatpush3.bf16.xpose.msk.msra.mxu0 %vm5661_vm5, %v5667_v38  ;;  %v890_v57 = vadd.f32 %v4240_v27, %v889_v46  ;;  %v1877_v26 = vmul.f32 %v5779_v20, %v885_v56 }
  0xf6   : > { %v5688_v48 = vpack.c.bf16 %v993_v40, %v988_v45  ;;  %4683 = vmatprep.mubr.msk.f32.mxu1 %vm800_vm0, %v1095_v43  ;;  %4697 = vmatprep.mubr.msk.f32.mxu0 %vm800_vm0, %v1265_v44  ;;  %v1268_v6 = vmul.f32 %v5657_v34, %v895_v62  ;;  %v1098_v8 = vmul.f32 %v5652_v33, %v895_v62 }
  0xf7   : > { %v4671_v49 = vpop.f32.mrb[4].mxu0  ;;  %v1267_v2 = vmul.f32 %v5657_v34, %v890_v57  ;;  %v1097_v5 = vmul.f32 %v5652_v33, %v890_v57  ;;  %v1619_v17 = vmul.f32 %v5737_v7, %v890_v57  ;;  %v1620_v22 = vmul.f32 %v5737_v7, %v895_v62 }
  0xf8   : > { %5037 = vmatprep.subr.msk.bf16.mxu1 %vm5661_vm5, %v5688_v48  ;;  %5049 = vmatprep.subr.msk.bf16.mxu0 %vm5661_vm5, %v5688_v48  ;;  %v5698_v50 = vadd.f32 %v4671_v49, %v4260_v47  ;;  %v1075_v51 = vpop.f32.mrb[5].mxu0  ;;  %v1878_v27 = vmul.f32 %v5779_v20, %v890_v57  ;;  %v1879_v28 = vmul.f32 %v5779_v20, %v895_v62 }
  0xf9   : > { %v5700_v52 = vadd.f32 %v4260_v47, %v1075_v51 }
  0xfa   : > { %v1419_v53 = vmul.f32 %v5657_v34, %v5698_v50  ;;  %v1261_v10 = vmul.f32 %v5652_v33, %v5698_v50 }
  0xfb   : > { %v4674_v54 = vpop.f32.mrb[6].mxu0  ;;  %v1418_v55 = vmul.f32 %v5657_v34, %v5700_v52  ;;  %v1260_v9 = vmul.f32 %v5652_v33, %v5700_v52 }
  0xfc   : > { %v1085_v58 = vpop.f32.mrb[7].mxu0  ;;  %v5712_v59 = vadd.f32 %v4674_v54, %v4260_v47 }
  0xfd   : > { %5040 = vmatpush3.bf16.xpose.msk.msra.mxu1 %vm5661_vm5, %v5688_v48  ;;  %5052 = vmatpush3.bf16.xpose.msk.msra.mxu0 %vm5661_vm5, %v5688_v48  ;;  %v5714_v60 = vadd.f32 %v4260_v47, %v1085_v58  ;;  %v5053_v61 = vpack.c.bf16 %v1419_v53, %v1418_v55  ;;  %v5758_v13 = vpack.c.bf16 %v1261_v10, %v1260_v9 }
  0xfe   : > { %5071 = vmatprep.subr.msk.bf16.mxu0 %vm5661_vm5, %v5667_v38  ;;  %v1421_v4 = vmul.f32 %v5657_v34, %v5712_v59 }
  0xff   : > { %5054 = vmatprep.subr.bf16.mxu1 %v5053_v61  ;;  %v1420_v3 = vmul.f32 %v5657_v34, %v5714_v60 }
 0x101   : > { %v5057_v11 = vpack.c.bf16 %v1421_v4, %v1420_v3 }
 0x104   : > { %4684 = vmatmul.mubr.msk.f32.vlgmr.msra.gmra.mrb[4].mxu1 %vm800_vm0, %v1096_v63  ;;  %4698 = vmatmul.mubr.msk.f32.vlgmr.msra.gmra.mrb[8].mxu0 %vm800_vm0, %v1266_v0 }
 0x105   : > { %5074 = vmatpush3.bf16.xpose.msk.msra.mxu0 %vm5661_vm5, %v5667_v38  ;;  %4700 = vmatprep.mubr.msk.f32.mxu0 %vm800_vm0, %v1267_v2 }
 0x106   : > { %5077 = vmatprep.subr.msk.bf16.mxu0 %vm5661_vm5, %v5688_v48  ;;  %4686 = vmatprep.mubr.msk.f32.mxu1 %vm800_vm0, %v1097_v5 }
 0x107   : > { %5056 = vmatpush3.bf16.msra.mxu1 %v5053_v61 }
 0x108   : > { %4701 = vmatmul.mubr.msk.f32.gmra.mrb[10].mxu0 %vm800_vm0, %v1268_v6  ;;  %4687 = vmatmul.mubr.msk.f32.gmra.mrb[6].mxu1 %vm800_vm0, %v1098_v8 }
 0x109   : > { %4739 = vmatprep.mubr.msk.f32.mxu0 %vm800_vm0, %v1617_v12  ;;  %5058 = vmatprep.subr.bf16.mxu1 %v5057_v11 }
 0x10b   : > { %5060 = vmatpush3.bf16.msra.mxu1 %v5057_v11 }
 0x10c   : > { %5062 = vmatprep.subr.bf16.mxu1 %v5758_v13 }
 0x10d   : > { %5080 = vmatpush3.bf16.xpose.msk.msra.mxu0 %vm5661_vm5, %v5688_v48 }
 0x10e   : > { %5091 = vmatprep.subr.msk.bf16.mxu0 %vm5661_vm5, %v5667_v38 }
 0x114   : > { %4740 = vmatmul.mubr.msk.f32.vlgmr.msra.gmra.mrb[12].mxu0 %vm800_vm0, %v1618_v16 }
 0x115   : > { %4742 = vmatprep.mubr.msk.f32.mxu0 %vm800_vm0, %v1619_v17  ;;  %5094 = vmatpush3.bf16.xpose.msk.msra.mxu0 %vm5661_vm5, %v5667_v38 }
 0x116   : > { %5097 = vmatprep.subr.msk.bf16.mxu0 %vm5661_vm5, %v5688_v48 }
 0x118   : > { %4743 = vmatmul.mubr.msk.f32.gmra.mrb[14].mxu0 %vm800_vm0, %v1620_v22 }
 0x119   : > { %4767 = vmatprep.mubr.msk.f32.mxu0 %vm800_vm0, %v1876_v24 }
 0x11d   : > { %5100 = vmatpush3.bf16.xpose.msk.msra.mxu0 %vm5661_vm5, %v5688_v48 }
 0x124   : > { %4768 = vmatmul.mubr.msk.f32.vlgmr.msra.gmra.mrb[16].mxu0 %vm800_vm0, %v1877_v26 }
 0x125   : > { %4770 = vmatprep.mubr.msk.f32.mxu0 %vm800_vm0, %v1878_v27 }
 0x128   : > { %4771 = vmatmul.mubr.msk.f32.gmra.mrb[18].mxu0 %vm800_vm0, %v1879_v28 }
 0x1d7   : > { %v4685_v29 = vpop.f32.mrb[4].mxu1  ;;  %v4699_v30 = vpop.f32.mrb[8].mxu0 }
 0x1d8   : > { %v1367_v31 = vmul.f32 0.35355338, %v4699_v30  ;;  %v1189_v32 = vpop.f32.mrb[5].mxu1  ;;  %v1347_v35 = vpop.f32.mrb[9].mxu0  ;;  %v1209_v49 = vmul.f32 0.35355338, %v4685_v29 }
 0x1d9   : > { %v1366_v37 = vmul.f32 0.35355338, %v1347_v35  ;;  %v1208_v41 = vmul.f32 0.35355338, %v1189_v32 }
 0x1da   : > { %v5811_v44 = vsel %vm5642_vm4, %v1367_v31, -1e+09  ;;  %v5835_v62 = vsel %vm5642_vm4, %v1209_v49, -1e+09 }
 0x1db   : > { %v4702_v38 = vpop.f32.mrb[10].mxu0  ;;  %v5805_v39 = vsel %vm674_vm3, %v1366_v37, -1e+09  ;;  %v4688_v40 = vpop.f32.mrb[6].mxu1  ;;  %v1377_v51 = vsel %vm800_vm0, %v5811_v44, -inf  ;;  %v1219_v3 = vsel %vm800_vm0, %v5835_v62, -inf }
 0x1dc   : > { %v1357_v42 = vpop.f32.mrb[11].mxu0  ;;  %v1374_v43 = vsel %vm800_vm0, %v5805_v39, -inf  ;;  %v1369_v45 = vmul.f32 0.35355338, %v4702_v38  ;;  %v1199_v47 = vpop.f32.mrb[7].mxu1 }
 0x1dd   : > { %v1368_v46 = vmul.f32 0.35355338, %v1357_v42  ;;  %1375 = vmax.xlane.f32.xlu0 %v1374_v43  ;;  %v1210_v54 = vmul.f32 0.35355338, %v1199_v47  ;;  %v5827_v56 = vsel %vm674_vm3, %v1208_v41, -1e+09 }
 0x1de   : > { %v5823_v55 = vsel %vm5770_vm11, %v1369_v45, -1e+09  ;;  %v1216_v58 = vsel %vm800_vm0, %v5827_v56, -inf  ;;  %v1211_v61 = vmul.f32 0.35355338, %v4688_v40 }
 0x1df   : > { %v5815_v48 = vsel %vm5723_vm8, %v1368_v46, -1e+09  ;;  %v1383_v57 = vsel %vm800_vm0, %v5823_v55, -inf  ;;  %v5839_v63 = vsel %vm5723_vm8, %v1210_v54, -1e+09 }
 0x1e0   : > { %v1380_v53 = vsel %vm800_vm0, %v5815_v48, -inf  ;;  %v1222_v4 = vsel %vm800_vm0, %v5839_v63, -inf  ;;  %v5847_v8 = vsel %vm5770_vm11, %v1211_v61, -1e+09 }
 0x1e1   : > { %1378 = vmax.xlane.f32.xlu0 %v1377_v51  ;;  %1381 = vmax.xlane.f32.xlu1 %v1380_v53  ;;  %v1225_v12 = vsel %vm800_vm0, %v5847_v8, -inf }
 0x1e5   : > { %1384 = vmax.xlane.f32.xlu1 %v1383_v57  ;;  %1217 = vmax.xlane.f32.xlu0 %v1216_v58 }
 0x1e7   : > { %v4741_v0 = vpop.f32.mrb[12].mxu0 }
 0x1e8   : > { %v1699_v2 = vpop.f32.mrb[13].mxu0  ;;  %v1719_v5 = vmul.f32 0.35355338, %v4741_v0 }
 0x1e9   : > { %v1718_v6 = vmul.f32 0.35355338, %v1699_v2  ;;  %1220 = vmax.xlane.f32.xlu1 %v1219_v3  ;;  %1223 = vmax.xlane.f32.xlu0 %v1222_v4 }
 0x1ea   : > { %v5859_v24 = vsel %vm5642_vm4, %v1719_v5, -1e+09 }
 0x1eb   : > { %v4744_v9 = vpop.f32.mrb[14].mxu0  ;;  %v5851_v10 = vsel %vm674_vm3, %v1718_v6, -1e+09  ;;  %v1729_v27 = vsel %vm800_vm0, %v5859_v24, -inf }
 0x1ec   : > { %v1709_v11 = vpop.f32.mrb[15].mxu0  ;;  %v1726_v16 = vsel %vm800_vm0, %v5851_v10, -inf  ;;  %v1721_v17 = vmul.f32 0.35355338, %v4744_v9 }
 0x1ed   : > { %v1720_v22 = vmul.f32 0.35355338, %v1709_v11  ;;  %1226 = vmax.xlane.f32.xlu1 %v1225_v12  ;;  %1727 = vmax.xlane.f32.xlu0 %v1726_v16 }
 0x1ee   : > { %v5871_v29 = vsel %vm5770_vm11, %v1721_v17, -1e+09 }
 0x1ef   : > { %v5863_v26 = vsel %vm5723_vm8, %v1720_v22, -1e+09  ;;  %v1735_v30 = vsel %vm800_vm0, %v5871_v29, -inf }
 0x1f0   : > { %v1732_v28 = vsel %vm800_vm0, %v5863_v26, -inf }
 0x1f1   : > { %1730 = vmax.xlane.f32.xlu1 %v1729_v27  ;;  %1733 = vmax.xlane.f32.xlu0 %v1732_v28 }
 0x1f5   : > { %1736 = vmax.xlane.f32.xlu1 %v1735_v30 }
 0x1f7   : > { %v4769_v31 = vpop.f32.mrb[16].mxu0 }
 0x1f8   : > { %v1978_v32 = vmul.f32 0.35355338, %v4769_v31  ;;  %v1958_v35 = vpop.f32.mrb[17].mxu0 }
 0x1f9   : > { %v1977_v37 = vmul.f32 0.35355338, %v1958_v35 }
 0x1fa   : > { %v5877_v38 = vsel %vm5642_vm4, %v1978_v32, -1e+09 }
 0x1fb   : > { %v4772_v40 = vpop.f32.mrb[18].mxu0  ;;  %v1988_v41 = vsel %vm800_vm0, %v5877_v38, -inf  ;;  %v5883_v42 = vsel %vm674_vm3, %v1977_v37, -1e+09 }
 0x1fc   : > { %v1980_v43 = vmul.f32 0.35355338, %v4772_v40  ;;  %v1968_v45 = vpop.f32.mrb[19].mxu0  ;;  %1989 = vmax.xlane.f32.xlu1 %v1988_v41  ;;  %v1985_v46 = vsel %vm800_vm0, %v5883_v42, -inf }
 0x1fd   : > { %v1979_v47 = vmul.f32 0.35355338, %v1968_v45  ;;  %1986 = vmax.xlane.f32.xlu0 %v1985_v46 }
 0x1fe   : > { %v5889_v25 = vsel %vm5770_vm11, %v1980_v43, -1e+09 }
 0x1ff   : > { %v1994_v49 = vsel %vm800_vm0, %v5889_v25, -inf  ;;  %v5895_v23 = vsel %vm5723_vm8, %v1979_v47, -1e+09 }
 0x200   : > { %1995 = vmax.xlane.f32.xlu1 %v1994_v49  ;;  %v1991_v51 = vsel %vm800_vm0, %v5895_v23, -inf }
 0x201   : > { %1992 = vmax.xlane.f32.xlu0 %v1991_v51 }
 0x26a   : > { %v1376_v53 = vpop.xlane.xlu0 %1375 }
 0x26b   : > { %v1386_v54 = vsub.f32 %v5805_v39, %v1376_v53 }
 0x26d   : > { %v1390_v57 = vmul.f32 1.442695, %v1386_v54 }
 0x26e   : > { %v1379_v58 = vpop.xlane.xlu0 %1378  ;;  %v1382_v15 = vpop.xlane.xlu1 %1381 }
 0x26f   : > { %5286 = vpow2.f32 %v1390_v57  ;;  %v1387_v61 = vsub.f32 %v5811_v44, %v1379_v58  ;;  %v1388_v0 = vsub.f32 %v5815_v48, %v1382_v15 }
 0x271   : > { %v1392_v2 = vmul.f32 1.442695, %v1387_v61  ;;  %v1394_v1 = vmul.f32 1.442695, %v1388_v0 }
 0x272   : > { %v1385_v3 = vpop.xlane.xlu1 %1384  ;;  %v1218_v4 = vpop.xlane.xlu0 %1217 }
 0x273   : > { %5288 = vpow2.f32 %v1392_v2  ;;  %v1389_v5 = vsub.f32 %v5823_v55, %v1385_v3  ;;  %v1228_v6 = vsub.f32 %v5827_v56, %v1218_v4 }
 0x274   : > { %5290 = vpow2.f32 %v1394_v1 }
 0x275   : > { %v1396_v9 = vmul.f32 1.442695, %v1389_v5  ;;  %v1232_v39 = vmul.f32 1.442695, %v1228_v6 }
 0x276   : > { %v1221_v11 = vpop.xlane.xlu1 %1220  ;;  %v1224_v12 = vpop.xlane.xlu0 %1223 }
 0x277   : > { %5292 = vpow2.f32 %v1396_v9  ;;  %v1229_v16 = vsub.f32 %v5835_v62, %v1221_v11  ;;  %v1230_v44 = vsub.f32 %v5839_v63, %v1224_v12 }
 0x278   : > { %5294 = vpow2.f32 %v1232_v39 }
 0x279   : > { %v5906_v48 = vpop.eup %5286  ;;  %v1234_v17 = vmul.f32 1.442695, %v1229_v16  ;;  %v1236_v22 = vmul.f32 1.442695, %v1230_v44 }
 0x27a   : > { %v1227_v27 = vpop.xlane.xlu1 %1226  ;;  %v1728_v28 = vpop.xlane.xlu0 %1727  ;;  %v1398_v55 = vsel %vm800_vm0, %v5906_v48, 0.0 }
 0x27b   : > { %5296 = vpow2.f32 %v1234_v17  ;;  %v1231_v56 = vsub.f32 %v5847_v8, %v1227_v27  ;;  %v1738_v30 = vsub.f32 %v5851_v10, %v1728_v28  ;;  %1399 = vadd.xlane.f32.xlu0 %v1398_v55 }
 0x27c   : > { %5298 = vpow2.f32 %v1236_v22 }
 0x27d   : > { %v5912_v62 = vpop.eup %5288  ;;  %v1238_v63 = vmul.f32 1.442695, %v1231_v56  ;;  %v1742_v31 = vmul.f32 1.442695, %v1738_v30 }
 0x27e   : > { %v5914_v32 = vpop.eup %5290  ;;  %v1731_v35 = vpop.xlane.xlu1 %1730  ;;  %v1401_v40 = vsel %vm800_vm0, %v5912_v62, 0.0 }
 0x27f   : > { %v1734_v37 = vpop.xlane.xlu0 %1733  ;;  %5300 = vpow2.f32 %v1238_v63  ;;  %v1739_v41 = vsub.f32 %v5859_v24, %v1731_v35  ;;  %1402 = vadd.xlane.f32.xlu1 %v1401_v40  ;;  %v1404_v10 = vsel %vm800_vm0, %v5914_v32, 0.0 }
 0x280   : > { %v1740_v8 = vsub.f32 %v5863_v26, %v1734_v37  ;;  %5302 = vpow2.f32 %v1742_v31  ;;  %1405 = vadd.xlane.f32.xlu0 %v1404_v10 }
 0x281   : > { %v5922_v43 = vpop.eup %5292  ;;  %v1744_v45 = vmul.f32 1.442695, %v1739_v41 }
 0x282   : > { %v1746_v46 = vmul.f32 1.442695, %v1740_v8  ;;  %v5924_v47 = vpop.eup %5294  ;;  %v1737_v49 = vpop.xlane.xlu1 %1736  ;;  %v1407_v51 = vsel %vm800_vm0, %v5922_v43, 0.0 }
 0x283   : > { %5304 = vpow2.f32 %v1744_v45  ;;  %v1741_v24 = vsub.f32 %v5871_v29, %v1737_v49  ;;  %1408 = vadd.xlane.f32.xlu1 %v1407_v51  ;;  %v1240_v26 = vsel %vm800_vm0, %v5924_v47, 0.0 }
 0x284   : > { %5306 = vpow2.f32 %v1746_v46  ;;  %1241 = vadd.xlane.f32.xlu0 %v1240_v26  ;;  %v1262_v26 = vmul.f32 %v5652_v33, %v5714_v60 }
 0x285   : > { %v5931_v53 = vpop.eup %5296  ;;  %v1748_v54 = vmul.f32 1.442695, %v1741_v24 }
 0x286   : > { %v5933_v57 = vpop.eup %5298  ;;  %v1243_v58 = vsel %vm800_vm0, %v5931_v53, 0.0 }
 0x287   : > { %5308 = vpow2.f32 %v1748_v54  ;;  %1244 = vadd.xlane.f32.xlu1 %v1243_v58  ;;  %v1246_v15 = vsel %vm800_vm0, %v5933_v57, 0.0  ;;  %v1263_v54 = vmul.f32 %v5652_v33, %v5712_v59 }
 0x288   : > { %1247 = vadd.xlane.f32.xlu0 %v1246_v15 }
 0x289   : > { %v5939_v29 = vpop.eup %5300  ;;  %v1990_v61 = vpop.xlane.xlu1 %1989 }
 0x28a   : > { %v5941_v0 = vpop.eup %5302  ;;  %v1998_v2 = vsub.f32 %v5877_v38, %v1990_v61  ;;  %v1987_v1 = vpop.xlane.xlu0 %1986  ;;  %v1249_v3 = vsel %vm800_vm0, %v5939_v29, 0.0 }
 0x28b   : > { %v1997_v4 = vsub.f32 %v5883_v42, %v1987_v1  ;;  %1250 = vadd.xlane.f32.xlu1 %v1249_v3  ;;  %v1750_v5 = vsel %vm800_vm0, %v5941_v0, 0.0  ;;  %v5065_v3 = vpack.c.bf16 %v1263_v54, %v1262_v26  ;;  %v2136_v26 = vld [vmem:[%s6695_s24 + $0x10] sm:$0xff]  ;;  %v2137_v54 = vld [vmem:[%s6695_s24 + $0x18] sm:$0xff] }
 0x28c   : > { %v2003_v6 = vmul.f32 1.442695, %v1998_v2  ;;  %1751 = vadd.xlane.f32.xlu0 %v1750_v5  ;;  %v1771_v5 = vmul.f32 %v5737_v7, %v5698_v50 }
 0x28d   : > { %v5949_v9 = vpop.eup %5304  ;;  %v2001_v39 = vmul.f32 1.442695, %v1997_v4  ;;  %v1996_v11 = vpop.xlane.xlu1 %1995  ;;  %v1770_v4 = vmul.f32 %v5737_v7, %v5700_v52 }
 0x28e   : > { %v5951_v12 = vpop.eup %5306  ;;  %5310 = vpow2.f32 %v2003_v6  ;;  %v2000_v38 = vsub.f32 %v5889_v25, %v1996_v11  ;;  %v1993_v16 = vpop.xlane.xlu0 %1992  ;;  %v1753_v44 = vsel %vm800_vm0, %v5949_v9, 0.0 }
 0x28f   : > { %5312 = vpow2.f32 %v2001_v39  ;;  %v1999_v42 = vsub.f32 %v5895_v23, %v1993_v16  ;;  %1754 = vadd.xlane.f32.xlu1 %v1753_v44  ;;  %v1756_v17 = vsel %vm800_vm0, %v5951_v12, 0.0  ;;  %v5081_v16 = vpack.c.bf16 %v1771_v5, %v1770_v4 }
 0x290   : > { %v2007_v22 = vmul.f32 1.442695, %v2000_v38  ;;  %1757 = vadd.xlane.f32.xlu0 %v1756_v17  ;;  %v1772_v44 = vmul.f32 %v5737_v7, %v5714_v60 }
 0x291   : > { %v5959_v27 = vpop.eup %5308  ;;  %v2005_v28 = vmul.f32 1.442695, %v1999_v42 }
 0x292   : > { %5314 = vpow2.f32 %v2007_v22  ;;  %v1759_v25 = vsel %vm800_vm0, %v5959_v27, 0.0 }
 0x293   : > { %5316 = vpow2.f32 %v2005_v28  ;;  %1760 = vadd.xlane.f32.xlu1 %v1759_v25  ;;  %v2029_v25 = vmul.f32 %v5779_v20, %v5700_v52  ;;  %v2032_v52 = vmul.f32 %v5779_v20, %v5712_v59 }
 0x298   : > { %v5963_v55 = vpop.eup %5310 }
 0x299   : > { %v5965_v56 = vpop.eup %5312  ;;  %v2012_v23 = vsel %vm800_vm0, %v5963_v55, 0.0 }
 0x29a   : > { %2013 = vadd.xlane.f32.xlu1 %v2012_v23  ;;  %v2009_v30 = vsel %vm800_vm0, %v5965_v56, 0.0  ;;  %v2030_v23 = vmul.f32 %v5779_v20, %v5698_v50 }
 0x29b   : > { %2010 = vadd.xlane.f32.xlu0 %v2009_v30 }
 0x29c   : > { %v5971_v63 = vpop.eup %5314 }
 0x29d   : > { %v5973_v31 = vpop.eup %5316  ;;  %v2018_v35 = vsel %vm800_vm0, %v5971_v63, 0.0 }
 0x29e   : > { %2019 = vadd.xlane.f32.xlu1 %v2018_v35  ;;  %v2015_v37 = vsel %vm800_vm0, %v5973_v31, 0.0 }
 0x29f   : > { %2016 = vadd.xlane.f32.xlu0 %v2015_v37 }
 0x308   : > { %v1400_v40 = vpop.xlane.xlu0 %1399 }
 0x309   : > { %5318 = vrcp.f32 %v1400_v40  ;;  %v2031_v40 = vmul.f32 %v5779_v20, %v5714_v60  ;;  %v2134_v60 = vld [vmem:[%s6695_s24] sm:$0xff] }
 0x30c   : > { %v1403_v41 = vpop.xlane.xlu1 %1402 }
 0x30d   : > { %5320 = vrcp.f32 %v1403_v41  ;;  %v1406_v8 = vpop.xlane.xlu0 %1405 }
 0x30e   : > { %5322 = vrcp.f32 %v1406_v8 }
 0x310   : > { %v1409_v10 = vpop.xlane.xlu1 %1408 }
 0x311   : > { %5324 = vrcp.f32 %v1409_v10  ;;  %v1242_v45 = vpop.xlane.xlu0 %1241 }
 0x312   : > { %5326 = vrcp.f32 %v1242_v45  ;;  %v5105_v45 = vpack.c.bf16 %v2032_v52, %v2031_v40 }
 0x313   : > { %v5319_v46 = vpop.eup %5318 }
 0x314   : > { %v1245_v49 = vpop.xlane.xlu1 %1244  ;;  %v1414_v51 = vmul.f32 %v5319_v46, %v5906_v48 }
 0x315   : > { %5328 = vrcp.f32 %v1245_v49  ;;  %v1248_v24 = vpop.xlane.xlu0 %1247 }
 0x316   : > { %5330 = vrcp.f32 %v1248_v24  ;;  %4711 = vmatprep.mubr.msk.f32.mxu1 %vm800_vm0, %v1414_v51 }
 0x317   : > { %v5321_v58 = vpop.eup %5320 }
 0x318   : > { %v5323_v15 = vpop.eup %5322  ;;  %v1415_v61 = vmul.f32 %v5321_v58, %v5912_v62  ;;  %v1251_v2 = vpop.xlane.xlu1 %1250 }
 0x319   : > { %5332 = vrcp.f32 %v1251_v2  ;;  %v1752_v1 = vpop.xlane.xlu0 %1751  ;;  %v1416_v48 = vmul.f32 %v5323_v15, %v5914_v32 }
 0x31a   : > { %5334 = vrcp.f32 %v1752_v1  ;;  %4712 = vmatmul.mubr.msk.f32.vlgmr.msra.gmra.mrb[8].mxu1 %vm800_vm0, %v1415_v61  ;;  %v5113_v61 = vpack.c.bf16 %v2137_v54, %v2136_v26  ;;  %v2331_v54 = vld [vmem:[%s6662_s8 + $0x10] sm:$0xff] }
 0x31b   : > { %v5325_v6 = vpop.eup %5324  ;;  %5064 = vmatpush3.bf16.msra.mxu1 %v5758_v13  ;;  %4714 = vmatprep.mubr.msk.f32.mxu1 %vm800_vm0, %v1416_v48  ;;  %v1773_v13 = vmul.f32 %v5737_v7, %v5712_v59  ;;  %v2135_v59 = vld [vmem:[%s6695_s24 + $0x8] sm:$0xff] }
 0x31c   : > { %v5327_v62 = vpop.eup %5326  ;;  %5066 = vmatprep.subr.bf16.mxu1 %v5065_v3  ;;  %v1755_v39 = vpop.xlane.xlu1 %1754  ;;  %v1417_v32 = vmul.f32 %v5325_v6, %v5922_v43  ;;  %v5109_v51 = vpack.c.bf16 %v2135_v59, %v2134_v60  ;;  %v4329_v59 = vld [vmem:[%s6662_s8 + $0x20] sm:$0xff] }
 0x31d   : > { %5336 = vrcp.f32 %v1755_v39  ;;  %v1758_v11 = vpop.xlane.xlu0 %1757  ;;  %v1256_v38 = vmul.f32 %v5327_v62, %v5924_v47  ;;  %v5085_v28 = vpack.c.bf16 %v1773_v13, %v1772_v44 }
 0x31e   : > { %5338 = vrcp.f32 %v1758_v11  ;;  %4715 = vmatmul.mubr.msk.f32.gmra.mrb[10].mxu1 %vm800_vm0, %v1417_v32 }
 0x31f   : > { %v5329_v42 = vpop.eup %5328  ;;  %5068 = vmatpush3.bf16.msra.mxu1 %v5065_v3  ;;  %4725 = vmatprep.mubr.msk.f32.mxu1 %vm800_vm0, %v1256_v38 }
 0x320   : > { %v5331_v17 = vpop.eup %5330  ;;  %v1257_v43 = vmul.f32 %v5329_v42, %v5931_v53  ;;  %5082 = vmatprep.subr.bf16.mxu1 %v5081_v16  ;;  %v1761_v22 = vpop.xlane.xlu1 %1760 }
 0x321   : > { %5340 = vrcp.f32 %v1761_v22  ;;  %v1258_v47 = vmul.f32 %v5331_v17, %v5933_v57  ;;  %v5101_v57 = vpack.c.bf16 %v2030_v23, %v2029_v25 }
 0x322   : > { %4726 = vmatmul.mubr.msk.f32.vlgmr.msra.gmra.mrb[8].mxu1 %vm800_vm0, %v1257_v43 }
 0x323   : > { %v5333_v30 = vpop.eup %5332  ;;  %5084 = vmatpush3.bf16.msra.mxu1 %v5081_v16  ;;  %4728 = vmatprep.mubr.msk.f32.mxu1 %vm800_vm0, %v1258_v47 }
 0x324   : > { %v5335_v35 = vpop.eup %5334  ;;  %5086 = vmatprep.subr.bf16.mxu1 %v5085_v28  ;;  %v1259_v53 = vmul.f32 %v5333_v30, %v5939_v29 }
 0x325   : > { %v1766_v37 = vmul.f32 %v5335_v35, %v5941_v0 }
 0x326   : > { %4729 = vmatmul.mubr.msk.f32.gmra.mrb[10].mxu1 %vm800_vm0, %v1259_v53 }
 0x327   : > { %v5337_v50 = vpop.eup %5336  ;;  %5088 = vmatpush3.bf16.msra.mxu1 %v5085_v28  ;;  %v2014_v41 = vpop.xlane.xlu1 %2013  ;;  %4753 = vmatprep.mubr.msk.f32.mxu1 %vm800_vm0, %v1766_v37 }
 0x328   : > { %v5339_v8 = vpop.eup %5338  ;;  %v1767_v10 = vmul.f32 %v5337_v50, %v5949_v9  ;;  %5342 = vrcp.f32 %v2014_v41  ;;  %5102 = vmatprep.subr.bf16.mxu1 %v5101_v57  ;;  %v2011_v29 = vpop.xlane.xlu0 %2010 }
 0x329   : > { %5344 = vrcp.f32 %v2011_v29  ;;  %v1768_v0 = vmul.f32 %v5339_v8, %v5951_v12 }
 0x32a   : > { %4754 = vmatmul.mubr.msk.f32.vlgmr.msra.gmra.mrb[8].mxu1 %vm800_vm0, %v1767_v10 }
 0x32b   : > { %v5341_v46 = vpop.eup %5340  ;;  %5104 = vmatpush3.bf16.msra.mxu1 %v5101_v57  ;;  %v2020_v9 = vpop.xlane.xlu1 %2019  ;;  %4756 = vmatprep.mubr.msk.f32.mxu1 %vm800_vm0, %v1768_v0 }
 0x32c   : > { %5346 = vrcp.f32 %v2020_v9  ;;  %5106 = vmatprep.subr.bf16.mxu1 %v5105_v45  ;;  %v2017_v49 = vpop.xlane.xlu0 %2016  ;;  %v1769_v12 = vmul.f32 %v5341_v46, %v5959_v27  ;;  %v2329_v46 = vld [vmem:[%s6662_s8] sm:$0xff] }
 0x32d   : > { %5348 = vrcp.f32 %v2017_v49  ;;  %v2330_v49 = vld [vmem:[%s6662_s8 + $0x8] sm:$0xff] }
 0x32e   : > { %4757 = vmatmul.mubr.msk.f32.gmra.mrb[10].mxu1 %vm800_vm0, %v1769_v12  ;;  %v4331_v12 = vld [vmem:[%s6662_s8 + $0x30] sm:$0xff] }
 0x32f   : > { %5108 = vmatpush3.bf16.msra.mxu1 %v5105_v45  ;;  %v4330_v45 = vld [vmem:[%s6662_s8 + $0x28] sm:$0xff] }
 0x330   : > { %5110 = vmatprep.subr.bf16.mxu1 %v5109_v51  ;;  %v5125_v9 = vpack.c.bf16 %v4330_v45, %v4329_v59 }
 0x332   : > { %v5343_v24 = vpop.eup %5342 }
 0x333   : > { %v5345_v58 = vpop.eup %5344  ;;  %v2026_v27 = vmul.f32 %v5343_v24, %v5963_v55  ;;  %v5117_v24 = vpack.c.bf16 %v2330_v49, %v2329_v46 }
 0x334   : > { %v2025_v15 = vmul.f32 %v5345_v58, %v5965_v56  ;;  %v2332_v58 = vld [vmem:[%s6662_s8 + $0x18] sm:$0xff] }
 0x335   : > { %5118 = vmatprep.subr.bf16.mxu0 %v5117_v24 }
 0x336   : > { %v5347_v2 = vpop.eup %5346  ;;  %4781 = vmatprep.mubr.msk.f32.mxu1 %vm800_vm0, %v2025_v15  ;;  %v5121_v15 = vpack.c.bf16 %v2332_v58, %v2331_v54  ;;  %5120 = vmatpush3.bf16.msra.mxu0 %v5117_v24  ;;  %v4344_v24 = vld [vmem:[%s6663_s9 + $0x2] ss:$0 sm:$0xff] }
 0x337   : > { %v5349_v1 = vpop.eup %5348  ;;  %4782 = vmatmul.mubr.msk.f32.vlgmr.msra.gmra.mrb[8].mxu1 %vm800_vm0, %v2026_v27  ;;  %v2028_v3 = vmul.f32 %v5347_v2, %v5971_v63  ;;  %v4317_v63 = vld [vmem:[%s6659_s5] ss:$0 sm:$0xff] }
 0x338   : > { %v2027_v48 = vmul.f32 %v5349_v1, %v5973_v31  ;;  %5112 = vmatpush3.bf16.msra.mxu1 %v5109_v51  ;;  %v4332_v51 = vld [vmem:[%s6662_s8 + $0x38] sm:$0xff]  ;;  %5122 = vmatprep.subr.bf16.mxu0 %v5121_v15  ;;  %v4339_v27 = vld [vmem:[%s6662_s8 + $0x40] sm:$0xff] }
 0x339   : > { %5114 = vmatprep.subr.bf16.mxu1 %v5113_v61  ;;  %v5129_v26 = vpack.c.bf16 %v4332_v51, %v4331_v12 }
 0x33a   : > { %4784 = vmatprep.mubr.msk.f32.mxu1 %vm800_vm0, %v2027_v48  ;;  %5124 = vmatpush3.bf16.msra.mxu0 %v5121_v15 }
 0x33b   : > { %4785 = vmatmul.mubr.msk.f32.gmra.mrb[10].mxu1 %vm800_vm0, %v2028_v3 }
 0x33c   : > { %5116 = vmatpush3.bf16.msra.mxu1 %v5113_v61  ;;  %v4340_v61 = vld [vmem:[%s6662_s8 + $0x48] sm:$0xff] }
 0x33d   : > { %5126 = vmatprep.subr.bf16.mxu1 %v5125_v9  ;;  %v5133_v2 = vpack.c.bf16 %v4340_v61, %v4339_v27 }
 0x33f   : > { %5134 = vmatprep.subr.bf16.mxu0 %v5133_v2 }
 0x40a   : > { %v4783_v56 = vpop.f32.mrb[8].mxu1 }
 0x40b   : > { %v2111_v55 = vpop.f32.mrb[9].mxu1 }
 0x40c   : > { %4795 = vmatprep.mubr.msk.f32.mxu1 %vm800_vm0, %v2111_v55 }
 0x40d   : > { %4796 = vmatmul.mubr.msk.f32.vlgmr.msra.gmra.mrb[12].mxu1 %vm800_vm0, %v4783_v56 }
 0x40e   : > { %v4786_v4 = vpop.f32.mrb[10].mxu1  ;;  %5128 = vmatpush3.bf16.msra.mxu1 %v5125_v9 }
 0x40f   : > { %v2121_v5 = vpop.f32.mrb[11].mxu1  ;;  %5130 = vmatprep.subr.bf16.mxu1 %v5129_v26 }
 0x410   : > { %4798 = vmatprep.mubr.msk.f32.mxu1 %vm800_vm0, %v2121_v5 }
 0x411   : > { %4799 = vmatmul.mubr.msk.f32.gmra.mrb[14].mxu1 %vm800_vm0, %v4786_v4 }
 0x412   : > { %5132 = vmatpush3.bf16.msra.mxu1 %v5129_v26 }
 0x4e0   : > { %v4797_v31 = vpop.f32.mrb[12].mxu1 }
 0x4e1   : > { %v2229_v6 = vadd.f32 %v4797_v31, %v4317_v63  ;;  %v2223_v62 = vpop.f32.mrb[13].mxu1 }
 0x4e2   : > { %v2224_v39 = vadd.f32 %v4317_v63, %v2223_v62 }
 0x4e3   : > { %v2243_v32 = vadd.f32 %v2229_v6, %v5608_v18 }
 0x4e4   : > { %v4800_v11 = vpop.f32.mrb[14].mxu1  ;;  %v2242_v38 = vadd.f32 %v2224_v39, %v5596_v14 }
 0x4e5   : > { %v2239_v16 = vadd.f32 %v4800_v11, %v4317_v63  ;;  %v2233_v44 = vpop.f32.mrb[15].mxu1  ;;  %v2251_v13 = vsel %vm800_vm0, %v2243_v32, 0.0  ;;  %v4322_v11 = vld [vmem:[%s6660_s6] ss:$0 sm:$0xff] }
 0x4e6   : > { %v2234_v42 = vadd.f32 %v4317_v63, %v2233_v44  ;;  %2252 = vadd.xlane.f32.xlu1 %v2251_v13  ;;  %v2248_v17 = vsel %vm800_vm0, %v2242_v38, 0.0  ;;  %v4323_v13 = vld [vmem:[%s6661_s7] ss:$0 sm:$0xff] }
 0x4e7   : > { %2249 = vadd.xlane.f32.xlu0 %v2248_v17  ;;  %v2245_v43 = vadd.f32 %v2239_v16, %v5616_v21 }
 0x4e8   : > { %v2244_v22 = vadd.f32 %v2234_v42, %v5610_v19 }
 0x4e9   : > { %v2257_v47 = vsel %vm800_vm0, %v2245_v43, 0.0 }
 0x4ea   : > { %2258 = vadd.xlane.f32.xlu1 %v2257_v47  ;;  %v2254_v18 = vsel %vm800_vm0, %v2244_v22, 0.0  ;;  %v4342_v47 = vld [vmem:[%s6662_s8 + $0x58] sm:$0xff] }
 0x4eb   : > { %2255 = vadd.xlane.f32.xlu0 %v2254_v18 }
 0x573   : > { %v2253_v14 = vpop.xlane.xlu1 %2252 }
 0x574   : > { %v2262_v28 = vmul.f32 0.03125, %v2253_v14  ;;  %v2250_v25 = vpop.xlane.xlu0 %2249 }
 0x575   : > { %v2261_v23 = vmul.f32 0.03125, %v2250_v25 }
 0x576   : > { %v6059_v30 = vsub.f32 %v2243_v32, %v2262_v28 }
 0x577   : > { %v6061_v35 = vsub.f32 %v2242_v38, %v2261_v23  ;;  %v2259_v53 = vpop.xlane.xlu1 %2258 }
 0x578   : > { %v2264_v37 = vmul.f32 0.03125, %v2259_v53  ;;  %v2256_v57 = vpop.xlane.xlu0 %2255  ;;  %v2270_v19 = vmul.f32 %v6059_v30, %v6059_v30 }
 0x579   : > { %v2263_v21 = vmul.f32 0.03125, %v2256_v57  ;;  %v2269_v40 = vmul.f32 %v6061_v35, %v6061_v35 }
 0x57a   : > { %v6067_v52 = vsub.f32 %v2245_v43, %v2264_v37  ;;  %v2276_v50 = vsel %vm800_vm0, %v2270_v19, 0.0  ;;  %v4334_v19 = vld [vmem:[%s6663_s9 + $0x1] ss:$0 sm:$0xff] }
 0x57b   : > { %v6070_v41 = vsub.f32 %v2244_v22, %v2263_v21  ;;  %2277 = vadd.xlane.f32.xlu1 %v2276_v50  ;;  %v2273_v8 = vsel %vm800_vm0, %v2269_v40, 0.0  ;;  %v4341_v22 = vld [vmem:[%s6662_s8 + $0x50] sm:$0xff]  ;;  %v6163_v21 = vld [vmem:[%s6663_s9] ss:$0 sm:$0xff] }
 0x57c   : > { %2274 = vadd.xlane.f32.xlu0 %v2273_v8  ;;  %v2272_v10 = vmul.f32 %v6067_v52, %v6067_v52 }
 0x57d   : > { %v2271_v29 = vmul.f32 %v6070_v41, %v6070_v41 }
 0x57e   : > { %v2282_v0 = vsel %vm800_vm0, %v2272_v10, 0.0 }
 0x57f   : > { %2283 = vadd.xlane.f32.xlu1 %v2282_v0  ;;  %v2279_v60 = vsel %vm800_vm0, %v2271_v29, 0.0 }
 0x580   : > { %2280 = vadd.xlane.f32.xlu0 %v2279_v60 }
 0x608   : > { %v2278_v1 = vpop.xlane.xlu1 %2277 }
 0x609   : > { %v2286_v48 = vmul.f32 0.03125, %v2278_v1  ;;  %v2275_v3 = vpop.xlane.xlu0 %2274 }
 0x60a   : > { %v2285_v56 = vmul.f32 0.03125, %v2275_v3 }
 0x60b   : > { %v2290_v55 = vadd.f32 1e-05, %v2286_v48 }
 0x60c   : > { %v2289_v4 = vadd.f32 1e-05, %v2285_v56  ;;  %v2284_v5 = vpop.xlane.xlu1 %2283 }
 0x60d   : > { %5350 = vrsqrt.f32 %v2290_v55  ;;  %v2288_v63 = vmul.f32 0.03125, %v2284_v5  ;;  %v2281_v31 = vpop.xlane.xlu0 %2280 }
 0x60e   : > { %5352 = vrsqrt.f32 %v2289_v4  ;;  %v2287_v6 = vmul.f32 0.03125, %v2281_v31 }
 0x60f   : > { %v2292_v62 = vadd.f32 1e-05, %v2288_v63 }
 0x610   : > { %v2291_v39 = vadd.f32 1e-05, %v2287_v6 }
 0x611   : > { %5354 = vrsqrt.f32 %v2292_v62 }
 0x612   : > { %5356 = vrsqrt.f32 %v2291_v39 }
 0x617   : > { %v5351_v32 = vpop.eup %5350 }
 0x618   : > { %v5353_v38 = vpop.eup %5352  ;;  %v2298_v16 = vmul.f32 %v5351_v32, %v6059_v30 }
 0x619   : > { %v2297_v44 = vmul.f32 %v5353_v38, %v6061_v35  ;;  %v5137_v35 = vpack.c.bf16 %v4342_v47, %v4341_v22 }
 0x61a   : > { %v2308_v42 = vmul.f32 %v4322_v11, %v2298_v16 }
 0x61b   : > { %v5355_v17 = vpop.eup %5354  ;;  %v2307_v43 = vmul.f32 %v4322_v11, %v2297_v44 }
 0x61c   : > { %v5357_v18 = vpop.eup %5356  ;;  %v2300_v14 = vmul.f32 %v5355_v17, %v6067_v52  ;;  %v6127_v23 = vadd.f32 %v4323_v13, %v2308_v42 }
 0x61d   : > { %v6124_v28 = vadd.f32 %v4323_v13, %v2307_v43  ;;  %v2299_v25 = vmul.f32 %v5357_v18, %v6070_v41 }
 0x61e   : > { %v2310_v30 = vmul.f32 %v4322_v11, %v2300_v14 }
 0x61f   : > { %4809 = vmatprep.mubr.msk.f32.mxu0 %vm800_vm0, %v6124_v28  ;;  %4823 = vmatprep.mubr.msk.f32.mxu1 %vm800_vm0, %v6124_v28  ;;  %v2309_v53 = vmul.f32 %v4322_v11, %v2299_v25 }
 0x620   : > { %4810 = vmatmul.mubr.msk.f32.vlgmr.msra.gmra.mrb[20].mxu0 %vm800_vm0, %v6127_v23  ;;  %4824 = vmatmul.mubr.msk.f32.vlgmr.msra.gmra.mrb[16].mxu1 %vm800_vm0, %v6127_v23  ;;  %v6139_v57 = vadd.f32 %v4323_v13, %v2310_v30 }
 0x621   : > { %5136 = vmatpush3.bf16.msra.mxu0 %v5133_v2  ;;  %v6137_v37 = vadd.f32 %v4323_v13, %v2309_v53 }
 0x622   : > { %5138 = vmatprep.subr.bf16.mxu0 %v5137_v35 }
 0x623   : > { %4812 = vmatprep.mubr.msk.f32.mxu0 %vm800_vm0, %v6137_v37  ;;  %4826 = vmatprep.mubr.msk.f32.mxu1 %vm800_vm0, %v6137_v37 }
 0x624   : > { %4813 = vmatmul.mubr.msk.f32.gmra.mrb[22].mxu0 %vm800_vm0, %v6139_v57  ;;  %4827 = vmatmul.mubr.msk.f32.gmra.mrb[18].mxu1 %vm800_vm0, %v6139_v57 }
 0x625   : > { %5140 = vmatpush3.bf16.msra.mxu0 %v5137_v35  ;;  %4837 = vmatprep.mubr.msk.f32.mxu0 %vm800_vm0, %v6124_v28 }
 0x628   : > { %4838 = vmatmul.mubr.msk.f32.vlgmr.msra.gmra.mrb[24].mxu0 %vm800_vm0, %v6127_v23 }
 0x629   : > { %4840 = vmatprep.mubr.msk.f32.mxu0 %vm800_vm0, %v6137_v37 }
 0x62c   : > { %4841 = vmatmul.mubr.msk.f32.gmra.mrb[26].mxu0 %vm800_vm0, %v6139_v57 }
 0x6f3   : > { %v4811_v40 = vpop.f32.mrb[20].mxu0  ;;  %v4825_v52 = vpop.f32.mrb[16].mxu1 }
 0x6f4   : > { %v2522_v50 = vadd.f32 %v4825_v52, %v4334_v19  ;;  %v2418_v41 = vpop.f32.mrb[21].mxu0  ;;  %v2516_v8 = vpop.f32.mrb[17].mxu1  ;;  %v2424_v43 = vadd.f32 %v4811_v40, %v6163_v21 }
 0x6f5   : > { %v6166_v10 = vadd.f32 %v6163_v21, %v2418_v41  ;;  %v2517_v29 = vadd.f32 %v4334_v19, %v2516_v8 }
 0x6f6   : > { %v2634_v53 = vmul.f32 %v5652_v33, %v2424_v43 }
 0x6f7   : > { %v6168_v0 = vpack.c.bf16 %v2522_v50, %v2517_v29  ;;  %v4814_v60 = vpop.f32.mrb[22].mxu0  ;;  %v4828_v59 = vpop.f32.mrb[18].mxu1  ;;  %v2633_v45 = vmul.f32 %v5652_v33, %v6166_v10  ;;  %v2802_v46 = vmul.f32 %v5657_v34, %v6166_v10  ;;  %v3153_v8 = vmul.f32 %v5737_v7, %v6166_v10 }
 0x6f8   : > { %v2532_v9 = vadd.f32 %v4828_v59, %v4334_v19  ;;  %v2428_v49 = vpop.f32.mrb[23].mxu0  ;;  %v2526_v12 = vpop.f32.mrb[19].mxu1  ;;  %v2434_v40 = vadd.f32 %v4814_v60, %v6163_v21  ;;  %v3411_v60 = vmul.f32 %v5779_v20, %v6166_v10  ;;  %v3412_v59 = vmul.f32 %v5779_v20, %v2424_v43  ;;  %v6295_v10 = vld [vmem:[%s644_s26 + $0x8] sm:$0xff] }
 0x6f9   : > { %v2527_v51 = vadd.f32 %v4334_v19, %v2526_v12  ;;  %5143 = vmatprep.subr.msk.bf16.mxu1 %vm5661_vm5, %v6168_v0  ;;  %4851 = vmatprep.mubr.msk.f32.mxu1 %vm800_vm0, %v2633_v45  ;;  %v2429_v18 = vadd.f32 %v6163_v21, %v2428_v49  ;;  %v2803_v19 = vmul.f32 %v5657_v34, %v2424_v43  ;;  %vm2326_vm12 = vcmp.ne.f32.partialorder %v6295_v10, 0.0 }
 0x6fa   : > { %5155 = vmatprep.subr.msk.bf16.mxu0 %vm5661_vm5, %v6168_v0  ;;  %4865 = vmatprep.mubr.msk.f32.mxu0 %vm800_vm0, %v2802_v46  ;;  %v2636_v41 = vmul.f32 %v5652_v33, %v2434_v40  ;;  %v2805_v21 = vmul.f32 %v5657_v34, %v2434_v40  ;;  %v3156_v29 = vmul.f32 %v5737_v7, %v2434_v40 }
 0x6fb   : > { %v6185_v26 = vpack.c.bf16 %v2532_v9, %v2527_v51  ;;  %5146 = vmatpush3.bf16.xpose.msk.msra.mxu1 %vm5661_vm5, %v6168_v0  ;;  %5158 = vmatpush3.bf16.xpose.msk.msra.mxu0 %vm5661_vm5, %v6168_v0  ;;  %v4839_v54 = vpop.f32.mrb[24].mxu0  ;;  %v2635_v52 = vmul.f32 %v5652_v33, %v2429_v18  ;;  %v2804_v50 = vmul.f32 %v5657_v34, %v2429_v18  ;;  %v6300_v9 = vld [vmem:[%s644_s26 + $0x18] sm:$0xff] }
 0x6fc   : > { %v2620_v58 = vadd.f32 %v4839_v54, %v4344_v24  ;;  %v2614_v15 = vpop.f32.mrb[25].mxu0  ;;  %vm2328_vm14 = vcmp.ne.f32.partialorder %v6300_v9, 0.0 }
 0x6fd   : > { %v2615_v27 = vadd.f32 %v4344_v24, %v2614_v15  ;;  %5149 = vmatprep.subr.msk.bf16.mxu1 %vm5661_vm5, %v6185_v26  ;;  %5161 = vmatprep.subr.msk.bf16.mxu0 %vm5661_vm5, %v6185_v26 }
 0x6fe   : > { %v2956_v61 = vmul.f32 %v5657_v34, %v2620_v58  ;;  %v2799_v2 = vmul.f32 %v5652_v33, %v2620_v58  ;;  %v3307_v1 = vmul.f32 %v5737_v7, %v2620_v58  ;;  %v3565_v48 = vmul.f32 %v5779_v20, %v2620_v58 }
 0x6ff   : > { %v4842_v3 = vpop.f32.mrb[26].mxu0  ;;  %v2955_v56 = vmul.f32 %v5657_v34, %v2615_v27  ;;  %v2798_v55 = vmul.f32 %v5652_v33, %v2615_v27  ;;  %v3306_v4 = vmul.f32 %v5737_v7, %v2615_v27  ;;  %v3564_v5 = vmul.f32 %v5779_v20, %v2615_v27 }
 0x700   : > { %v2630_v63 = vadd.f32 %v4842_v3, %v4344_v24  ;;  %v2624_v31 = vpop.f32.mrb[27].mxu0 }
 0x701   : > { %v2625_v6 = vadd.f32 %v4344_v24, %v2624_v31  ;;  %v5165_v62 = vpack.c.bf16 %v2956_v61, %v2955_v56  ;;  %v6207_v39 = vpack.c.bf16 %v2799_v2, %v2798_v55  ;;  %v6209_v32 = vpack.c.bf16 %v3307_v1, %v3306_v4 }
 0x702   : > { %v2958_v11 = vmul.f32 %v5657_v34, %v2630_v63  ;;  %v2801_v38 = vmul.f32 %v5652_v33, %v2630_v63  ;;  %v3309_v16 = vmul.f32 %v5737_v7, %v2630_v63  ;;  %v6214_v44 = vpack.c.bf16 %v3565_v48, %v3564_v5 }
 0x703   : > { %5152 = vmatpush3.bf16.xpose.msk.msra.mxu1 %vm5661_vm5, %v6185_v26  ;;  %5164 = vmatpush3.bf16.xpose.msk.msra.mxu0 %vm5661_vm5, %v6185_v26  ;;  %v2957_v13 = vmul.f32 %v5657_v34, %v2625_v6  ;;  %v2800_v42 = vmul.f32 %v5652_v33, %v2625_v6  ;;  %v3308_v17 = vmul.f32 %v5737_v7, %v2625_v6 }
 0x704   : > { %5166 = vmatprep.subr.bf16.mxu1 %v5165_v62  ;;  %5183 = vmatprep.subr.msk.bf16.mxu0 %vm5661_vm5, %v6168_v0  ;;  %v3566_v22 = vmul.f32 %v5779_v20, %v2625_v6  ;;  %v3567_v47 = vmul.f32 %v5779_v20, %v2630_v63  ;;  %v3154_v33 = vmul.f32 %v5737_v7, %v2424_v43 }
 0x705   : > { %v5169_v14 = vpack.c.bf16 %v2958_v11, %v2957_v13  ;;  %v6232_v25 = vpack.c.bf16 %v2801_v38, %v2800_v42  ;;  %v6234_v30 = vpack.c.bf16 %v3309_v16, %v3308_v17  ;;  %v3155_v34 = vmul.f32 %v5737_v7, %v2429_v18 }
 0x706   : > { %v6236_v35 = vpack.c.bf16 %v3567_v47, %v3566_v22  ;;  %v3414_v7 = vmul.f32 %v5779_v20, %v2434_v40 }
 0x70a   : > { %4852 = vmatmul.mubr.msk.f32.vlgmr.msra.gmra.mrb[20].mxu1 %vm800_vm0, %v2634_v53  ;;  %4866 = vmatmul.mubr.msk.f32.vlgmr.msra.gmra.mrb[28].mxu0 %vm800_vm0, %v2803_v19 }
 0x70b   : > { %4854 = vmatprep.mubr.msk.f32.mxu1 %vm800_vm0, %v2635_v52  ;;  %4868 = vmatprep.mubr.msk.f32.mxu0 %vm800_vm0, %v2804_v50 }
 0x70c   : > { %5168 = vmatpush3.bf16.msra.mxu1 %v5165_v62  ;;  %5186 = vmatpush3.bf16.xpose.msk.msra.mxu0 %vm5661_vm5, %v6168_v0 }
 0x70d   : > { %5170 = vmatprep.subr.bf16.mxu1 %v5169_v14  ;;  %5189 = vmatprep.subr.msk.bf16.mxu0 %vm5661_vm5, %v6185_v26 }
 0x70e   : > { %4855 = vmatmul.mubr.msk.f32.gmra.mrb[22].mxu1 %vm800_vm0, %v2636_v41  ;;  %4869 = vmatmul.mubr.msk.f32.gmra.mrb[30].mxu0 %vm800_vm0, %v2805_v21 }
 0x70f   : > { %4907 = vmatprep.mubr.msk.f32.mxu0 %vm800_vm0, %v3153_v8 }
 0x710   : > { %5172 = vmatpush3.bf16.msra.mxu1 %v5169_v14 }
 0x711   : > { %5174 = vmatprep.subr.bf16.mxu1 %v6207_v39 }
 0x714   : > { %5192 = vmatpush3.bf16.xpose.msk.msra.mxu0 %vm5661_vm5, %v6185_v26 }
 0x715   : > { %5203 = vmatprep.subr.msk.bf16.mxu0 %vm5661_vm5, %v6168_v0 }
 0x71b   : > { %4908 = vmatmul.mubr.msk.f32.vlgmr.msra.gmra.mrb[32].mxu0 %vm800_vm0, %v3154_v33 }
 0x71c   : > { %4910 = vmatprep.mubr.msk.f32.mxu0 %vm800_vm0, %v3155_v34  ;;  %5206 = vmatpush3.bf16.xpose.msk.msra.mxu0 %vm5661_vm5, %v6168_v0  ;;  %v3413_v0 = vmul.f32 %v5779_v20, %v2429_v18  ;;  %v6303_v20 = vld [vmem:[%s644_s26 + $0x10] sm:$0xff] }
 0x71d   : > { %5209 = vmatprep.subr.msk.bf16.mxu0 %vm5661_vm5, %v6185_v26  ;;  %vm2327_vm15 = vcmp.ne.f32.partialorder %v6303_v20, 0.0 }
 0x71f   : > { %4911 = vmatmul.mubr.msk.f32.gmra.mrb[34].mxu0 %vm800_vm0, %v3156_v29 }
 0x720   : > { %4935 = vmatprep.mubr.msk.f32.mxu0 %vm800_vm0, %v3411_v60 }
 0x724   : > { %5212 = vmatpush3.bf16.xpose.msk.msra.mxu0 %vm5661_vm5, %v6185_v26 }
 0x72b   : > { %4936 = vmatmul.mubr.msk.f32.vlgmr.msra.gmra.mrb[36].mxu0 %vm800_vm0, %v3412_v59 }
 0x72c   : > { %4938 = vmatprep.mubr.msk.f32.mxu0 %vm800_vm0, %v3413_v0 }
 0x72f   : > { %4939 = vmatmul.mubr.msk.f32.gmra.mrb[38].mxu0 %vm800_vm0, %v3414_v7 }
 0x7dd   : > { %v4853_v45 = vpop.f32.mrb[20].mxu1  ;;  %v4867_v46 = vpop.f32.mrb[28].mxu0 }
 0x7de   : > { %v2904_v49 = vmul.f32 0.35355338, %v4867_v46  ;;  %v2727_v12 = vpop.f32.mrb[21].mxu1  ;;  %v2884_v51 = vpop.f32.mrb[29].mxu0  ;;  %v2747_v61 = vmul.f32 0.35355338, %v4853_v45 }
 0x7df   : > { %v2903_v24 = vmul.f32 0.35355338, %v2884_v51  ;;  %v2746_v55 = vmul.f32 0.35355338, %v2727_v12 }
 0x7e0   : > { %v6307_v26 = vsel %vm2326_vm12, %v2904_v49, -1e+09  ;;  %v6333_v62 = vsel %vm2326_vm12, %v2747_v61, -1e+09 }
 0x7e1   : > { %v4856_v54 = vpop.f32.mrb[22].mxu1  ;;  %v4870_v58 = vpop.f32.mrb[30].mxu0  ;;  %v2914_v15 = vsel %vm800_vm0, %v6307_v26, -inf  ;;  %v6314_v27 = vsel %vm2325_vm13, %v2903_v24, -1e+09  ;;  %v2757_v16 = vsel %vm800_vm0, %v6333_v62, -inf }
 0x7e2   : > { %v2906_v2 = vmul.f32 0.35355338, %v4870_v58  ;;  %2915 = vmax.xlane.f32.xlu1 %v2914_v15  ;;  %v2737_v1 = vpop.f32.mrb[23].mxu1  ;;  %v2894_v48 = vpop.f32.mrb[31].mxu0  ;;  %v2911_v56 = vsel %vm800_vm0, %v6314_v27, -inf }
 0x7e3   : > { %v2905_v3 = vmul.f32 0.35355338, %v2894_v48  ;;  %2912 = vmax.xlane.f32.xlu0 %v2911_v56  ;;  %v2749_v31 = vmul.f32 0.35355338, %v4856_v54  ;;  %v2748_v11 = vmul.f32 0.35355338, %v2737_v1 }
 0x7e4   : > { %v6321_v4 = vsel %vm2328_vm14, %v2906_v2, -1e+09  ;;  %v6337_v38 = vsel %vm2325_vm13, %v2746_v55, -1e+09 }
 0x7e5   : > { %v2920_v5 = vsel %vm800_vm0, %v6321_v4, -inf  ;;  %v6327_v63 = vsel %vm2327_vm15, %v2905_v3, -1e+09  ;;  %v6343_v13 = vsel %vm2328_vm14, %v2749_v31, -1e+09  ;;  %v2754_v42 = vsel %vm800_vm0, %v6337_v38, -inf }
 0x7e6   : > { %2921 = vmax.xlane.f32.xlu1 %v2920_v5  ;;  %v2917_v6 = vsel %vm800_vm0, %v6327_v63, -inf  ;;  %v6349_v17 = vsel %vm2327_vm15, %v2748_v11, -1e+09  ;;  %v2763_v43 = vsel %vm800_vm0, %v6343_v13, -inf }
 0x7e7   : > { %2918 = vmax.xlane.f32.xlu0 %v2917_v6  ;;  %v2760_v14 = vsel %vm800_vm0, %v6349_v17, -inf }
 0x7ea   : > { %2758 = vmax.xlane.f32.xlu1 %v2757_v16 }
 0x7eb   : > { %2755 = vmax.xlane.f32.xlu0 %v2754_v42 }
 0x7ee   : > { %v4909_v22 = vpop.f32.mrb[32].mxu0  ;;  %2764 = vmax.xlane.f32.xlu1 %v2763_v43 }
 0x7ef   : > { %v3255_v47 = vmul.f32 0.35355338, %v4909_v22  ;;  %v3235_v18 = vpop.f32.mrb[33].mxu0  ;;  %2761 = vmax.xlane.f32.xlu0 %v2760_v14 }
 0x7f0   : > { %v3254_v53 = vmul.f32 0.35355338, %v3235_v18 }
 0x7f1   : > { %v6357_v19 = vsel %vm2326_vm12, %v3255_v47, -1e+09 }
 0x7f2   : > { %v4912_v40 = vpop.f32.mrb[34].mxu0  ;;  %v3265_v52 = vsel %vm800_vm0, %v6357_v19, -inf  ;;  %v6363_v50 = vsel %vm2325_vm13, %v3254_v53, -1e+09 }
 0x7f3   : > { %v3257_v41 = vmul.f32 0.35355338, %v4912_v40  ;;  %v3245_v21 = vpop.f32.mrb[35].mxu0  ;;  %3266 = vmax.xlane.f32.xlu1 %v3265_v52  ;;  %v3262_v8 = vsel %vm800_vm0, %v6363_v50, -inf }
 0x7f4   : > { %v3256_v33 = vmul.f32 0.35355338, %v3245_v21  ;;  %3263 = vmax.xlane.f32.xlu0 %v3262_v8 }
 0x7f5   : > { %v6369_v34 = vsel %vm2328_vm14, %v3257_v41, -1e+09 }
 0x7f6   : > { %v3271_v29 = vsel %vm800_vm0, %v6369_v34, -inf  ;;  %v6375_v60 = vsel %vm2327_vm15, %v3256_v33, -1e+09 }
 0x7f7   : > { %3272 = vmax.xlane.f32.xlu1 %v3271_v29  ;;  %v3268_v59 = vsel %vm800_vm0, %v6375_v60, -inf }
 0x7f8   : > { %3269 = vmax.xlane.f32.xlu0 %v3268_v59 }
 0x7fe   : > { %v4937_v0 = vpop.f32.mrb[36].mxu0 }
 0x7ff   : > { %v3513_v7 = vmul.f32 0.35355338, %v4937_v0  ;;  %v3493_v45 = vpop.f32.mrb[37].mxu0 }
 0x800   : > { %v3512_v46 = vmul.f32 0.35355338, %v3493_v45 }
 0x801   : > { %v6381_v49 = vsel %vm2326_vm12, %v3513_v7, -1e+09 }
 0x802   : > { %v4940_v12 = vpop.f32.mrb[38].mxu0  ;;  %v3523_v51 = vsel %vm800_vm0, %v6381_v49, -inf  ;;  %v6387_v24 = vsel %vm2325_vm13, %v3512_v46, -1e+09 }
 0x803   : > { %v3515_v54 = vmul.f32 0.35355338, %v4940_v12  ;;  %v3503_v58 = vpop.f32.mrb[39].mxu0  ;;  %3524 = vmax.xlane.f32.xlu1 %v3523_v51  ;;  %v3520_v15 = vsel %vm800_vm0, %v6387_v24, -inf }
 0x804   : > { %v3514_v61 = vmul.f32 0.35355338, %v3503_v58  ;;  %3521 = vmax.xlane.f32.xlu0 %v3520_v15 }
 0x805   : > { %v6393_v10 = vsel %vm2328_vm14, %v3515_v54, -1e+09 }
 0x806   : > { %v3529_v2 = vsel %vm800_vm0, %v6393_v10, -inf  ;;  %v6399_v36 = vsel %vm2327_vm15, %v3514_v61, -1e+09 }
 0x807   : > { %3530 = vmax.xlane.f32.xlu1 %v3529_v2  ;;  %v3526_v1 = vsel %vm800_vm0, %v6399_v36, -inf }
 0x808   : > { %3527 = vmax.xlane.f32.xlu0 %v3526_v1 }
 0x86f   : > { %v2916_v48 = vpop.xlane.xlu1 %2915 }
 0x870   : > { %v2924_v3 = vsub.f32 %v6307_v26, %v2916_v48  ;;  %v2913_v56 = vpop.xlane.xlu0 %2912 }
 0x871   : > { %v2923_v9 = vsub.f32 %v6314_v27, %v2913_v56 }
 0x872   : > { %v2929_v55 = vmul.f32 1.442695, %v2924_v3 }
 0x873   : > { %v2922_v5 = vpop.xlane.xlu1 %2921  ;;  %v2927_v31 = vmul.f32 1.442695, %v2923_v9 }
 0x874   : > { %5358 = vpow2.f32 %v2929_v55  ;;  %v2926_v6 = vsub.f32 %v6321_v4, %v2922_v5  ;;  %v2919_v20 = vpop.xlane.xlu0 %2918 }
 0x875   : > { %5360 = vpow2.f32 %v2927_v31  ;;  %v2925_v16 = vsub.f32 %v6327_v63, %v2919_v20 }
 0x876   : > { %v2933_v11 = vmul.f32 1.442695, %v2926_v6 }
 0x877   : > { %v2759_v42 = vpop.xlane.xlu1 %2758  ;;  %v2931_v43 = vmul.f32 1.442695, %v2925_v16 }
 0x878   : > { %5362 = vpow2.f32 %v2933_v11  ;;  %v2767_v22 = vsub.f32 %v6333_v62, %v2759_v42  ;;  %v2756_v26 = vpop.xlane.xlu0 %2755 }
 0x879   : > { %5364 = vpow2.f32 %v2931_v43  ;;  %v2766_v27 = vsub.f32 %v6337_v38, %v2756_v26 }
 0x87a   : > { %v2772_v47 = vmul.f32 1.442695, %v2767_v22 }
 0x87b   : > { %v2765_v18 = vpop.xlane.xlu1 %2764  ;;  %v2770_v14 = vmul.f32 1.442695, %v2766_v27 }
 0x87c   : > { %5366 = vpow2.f32 %v2772_v47  ;;  %v2769_v4 = vsub.f32 %v6343_v13, %v2765_v18  ;;  %v2762_v53 = vpop.xlane.xlu0 %2761 }
 0x87d   : > { %5368 = vpow2.f32 %v2770_v14  ;;  %v2768_v52 = vsub.f32 %v6349_v17, %v2762_v53 }
 0x87e   : > { %v6410_v40 = vpop.eup %5358  ;;  %v2776_v63 = vmul.f32 1.442695, %v2769_v4 }
 0x87f   : > { %v2938_v62 = vsel %vm800_vm0, %v6410_v40, 0.0  ;;  %v6415_v41 = vpop.eup %5360  ;;  %v2774_v21 = vmul.f32 1.442695, %v2768_v52 }
 0x880   : > { %5370 = vpow2.f32 %v2776_v63  ;;  %v3267_v38 = vpop.xlane.xlu1 %3266  ;;  %2939 = vadd.xlane.f32.xlu1 %v2938_v62  ;;  %v2935_v13 = vsel %vm800_vm0, %v6415_v41, 0.0 }
 0x881   : > { %v3275_v8 = vsub.f32 %v6357_v19, %v3267_v38  ;;  %v3264_v33 = vpop.xlane.xlu0 %3263  ;;  %5372 = vpow2.f32 %v2774_v21  ;;  %2936 = vadd.xlane.f32.xlu0 %v2935_v13 }
 0x882   : > { %v6420_v29 = vpop.eup %5362  ;;  %v3274_v17 = vsub.f32 %v6363_v50, %v3264_v33 }
 0x883   : > { %v3280_v59 = vmul.f32 1.442695, %v3275_v8  ;;  %v2944_v0 = vsel %vm800_vm0, %v6420_v29, 0.0  ;;  %v6425_v7 = vpop.eup %5364 }
 0x884   : > { %v3278_v45 = vmul.f32 1.442695, %v3274_v17  ;;  %v3273_v46 = vpop.xlane.xlu1 %3272  ;;  %2945 = vadd.xlane.f32.xlu1 %v2944_v0  ;;  %v2941_v51 = vsel %vm800_vm0, %v6425_v7, 0.0 }
 0x885   : > { %5374 = vpow2.f32 %v3280_v59  ;;  %v3277_v19 = vsub.f32 %v6369_v34, %v3273_v46  ;;  %v3270_v12 = vpop.xlane.xlu0 %3269  ;;  %2942 = vadd.xlane.f32.xlu0 %v2941_v51 }
 0x886   : > { %v6430_v54 = vpop.eup %5366  ;;  %5376 = vpow2.f32 %v3278_v45  ;;  %v3276_v50 = vsub.f32 %v6375_v60, %v3270_v12 }
 0x887   : > { %v3284_v58 = vmul.f32 1.442695, %v3277_v19  ;;  %v2781_v15 = vsel %vm800_vm0, %v6430_v54, 0.0  ;;  %v6435_v61 = vpop.eup %5368 }
 0x888   : > { %v3282_v2 = vmul.f32 1.442695, %v3276_v50  ;;  %2782 = vadd.xlane.f32.xlu1 %v2781_v15  ;;  %v2778_v34 = vsel %vm800_vm0, %v6435_v61, 0.0 }
 0x889   : > { %5378 = vpow2.f32 %v3284_v58  ;;  %2779 = vadd.xlane.f32.xlu0 %v2778_v34 }
 0x88a   : > { %v6439_v1 = vpop.eup %5370  ;;  %5380 = vpow2.f32 %v3282_v2 }
 0x88b   : > { %v2787_v60 = vsel %vm800_vm0, %v6439_v1, 0.0  ;;  %v6443_v48 = vpop.eup %5372 }
 0x88c   : > { %2788 = vadd.xlane.f32.xlu1 %v2787_v60  ;;  %v2784_v3 = vsel %vm800_vm0, %v6443_v48, 0.0 }
 0x88d   : > { %2785 = vadd.xlane.f32.xlu0 %v2784_v3 }
 0x88f   : > { %v6447_v56 = vpop.eup %5374 }
 0x890   : > { %v6449_v55 = vpop.eup %5376  ;;  %v3525_v9 = vpop.xlane.xlu1 %3524  ;;  %v3289_v5 = vsel %vm800_vm0, %v6447_v56, 0.0 }
 0x891   : > { %v3533_v31 = vsub.f32 %v6381_v49, %v3525_v9  ;;  %3290 = vadd.xlane.f32.xlu1 %v3289_v5  ;;  %v3522_v6 = vpop.xlane.xlu0 %3521  ;;  %v3286_v20 = vsel %vm800_vm0, %v6449_v55, 0.0 }
 0x892   : > { %v3532_v11 = vsub.f32 %v6387_v24, %v3522_v6  ;;  %3287 = vadd.xlane.f32.xlu0 %v3286_v20 }
 0x893   : > { %v6457_v16 = vpop.eup %5378  ;;  %v3538_v42 = vmul.f32 1.442695, %v3533_v31 }
 0x894   : > { %v6459_v43 = vpop.eup %5380  ;;  %v3536_v22 = vmul.f32 1.442695, %v3532_v11  ;;  %v3531_v26 = vpop.xlane.xlu1 %3530  ;;  %v3295_v47 = vsel %vm800_vm0, %v6457_v16, 0.0 }
 0x895   : > { %5382 = vpow2.f32 %v3538_v42  ;;  %v3535_v49 = vsub.f32 %v6393_v10, %v3531_v26  ;;  %3296 = vadd.xlane.f32.xlu1 %v3295_v47  ;;  %v3528_v27 = vpop.xlane.xlu0 %3527  ;;  %v3292_v18 = vsel %vm800_vm0, %v6459_v43, 0.0 }
 0x896   : > { %5384 = vpow2.f32 %v3536_v22  ;;  %v3534_v24 = vsub.f32 %v6399_v36, %v3528_v27  ;;  %3293 = vadd.xlane.f32.xlu0 %v3292_v18 }
 0x897   : > { %v3542_v14 = vmul.f32 1.442695, %v3535_v49 }
 0x898   : > { %v3540_v4 = vmul.f32 1.442695, %v3534_v24 }
 0x899   : > { %5386 = vpow2.f32 %v3542_v14 }
 0x89a   : > { %5388 = vpow2.f32 %v3540_v4 }
 0x89f   : > { %v6467_v53 = vpop.eup %5382 }
 0x8a0   : > { %v6469_v63 = vpop.eup %5384  ;;  %v3547_v10 = vsel %vm800_vm0, %v6467_v53, 0.0 }
 0x8a1   : > { %3548 = vadd.xlane.f32.xlu1 %v3547_v10  ;;  %v3544_v52 = vsel %vm800_vm0, %v6469_v63, 0.0 }
 0x8a2   : > { %3545 = vadd.xlane.f32.xlu0 %v3544_v52 }
 0x8a3   : > { %v6475_v62 = vpop.eup %5386 }
 0x8a4   : > { %v6477_v36 = vpop.eup %5388  ;;  %v3553_v21 = vsel %vm800_vm0, %v6475_v62, 0.0 }
 0x8a5   : > { %3554 = vadd.xlane.f32.xlu1 %v3553_v21  ;;  %v3550_v38 = vsel %vm800_vm0, %v6477_v36, 0.0 }
 0x8a6   : > { %3551 = vadd.xlane.f32.xlu0 %v3550_v38 }
 0x90d   : > { %v2940_v8 = vpop.xlane.xlu1 %2939 }
 0x90e   : > { %5390 = vrcp.f32 %v2940_v8  ;;  %v2937_v33 = vpop.xlane.xlu0 %2936 }
 0x90f   : > { %5392 = vrcp.f32 %v2937_v33 }
 0x911   : > { %v2946_v13 = vpop.xlane.xlu1 %2945 }
 0x912   : > { %5394 = vrcp.f32 %v2946_v13  ;;  %v2943_v17 = vpop.xlane.xlu0 %2942 }
 0x913   : > { %5396 = vrcp.f32 %v2943_v17 }
 0x915   : > { %v2783_v59 = vpop.xlane.xlu1 %2782 }
 0x916   : > { %5398 = vrcp.f32 %v2783_v59  ;;  %v2780_v0 = vpop.xlane.xlu0 %2779 }
 0x917   : > { %5400 = vrcp.f32 %v2780_v0 }
 0x918   : > { %v5391_v45 = vpop.eup %5390 }
 0x919   : > { %v2789_v46 = vpop.xlane.xlu1 %2788  ;;  %v5393_v19 = vpop.eup %5392  ;;  %v2952_v50 = vmul.f32 %v5391_v45, %v6410_v40 }
 0x91a   : > { %5402 = vrcp.f32 %v2789_v46  ;;  %v2786_v12 = vpop.xlane.xlu0 %2785  ;;  %v2951_v51 = vmul.f32 %v5393_v19, %v6415_v41 }
 0x91b   : > { %5404 = vrcp.f32 %v2786_v12 }
 0x91c   : > { %v5395_v58 = vpop.eup %5394  ;;  %4879 = vmatprep.mubr.msk.f32.mxu1 %vm800_vm0, %v2951_v51 }
 0x91d   : > { %v5397_v15 = vpop.eup %5396  ;;  %4880 = vmatmul.mubr.msk.f32.vlgmr.msra.gmra.mrb[24].mxu1 %vm800_vm0, %v2952_v50  ;;  %v2954_v41 = vmul.f32 %v5395_v58, %v6420_v29 }
 0x91e   : > { %v3291_v2 = vpop.xlane.xlu1 %3290  ;;  %5176 = vmatpush3.bf16.msra.mxu1 %v6207_v39  ;;  %v2953_v60 = vmul.f32 %v5397_v15, %v6425_v7 }
 0x91f   : > { %5406 = vrcp.f32 %v3291_v2  ;;  %v3288_v34 = vpop.xlane.xlu0 %3287  ;;  %5178 = vmatprep.subr.bf16.mxu1 %v6232_v25 }
 0x920   : > { %5408 = vrcp.f32 %v3288_v34  ;;  %v5399_v40 = vpop.eup %5398  ;;  %4882 = vmatprep.mubr.msk.f32.mxu1 %vm800_vm0, %v2953_v60 }
 0x921   : > { %v5401_v3 = vpop.eup %5400  ;;  %4883 = vmatmul.mubr.msk.f32.gmra.mrb[26].mxu1 %vm800_vm0, %v2954_v41  ;;  %v2795_v7 = vmul.f32 %v5399_v40, %v6430_v54 }
 0x922   : > { %v3297_v9 = vpop.xlane.xlu1 %3296  ;;  %5180 = vmatpush3.bf16.msra.mxu1 %v6232_v25  ;;  %v2794_v39 = vmul.f32 %v5401_v3, %v6435_v61 }
 0x923   : > { %5410 = vrcp.f32 %v3297_v9  ;;  %v3294_v5 = vpop.xlane.xlu0 %3293  ;;  %5194 = vmatprep.subr.bf16.mxu1 %v6209_v32 }
 0x924   : > { %5412 = vrcp.f32 %v3294_v5  ;;  %v5403_v31 = vpop.eup %5402  ;;  %4893 = vmatprep.mubr.msk.f32.mxu1 %vm800_vm0, %v2794_v39 }
 0x925   : > { %v5405_v29 = vpop.eup %5404  ;;  %4894 = vmatmul.mubr.msk.f32.vlgmr.msra.gmra.mrb[24].mxu1 %vm800_vm0, %v2795_v7  ;;  %v2797_v25 = vmul.f32 %v5403_v31, %v6439_v1  ;;  %v3669_v1 = vld [vmem:[%s6664_s10] sm:$0xff] }
 0x926   : > { %5196 = vmatpush3.bf16.msra.mxu1 %v6209_v32  ;;  %v2796_v6 = vmul.f32 %v5405_v29, %v6443_v48  ;;  %v3670_v48 = vld [vmem:[%s6664_s10 + $0x8] sm:$0xff] }
 0x927   : > { %5198 = vmatprep.subr.bf16.mxu1 %v6234_v30  ;;  %v5221_v26 = vpack.c.bf16 %v3670_v48, %v3669_v1  ;;  %v3857_v48 = vld [vmem:[%s6668_s14 + $0x10] sm:$0xff] }
 0x928   : > { %4896 = vmatprep.mubr.msk.f32.mxu1 %vm800_vm0, %v2796_v6 }
 0x929   : > { %v5407_v61 = vpop.eup %5406  ;;  %4897 = vmatmul.mubr.msk.f32.gmra.mrb[26].mxu1 %vm800_vm0, %v2797_v25 }
 0x92a   : > { %v5409_v54 = vpop.eup %5408  ;;  %5200 = vmatpush3.bf16.msra.mxu1 %v6234_v30  ;;  %v3303_v11 = vmul.f32 %v5407_v61, %v6447_v56 }
 0x92b   : > { %v3302_v20 = vmul.f32 %v5409_v54, %v6449_v55  ;;  %5214 = vmatprep.subr.bf16.mxu1 %v6214_v44 }
 0x92d   : > { %v5411_v32 = vpop.eup %5410  ;;  %4921 = vmatprep.mubr.msk.f32.mxu1 %vm800_vm0, %v3302_v20 }
 0x92e   : > { %v5413_v42 = vpop.eup %5412  ;;  %v3549_v22 = vpop.xlane.xlu1 %3548  ;;  %4922 = vmatmul.mubr.msk.f32.vlgmr.msra.gmra.mrb[24].mxu1 %vm800_vm0, %v3303_v11  ;;  %v3305_v55 = vmul.f32 %v5411_v32, %v6457_v16  ;;  %v3672_v16 = vld [vmem:[%s6664_s10 + $0x18] sm:$0xff]  ;;  %v3855_v11 = vld [vmem:[%s6668_s14] sm:$0xff]  ;;  %v3856_v32 = vld [vmem:[%s6668_s14 + $0x8] sm:$0xff] }
 0x92f   : > { %5414 = vrcp.f32 %v3549_v22  ;;  %5216 = vmatpush3.bf16.msra.mxu1 %v6214_v44  ;;  %v3546_v30 = vpop.xlane.xlu0 %3545  ;;  %v3304_v56 = vmul.f32 %v5413_v42, %v6459_v43  ;;  %v3671_v43 = vld [vmem:[%s6664_s10 + $0x10] sm:$0xff]  ;;  %v5229_v1 = vpack.c.bf16 %v3856_v32, %v3855_v11  ;;  %v3858_v42 = vld [vmem:[%s6668_s14 + $0x18] sm:$0xff] }
 0x930   : > { %5218 = vmatprep.subr.bf16.mxu1 %v6236_v35  ;;  %5416 = vrcp.f32 %v3546_v30  ;;  %v5225_v14 = vpack.c.bf16 %v3672_v16, %v3671_v43  ;;  %v5233_v22 = vpack.c.bf16 %v3858_v42, %v3857_v48  ;;  %v3967_v30 = vld [vmem:[%s6670_s16] sm:$0xff]  ;;  %v3972_v43 = vld [vmem:[%s6670_s16 + $0x28] sm:$0xff] }
 0x931   : > { %4924 = vmatprep.mubr.msk.f32.mxu1 %vm800_vm0, %v3304_v56  ;;  %5230 = vmatprep.subr.bf16.mxu0 %v5229_v1  ;;  %v3968_v56 = vld [vmem:[%s6670_s16 + $0x8] sm:$0xff] }
 0x932   : > { %v3555_v47 = vpop.xlane.xlu1 %3554  ;;  %4925 = vmatmul.mubr.msk.f32.gmra.mrb[26].mxu1 %vm800_vm0, %v3305_v55  ;;  %5232 = vmatpush3.bf16.msra.mxu0 %v5229_v1  ;;  %v3969_v55 = vld [vmem:[%s6670_s16 + $0x10] sm:$0xff] }
 0x933   : > { %5418 = vrcp.f32 %v3555_v47  ;;  %5220 = vmatpush3.bf16.msra.mxu1 %v6236_v35  ;;  %v3552_v49 = vpop.xlane.xlu0 %3551  ;;  %5234 = vmatprep.subr.bf16.mxu0 %v5233_v22  ;;  %v3970_v47 = vld [vmem:[%s6670_s16 + $0x18] sm:$0xff] }
 0x934   : > { %5420 = vrcp.f32 %v3552_v49  ;;  %5222 = vmatprep.subr.bf16.mxu1 %v5221_v26  ;;  %v5241_v49 = vpack.c.bf16 %v3970_v47, %v3969_v55 }
 0x936   : > { %5236 = vmatpush3.bf16.msra.mxu0 %v5233_v22 }
 0x939   : > { %v5415_v44 = vpop.eup %5414 }
 0x93a   : > { %v5417_v27 = vpop.eup %5416  ;;  %v3561_v24 = vmul.f32 %v5415_v44, %v6467_v53  ;;  %v3971_v44 = vld [vmem:[%s6670_s16 + $0x20] sm:$0xff] }
 0x93b   : > { %v3560_v18 = vmul.f32 %v5417_v27, %v6469_v63  ;;  %v5245_v16 = vpack.c.bf16 %v3972_v43, %v3971_v44 }
 0x93d   : > { %v5419_v4 = vpop.eup %5418  ;;  %4949 = vmatprep.mubr.msk.f32.mxu1 %vm800_vm0, %v3560_v18 }
 0x93e   : > { %v5421_v35 = vpop.eup %5420  ;;  %4950 = vmatmul.mubr.msk.f32.vlgmr.msra.gmra.mrb[24].mxu1 %vm800_vm0, %v3561_v24  ;;  %v3563_v52 = vmul.f32 %v5419_v4, %v6475_v62  ;;  %v4397_v62 = vld [vmem:[%s6665_s11] ss:$0 sm:$0xff] }
 0x93f   : > { %v3562_v10 = vmul.f32 %v5421_v35, %v6477_v36  ;;  %5224 = vmatpush3.bf16.msra.mxu1 %v5221_v26  ;;  %v5237_v26 = vpack.c.bf16 %v3968_v56, %v3967_v30 }
 0x940   : > { %5226 = vmatprep.subr.bf16.mxu1 %v5225_v14 }
 0x941   : > { %4952 = vmatprep.mubr.msk.f32.mxu1 %vm800_vm0, %v3562_v10 }
 0x942   : > { %4953 = vmatmul.mubr.msk.f32.gmra.mrb[26].mxu1 %vm800_vm0, %v3563_v52 }
 0x943   : > { %5228 = vmatpush3.bf16.msra.mxu1 %v5225_v14 }
 0x944   : > { %5238 = vmatprep.subr.bf16.mxu1 %v5237_v26 }
 0xa11   : > { %v4951_v63 = vpop.f32.mrb[24].mxu1 }
 0xa12   : > { %v3646_v53 = vpop.f32.mrb[25].mxu1 }
 0xa13   : > { %4963 = vmatprep.mubr.msk.f32.mxu1 %vm800_vm0, %v3646_v53 }
 0xa14   : > { %4964 = vmatmul.mubr.msk.f32.vlgmr.msra.gmra.mrb[28].mxu1 %vm800_vm0, %v4951_v63 }
 0xa15   : > { %v4954_v21 = vpop.f32.mrb[26].mxu1  ;;  %5240 = vmatpush3.bf16.msra.mxu1 %v5237_v26 }
 0xa16   : > { %v3656_v38 = vpop.f32.mrb[27].mxu1  ;;  %5242 = vmatprep.subr.bf16.mxu1 %v5241_v49 }
 0xa17   : > { %4966 = vmatprep.mubr.msk.f32.mxu1 %vm800_vm0, %v3656_v38 }
 0xa18   : > { %4967 = vmatmul.mubr.msk.f32.gmra.mrb[30].mxu1 %vm800_vm0, %v4954_v21 }
 0xa19   : > { %5244 = vmatpush3.bf16.msra.mxu1 %v5241_v49 }
 0xa1a   : > { %5246 = vmatprep.subr.bf16.mxu1 %v5245_v16 }
 0xa1d   : > { %5248 = vmatpush3.bf16.msra.mxu1 %v5245_v16 }
 0xae7   : > { %v4965_v36 = vpop.f32.mrb[28].mxu1 }
 0xae8   : > { %v3764_v8 = vadd.f32 %v4965_v36, %v4397_v62  ;;  %v3758_v33 = vpop.f32.mrb[29].mxu1  ;;  %v4402_v36 = vld [vmem:[%s6666_s12] ss:$0 sm:$0xff] }
 0xae9   : > { %v3759_v13 = vadd.f32 %v4397_v62, %v3758_v33 }
 0xaea   : > { %v3778_v17 = vadd.f32 %v3764_v8, %v6127_v23 }
 0xaeb   : > { %v4968_v59 = vpop.f32.mrb[30].mxu1  ;;  %v3777_v0 = vadd.f32 %v3759_v13, %v6124_v28 }
 0xaec   : > { %v3774_v45 = vadd.f32 %v4968_v59, %v4397_v62  ;;  %v3768_v46 = vpop.f32.mrb[31].mxu1  ;;  %v3786_v19 = vsel %vm800_vm0, %v3778_v17, 0.0 }
 0xaed   : > { %v3769_v12 = vadd.f32 %v4397_v62, %v3768_v46  ;;  %3787 = vadd.xlane.f32.xlu1 %v3786_v19  ;;  %v3783_v51 = vsel %vm800_vm0, %v3777_v0, 0.0 }
 0xaee   : > { %3784 = vadd.xlane.f32.xlu0 %v3783_v51  ;;  %v3780_v50 = vadd.f32 %v3774_v45, %v6139_v57 }
 0xaef   : > { %v3779_v58 = vadd.f32 %v3769_v12, %v6137_v37 }
 0xaf0   : > { %v3792_v15 = vsel %vm800_vm0, %v3780_v50, 0.0 }
 0xaf1   : > { %3793 = vadd.xlane.f32.xlu1 %v3792_v15  ;;  %v3789_v23 = vsel %vm800_vm0, %v3779_v58, 0.0 }
 0xaf2   : > { %3790 = vadd.xlane.f32.xlu0 %v3789_v23 }
 0xb7a   : > { %v3788_v28 = vpop.xlane.xlu1 %3787 }
 0xb7b   : > { %v3796_v2 = vmul.f32 0.03125, %v3788_v28  ;;  %v3785_v34 = vpop.xlane.xlu0 %3784 }
 0xb7c   : > { %v3795_v60 = vmul.f32 0.03125, %v3785_v34  ;;  %v3974_v34 = vld [vmem:[%s6670_s16 + $0x38] sm:$0xff] }
 0xb7d   : > { %v6553_v41 = vsub.f32 %v3778_v17, %v3796_v2  ;;  %v4403_v17 = vld [vmem:[%s6667_s13] ss:$0 sm:$0xff]  ;;  %v3973_v2 = vld [vmem:[%s6670_s16 + $0x30] sm:$0xff] }
 0xb7e   : > { %v6555_v40 = vsub.f32 %v3777_v0, %v3795_v60  ;;  %v3794_v3 = vpop.xlane.xlu1 %3793  ;;  %v5249_v60 = vpack.c.bf16 %v3974_v34, %v3973_v2 }
 0xb7f   : > { %v3798_v9 = vmul.f32 0.03125, %v3794_v3  ;;  %v3791_v5 = vpop.xlane.xlu0 %3790  ;;  %v3804_v37 = vmul.f32 %v6553_v41, %v6553_v41 }
 0xb80   : > { %v3797_v57 = vmul.f32 0.03125, %v3791_v5  ;;  %v3803_v39 = vmul.f32 %v6555_v40, %v6555_v40  ;;  %5250 = vmatprep.subr.bf16.mxu1 %v5249_v60 }
 0xb81   : > { %v6561_v7 = vsub.f32 %v3780_v50, %v3798_v9  ;;  %v3810_v31 = vsel %vm800_vm0, %v3804_v37, 0.0  ;;  %5252 = vmatpush3.bf16.msra.mxu1 %v5249_v60  ;;  %v4414_v60 = vld [vmem:[%s6672_s18] ss:$0 sm:$0xff] }
 0xb82   : > { %v6564_v29 = vsub.f32 %v3779_v58, %v3797_v57  ;;  %3811 = vadd.xlane.f32.xlu1 %v3810_v31  ;;  %v3807_v6 = vsel %vm800_vm0, %v3803_v39, 0.0 }
 0xb83   : > { %3808 = vadd.xlane.f32.xlu0 %v3807_v6  ;;  %v3806_v25 = vmul.f32 %v6561_v7, %v6561_v7 }
 0xb84   : > { %v3805_v61 = vmul.f32 %v6564_v29, %v6564_v29 }
 0xb85   : > { %v3816_v54 = vsel %vm800_vm0, %v3806_v25, 0.0 }
 0xb86   : > { %3817 = vadd.xlane.f32.xlu1 %v3816_v54  ;;  %v3813_v20 = vsel %vm800_vm0, %v3805_v61, 0.0  ;;  %v4409_v61 = vld [vmem:[%s6671_s17] ss:$0 sm:$0xff] }
 0xb87   : > { %3814 = vadd.xlane.f32.xlu0 %v3813_v20 }
 0xc0f   : > { %v3812_v27 = vpop.xlane.xlu1 %3811 }
 0xc10   : > { %v3820_v18 = vmul.f32 0.03125, %v3812_v27  ;;  %v3809_v24 = vpop.xlane.xlu0 %3808 }
 0xc11   : > { %v3819_v14 = vmul.f32 0.03125, %v3809_v24 }
 0xc12   : > { %v3824_v4 = vadd.f32 1e-05, %v3820_v18 }
 0xc13   : > { %v3823_v35 = vadd.f32 1e-05, %v3819_v14  ;;  %v3818_v10 = vpop.xlane.xlu1 %3817 }
 0xc14   : > { %5422 = vrsqrt.f32 %v3824_v4  ;;  %v3822_v52 = vmul.f32 0.03125, %v3818_v10  ;;  %v3815_v63 = vpop.xlane.xlu0 %3814 }
 0xc15   : > { %5424 = vrsqrt.f32 %v3823_v35  ;;  %v3821_v53 = vmul.f32 0.03125, %v3815_v63 }
 0xc16   : > { %v3826_v21 = vadd.f32 1e-05, %v3822_v52 }
 0xc17   : > { %v3825_v38 = vadd.f32 1e-05, %v3821_v53 }
 0xc18   : > { %5426 = vrsqrt.f32 %v3826_v21 }
 0xc19   : > { %5428 = vrsqrt.f32 %v3825_v38 }
 0xc1e   : > { %v5423_v62 = vpop.eup %5422 }
 0xc1f   : > { %v5425_v8 = vpop.eup %5424  ;;  %v3832_v33 = vmul.f32 %v5423_v62, %v6553_v41  ;;  %v4404_v41 = vld [vmem:[%s6669_s15] ss:$0 sm:$0xff] }
 0xc20   : > { %v3831_v13 = vmul.f32 %v5425_v8, %v6555_v40 }
 0xc21   : > { %v3842_v59 = vmul.f32 %v4402_v36, %v3832_v33 }
 0xc22   : > { %v5427_v0 = vpop.eup %5426  ;;  %v3841_v45 = vmul.f32 %v4402_v36, %v3831_v13 }
 0xc23   : > { %v5429_v46 = vpop.eup %5428  ;;  %v3834_v19 = vmul.f32 %v5427_v0, %v6561_v7  ;;  %v3852_v50 = vadd.f32 %v4403_v17, %v3842_v59 }
 0xc24   : > { %v3851_v12 = vadd.f32 %v4403_v17, %v3841_v45  ;;  %v3833_v51 = vmul.f32 %v5429_v46, %v6564_v29 }
 0xc25   : > { %v3844_v58 = vmul.f32 %v4402_v36, %v3834_v19 }
 0xc26   : > { %4977 = vmatprep.mubr.msk.f32.mxu0 %vm800_vm0, %v3851_v12  ;;  %v3843_v15 = vmul.f32 %v4402_v36, %v3833_v51 }
 0xc27   : > { %4978 = vmatmul.mubr.msk.f32.vlgmr.msra.gmra.mrb[40].mxu0 %vm800_vm0, %v3852_v50  ;;  %v3854_v28 = vadd.f32 %v4403_v17, %v3844_v58 }
 0xc28   : > { %v3853_v23 = vadd.f32 %v4403_v17, %v3843_v15 }
 0xc2a   : > { %4980 = vmatprep.mubr.msk.f32.mxu0 %vm800_vm0, %v3853_v23 }
 0xc2b   : > { %4981 = vmatmul.mubr.msk.f32.gmra.mrb[42].mxu0 %vm800_vm0, %v3854_v28 }
 0xcfa   : > { %v4979_v40 = vpop.f32.mrb[40].mxu0 }
 0xcfb   : > { %v3950_v3 = vadd.f32 %v4979_v40, %v4404_v41  ;;  %v3944_v9 = vpop.f32.mrb[41].mxu0 }
 0xcfc   : > { %v3945_v5 = vadd.f32 %v4404_v41, %v3944_v9 }
 0xcfd   : > { %v3964_v39 = vmax.f32 %v3950_v3, 0.0  ;;  %v4415_v3 = vld [vmem:[%s6673_s19] ss:$0 sm:$0xff] }
 0xcfe   : > { %v3963_v37 = vmax.f32 %v3945_v5, 0.0  ;;  %v4982_v57 = vpop.f32.mrb[42].mxu0 }
 0xcff   : > { %v3960_v7 = vadd.f32 %v4982_v57, %v4404_v41  ;;  %v3954_v31 = vpop.f32.mrb[43].mxu0 }
 0xd00   : > { %v3955_v29 = vadd.f32 %v4404_v41, %v3954_v31  ;;  %4999 = vmatprep.mubr.msk.f32.mxu1 %vm3982_vm1, %v3963_v37 }
 0xd01   : > { %5000 = vmatmul.mubr.msk.f32.vlgmr.msra.gmra.mrb[32].mxu1 %vm3982_vm1, %v3964_v39  ;;  %v3966_v25 = vmax.f32 %v3960_v7, 0.0 }
 0xd02   : > { %v3965_v6 = vmax.f32 %v3955_v29, 0.0 }
 0xd04   : > { %5002 = vmatprep.mubr.msk.f32.mxu1 %vm3982_vm1, %v3965_v6 }
 0xd05   : > { %5003 = vmatmul.mubr.msk.f32.gmra.mrb[34].mxu1 %vm3982_vm1, %v3966_v25 }
 0xdd4   : > { %v5001_v54 = vpop.f32.mrb[32].mxu1 }
 0xdd5   : > { %v4067_v20 = vadd.f32 %v5001_v54, %v4409_v61  ;;  %v4061_v11 = vpop.f32.mrb[33].mxu1 }
 0xdd6   : > { %v4062_v32 = vadd.f32 %v4409_v61, %v4061_v11 }
 0xdd7   : > { %v4081_v1 = vadd.f32 %v4067_v20, %v3852_v50 }
 0xdd8   : > { %v5004_v48 = vpop.f32.mrb[34].mxu1  ;;  %v4080_v42 = vadd.f32 %v4062_v32, %v3851_v12 }
 0xdd9   : > { %v4077_v22 = vadd.f32 %v5004_v48, %v4409_v61  ;;  %v4071_v30 = vpop.f32.mrb[35].mxu1  ;;  %v4089_v56 = vsel %vm800_vm0, %v4081_v1, 0.0 }
 0xdda   : > { %v4072_v55 = vadd.f32 %v4409_v61, %v4071_v30  ;;  %4090 = vadd.xlane.f32.xlu1 %v4089_v56  ;;  %v4086_v26 = vsel %vm800_vm0, %v4080_v42, 0.0 }
 0xddb   : > { %4087 = vadd.xlane.f32.xlu0 %v4086_v26  ;;  %v4083_v47 = vadd.f32 %v4077_v22, %v3854_v28 }
 0xddc   : > { %v4082_v49 = vadd.f32 %v4072_v55, %v3853_v23 }
 0xddd   : > { %v4095_v44 = vsel %vm800_vm0, %v4083_v47, 0.0 }
 0xdde   : > { %4096 = vadd.xlane.f32.xlu1 %v4095_v44  ;;  %v4092_v43 = vsel %vm800_vm0, %v4082_v49, 0.0 }
 0xddf   : > { %4093 = vadd.xlane.f32.xlu0 %v4092_v43 }
 0xe67   : > { %v4091_v16 = vpop.xlane.xlu1 %4090 }
 0xe68   : > { %v4099_v27 = vmul.f32 0.03125, %v4091_v16  ;;  %v4088_v18 = vpop.xlane.xlu0 %4087 }
 0xe69   : > { %v4098_v24 = vmul.f32 0.03125, %v4088_v18 }
 0xe6a   : > { %v4103_v14 = vsub.f32 %v4081_v1, %v4099_v27 }
 0xe6b   : > { %v4102_v4 = vsub.f32 %v4080_v42, %v4098_v24  ;;  %v4097_v35 = vpop.xlane.xlu1 %4096 }
 0xe6c   : > { %v4101_v10 = vmul.f32 0.03125, %v4097_v35  ;;  %v4094_v52 = vpop.xlane.xlu0 %4093  ;;  %v4107_v63 = vmul.f32 %v4103_v14, %v4103_v14 }
 0xe6d   : > { %v4100_v53 = vmul.f32 0.03125, %v4094_v52  ;;  %v4106_v21 = vmul.f32 %v4102_v4, %v4102_v4 }
 0xe6e   : > { %v4105_v38 = vsub.f32 %v4083_v47, %v4101_v10  ;;  %v4113_v62 = vsel %vm800_vm0, %v4107_v63, 0.0 }
 0xe6f   : > { %v4104_v36 = vsub.f32 %v4082_v49, %v4100_v53  ;;  %4114 = vadd.xlane.f32.xlu1 %v4113_v62  ;;  %v4110_v8 = vsel %vm800_vm0, %v4106_v21, 0.0 }
 0xe70   : > { %4111 = vadd.xlane.f32.xlu0 %v4110_v8  ;;  %v4109_v33 = vmul.f32 %v4105_v38, %v4105_v38 }
 0xe71   : > { %v4108_v13 = vmul.f32 %v4104_v36, %v4104_v36 }
 0xe72   : > { %v4119_v17 = vsel %vm800_vm0, %v4109_v33, 0.0 }
 0xe73   : > { %4120 = vadd.xlane.f32.xlu1 %v4119_v17  ;;  %v4116_v59 = vsel %vm800_vm0, %v4108_v13, 0.0 }
 0xe74   : > { %4117 = vadd.xlane.f32.xlu0 %v4116_v59 }
 0xefc   : > { %v4115_v0 = vpop.xlane.xlu1 %4114 }
 0xefd   : > { %v4123_v45 = vmul.f32 0.03125, %v4115_v0  ;;  %v4112_v46 = vpop.xlane.xlu0 %4111 }
 0xefe   : > { %v4122_v19 = vmul.f32 0.03125, %v4112_v46 }
 0xeff   : > { %v4127_v12 = vadd.f32 1e-06, %v4123_v45 }
 0xf00   : > { %v4126_v51 = vadd.f32 1e-06, %v4122_v19  ;;  %v4121_v50 = vpop.xlane.xlu1 %4120 }
 0xf01   : > { %5430 = vrsqrt.f32 %v4127_v12  ;;  %v4125_v58 = vmul.f32 0.03125, %v4121_v50  ;;  %v4118_v15 = vpop.xlane.xlu0 %4117 }
 0xf02   : > { %5432 = vrsqrt.f32 %v4126_v51  ;;  %v4124_v23 = vmul.f32 0.03125, %v4118_v15 }
 0xf03   : > { %v4129_v28 = vadd.f32 1e-06, %v4125_v58 }
 0xf04   : > { %v4128_v2 = vadd.f32 1e-06, %v4124_v23 }
 0xf05   : > { %5434 = vrsqrt.f32 %v4129_v28 }
 0xf06   : > { %5436 = vrsqrt.f32 %v4128_v2 }
 0xf0b   : > { %v5431_v34 = vpop.eup %5430 }
 0xf0c   : > { %v5433_v41 = vpop.eup %5432  ;;  %v4135_v40 = vmul.f32 %v5431_v34, %v4103_v14 }
 0xf0d   : > { %v4134_v9 = vmul.f32 %v5433_v41, %v4102_v4 }
 0xf0e   : > { %v4145_v5 = vmul.f32 %v4414_v60, %v4135_v40 }
 0xf0f   : > { %v5435_v37 = vpop.eup %5434  ;;  %v4144_v57 = vmul.f32 %v4414_v60, %v4134_v9 }
 0xf10   : > { %v5437_v39 = vpop.eup %5436  ;;  %v4155_v7 = vadd.f32 %v4415_v3, %v4145_v5  ;;  %v4137_v31 = vmul.f32 %v5435_v37, %v4105_v38 }
 0xf11   : > { %v4154_v29 = vadd.f32 %v4415_v3, %v4144_v57  ;;  %v4136_v6 = vmul.f32 %v5437_v39, %v4104_v36 }
 0xf12   : > { %4159 = vst.msk [vmem:[%s649_s0 + $0x8] sm:$0xff] %vm800_vm0, %v4155_v7  ;;  %v4147_v25 = vmul.f32 %v4414_v60, %v4137_v31 }
 0xf13   : > { %4158 = vst.msk [vmem:[%s649_s0] sm:$0xff] %vm800_vm0, %v4154_v29  ;;  %v4146_v61 = vmul.f32 %v4414_v60, %v4136_v6 }
 0xf14   : > { %v4157_v54 = vadd.f32 %v4415_v3, %v4147_v25 }
 0xf15   : > { %v4156_v20 = vadd.f32 %v4415_v3, %v4146_v61 }
 0xf16   : > { %4161 = vst.msk [vmem:[%s649_s0 + $0x18] sm:$0xff] %vm800_vm0, %v4157_v54 }
 0xf17   : > { %4160 = vst.msk [vmem:[%s649_s0 + $0x10] sm:$0xff] %vm800_vm0, %v4156_v20 }
 0xf18 PF: > { %s30_s1 = sadd.s32 1, %s5444_s1  }
 0xf19   : > { %p27_p4 = scmp.ge.s32.totalorder %s30_s1, 4  }
 0xf1b   :  { %29 = sbr.rel (!%p27_p4) target bundleno = 6 (0x6), region = 141 }

// kernel: seq2seq_forward.7
= control target key start
LH: loop header
LB: loop body
LE: loop exit
PB: predicated region body
PF: predicated region fallthrough
CT: control target
= control target key end

     0   :  { %s6955_s0 = inlined_call_operand.vmem [shape: f32[2,32,32], index: 0, kind: input, shape index: {}]   ;;  %s6956_s1 = inlined_call_operand.vmem [shape: f32[2,32,32], index: 1, kind: input, shape index: {}]   ;;  %s6957_s2 = inlined_call_operand.vmem [shape: f32[3,32,32], index: 2, kind: input, shape index: {}]   ;;  %s6958_s3 = inlined_call_operand.vmem [shape: f32[3,1,32], index: 3, kind: input, shape index: {}]   ;;  %s6959_s4 = inlined_call_operand.vmem [shape: f32[32,32], index: 4, kind: input, shape index: {}]   ;;  %s6960_s5 = inlined_call_operand.vmem [shape: f32[1,32], index: 5, kind: input, shape index: {}]   ;;  %s6961_s6 = inlined_call_operand.vmem [shape: f32[1,32], index: 6, kind: input, shape index: {}]   ;;  %s6962_s7 = inlined_call_operand.vmem [shape: f32[1,32], index: 7, kind: input, shape index: {}]   ;;  %s6963_s8 = inlined_call_operand.vmem [shape: f32[3,32,32], index: 8, kind: input, shape index: {}]   ;;  %s6964_s9 = inlined_call_operand.vmem [shape: f32[3,1,32], index: 9, kind: input, shape index: {}]   ;;  %s6965_s10 = inlined_call_operand.vmem [shape: f32[32,32], index: 10, kind: input, shape index: {}]   ;;  %s6966_s11 = inlined_call_operand.vmem [shape: f32[1,32], index: 11, kind: input, shape index: {}]   ;;  %s6967_s12 = inlined_call_operand.vmem [shape: f32[1,32], index: 12, kind: input, shape index: {}]   ;;  %s6968_s13 = inlined_call_operand.vmem [shape: f32[1,32], index: 13, kind: input, shape index: {}]   ;;  %s6969_s14 = inlined_call_operand.vmem [shape: f32[32,64], index: 14, kind: input, shape index: {}]   ;;  %s6970_s15 = inlined_call_operand.vmem [shape: f32[1,64], index: 15, kind: input, shape index: {}]   ;;  %s6971_s16 = inlined_call_operand.vmem [shape: f32[64,32], index: 16, kind: input, shape index: {}]   ;;  %s6972_s17 = inlined_call_operand.hbm [shape: f32[1,32], index: 17, kind: input, shape index: {}]   ;;  %s6973_s18 = inlined_call_operand.hbm [shape: f32[1,32], index: 18, kind: input, shape index: {}]   ;;  %s6974_s19 = inlined_call_operand.hbm [shape: f32[1,32], index: 19, kind: input, shape index: {}]   ;;  %s6975_s20 = inlined_call_operand.vmem [shape: f32[2,32,32], index: 20, kind: output, shape index: {}]  }
   0x1   :  { %6982 = sst [smem:[#allocation10_spill]] %s6955_s0 }
   0x2   :  { %6983 = sst [smem:[#allocation11_spill]] %s6956_s1 }
   0x3   :  { %6984 = sst [smem:[#allocation12_spill]] %s6957_s2 }
   0x4   :  { %6985 = sst [smem:[#allocation13_spill]] %s6958_s3 }
   0x5   :  { %6986 = sst [smem:[#allocation14_spill]] %s6959_s4 }
   0x6   :  { %6987 = sst [smem:[#allocation15_spill]] %s6975_s20 }
   0x7   :  { %25 = vsyncpa [#allocation3], 0 }
   0x8   :  { %26 = vsyncpa [#allocation5], 0  ;;  %s5753_s1 = smov 0  }
   0x9 LB: > { %6988 = sst [smem:[#allocation9_spill]] %s5642_s1  ;;  %s5759_s22 = sadd.s32 4294967295, %s5642_s1   ;;  %s5642_s1 = sphi %s5753_s1, %s32_s1  }
   0xa   : > { %p4300_p0 = scmp.ge.s32.totalorder %s5642_s1, 1  ;;  %p493_p1 = scmp.lt.s32.totalorder %s5642_s1, 3 }
   0xb   : > { %p6979_p2 = scmp.eq.s32.totalorder %s5759_s22, 0  ;;  %s5644_s24 = smov [#allocation4]  }
   0xc   : > { %p5764_p3 = pnand %p4300_p0, %p493_p1  ;;  %s562_s2 = sshll.u32 %s5644_s24, 4  ;;  %s563_s2 = int_to_ptr.vmem [resolvable:$true] %s562_s2 }
   0xd   : > { %s5645_s25 = smov [#allocation2]   ;;  %s5646_s26 = smov [#allocation6]  }
   0xe   : > { %s6989_s23 = scalar_select %p5764_p3, 1, 0 }
   0xf   : > { %p5364_p4 = pneg %p5764_p3  ;;  %s551_s3 = sshll.u32 %s5645_s25, 4  ;;  %s5776_s3 = int_to_ptr.vmem [resolvable:$true] %s551_s3 }
  0x10   : > { %s573_s27 = sshll.u32 %s5646_s26, 4  ;;  %s5544_s30 = scalar_lea.hbm %s6973_s18, 16  ;;  %s5778_s27 = int_to_ptr.vmem [resolvable:$true] %s573_s27 }
  0x11   : > { %p5772_p5 = pnand %p6979_p2, %p5364_p4  ;;  %p5545_p6 = scmp.ne.s32.totalorder %s6973_s18, %s5544_s30 }
  0x12   : > { %p5551_p10 = scmp.lt.u32.totalorder %s5544_s30, %s6973_s18 }
  0x13   : > { %p5788_p7 = pneg %p5772_p5 }
  0x15   : > { %p5547_p8 = pnand %p5788_p7, %p5545_p6 }
  0x17   : > { %p5548_p9 = pneg %p5547_p8 }
  0x19   : > { %p5553_p11 = pnand %p5551_p10, %p5548_p9 }
  0x1b   : > { %5556 = shalt.err (!%p5553_p11)
}
  0x1c   : > { %s5557_s4 = scalar_lea.vmem %s563_s2, 16  ;;  %s5564_s29 = scalar_lea.vmem %s563_s2, 32 }
  0x1d   : > { %p5558_p12 = scmp.ne.s32.totalorder %s563_s2, %s5557_s4  ;;  %p5565_p1 = scmp.lt.s32.totalorder %s563_s2, %s563_s2 }
  0x1e   : > { %p5566_p4 = scmp.lt.s32.totalorder %s5564_s29, %s5557_s4 }
  0x1f   : > { %p5560_p13 = pnand %p5558_p12, %p5788_p7 }
  0x20   : > { %p5567_p2 = por %p5566_p4, %p5565_p1 }
  0x21   : > { %p5561_p0 = pneg %p5560_p13 }
  0x23   : > { %p5568_p3 = pnand %p5567_p2, %p5561_p0 }
  0x25   : > { %5571 = shalt.err (!%p5568_p3)
}
  0x26   : > { %5370 = dma.hbm_to_vmem [thread:$0]  (!%p5772_p5), %s6973_s18, 16, %s563_s2, [#allocation5]  }
  0x27   : > { %s5572_s26 = scalar_lea.hbm %s6972_s17, 16 }
  0x28   : > { %p5573_p6 = scmp.ne.s32.totalorder %s6972_s17, %s5572_s26  ;;  %p5579_p2 = scmp.lt.u32.totalorder %s5572_s26, %s6972_s17 }
  0x2a   : > { %p5575_p8 = pnand %p5573_p6, %p5788_p7 }
  0x2c   : > { %p5576_p9 = pneg %p5575_p8 }
  0x2e   : > { %p5581_p3 = pnand %p5579_p2, %p5576_p9 }
  0x30   : > { %5584 = shalt.err (!%p5581_p3)
}
  0x31   : > { %s5585_s2 = scalar_lea.vmem %s5776_s3, 16  ;;  %s5592_s20 = scalar_lea.vmem %s5776_s3, 32 }
  0x32   : > { %p5586_p10 = scmp.ne.s32.totalorder %s5776_s3, %s5585_s2  ;;  %p5593_p13 = scmp.lt.s32.totalorder %s5776_s3, %s5776_s3 }
  0x33   : > { %p5594_p0 = scmp.lt.s32.totalorder %s5592_s20, %s5585_s2 }
  0x34   : > { %p5588_p11 = pnand %p5586_p10, %p5788_p7 }
  0x35   : > { %p5595_p1 = por %p5594_p0, %p5593_p13 }
  0x36   : > { %p5589_p12 = pneg %p5588_p11 }
  0x38   : > { %p5596_p4 = pnand %p5595_p1, %p5589_p12 }
  0x3a   : > { %5599 = shalt.err (!%p5596_p4)
}
  0x3b   : > { %5367 = dma.hbm_to_vmem [thread:$0]  (!%p5772_p5), %s6972_s17, 16, %s5776_s3, [#allocation3]  }
  0x3c   : > { %s5600_s25 = scalar_lea.hbm %s6974_s19, 16 }
  0x3d   : > { %p5601_p6 = scmp.ne.s32.totalorder %s6974_s19, %s5600_s25  ;;  %p5607_p2 = scmp.lt.u32.totalorder %s5600_s25, %s6974_s19 }
  0x3f   : > { %p5603_p8 = pnand %p5601_p6, %p5788_p7 }
  0x41   : > { %p5604_p9 = pneg %p5603_p8 }
  0x43   : > { %p5609_p3 = pnand %p5607_p2, %p5604_p9 }
  0x45   : > { %5612 = shalt.err (!%p5609_p3)
}
  0x46   : > { %s5613_s3 = scalar_lea.vmem %s5778_s27, 16  ;;  %s5620_s20 = scalar_lea.vmem %s5778_s27, 32 }
  0x47   : > { %p5614_p10 = scmp.ne.s32.totalorder %s5778_s27, %s5613_s3  ;;  %p5621_p13 = scmp.lt.s32.totalorder %s5778_s27, %s5778_s27 }
  0x48   : > { %p5622_p0 = scmp.lt.s32.totalorder %s5620_s20, %s5613_s3 }
  0x49   : > { %p5616_p11 = pnand %p5614_p10, %p5788_p7 }
  0x4a   : > { %p5623_p1 = por %p5622_p0, %p5621_p13 }
  0x4b   : > { %p5617_p12 = pneg %p5616_p11 }
  0x4d   : > { %p5624_p4 = pnand %p5623_p1, %p5617_p12 }
  0x4f   : > { %5627 = shalt.err (!%p5624_p4)
}
  0x50   : > { %5373 = dma.hbm_to_vmem [thread:$0]  (!%p5772_p5), %s6974_s19, 16, %s5778_s27, [#allocation5]  }
  0x51   : > { %p6992_p6 = scmp.ne.s32.totalorder %s6989_s23, 0 }
  0x52   : > { %p6993_p7 = scmp.eq.s32.totalorder (!%p6992_p6), %s5759_s22, 0 }
  0x53   : > { %602 = sbr.rel (%p6992_p6) target bundleno = 3949 (0xf6d), region = 100 }
  0x5a   : > { %5633 = dma.done.wait (%p6993_p7), [#allocation3], 16   ;;  %p6994_p8 = pmov %p6993_p7 }
  0x5b   : > { %p6995_p9 = pmov %p6993_p7 }
  0x5c   : > { %5635 = vsyncadd (%p6994_p8), [#allocation3], 4294967280 }
  0x5d   : > { %5637 = dma.done.wait (%p6995_p9), [#allocation5], 32   ;;  %p6996_p2 = pmov %p6993_p7 }
  0x5e   : > { %p673_p3 = scmp.lt.s32.totalorder %s5759_s22, 1  ;;  %s6997_s24 = sld [smem:[#allocation10_spill]]  ;;  %vm838_vm0 = vcmask 261120   ;;  %v697_v22 = vlaneseq  ;;  %v5647_v33 = vmov 0.0  }
  0x5f   : > { %5639 = vsyncadd (%p6996_p2), [#allocation5], 4294967264  ;;  %s6998_s26 = sld [smem:[#allocation12_spill]]  ;;  %s7009_s4 = sld [smem:[#allocation11_spill]] }
  0x60   : > { %s7013_s22 = smov (!%p673_p3, %s5759_s22), 1  ;;  %v5944_v23 = vand.u32 127, %v697_v22  ;;  %vm5961_vm5 = vmpackc.low %vm838_vm0, %vm838_vm0 }
  0x61   : > { %s5864_s27 = sshll.u32 %s7013_s22, 5  ;;  %s7008_s22 = sld [smem:[#allocation14_spill]] }
  0x62   : > { %vm740_vm1 = vcmp.ge.s32.totalorder %v5944_v23, 8  ;;  %vm741_vm2 = vcmp.lt.s32.totalorder %v5944_v23, 16  ;;  %vm712_vm3 = vcmp.lt.s32.totalorder %v5944_v23, 8  ;;  %vm773_vm6 = vcmp.ge.s32.totalorder %v5944_v23, 16 }
  0x63   : > { %vm5952_vm4 = vmand %vm740_vm1, %vm741_vm2  ;;  %v5968_v34 = vsel %vm712_vm3, 1.0, %v5647_v33  ;;  %vm774_vm7 = vcmp.lt.s32.totalorder %v5944_v23, 24  ;;  %vm806_vm9 = vcmp.ge.s32.totalorder %v5944_v23, 24  ;;  %vm807_vm10 = vcmp.lt.s32.totalorder %v5944_v23, 32 }
  0x64   : > { %s5870_s21 = scalar_lea.vmem %s6997_s24, %s5864_s27  ;;  %s6999_s24 = sld [smem:[#allocation13_spill]]  ;;  %v5975_v38 = vsel %vm5952_vm4, 1.0, %v5647_v33  ;;  %vm6033_vm8 = vmand %vm773_vm6, %vm774_vm7  ;;  %vm4020_vm1 = vcmask 523264  }
  0x65   : > { %v4320_v0 = vld [vmem:[%s6998_s26 + $0x20] sm:$0xff]  ;;  %v4321_v1 = vld [vmem:[%s6998_s26 + $0x28] sm:$0xff]  ;;  %v4322_v2 = vld [vmem:[%s6998_s26 + $0x30] sm:$0xff]  ;;  %s682_s29 = scalar_lea.vmem %s7009_s4, %s5864_s27 }
  0x66   : > { %v5088_v3 = vpack.c.bf16 %v4321_v1, %v4320_v0  ;;  %v4323_v4 = vld [vmem:[%s6998_s26 + $0x38] sm:$0xff]  ;;  %v5885_v5 = vld [vmem:[%s5870_s21] sm:$0xff]  ;;  %v828_v8 = vld [vmem:[%s6998_s26 + $0x8] sm:$0xff] }
  0x67   : > { %v5092_v6 = vpack.c.bf16 %v4323_v4, %v4322_v2  ;;  %4730 = vmatprep.mubr.msk.f32.mxu1 %vm838_vm0, %v5885_v5  ;;  %v827_v7 = vld [vmem:[%s6998_s26] sm:$0xff]  ;;  %4716 = vmatprep.mubr.msk.f32.mxu0 %vm838_vm0, %v5885_v5  ;;  %v829_v10 = vld [vmem:[%s6998_s26 + $0x10] sm:$0xff]  ;;  %v830_v11 = vld [vmem:[%s6998_s26 + $0x18] sm:$0xff] }
  0x68   : > { %5089 = vmatprep.subr.bf16.mxu1 %v5088_v3  ;;  %v5080_v9 = vpack.c.bf16 %v828_v8, %v827_v7  ;;  %v5084_v12 = vpack.c.bf16 %v830_v11, %v829_v10  ;;  %v4330_v13 = vld [vmem:[%s6998_s26 + $0x40] sm:$0xff]  ;;  %v4331_v14 = vld [vmem:[%s6998_s26 + $0x48] sm:$0xff]  ;;  %v4332_v17 = vld [vmem:[%s6998_s26 + $0x50] sm:$0xff]  ;;  %v6047_v8 = vsel %vm6033_vm8, 1.0, %v5647_v33 }
  0x69   : > { %5091 = vmatpush3.bf16.msra.mxu1 %v5088_v3  ;;  %v5096_v15 = vpack.c.bf16 %v4331_v14, %v4330_v13  ;;  %v5910_v16 = vld [vmem:[%s5870_s21 + $0x8] sm:$0xff]  ;;  %v4333_v18 = vld [vmem:[%s6998_s26 + $0x58] sm:$0xff]  ;;  %v5919_v19 = vld [vmem:[%s5870_s21 + $0x10] sm:$0xff] }
  0x6a   : > { %5093 = vmatprep.subr.bf16.mxu1 %v5092_v6  ;;  %5081 = vmatprep.subr.bf16.mxu0 %v5080_v9  ;;  %v5100_v20 = vpack.c.bf16 %v4333_v18, %v4332_v17  ;;  %v5926_v21 = vld [vmem:[%s5870_s21 + $0x18] sm:$0xff]  ;;  %v4325_v24 = vld [vmem:[%s6999_s24 + $0x1] ss:$0 sm:$0xff]  ;;  %v4315_v29 = vld [vmem:[%s6999_s24] ss:$0 sm:$0xff]  ;;  %s7010_s21 = sld [smem:[#allocation15_spill]] }
  0x6b   : > { %5083 = vmatpush3.bf16.msra.mxu0 %v5080_v9  ;;  %v4335_v48 = vld [vmem:[%s6999_s24 + $0x2] ss:$0 sm:$0xff]  ;;  %vm6080_vm11 = vmand %vm806_vm9, %vm807_vm10 }
  0x6c   : > { %5085 = vmatprep.subr.bf16.mxu0 %v5084_v12  ;;  %v6607_v32 = vld [vmem:[%s682_s29] sm:$0xff] }
  0x6d   : > { %5095 = vmatpush3.bf16.msra.mxu1 %v5092_v6  ;;  %vm2363_vm13 = vcmp.ne.f32.partialorder %v6607_v32, 0.0 }
  0x6f   : > { %5087 = vmatpush3.bf16.msra.mxu0 %v5084_v12 }
  0x70   : > { %4731 = vmatmul.mubr.msk.f32.vlgmr.msra.gmra.mrb[0].mxu1 %vm838_vm0, %v5910_v16  ;;  %5097 = vmatprep.subr.bf16.mxu0 %v5096_v15  ;;  %s687_s28 = scalar_lea.vmem %s7010_s21, %s5864_s27 }
  0x71   : > { %4733 = vmatprep.mubr.msk.f32.mxu1 %vm838_vm0, %v5919_v19 }
  0x72   : > { %4717 = vmatmul.mubr.msk.f32.vlgmr.msra.gmra.mrb[0].mxu0 %vm838_vm0, %v5910_v16 }
  0x73   : > { %4719 = vmatprep.mubr.msk.f32.mxu0 %vm838_vm0, %v5919_v19  ;;  %5099 = vmatpush3.bf16.msra.mxu0 %v5096_v15 }
  0x74   : > { %4734 = vmatmul.mubr.msk.f32.gmra.mrb[2].mxu1 %vm838_vm0, %v5926_v21  ;;  %5101 = vmatprep.subr.bf16.mxu0 %v5100_v20 }
  0x76   : > { %4720 = vmatmul.mubr.msk.f32.gmra.mrb[2].mxu0 %vm838_vm0, %v5926_v21 }
  0x77   : > { %5103 = vmatpush3.bf16.msra.mxu0 %v5100_v20  ;;  %4744 = vmatprep.mubr.msk.f32.mxu0 %vm838_vm0, %v5885_v5  ;;  %v6089_v20 = vsel %vm6080_vm11, 1.0, %v5647_v33 }
  0x7a   : > { %4745 = vmatmul.mubr.msk.f32.vlgmr.msra.gmra.mrb[4].mxu0 %vm838_vm0, %v5910_v16 }
  0x7b   : > { %4747 = vmatprep.mubr.msk.f32.mxu0 %vm838_vm0, %v5919_v19 }
  0x7e   : > { %4748 = vmatmul.mubr.msk.f32.gmra.mrb[6].mxu0 %vm838_vm0, %v5926_v21 }
 0x143   : > { %v4732_v25 = vpop.f32.mrb[0].mxu1 }
 0x144   : > { %v1021_v26 = vadd.f32 %v4732_v25, %v4325_v24  ;;  %v1015_v27 = vpop.f32.mrb[1].mxu1 }
 0x145   : > { %v1016_v30 = vadd.f32 %v4325_v24, %v1015_v27  ;;  %v4718_v31 = vpop.f32.mrb[0].mxu0 }
 0x146   : > { %v917_v35 = vpop.f32.mrb[1].mxu0  ;;  %v923_v54 = vadd.f32 %v4718_v31, %v4315_v29 }
 0x147   : > { %v5970_v36 = vpack.c.bf16 %v1021_v26, %v1016_v30  ;;  %v4735_v37 = vpop.f32.mrb[2].mxu1  ;;  %v5977_v39 = vadd.f32 %v4315_v29, %v917_v35 }
 0x148   : > { %v1031_v40 = vadd.f32 %v4735_v37, %v4325_v24  ;;  %v1025_v41 = vpop.f32.mrb[3].mxu1  ;;  %v1134_v63 = vmul.f32 %v5968_v34, %v923_v54  ;;  %v1304_v0 = vmul.f32 %v5975_v38, %v923_v54  ;;  %v1656_v17 = vmul.f32 %v6047_v8, %v923_v54 }
 0x149   : > { %5106 = vmatprep.subr.msk.bf16.mxu1 %vm5961_vm5, %v5970_v36  ;;  %5118 = vmatprep.subr.msk.bf16.mxu0 %vm5961_vm5, %v5970_v36  ;;  %v1026_v42 = vadd.f32 %v4325_v24, %v1025_v41  ;;  %v4721_v43 = vpop.f32.mrb[2].mxu0  ;;  %v1133_v44 = vmul.f32 %v5968_v34, %v5977_v39  ;;  %v1303_v46 = vmul.f32 %v5975_v38, %v5977_v39 }
 0x14a   : > { %5109 = vmatpush3.bf16.xpose.msk.msra.mxu1 %vm5961_vm5, %v5970_v36  ;;  %5121 = vmatpush3.bf16.xpose.msk.msra.mxu0 %vm5961_vm5, %v5970_v36  ;;  %v927_v45 = vpop.f32.mrb[3].mxu0  ;;  %v933_v62 = vadd.f32 %v4721_v43, %v4315_v29  ;;  %v1655_v13 = vmul.f32 %v6047_v8, %v5977_v39  ;;  %v1914_v24 = vmul.f32 %v6089_v20, %v5977_v39 }
 0x14b   : > { %v5995_v47 = vpack.c.bf16 %v1031_v40, %v1026_v42  ;;  %4758 = vmatprep.mubr.msk.f32.mxu1 %vm838_vm0, %v1133_v44  ;;  %4772 = vmatprep.mubr.msk.f32.mxu0 %vm838_vm0, %v1303_v46  ;;  %v928_v57 = vadd.f32 %v4315_v29, %v927_v45  ;;  %v1915_v25 = vmul.f32 %v6089_v20, %v923_v54 }
 0x14c   : > { %v1306_v7 = vmul.f32 %v5975_v38, %v933_v62  ;;  %v1136_v9 = vmul.f32 %v5968_v34, %v933_v62  ;;  %v1658_v22 = vmul.f32 %v6047_v8, %v933_v62  ;;  %v1917_v27 = vmul.f32 %v6089_v20, %v933_v62 }
 0x14d   : > { %5112 = vmatprep.subr.msk.bf16.mxu1 %vm5961_vm5, %v5995_v47  ;;  %5124 = vmatprep.subr.msk.bf16.mxu0 %vm5961_vm5, %v5995_v47  ;;  %v4746_v49 = vpop.f32.mrb[4].mxu0  ;;  %v1305_v2 = vmul.f32 %v5975_v38, %v928_v57  ;;  %v1135_v6 = vmul.f32 %v5968_v34, %v928_v57  ;;  %v1657_v18 = vmul.f32 %v6047_v8, %v928_v57 }
 0x14e   : > { %v6008_v50 = vadd.f32 %v4746_v49, %v4335_v48  ;;  %v1113_v51 = vpop.f32.mrb[5].mxu0  ;;  %v1916_v26 = vmul.f32 %v6089_v20, %v928_v57 }
 0x14f   : > { %v6010_v52 = vadd.f32 %v4335_v48, %v1113_v51 }
 0x150   : > { %v1457_v53 = vmul.f32 %v5975_v38, %v6008_v50  ;;  %v1299_v11 = vmul.f32 %v5968_v34, %v6008_v50 }
 0x151   : > { %v4749_v55 = vpop.f32.mrb[6].mxu0  ;;  %v1456_v56 = vmul.f32 %v5975_v38, %v6010_v52  ;;  %v1298_v10 = vmul.f32 %v5968_v34, %v6010_v52 }
 0x152   : > { %5115 = vmatpush3.bf16.xpose.msk.msra.mxu1 %vm5961_vm5, %v5995_v47  ;;  %5127 = vmatpush3.bf16.xpose.msk.msra.mxu0 %vm5961_vm5, %v5995_v47  ;;  %v6022_v58 = vadd.f32 %v4749_v55, %v4335_v48  ;;  %v1123_v59 = vpop.f32.mrb[7].mxu0 }
 0x153   : > { %5146 = vmatprep.subr.msk.bf16.mxu0 %vm5961_vm5, %v5970_v36  ;;  %v6029_v60 = vadd.f32 %v4335_v48, %v1123_v59  ;;  %v5128_v61 = vpack.c.bf16 %v1457_v53, %v1456_v56  ;;  %v6068_v14 = vpack.c.bf16 %v1299_v11, %v1298_v10 }
 0x154   : > { %v1459_v4 = vmul.f32 %v5975_v38, %v6022_v58 }
 0x155   : > { %5129 = vmatprep.subr.bf16.mxu1 %v5128_v61  ;;  %v1458_v3 = vmul.f32 %v5975_v38, %v6029_v60 }
 0x157   : > { %v5132_v12 = vpack.c.bf16 %v1459_v4, %v1458_v3 }
 0x159   : > { %4759 = vmatmul.mubr.msk.f32.vlgmr.msra.gmra.mrb[4].mxu1 %vm838_vm0, %v1134_v63  ;;  %4773 = vmatmul.mubr.msk.f32.vlgmr.msra.gmra.mrb[8].mxu0 %vm838_vm0, %v1304_v0 }
 0x15a   : > { %5149 = vmatpush3.bf16.xpose.msk.msra.mxu0 %vm5961_vm5, %v5970_v36  ;;  %4775 = vmatprep.mubr.msk.f32.mxu0 %vm838_vm0, %v1305_v2 }
 0x15b   : > { %5152 = vmatprep.subr.msk.bf16.mxu0 %vm5961_vm5, %v5995_v47  ;;  %4761 = vmatprep.mubr.msk.f32.mxu1 %vm838_vm0, %v1135_v6 }
 0x15c   : > { %5131 = vmatpush3.bf16.msra.mxu1 %v5128_v61 }
 0x15d   : > { %4776 = vmatmul.mubr.msk.f32.gmra.mrb[10].mxu0 %vm838_vm0, %v1306_v7  ;;  %4762 = vmatmul.mubr.msk.f32.gmra.mrb[6].mxu1 %vm838_vm0, %v1136_v9 }
 0x15e   : > { %4814 = vmatprep.mubr.msk.f32.mxu0 %vm838_vm0, %v1655_v13  ;;  %5133 = vmatprep.subr.bf16.mxu1 %v5132_v12 }
 0x160   : > { %5135 = vmatpush3.bf16.msra.mxu1 %v5132_v12 }
 0x161   : > { %5137 = vmatprep.subr.bf16.mxu1 %v6068_v14 }
 0x162   : > { %5155 = vmatpush3.bf16.xpose.msk.msra.mxu0 %vm5961_vm5, %v5995_v47 }
 0x163   : > { %5166 = vmatprep.subr.msk.bf16.mxu0 %vm5961_vm5, %v5970_v36 }
 0x169   : > { %4815 = vmatmul.mubr.msk.f32.vlgmr.msra.gmra.mrb[12].mxu0 %vm838_vm0, %v1656_v17 }
 0x16a   : > { %4817 = vmatprep.mubr.msk.f32.mxu0 %vm838_vm0, %v1657_v18  ;;  %5169 = vmatpush3.bf16.xpose.msk.msra.mxu0 %vm5961_vm5, %v5970_v36 }
 0x16b   : > { %5172 = vmatprep.subr.msk.bf16.mxu0 %vm5961_vm5, %v5995_v47 }
 0x16d   : > { %4818 = vmatmul.mubr.msk.f32.gmra.mrb[14].mxu0 %vm838_vm0, %v1658_v22 }
 0x16e   : > { %4842 = vmatprep.mubr.msk.f32.mxu0 %vm838_vm0, %v1914_v24 }
 0x172   : > { %5175 = vmatpush3.bf16.xpose.msk.msra.mxu0 %vm5961_vm5, %v5995_v47 }
 0x179   : > { %4843 = vmatmul.mubr.msk.f32.vlgmr.msra.gmra.mrb[16].mxu0 %vm838_vm0, %v1915_v25 }
 0x17a   : > { %4845 = vmatprep.mubr.msk.f32.mxu0 %vm838_vm0, %v1916_v26 }
 0x17d   : > { %4846 = vmatmul.mubr.msk.f32.gmra.mrb[18].mxu0 %vm838_vm0, %v1917_v27 }
 0x22c   : > { %v4760_v29 = vpop.f32.mrb[4].mxu1  ;;  %v4774_v30 = vpop.f32.mrb[8].mxu0 }
 0x22d   : > { %v1405_v31 = vmul.f32 0.35355338, %v4774_v30  ;;  %v1227_v33 = vpop.f32.mrb[5].mxu1  ;;  %v1385_v35 = vpop.f32.mrb[9].mxu0  ;;  %v1247_v49 = vmul.f32 0.35355338, %v4760_v29 }
 0x22e   : > { %v1404_v36 = vmul.f32 0.35355338, %v1385_v35  ;;  %v1246_v41 = vmul.f32 0.35355338, %v1227_v33 }
 0x22f   : > { %v6121_v44 = vsel %vm5952_vm4, %v1405_v31, -1e+09  ;;  %v6145_v62 = vsel %vm5952_vm4, %v1247_v49, -1e+09 }
 0x230   : > { %v4777_v37 = vpop.f32.mrb[10].mxu0  ;;  %v6115_v39 = vsel %vm712_vm3, %v1404_v36, -1e+09  ;;  %v4763_v40 = vpop.f32.mrb[6].mxu1  ;;  %v1415_v51 = vsel %vm838_vm0, %v6121_v44, -inf  ;;  %v1257_v3 = vsel %vm838_vm0, %v6145_v62, -inf }
 0x231   : > { %v1395_v42 = vpop.f32.mrb[11].mxu0  ;;  %v1412_v43 = vsel %vm838_vm0, %v6115_v39, -inf  ;;  %v1407_v45 = vmul.f32 0.35355338, %v4777_v37  ;;  %v1237_v47 = vpop.f32.mrb[7].mxu1 }
 0x232   : > { %v1406_v46 = vmul.f32 0.35355338, %v1395_v42  ;;  %1413 = vmax.xlane.f32.xlu0 %v1412_v43  ;;  %v1248_v54 = vmul.f32 0.35355338, %v1237_v47  ;;  %v6137_v56 = vsel %vm712_vm3, %v1246_v41, -1e+09 }
 0x233   : > { %v6133_v55 = vsel %vm6080_vm11, %v1407_v45, -1e+09  ;;  %v1254_v59 = vsel %vm838_vm0, %v6137_v56, -inf  ;;  %v1249_v61 = vmul.f32 0.35355338, %v4763_v40 }
 0x234   : > { %v6125_v48 = vsel %vm6033_vm8, %v1406_v46, -1e+09  ;;  %v1421_v57 = vsel %vm838_vm0, %v6133_v55, -inf  ;;  %v6149_v63 = vsel %vm6033_vm8, %v1248_v54, -1e+09 }
 0x235   : > { %v1418_v53 = vsel %vm838_vm0, %v6125_v48, -inf  ;;  %v1260_v4 = vsel %vm838_vm0, %v6149_v63, -inf  ;;  %v6157_v9 = vsel %vm6080_vm11, %v1249_v61, -1e+09 }
 0x236   : > { %1416 = vmax.xlane.f32.xlu0 %v1415_v51  ;;  %1419 = vmax.xlane.f32.xlu1 %v1418_v53  ;;  %v1263_v13 = vsel %vm838_vm0, %v6157_v9, -inf }
 0x23a   : > { %1422 = vmax.xlane.f32.xlu1 %v1421_v57  ;;  %1255 = vmax.xlane.f32.xlu0 %v1254_v59 }
 0x23c   : > { %v4816_v0 = vpop.f32.mrb[12].mxu0 }
 0x23d   : > { %v1737_v2 = vpop.f32.mrb[13].mxu0  ;;  %v1757_v6 = vmul.f32 0.35355338, %v4816_v0 }
 0x23e   : > { %v1756_v7 = vmul.f32 0.35355338, %v1737_v2  ;;  %1258 = vmax.xlane.f32.xlu1 %v1257_v3  ;;  %1261 = vmax.xlane.f32.xlu0 %v1260_v4 }
 0x23f   : > { %v6169_v24 = vsel %vm5952_vm4, %v1757_v6, -1e+09 }
 0x240   : > { %v4819_v10 = vpop.f32.mrb[14].mxu0  ;;  %v6161_v11 = vsel %vm712_vm3, %v1756_v7, -1e+09  ;;  %v1767_v26 = vsel %vm838_vm0, %v6169_v24, -inf }
 0x241   : > { %v1747_v12 = vpop.f32.mrb[15].mxu0  ;;  %v1764_v17 = vsel %vm838_vm0, %v6161_v11, -inf  ;;  %v1759_v18 = vmul.f32 0.35355338, %v4819_v10 }
 0x242   : > { %v1758_v22 = vmul.f32 0.35355338, %v1747_v12  ;;  %1264 = vmax.xlane.f32.xlu1 %v1263_v13  ;;  %1765 = vmax.xlane.f32.xlu0 %v1764_v17 }
 0x243   : > { %v6181_v29 = vsel %vm6080_vm11, %v1759_v18, -1e+09 }
 0x244   : > { %v6173_v25 = vsel %vm6033_vm8, %v1758_v22, -1e+09  ;;  %v1773_v30 = vsel %vm838_vm0, %v6181_v29, -inf }
 0x245   : > { %v1770_v27 = vsel %vm838_vm0, %v6173_v25, -inf }
 0x246   : > { %1768 = vmax.xlane.f32.xlu1 %v1767_v26  ;;  %1771 = vmax.xlane.f32.xlu0 %v1770_v27 }
 0x24a   : > { %1774 = vmax.xlane.f32.xlu1 %v1773_v30 }
 0x24c   : > { %v4844_v31 = vpop.f32.mrb[16].mxu0 }
 0x24d   : > { %v2016_v33 = vmul.f32 0.35355338, %v4844_v31  ;;  %v1996_v35 = vpop.f32.mrb[17].mxu0 }
 0x24e   : > { %v2015_v36 = vmul.f32 0.35355338, %v1996_v35 }
 0x24f   : > { %v6187_v37 = vsel %vm5952_vm4, %v2016_v33, -1e+09 }
 0x250   : > { %v4847_v40 = vpop.f32.mrb[18].mxu0  ;;  %v2026_v41 = vsel %vm838_vm0, %v6187_v37, -inf  ;;  %v6193_v42 = vsel %vm712_vm3, %v2015_v36, -1e+09 }
 0x251   : > { %v2018_v43 = vmul.f32 0.35355338, %v4847_v40  ;;  %v2006_v45 = vpop.f32.mrb[19].mxu0  ;;  %2027 = vmax.xlane.f32.xlu1 %v2026_v41  ;;  %v2023_v46 = vsel %vm838_vm0, %v6193_v42, -inf }
 0x252   : > { %v2017_v47 = vmul.f32 0.35355338, %v2006_v45  ;;  %2024 = vmax.xlane.f32.xlu0 %v2023_v46 }
 0x253   : > { %v6199_v28 = vsel %vm6080_vm11, %v2018_v43, -1e+09 }
 0x254   : > { %v2032_v49 = vsel %vm838_vm0, %v6199_v28, -inf  ;;  %v6205_v23 = vsel %vm6033_vm8, %v2017_v47, -1e+09 }
 0x255   : > { %2033 = vmax.xlane.f32.xlu1 %v2032_v49  ;;  %v2029_v51 = vsel %vm838_vm0, %v6205_v23, -inf }
 0x256   : > { %2030 = vmax.xlane.f32.xlu0 %v2029_v51 }
 0x2bf   : > { %v1414_v53 = vpop.xlane.xlu0 %1413 }
 0x2c0   : > { %v1424_v54 = vsub.f32 %v6115_v39, %v1414_v53 }
 0x2c2   : > { %v1428_v57 = vmul.f32 1.442695, %v1424_v54 }
 0x2c3   : > { %v1417_v59 = vpop.xlane.xlu0 %1416  ;;  %v1420_v15 = vpop.xlane.xlu1 %1419 }
 0x2c4   : > { %5392 = vpow2.f32 %v1428_v57  ;;  %v1425_v61 = vsub.f32 %v6121_v44, %v1417_v59  ;;  %v1426_v0 = vsub.f32 %v6125_v48, %v1420_v15 }
 0x2c6   : > { %v1430_v2 = vmul.f32 1.442695, %v1425_v61  ;;  %v1432_v1 = vmul.f32 1.442695, %v1426_v0 }
 0x2c7   : > { %v1423_v3 = vpop.xlane.xlu1 %1422  ;;  %v1256_v4 = vpop.xlane.xlu0 %1255 }
 0x2c8   : > { %5394 = vpow2.f32 %v1430_v2  ;;  %v1427_v6 = vsub.f32 %v6133_v55, %v1423_v3  ;;  %v1266_v7 = vsub.f32 %v6137_v56, %v1256_v4 }
 0x2c9   : > { %5396 = vpow2.f32 %v1432_v1 }
 0x2ca   : > { %v1434_v10 = vmul.f32 1.442695, %v1427_v6  ;;  %v1270_v39 = vmul.f32 1.442695, %v1266_v7 }
 0x2cb   : > { %v1259_v12 = vpop.xlane.xlu1 %1258  ;;  %v1262_v13 = vpop.xlane.xlu0 %1261 }
 0x2cc   : > { %5398 = vpow2.f32 %v1434_v10  ;;  %v1267_v17 = vsub.f32 %v6145_v62, %v1259_v12  ;;  %v1268_v44 = vsub.f32 %v6149_v63, %v1262_v13 }
 0x2cd   : > { %5400 = vpow2.f32 %v1270_v39 }
 0x2ce   : > { %v6216_v48 = vpop.eup %5392  ;;  %v1272_v18 = vmul.f32 1.442695, %v1267_v17  ;;  %v1274_v22 = vmul.f32 1.442695, %v1268_v44 }
 0x2cf   : > { %v1265_v26 = vpop.xlane.xlu1 %1264  ;;  %v1766_v27 = vpop.xlane.xlu0 %1765  ;;  %v1436_v55 = vsel %vm838_vm0, %v6216_v48, 0.0 }
 0x2d0   : > { %5402 = vpow2.f32 %v1272_v18  ;;  %v1269_v56 = vsub.f32 %v6157_v9, %v1265_v26  ;;  %v1776_v30 = vsub.f32 %v6161_v11, %v1766_v27  ;;  %1437 = vadd.xlane.f32.xlu0 %v1436_v55 }
 0x2d1   : > { %5404 = vpow2.f32 %v1274_v22 }
 0x2d2   : > { %v6222_v62 = vpop.eup %5394  ;;  %v1276_v63 = vmul.f32 1.442695, %v1269_v56  ;;  %v1780_v31 = vmul.f32 1.442695, %v1776_v30 }
 0x2d3   : > { %v6224_v33 = vpop.eup %5396  ;;  %v1769_v35 = vpop.xlane.xlu1 %1768  ;;  %v1439_v40 = vsel %vm838_vm0, %v6222_v62, 0.0 }
 0x2d4   : > { %v1772_v36 = vpop.xlane.xlu0 %1771  ;;  %5406 = vpow2.f32 %v1276_v63  ;;  %v1777_v41 = vsub.f32 %v6169_v24, %v1769_v35  ;;  %1440 = vadd.xlane.f32.xlu1 %v1439_v40  ;;  %v1442_v11 = vsel %vm838_vm0, %v6224_v33, 0.0 }
 0x2d5   : > { %v1778_v9 = vsub.f32 %v6173_v25, %v1772_v36  ;;  %5408 = vpow2.f32 %v1780_v31  ;;  %1443 = vadd.xlane.f32.xlu0 %v1442_v11 }
 0x2d6   : > { %v6232_v43 = vpop.eup %5398  ;;  %v1782_v45 = vmul.f32 1.442695, %v1777_v41 }
 0x2d7   : > { %v1784_v46 = vmul.f32 1.442695, %v1778_v9  ;;  %v6234_v47 = vpop.eup %5400  ;;  %v1775_v49 = vpop.xlane.xlu1 %1774  ;;  %v1445_v51 = vsel %vm838_vm0, %v6232_v43, 0.0 }
 0x2d8   : > { %5410 = vpow2.f32 %v1782_v45  ;;  %v1779_v24 = vsub.f32 %v6181_v29, %v1775_v49  ;;  %1446 = vadd.xlane.f32.xlu1 %v1445_v51  ;;  %v1278_v25 = vsel %vm838_vm0, %v6234_v47, 0.0 }
 0x2d9   : > { %5412 = vpow2.f32 %v1784_v46  ;;  %1279 = vadd.xlane.f32.xlu0 %v1278_v25  ;;  %v1300_v25 = vmul.f32 %v5968_v34, %v6029_v60 }
 0x2da   : > { %v6241_v53 = vpop.eup %5402  ;;  %v1786_v54 = vmul.f32 1.442695, %v1779_v24 }
 0x2db   : > { %v6243_v57 = vpop.eup %5404  ;;  %v1281_v59 = vsel %vm838_vm0, %v6241_v53, 0.0 }
 0x2dc   : > { %5414 = vpow2.f32 %v1786_v54  ;;  %1282 = vadd.xlane.f32.xlu1 %v1281_v59  ;;  %v1284_v15 = vsel %vm838_vm0, %v6243_v57, 0.0  ;;  %v1301_v54 = vmul.f32 %v5968_v34, %v6022_v58 }
 0x2dd   : > { %1285 = vadd.xlane.f32.xlu0 %v1284_v15 }
 0x2de   : > { %v6249_v29 = vpop.eup %5406  ;;  %v2028_v61 = vpop.xlane.xlu1 %2027 }
 0x2df   : > { %v6251_v0 = vpop.eup %5408  ;;  %v2036_v2 = vsub.f32 %v6187_v37, %v2028_v61  ;;  %v2025_v1 = vpop.xlane.xlu0 %2024  ;;  %v1287_v3 = vsel %vm838_vm0, %v6249_v29, 0.0 }
 0x2e0   : > { %v2035_v4 = vsub.f32 %v6193_v42, %v2025_v1  ;;  %1288 = vadd.xlane.f32.xlu1 %v1287_v3  ;;  %v1788_v6 = vsel %vm838_vm0, %v6251_v0, 0.0  ;;  %v5140_v3 = vpack.c.bf16 %v1301_v54, %v1300_v25  ;;  %v2174_v25 = vld [vmem:[%s7008_s22 + $0x10] sm:$0xff]  ;;  %v2175_v54 = vld [vmem:[%s7008_s22 + $0x18] sm:$0xff] }
 0x2e1   : > { %v2041_v7 = vmul.f32 1.442695, %v2036_v2  ;;  %1789 = vadd.xlane.f32.xlu0 %v1788_v6  ;;  %v1809_v6 = vmul.f32 %v6047_v8, %v6008_v50 }
 0x2e2   : > { %v6259_v10 = vpop.eup %5410  ;;  %v2039_v39 = vmul.f32 1.442695, %v2035_v4  ;;  %v2034_v12 = vpop.xlane.xlu1 %2033  ;;  %v1808_v4 = vmul.f32 %v6047_v8, %v6010_v52 }
 0x2e3   : > { %v6261_v13 = vpop.eup %5412  ;;  %5416 = vpow2.f32 %v2041_v7  ;;  %v2038_v37 = vsub.f32 %v6199_v28, %v2034_v12  ;;  %v2031_v17 = vpop.xlane.xlu0 %2030  ;;  %v1791_v44 = vsel %vm838_vm0, %v6259_v10, 0.0 }
 0x2e4   : > { %5418 = vpow2.f32 %v2039_v39  ;;  %v2037_v42 = vsub.f32 %v6205_v23, %v2031_v17  ;;  %1792 = vadd.xlane.f32.xlu1 %v1791_v44  ;;  %v1794_v18 = vsel %vm838_vm0, %v6261_v13, 0.0  ;;  %v5156_v17 = vpack.c.bf16 %v1809_v6, %v1808_v4 }
 0x2e5   : > { %v2045_v22 = vmul.f32 1.442695, %v2038_v37  ;;  %1795 = vadd.xlane.f32.xlu0 %v1794_v18  ;;  %v1810_v44 = vmul.f32 %v6047_v8, %v6029_v60 }
 0x2e6   : > { %v6269_v26 = vpop.eup %5414  ;;  %v2043_v27 = vmul.f32 1.442695, %v2037_v42 }
 0x2e7   : > { %5420 = vpow2.f32 %v2045_v22  ;;  %v1797_v28 = vsel %vm838_vm0, %v6269_v26, 0.0 }
 0x2e8   : > { %5422 = vpow2.f32 %v2043_v27  ;;  %1798 = vadd.xlane.f32.xlu1 %v1797_v28  ;;  %v2067_v28 = vmul.f32 %v6089_v20, %v6010_v52  ;;  %v2070_v52 = vmul.f32 %v6089_v20, %v6022_v58 }
 0x2ed   : > { %v6273_v55 = vpop.eup %5416 }
 0x2ee   : > { %v6275_v56 = vpop.eup %5418  ;;  %v2050_v23 = vsel %vm838_vm0, %v6273_v55, 0.0 }
 0x2ef   : > { %2051 = vadd.xlane.f32.xlu1 %v2050_v23  ;;  %v2047_v30 = vsel %vm838_vm0, %v6275_v56, 0.0  ;;  %v2068_v23 = vmul.f32 %v6089_v20, %v6008_v50 }
 0x2f0   : > { %2048 = vadd.xlane.f32.xlu0 %v2047_v30 }
 0x2f1   : > { %v6281_v63 = vpop.eup %5420 }
 0x2f2   : > { %v6283_v31 = vpop.eup %5422  ;;  %v2056_v35 = vsel %vm838_vm0, %v6281_v63, 0.0 }
 0x2f3   : > { %2057 = vadd.xlane.f32.xlu1 %v2056_v35  ;;  %v2053_v36 = vsel %vm838_vm0, %v6283_v31, 0.0 }
 0x2f4   : > { %2054 = vadd.xlane.f32.xlu0 %v2053_v36 }
 0x35d   : > { %v1438_v40 = vpop.xlane.xlu0 %1437 }
 0x35e   : > { %5424 = vrcp.f32 %v1438_v40  ;;  %v2069_v40 = vmul.f32 %v6089_v20, %v6029_v60  ;;  %v2172_v60 = vld [vmem:[%s7008_s22] sm:$0xff] }
 0x361   : > { %v1441_v41 = vpop.xlane.xlu1 %1440 }
 0x362   : > { %5426 = vrcp.f32 %v1441_v41  ;;  %v1444_v9 = vpop.xlane.xlu0 %1443 }
 0x363   : > { %5428 = vrcp.f32 %v1444_v9 }
 0x365   : > { %v1447_v11 = vpop.xlane.xlu1 %1446 }
 0x366   : > { %5430 = vrcp.f32 %v1447_v11  ;;  %v1280_v45 = vpop.xlane.xlu0 %1279 }
 0x367   : > { %5432 = vrcp.f32 %v1280_v45  ;;  %v5180_v45 = vpack.c.bf16 %v2070_v52, %v2069_v40 }
 0x368   : > { %v5425_v46 = vpop.eup %5424 }
 0x369   : > { %v1283_v49 = vpop.xlane.xlu1 %1282  ;;  %v1452_v51 = vmul.f32 %v5425_v46, %v6216_v48 }
 0x36a   : > { %5434 = vrcp.f32 %v1283_v49  ;;  %v1286_v24 = vpop.xlane.xlu0 %1285 }
 0x36b   : > { %5436 = vrcp.f32 %v1286_v24  ;;  %4786 = vmatprep.mubr.msk.f32.mxu1 %vm838_vm0, %v1452_v51 }
 0x36c   : > { %v5427_v59 = vpop.eup %5426 }
 0x36d   : > { %v5429_v15 = vpop.eup %5428  ;;  %v1453_v61 = vmul.f32 %v5427_v59, %v6222_v62  ;;  %v1289_v2 = vpop.xlane.xlu1 %1288 }
 0x36e   : > { %5438 = vrcp.f32 %v1289_v2  ;;  %v1790_v1 = vpop.xlane.xlu0 %1789  ;;  %v1454_v48 = vmul.f32 %v5429_v15, %v6224_v33 }
 0x36f   : > { %5440 = vrcp.f32 %v1790_v1  ;;  %4787 = vmatmul.mubr.msk.f32.vlgmr.msra.gmra.mrb[8].mxu1 %vm838_vm0, %v1453_v61  ;;  %v5188_v61 = vpack.c.bf16 %v2175_v54, %v2174_v25  ;;  %v2369_v54 = vld [vmem:[%s6963_s8 + $0x10] sm:$0xff] }
 0x370   : > { %v5431_v7 = vpop.eup %5430  ;;  %5139 = vmatpush3.bf16.msra.mxu1 %v6068_v14  ;;  %4789 = vmatprep.mubr.msk.f32.mxu1 %vm838_vm0, %v1454_v48  ;;  %v1811_v14 = vmul.f32 %v6047_v8, %v6022_v58  ;;  %v2173_v58 = vld [vmem:[%s7008_s22 + $0x8] sm:$0xff] }
 0x371   : > { %v5433_v62 = vpop.eup %5432  ;;  %5141 = vmatprep.subr.bf16.mxu1 %v5140_v3  ;;  %v1793_v39 = vpop.xlane.xlu1 %1792  ;;  %v1455_v33 = vmul.f32 %v5431_v7, %v6232_v43  ;;  %v5184_v51 = vpack.c.bf16 %v2173_v58, %v2172_v60  ;;  %v4404_v58 = vld [vmem:[%s6963_s8 + $0x20] sm:$0xff] }
 0x372   : > { %5442 = vrcp.f32 %v1793_v39  ;;  %v1796_v12 = vpop.xlane.xlu0 %1795  ;;  %v1294_v37 = vmul.f32 %v5433_v62, %v6234_v47  ;;  %v5160_v27 = vpack.c.bf16 %v1811_v14, %v1810_v44 }
 0x373   : > { %5444 = vrcp.f32 %v1796_v12  ;;  %4790 = vmatmul.mubr.msk.f32.gmra.mrb[10].mxu1 %vm838_vm0, %v1455_v33 }
 0x374   : > { %v5435_v42 = vpop.eup %5434  ;;  %5143 = vmatpush3.bf16.msra.mxu1 %v5140_v3  ;;  %4800 = vmatprep.mubr.msk.f32.mxu1 %vm838_vm0, %v1294_v37 }
 0x375   : > { %v5437_v18 = vpop.eup %5436  ;;  %v1295_v43 = vmul.f32 %v5435_v42, %v6241_v53  ;;  %5157 = vmatprep.subr.bf16.mxu1 %v5156_v17  ;;  %v1799_v22 = vpop.xlane.xlu1 %1798 }
 0x376   : > { %5446 = vrcp.f32 %v1799_v22  ;;  %v1296_v47 = vmul.f32 %v5437_v18, %v6243_v57  ;;  %v5176_v57 = vpack.c.bf16 %v2068_v23, %v2067_v28 }
 0x377   : > { %4801 = vmatmul.mubr.msk.f32.vlgmr.msra.gmra.mrb[8].mxu1 %vm838_vm0, %v1295_v43 }
 0x378   : > { %v5439_v30 = vpop.eup %5438  ;;  %5159 = vmatpush3.bf16.msra.mxu1 %v5156_v17  ;;  %4803 = vmatprep.mubr.msk.f32.mxu1 %vm838_vm0, %v1296_v47 }
 0x379   : > { %v5441_v35 = vpop.eup %5440  ;;  %5161 = vmatprep.subr.bf16.mxu1 %v5160_v27  ;;  %v1297_v53 = vmul.f32 %v5439_v30, %v6249_v29 }
 0x37a   : > { %v1804_v36 = vmul.f32 %v5441_v35, %v6251_v0 }
 0x37b   : > { %4804 = vmatmul.mubr.msk.f32.gmra.mrb[10].mxu1 %vm838_vm0, %v1297_v53 }
 0x37c   : > { %v5443_v50 = vpop.eup %5442  ;;  %5163 = vmatpush3.bf16.msra.mxu1 %v5160_v27  ;;  %v2052_v41 = vpop.xlane.xlu1 %2051  ;;  %4828 = vmatprep.mubr.msk.f32.mxu1 %vm838_vm0, %v1804_v36 }
 0x37d   : > { %v5445_v9 = vpop.eup %5444  ;;  %v1805_v11 = vmul.f32 %v5443_v50, %v6259_v10  ;;  %5448 = vrcp.f32 %v2052_v41  ;;  %5177 = vmatprep.subr.bf16.mxu1 %v5176_v57  ;;  %v2049_v29 = vpop.xlane.xlu0 %2048 }
 0x37e   : > { %5450 = vrcp.f32 %v2049_v29  ;;  %v1806_v0 = vmul.f32 %v5445_v9, %v6261_v13 }
 0x37f   : > { %4829 = vmatmul.mubr.msk.f32.vlgmr.msra.gmra.mrb[8].mxu1 %vm838_vm0, %v1805_v11 }
 0x380   : > { %v5447_v46 = vpop.eup %5446  ;;  %5179 = vmatpush3.bf16.msra.mxu1 %v5176_v57  ;;  %v2058_v10 = vpop.xlane.xlu1 %2057  ;;  %4831 = vmatprep.mubr.msk.f32.mxu1 %vm838_vm0, %v1806_v0 }
 0x381   : > { %5452 = vrcp.f32 %v2058_v10  ;;  %5181 = vmatprep.subr.bf16.mxu1 %v5180_v45  ;;  %v2055_v49 = vpop.xlane.xlu0 %2054  ;;  %v1807_v13 = vmul.f32 %v5447_v46, %v6269_v26  ;;  %v2367_v46 = vld [vmem:[%s6963_s8] sm:$0xff] }
 0x382   : > { %5454 = vrcp.f32 %v2055_v49  ;;  %v2368_v49 = vld [vmem:[%s6963_s8 + $0x8] sm:$0xff] }
 0x383   : > { %4832 = vmatmul.mubr.msk.f32.gmra.mrb[10].mxu1 %vm838_vm0, %v1807_v13  ;;  %v4406_v13 = vld [vmem:[%s6963_s8 + $0x30] sm:$0xff] }
 0x384   : > { %5183 = vmatpush3.bf16.msra.mxu1 %v5180_v45  ;;  %v4405_v45 = vld [vmem:[%s6963_s8 + $0x28] sm:$0xff] }
 0x385   : > { %5185 = vmatprep.subr.bf16.mxu1 %v5184_v51  ;;  %v5200_v10 = vpack.c.bf16 %v4405_v45, %v4404_v58 }
 0x387   : > { %v5449_v24 = vpop.eup %5448 }
 0x388   : > { %v5451_v59 = vpop.eup %5450  ;;  %v2064_v26 = vmul.f32 %v5449_v24, %v6273_v55  ;;  %v5192_v24 = vpack.c.bf16 %v2368_v49, %v2367_v46 }
 0x389   : > { %v2063_v15 = vmul.f32 %v5451_v59, %v6275_v56  ;;  %v2370_v59 = vld [vmem:[%s6963_s8 + $0x18] sm:$0xff] }
 0x38a   : > { %5193 = vmatprep.subr.bf16.mxu0 %v5192_v24 }
 0x38b   : > { %v5453_v2 = vpop.eup %5452  ;;  %4856 = vmatprep.mubr.msk.f32.mxu1 %vm838_vm0, %v2063_v15  ;;  %v5196_v15 = vpack.c.bf16 %v2370_v59, %v2369_v54  ;;  %5195 = vmatpush3.bf16.msra.mxu0 %v5192_v24  ;;  %v4419_v24 = vld [vmem:[%s6964_s9 + $0x2] ss:$0 sm:$0xff] }
 0x38c   : > { %v5455_v1 = vpop.eup %5454  ;;  %4857 = vmatmul.mubr.msk.f32.vlgmr.msra.gmra.mrb[8].mxu1 %vm838_vm0, %v2064_v26  ;;  %v2066_v3 = vmul.f32 %v5453_v2, %v6281_v63  ;;  %v4392_v63 = vld [vmem:[%s6960_s5] ss:$0 sm:$0xff] }
 0x38d   : > { %v2065_v48 = vmul.f32 %v5455_v1, %v6283_v31  ;;  %5187 = vmatpush3.bf16.msra.mxu1 %v5184_v51  ;;  %v4407_v51 = vld [vmem:[%s6963_s8 + $0x38] sm:$0xff]  ;;  %5197 = vmatprep.subr.bf16.mxu0 %v5196_v15  ;;  %v4414_v26 = vld [vmem:[%s6963_s8 + $0x40] sm:$0xff] }
 0x38e   : > { %5189 = vmatprep.subr.bf16.mxu1 %v5188_v61  ;;  %v5204_v25 = vpack.c.bf16 %v4407_v51, %v4406_v13 }
 0x38f   : > { %4859 = vmatprep.mubr.msk.f32.mxu1 %vm838_vm0, %v2065_v48  ;;  %5199 = vmatpush3.bf16.msra.mxu0 %v5196_v15 }
 0x390   : > { %4860 = vmatmul.mubr.msk.f32.gmra.mrb[10].mxu1 %vm838_vm0, %v2066_v3 }
 0x391   : > { %5191 = vmatpush3.bf16.msra.mxu1 %v5188_v61  ;;  %v4415_v61 = vld [vmem:[%s6963_s8 + $0x48] sm:$0xff] }
 0x392   : > { %5201 = vmatprep.subr.bf16.mxu1 %v5200_v10  ;;  %v5208_v2 = vpack.c.bf16 %v4415_v61, %v4414_v26 }
 0x394   : > { %5209 = vmatprep.subr.bf16.mxu0 %v5208_v2 }
 0x45f   : > { %v4858_v56 = vpop.f32.mrb[8].mxu1 }
 0x460   : > { %v2149_v55 = vpop.f32.mrb[9].mxu1 }
 0x461   : > { %4870 = vmatprep.mubr.msk.f32.mxu1 %vm838_vm0, %v2149_v55 }
 0x462   : > { %4871 = vmatmul.mubr.msk.f32.vlgmr.msra.gmra.mrb[12].mxu1 %vm838_vm0, %v4858_v56 }
 0x463   : > { %v4861_v4 = vpop.f32.mrb[10].mxu1  ;;  %5203 = vmatpush3.bf16.msra.mxu1 %v5200_v10 }
 0x464   : > { %v2159_v6 = vpop.f32.mrb[11].mxu1  ;;  %5205 = vmatprep.subr.bf16.mxu1 %v5204_v25 }
 0x465   : > { %4873 = vmatprep.mubr.msk.f32.mxu1 %vm838_vm0, %v2159_v6 }
 0x466   : > { %4874 = vmatmul.mubr.msk.f32.gmra.mrb[14].mxu1 %vm838_vm0, %v4861_v4 }
 0x467   : > { %5207 = vmatpush3.bf16.msra.mxu1 %v5204_v25 }
 0x535   : > { %v4872_v31 = vpop.f32.mrb[12].mxu1 }
 0x536   : > { %v2267_v7 = vadd.f32 %v4872_v31, %v4392_v63  ;;  %v2261_v62 = vpop.f32.mrb[13].mxu1 }
 0x537   : > { %v2262_v39 = vadd.f32 %v4392_v63, %v2261_v62 }
 0x538   : > { %v2281_v33 = vadd.f32 %v2267_v7, %v5910_v16 }
 0x539   : > { %v4875_v12 = vpop.f32.mrb[14].mxu1  ;;  %v2280_v37 = vadd.f32 %v2262_v39, %v5885_v5 }
 0x53a   : > { %v2277_v17 = vadd.f32 %v4875_v12, %v4392_v63  ;;  %v2271_v44 = vpop.f32.mrb[15].mxu1  ;;  %v2289_v14 = vsel %vm838_vm0, %v2281_v33, 0.0  ;;  %v4397_v12 = vld [vmem:[%s6961_s6] ss:$0 sm:$0xff] }
 0x53b   : > { %v2272_v42 = vadd.f32 %v4392_v63, %v2271_v44  ;;  %2290 = vadd.xlane.f32.xlu1 %v2289_v14  ;;  %v2286_v18 = vsel %vm838_vm0, %v2280_v37, 0.0  ;;  %v4398_v14 = vld [vmem:[%s6962_s7] ss:$0 sm:$0xff] }
 0x53c   : > { %2287 = vadd.xlane.f32.xlu0 %v2286_v18  ;;  %v2283_v43 = vadd.f32 %v2277_v17, %v5926_v21 }
 0x53d   : > { %v2282_v22 = vadd.f32 %v2272_v42, %v5919_v19 }
 0x53e   : > { %v2295_v47 = vsel %vm838_vm0, %v2283_v43, 0.0 }
 0x53f   : > { %2296 = vadd.xlane.f32.xlu1 %v2295_v47  ;;  %v2292_v16 = vsel %vm838_vm0, %v2282_v22, 0.0  ;;  %v4417_v47 = vld [vmem:[%s6963_s8 + $0x58] sm:$0xff] }
 0x540   : > { %2293 = vadd.xlane.f32.xlu0 %v2292_v16 }
 0x5c8   : > { %v2291_v5 = vpop.xlane.xlu1 %2290 }
 0x5c9   : > { %v2300_v27 = vmul.f32 0.03125, %v2291_v5  ;;  %v2288_v28 = vpop.xlane.xlu0 %2287 }
 0x5ca   : > { %v2299_v23 = vmul.f32 0.03125, %v2288_v28 }
 0x5cb   : > { %v6369_v30 = vsub.f32 %v2281_v33, %v2300_v27 }
 0x5cc   : > { %v6371_v35 = vsub.f32 %v2280_v37, %v2299_v23  ;;  %v2297_v53 = vpop.xlane.xlu1 %2296 }
 0x5cd   : > { %v2302_v36 = vmul.f32 0.03125, %v2297_v53  ;;  %v2294_v57 = vpop.xlane.xlu0 %2293  ;;  %v2308_v19 = vmul.f32 %v6369_v30, %v6369_v30 }
 0x5ce   : > { %v2301_v21 = vmul.f32 0.03125, %v2294_v57  ;;  %v2307_v40 = vmul.f32 %v6371_v35, %v6371_v35 }
 0x5cf   : > { %v6377_v52 = vsub.f32 %v2283_v43, %v2302_v36  ;;  %v2314_v50 = vsel %vm838_vm0, %v2308_v19, 0.0  ;;  %v4409_v19 = vld [vmem:[%s6964_s9 + $0x1] ss:$0 sm:$0xff] }
 0x5d0   : > { %v6380_v41 = vsub.f32 %v2282_v22, %v2301_v21  ;;  %2315 = vadd.xlane.f32.xlu1 %v2314_v50  ;;  %v2311_v9 = vsel %vm838_vm0, %v2307_v40, 0.0  ;;  %v4416_v22 = vld [vmem:[%s6963_s8 + $0x50] sm:$0xff]  ;;  %v6473_v21 = vld [vmem:[%s6964_s9] ss:$0 sm:$0xff] }
 0x5d1   : > { %2312 = vadd.xlane.f32.xlu0 %v2311_v9  ;;  %v2310_v11 = vmul.f32 %v6377_v52, %v6377_v52 }
 0x5d2   : > { %v2309_v29 = vmul.f32 %v6380_v41, %v6380_v41 }
 0x5d3   : > { %v2320_v0 = vsel %vm838_vm0, %v2310_v11, 0.0 }
 0x5d4   : > { %2321 = vadd.xlane.f32.xlu1 %v2320_v0  ;;  %v2317_v60 = vsel %vm838_vm0, %v2309_v29, 0.0 }
 0x5d5   : > { %2318 = vadd.xlane.f32.xlu0 %v2317_v60 }
 0x65d   : > { %v2316_v1 = vpop.xlane.xlu1 %2315 }
 0x65e   : > { %v2324_v48 = vmul.f32 0.03125, %v2316_v1  ;;  %v2313_v3 = vpop.xlane.xlu0 %2312 }
 0x65f   : > { %v2323_v56 = vmul.f32 0.03125, %v2313_v3 }
 0x660   : > { %v2328_v55 = vadd.f32 1e-05, %v2324_v48 }
 0x661   : > { %v2327_v4 = vadd.f32 1e-05, %v2323_v56  ;;  %v2322_v6 = vpop.xlane.xlu1 %2321 }
 0x662   : > { %5456 = vrsqrt.f32 %v2328_v55  ;;  %v2326_v63 = vmul.f32 0.03125, %v2322_v6  ;;  %v2319_v31 = vpop.xlane.xlu0 %2318 }
 0x663   : > { %5458 = vrsqrt.f32 %v2327_v4  ;;  %v2325_v7 = vmul.f32 0.03125, %v2319_v31 }
 0x664   : > { %v2330_v62 = vadd.f32 1e-05, %v2326_v63 }
 0x665   : > { %v2329_v39 = vadd.f32 1e-05, %v2325_v7 }
 0x666   : > { %5460 = vrsqrt.f32 %v2330_v62 }
 0x667   : > { %5462 = vrsqrt.f32 %v2329_v39 }
 0x66c   : > { %v5457_v33 = vpop.eup %5456 }
 0x66d   : > { %v5459_v37 = vpop.eup %5458  ;;  %v2336_v17 = vmul.f32 %v5457_v33, %v6369_v30 }
 0x66e   : > { %v2335_v44 = vmul.f32 %v5459_v37, %v6371_v35  ;;  %v5212_v35 = vpack.c.bf16 %v4417_v47, %v4416_v22 }
 0x66f   : > { %v2346_v42 = vmul.f32 %v4397_v12, %v2336_v17 }
 0x670   : > { %v5461_v18 = vpop.eup %5460  ;;  %v2345_v43 = vmul.f32 %v4397_v12, %v2335_v44 }
 0x671   : > { %v5463_v16 = vpop.eup %5462  ;;  %v2338_v5 = vmul.f32 %v5461_v18, %v6377_v52  ;;  %v6437_v23 = vadd.f32 %v4398_v14, %v2346_v42 }
 0x672   : > { %v6434_v27 = vadd.f32 %v4398_v14, %v2345_v43  ;;  %v2337_v28 = vmul.f32 %v5463_v16, %v6380_v41 }
 0x673   : > { %v2348_v30 = vmul.f32 %v4397_v12, %v2338_v5 }
 0x674   : > { %4884 = vmatprep.mubr.msk.f32.mxu0 %vm838_vm0, %v6434_v27  ;;  %4898 = vmatprep.mubr.msk.f32.mxu1 %vm838_vm0, %v6434_v27  ;;  %v2347_v53 = vmul.f32 %v4397_v12, %v2337_v28 }
 0x675   : > { %4885 = vmatmul.mubr.msk.f32.vlgmr.msra.gmra.mrb[20].mxu0 %vm838_vm0, %v6437_v23  ;;  %4899 = vmatmul.mubr.msk.f32.vlgmr.msra.gmra.mrb[16].mxu1 %vm838_vm0, %v6437_v23  ;;  %v6449_v57 = vadd.f32 %v4398_v14, %v2348_v30 }
 0x676   : > { %5211 = vmatpush3.bf16.msra.mxu0 %v5208_v2  ;;  %v6447_v36 = vadd.f32 %v4398_v14, %v2347_v53 }
 0x677   : > { %5213 = vmatprep.subr.bf16.mxu0 %v5212_v35 }
 0x678   : > { %4887 = vmatprep.mubr.msk.f32.mxu0 %vm838_vm0, %v6447_v36  ;;  %4901 = vmatprep.mubr.msk.f32.mxu1 %vm838_vm0, %v6447_v36 }
 0x679   : > { %4888 = vmatmul.mubr.msk.f32.gmra.mrb[22].mxu0 %vm838_vm0, %v6449_v57  ;;  %4902 = vmatmul.mubr.msk.f32.gmra.mrb[18].mxu1 %vm838_vm0, %v6449_v57 }
 0x67a   : > { %5215 = vmatpush3.bf16.msra.mxu0 %v5212_v35  ;;  %4912 = vmatprep.mubr.msk.f32.mxu0 %vm838_vm0, %v6434_v27 }
 0x67d   : > { %4913 = vmatmul.mubr.msk.f32.vlgmr.msra.gmra.mrb[24].mxu0 %vm838_vm0, %v6437_v23 }
 0x67e   : > { %4915 = vmatprep.mubr.msk.f32.mxu0 %vm838_vm0, %v6447_v36 }
 0x681   : > { %4916 = vmatmul.mubr.msk.f32.gmra.mrb[26].mxu0 %vm838_vm0, %v6449_v57 }
 0x748   : > { %v4886_v40 = vpop.f32.mrb[20].mxu0  ;;  %v4900_v52 = vpop.f32.mrb[16].mxu1 }
 0x749   : > { %v2560_v50 = vadd.f32 %v4900_v52, %v4409_v19  ;;  %v2456_v41 = vpop.f32.mrb[21].mxu0  ;;  %v2554_v9 = vpop.f32.mrb[17].mxu1  ;;  %v2462_v43 = vadd.f32 %v4886_v40, %v6473_v21 }
 0x74a   : > { %v6476_v11 = vadd.f32 %v6473_v21, %v2456_v41  ;;  %v2555_v29 = vadd.f32 %v4409_v19, %v2554_v9 }
 0x74b   : > { %v2672_v53 = vmul.f32 %v5968_v34, %v2462_v43 }
 0x74c   : > { %v6478_v0 = vpack.c.bf16 %v2560_v50, %v2555_v29  ;;  %v4889_v60 = vpop.f32.mrb[22].mxu0  ;;  %v4903_v58 = vpop.f32.mrb[18].mxu1  ;;  %v2671_v45 = vmul.f32 %v5968_v34, %v6476_v11  ;;  %v2840_v46 = vmul.f32 %v5975_v38, %v6476_v11  ;;  %v3191_v9 = vmul.f32 %v6047_v8, %v6476_v11 }
 0x74d   : > { %v2570_v10 = vadd.f32 %v4903_v58, %v4409_v19  ;;  %v2466_v49 = vpop.f32.mrb[23].mxu0  ;;  %v2564_v13 = vpop.f32.mrb[19].mxu1  ;;  %v2472_v40 = vadd.f32 %v4889_v60, %v6473_v21  ;;  %v3449_v60 = vmul.f32 %v6089_v20, %v6476_v11  ;;  %v3450_v58 = vmul.f32 %v6089_v20, %v2462_v43  ;;  %v6605_v11 = vld [vmem:[%s682_s29 + $0x8] sm:$0xff] }
 0x74e   : > { %v2565_v51 = vadd.f32 %v4409_v19, %v2564_v13  ;;  %5218 = vmatprep.subr.msk.bf16.mxu1 %vm5961_vm5, %v6478_v0  ;;  %4926 = vmatprep.mubr.msk.f32.mxu1 %vm838_vm0, %v2671_v45  ;;  %v2467_v16 = vadd.f32 %v6473_v21, %v2466_v49  ;;  %v2841_v19 = vmul.f32 %v5975_v38, %v2462_v43  ;;  %vm2364_vm12 = vcmp.ne.f32.partialorder %v6605_v11, 0.0 }
 0x74f   : > { %5230 = vmatprep.subr.msk.bf16.mxu0 %vm5961_vm5, %v6478_v0  ;;  %4940 = vmatprep.mubr.msk.f32.mxu0 %vm838_vm0, %v2840_v46  ;;  %v2674_v41 = vmul.f32 %v5968_v34, %v2472_v40  ;;  %v2843_v21 = vmul.f32 %v5975_v38, %v2472_v40  ;;  %v3194_v29 = vmul.f32 %v6047_v8, %v2472_v40 }
 0x750   : > { %v6495_v25 = vpack.c.bf16 %v2570_v10, %v2565_v51  ;;  %5221 = vmatpush3.bf16.xpose.msk.msra.mxu1 %vm5961_vm5, %v6478_v0  ;;  %5233 = vmatpush3.bf16.xpose.msk.msra.mxu0 %vm5961_vm5, %v6478_v0  ;;  %v4914_v54 = vpop.f32.mrb[24].mxu0  ;;  %v2673_v52 = vmul.f32 %v5968_v34, %v2467_v16  ;;  %v2842_v50 = vmul.f32 %v5975_v38, %v2467_v16  ;;  %v6610_v10 = vld [vmem:[%s682_s29 + $0x18] sm:$0xff] }
 0x751   : > { %v2658_v59 = vadd.f32 %v4914_v54, %v4419_v24  ;;  %v2652_v15 = vpop.f32.mrb[25].mxu0  ;;  %vm2366_vm14 = vcmp.ne.f32.partialorder %v6610_v10, 0.0 }
 0x752   : > { %v2653_v26 = vadd.f32 %v4419_v24, %v2652_v15  ;;  %5224 = vmatprep.subr.msk.bf16.mxu1 %vm5961_vm5, %v6495_v25  ;;  %5236 = vmatprep.subr.msk.bf16.mxu0 %vm5961_vm5, %v6495_v25 }
 0x753   : > { %v2994_v61 = vmul.f32 %v5975_v38, %v2658_v59  ;;  %v2837_v2 = vmul.f32 %v5968_v34, %v2658_v59  ;;  %v3345_v1 = vmul.f32 %v6047_v8, %v2658_v59  ;;  %v3603_v48 = vmul.f32 %v6089_v20, %v2658_v59 }
 0x754   : > { %v4917_v3 = vpop.f32.mrb[26].mxu0  ;;  %v2993_v56 = vmul.f32 %v5975_v38, %v2653_v26  ;;  %v2836_v55 = vmul.f32 %v5968_v34, %v2653_v26  ;;  %v3344_v4 = vmul.f32 %v6047_v8, %v2653_v26  ;;  %v3602_v6 = vmul.f32 %v6089_v20, %v2653_v26 }
 0x755   : > { %v2668_v63 = vadd.f32 %v4917_v3, %v4419_v24  ;;  %v2662_v31 = vpop.f32.mrb[27].mxu0 }
 0x756   : > { %v2663_v7 = vadd.f32 %v4419_v24, %v2662_v31  ;;  %v5240_v62 = vpack.c.bf16 %v2994_v61, %v2993_v56  ;;  %v6517_v39 = vpack.c.bf16 %v2837_v2, %v2836_v55  ;;  %v6519_v33 = vpack.c.bf16 %v3345_v1, %v3344_v4 }
 0x757   : > { %v2996_v12 = vmul.f32 %v5975_v38, %v2668_v63  ;;  %v2839_v37 = vmul.f32 %v5968_v34, %v2668_v63  ;;  %v3347_v17 = vmul.f32 %v6047_v8, %v2668_v63  ;;  %v6524_v44 = vpack.c.bf16 %v3603_v48, %v3602_v6 }
 0x758   : > { %5227 = vmatpush3.bf16.xpose.msk.msra.mxu1 %vm5961_vm5, %v6495_v25  ;;  %5239 = vmatpush3.bf16.xpose.msk.msra.mxu0 %vm5961_vm5, %v6495_v25  ;;  %v2995_v14 = vmul.f32 %v5975_v38, %v2663_v7  ;;  %v2838_v42 = vmul.f32 %v5968_v34, %v2663_v7  ;;  %v3346_v18 = vmul.f32 %v6047_v8, %v2663_v7 }
 0x759   : > { %5241 = vmatprep.subr.bf16.mxu1 %v5240_v62  ;;  %5258 = vmatprep.subr.msk.bf16.mxu0 %vm5961_vm5, %v6478_v0  ;;  %v3604_v22 = vmul.f32 %v6089_v20, %v2663_v7  ;;  %v3605_v47 = vmul.f32 %v6089_v20, %v2668_v63  ;;  %v3192_v34 = vmul.f32 %v6047_v8, %v2462_v43 }
 0x75a   : > { %v5244_v5 = vpack.c.bf16 %v2996_v12, %v2995_v14  ;;  %v6542_v28 = vpack.c.bf16 %v2839_v37, %v2838_v42  ;;  %v6544_v30 = vpack.c.bf16 %v3347_v17, %v3346_v18  ;;  %v3193_v38 = vmul.f32 %v6047_v8, %v2467_v16 }
 0x75b   : > { %v6546_v35 = vpack.c.bf16 %v3605_v47, %v3604_v22  ;;  %v3452_v8 = vmul.f32 %v6089_v20, %v2472_v40 }
 0x75f   : > { %4927 = vmatmul.mubr.msk.f32.vlgmr.msra.gmra.mrb[20].mxu1 %vm838_vm0, %v2672_v53  ;;  %4941 = vmatmul.mubr.msk.f32.vlgmr.msra.gmra.mrb[28].mxu0 %vm838_vm0, %v2841_v19 }
 0x760   : > { %4929 = vmatprep.mubr.msk.f32.mxu1 %vm838_vm0, %v2673_v52  ;;  %4943 = vmatprep.mubr.msk.f32.mxu0 %vm838_vm0, %v2842_v50 }
 0x761   : > { %5243 = vmatpush3.bf16.msra.mxu1 %v5240_v62  ;;  %5261 = vmatpush3.bf16.xpose.msk.msra.mxu0 %vm5961_vm5, %v6478_v0 }
 0x762   : > { %5245 = vmatprep.subr.bf16.mxu1 %v5244_v5  ;;  %5264 = vmatprep.subr.msk.bf16.mxu0 %vm5961_vm5, %v6495_v25 }
 0x763   : > { %4930 = vmatmul.mubr.msk.f32.gmra.mrb[22].mxu1 %vm838_vm0, %v2674_v41  ;;  %4944 = vmatmul.mubr.msk.f32.gmra.mrb[30].mxu0 %vm838_vm0, %v2843_v21 }
 0x764   : > { %4982 = vmatprep.mubr.msk.f32.mxu0 %vm838_vm0, %v3191_v9 }
 0x765   : > { %5247 = vmatpush3.bf16.msra.mxu1 %v5244_v5 }
 0x766   : > { %5249 = vmatprep.subr.bf16.mxu1 %v6517_v39 }
 0x769   : > { %5267 = vmatpush3.bf16.xpose.msk.msra.mxu0 %vm5961_vm5, %v6495_v25 }
 0x76a   : > { %5278 = vmatprep.subr.msk.bf16.mxu0 %vm5961_vm5, %v6478_v0 }
 0x770   : > { %4983 = vmatmul.mubr.msk.f32.vlgmr.msra.gmra.mrb[32].mxu0 %vm838_vm0, %v3192_v34 }
 0x771   : > { %4985 = vmatprep.mubr.msk.f32.mxu0 %vm838_vm0, %v3193_v38  ;;  %5281 = vmatpush3.bf16.xpose.msk.msra.mxu0 %vm5961_vm5, %v6478_v0  ;;  %v3451_v0 = vmul.f32 %v6089_v20, %v2467_v16  ;;  %v6613_v20 = vld [vmem:[%s682_s29 + $0x10] sm:$0xff] }
 0x772   : > { %5284 = vmatprep.subr.msk.bf16.mxu0 %vm5961_vm5, %v6495_v25  ;;  %vm2365_vm15 = vcmp.ne.f32.partialorder %v6613_v20, 0.0 }
 0x774   : > { %4986 = vmatmul.mubr.msk.f32.gmra.mrb[34].mxu0 %vm838_vm0, %v3194_v29 }
 0x775   : > { %5010 = vmatprep.mubr.msk.f32.mxu0 %vm838_vm0, %v3449_v60 }
 0x779   : > { %5287 = vmatpush3.bf16.xpose.msk.msra.mxu0 %vm5961_vm5, %v6495_v25 }
 0x780   : > { %5011 = vmatmul.mubr.msk.f32.vlgmr.msra.gmra.mrb[36].mxu0 %vm838_vm0, %v3450_v58 }
 0x781   : > { %5013 = vmatprep.mubr.msk.f32.mxu0 %vm838_vm0, %v3451_v0 }
 0x784   : > { %5014 = vmatmul.mubr.msk.f32.gmra.mrb[38].mxu0 %vm838_vm0, %v3452_v8 }
 0x832   : > { %v4928_v45 = vpop.f32.mrb[20].mxu1  ;;  %v4942_v46 = vpop.f32.mrb[28].mxu0 }
 0x833   : > { %v2942_v49 = vmul.f32 0.35355338, %v4942_v46  ;;  %v2765_v13 = vpop.f32.mrb[21].mxu1  ;;  %v2922_v51 = vpop.f32.mrb[29].mxu0  ;;  %v2785_v61 = vmul.f32 0.35355338, %v4928_v45 }
 0x834   : > { %v2941_v24 = vmul.f32 0.35355338, %v2922_v51  ;;  %v2784_v55 = vmul.f32 0.35355338, %v2765_v13 }
 0x835   : > { %v6617_v25 = vsel %vm2364_vm12, %v2942_v49, -1e+09  ;;  %v6643_v62 = vsel %vm2364_vm12, %v2785_v61, -1e+09 }
 0x836   : > { %v4931_v54 = vpop.f32.mrb[22].mxu1  ;;  %v4945_v59 = vpop.f32.mrb[30].mxu0  ;;  %v2952_v15 = vsel %vm838_vm0, %v6617_v25, -inf  ;;  %v6624_v26 = vsel %vm2363_vm13, %v2941_v24, -1e+09  ;;  %v2795_v17 = vsel %vm838_vm0, %v6643_v62, -inf }
 0x837   : > { %v2944_v2 = vmul.f32 0.35355338, %v4945_v59  ;;  %2953 = vmax.xlane.f32.xlu1 %v2952_v15  ;;  %v2775_v1 = vpop.f32.mrb[23].mxu1  ;;  %v2932_v48 = vpop.f32.mrb[31].mxu0  ;;  %v2949_v56 = vsel %vm838_vm0, %v6624_v26, -inf }
 0x838   : > { %v2943_v3 = vmul.f32 0.35355338, %v2932_v48  ;;  %2950 = vmax.xlane.f32.xlu0 %v2949_v56  ;;  %v2787_v31 = vmul.f32 0.35355338, %v4931_v54  ;;  %v2786_v12 = vmul.f32 0.35355338, %v2775_v1 }
 0x839   : > { %v6631_v4 = vsel %vm2366_vm14, %v2944_v2, -1e+09  ;;  %v6647_v37 = vsel %vm2363_vm13, %v2784_v55, -1e+09 }
 0x83a   : > { %v2958_v6 = vsel %vm838_vm0, %v6631_v4, -inf  ;;  %v6637_v63 = vsel %vm2365_vm15, %v2943_v3, -1e+09  ;;  %v6653_v14 = vsel %vm2366_vm14, %v2787_v31, -1e+09  ;;  %v2792_v42 = vsel %vm838_vm0, %v6647_v37, -inf }
 0x83b   : > { %2959 = vmax.xlane.f32.xlu1 %v2958_v6  ;;  %v2955_v7 = vsel %vm838_vm0, %v6637_v63, -inf  ;;  %v6659_v18 = vsel %vm2365_vm15, %v2786_v12, -1e+09  ;;  %v2801_v43 = vsel %vm838_vm0, %v6653_v14, -inf }
 0x83c   : > { %2956 = vmax.xlane.f32.xlu0 %v2955_v7  ;;  %v2798_v5 = vsel %vm838_vm0, %v6659_v18, -inf }
 0x83f   : > { %2796 = vmax.xlane.f32.xlu1 %v2795_v17 }
 0x840   : > { %2793 = vmax.xlane.f32.xlu0 %v2792_v42 }
 0x843   : > { %v4984_v22 = vpop.f32.mrb[32].mxu0  ;;  %2802 = vmax.xlane.f32.xlu1 %v2801_v43 }
 0x844   : > { %v3293_v47 = vmul.f32 0.35355338, %v4984_v22  ;;  %v3273_v16 = vpop.f32.mrb[33].mxu0  ;;  %2799 = vmax.xlane.f32.xlu0 %v2798_v5 }
 0x845   : > { %v3292_v53 = vmul.f32 0.35355338, %v3273_v16 }
 0x846   : > { %v6667_v19 = vsel %vm2364_vm12, %v3293_v47, -1e+09 }
 0x847   : > { %v4987_v40 = vpop.f32.mrb[34].mxu0  ;;  %v3303_v52 = vsel %vm838_vm0, %v6667_v19, -inf  ;;  %v6673_v50 = vsel %vm2363_vm13, %v3292_v53, -1e+09 }
 0x848   : > { %v3295_v41 = vmul.f32 0.35355338, %v4987_v40  ;;  %v3283_v21 = vpop.f32.mrb[35].mxu0  ;;  %3304 = vmax.xlane.f32.xlu1 %v3303_v52  ;;  %v3300_v9 = vsel %vm838_vm0, %v6673_v50, -inf }
 0x849   : > { %v3294_v34 = vmul.f32 0.35355338, %v3283_v21  ;;  %3301 = vmax.xlane.f32.xlu0 %v3300_v9 }
 0x84a   : > { %v6679_v38 = vsel %vm2366_vm14, %v3295_v41, -1e+09 }
 0x84b   : > { %v3309_v29 = vsel %vm838_vm0, %v6679_v38, -inf  ;;  %v6685_v60 = vsel %vm2365_vm15, %v3294_v34, -1e+09 }
 0x84c   : > { %3310 = vmax.xlane.f32.xlu1 %v3309_v29  ;;  %v3306_v58 = vsel %vm838_vm0, %v6685_v60, -inf }
 0x84d   : > { %3307 = vmax.xlane.f32.xlu0 %v3306_v58 }
 0x853   : > { %v5012_v0 = vpop.f32.mrb[36].mxu0 }
 0x854   : > { %v3551_v8 = vmul.f32 0.35355338, %v5012_v0  ;;  %v3531_v45 = vpop.f32.mrb[37].mxu0 }
 0x855   : > { %v3550_v46 = vmul.f32 0.35355338, %v3531_v45 }
 0x856   : > { %v6691_v49 = vsel %vm2364_vm12, %v3551_v8, -1e+09 }
 0x857   : > { %v5015_v13 = vpop.f32.mrb[38].mxu0  ;;  %v3561_v51 = vsel %vm838_vm0, %v6691_v49, -inf  ;;  %v6697_v24 = vsel %vm2363_vm13, %v3550_v46, -1e+09 }
 0x858   : > { %v3553_v54 = vmul.f32 0.35355338, %v5015_v13  ;;  %v3541_v59 = vpop.f32.mrb[39].mxu0  ;;  %3562 = vmax.xlane.f32.xlu1 %v3561_v51  ;;  %v3558_v15 = vsel %vm838_vm0, %v6697_v24, -inf }
 0x859   : > { %v3552_v61 = vmul.f32 0.35355338, %v3541_v59  ;;  %3559 = vmax.xlane.f32.xlu0 %v3558_v15 }
 0x85a   : > { %v6703_v11 = vsel %vm2366_vm14, %v3553_v54, -1e+09 }
 0x85b   : > { %v3567_v2 = vsel %vm838_vm0, %v6703_v11, -inf  ;;  %v6709_v32 = vsel %vm2365_vm15, %v3552_v61, -1e+09 }
 0x85c   : > { %3568 = vmax.xlane.f32.xlu1 %v3567_v2  ;;  %v3564_v1 = vsel %vm838_vm0, %v6709_v32, -inf }
 0x85d   : > { %3565 = vmax.xlane.f32.xlu0 %v3564_v1 }
 0x8c4   : > { %v2954_v48 = vpop.xlane.xlu1 %2953 }
 0x8c5   : > { %v2962_v3 = vsub.f32 %v6617_v25, %v2954_v48  ;;  %v2951_v56 = vpop.xlane.xlu0 %2950 }
 0x8c6   : > { %v2961_v10 = vsub.f32 %v6624_v26, %v2951_v56 }
 0x8c7   : > { %v2967_v55 = vmul.f32 1.442695, %v2962_v3 }
 0x8c8   : > { %v2960_v6 = vpop.xlane.xlu1 %2959  ;;  %v2965_v31 = vmul.f32 1.442695, %v2961_v10 }
 0x8c9   : > { %5464 = vpow2.f32 %v2967_v55  ;;  %v2964_v7 = vsub.f32 %v6631_v4, %v2960_v6  ;;  %v2957_v20 = vpop.xlane.xlu0 %2956 }
 0x8ca   : > { %5466 = vpow2.f32 %v2965_v31  ;;  %v2963_v17 = vsub.f32 %v6637_v63, %v2957_v20 }
 0x8cb   : > { %v2971_v12 = vmul.f32 1.442695, %v2964_v7 }
 0x8cc   : > { %v2797_v42 = vpop.xlane.xlu1 %2796  ;;  %v2969_v43 = vmul.f32 1.442695, %v2963_v17 }
 0x8cd   : > { %5468 = vpow2.f32 %v2971_v12  ;;  %v2805_v22 = vsub.f32 %v6643_v62, %v2797_v42  ;;  %v2794_v25 = vpop.xlane.xlu0 %2793 }
 0x8ce   : > { %5470 = vpow2.f32 %v2969_v43  ;;  %v2804_v26 = vsub.f32 %v6647_v37, %v2794_v25 }
 0x8cf   : > { %v2810_v47 = vmul.f32 1.442695, %v2805_v22 }
 0x8d0   : > { %v2803_v16 = vpop.xlane.xlu1 %2802  ;;  %v2808_v5 = vmul.f32 1.442695, %v2804_v26 }
 0x8d1   : > { %5472 = vpow2.f32 %v2810_v47  ;;  %v2807_v4 = vsub.f32 %v6653_v14, %v2803_v16  ;;  %v2800_v53 = vpop.xlane.xlu0 %2799 }
 0x8d2   : > { %5474 = vpow2.f32 %v2808_v5  ;;  %v2806_v52 = vsub.f32 %v6659_v18, %v2800_v53 }
 0x8d3   : > { %v6720_v40 = vpop.eup %5464  ;;  %v2814_v63 = vmul.f32 1.442695, %v2807_v4 }
 0x8d4   : > { %v2976_v62 = vsel %vm838_vm0, %v6720_v40, 0.0  ;;  %v6725_v41 = vpop.eup %5466  ;;  %v2812_v21 = vmul.f32 1.442695, %v2806_v52 }
 0x8d5   : > { %5476 = vpow2.f32 %v2814_v63  ;;  %v3305_v37 = vpop.xlane.xlu1 %3304  ;;  %2977 = vadd.xlane.f32.xlu1 %v2976_v62  ;;  %v2973_v14 = vsel %vm838_vm0, %v6725_v41, 0.0 }
 0x8d6   : > { %v3313_v9 = vsub.f32 %v6667_v19, %v3305_v37  ;;  %v3302_v34 = vpop.xlane.xlu0 %3301  ;;  %5478 = vpow2.f32 %v2812_v21  ;;  %2974 = vadd.xlane.f32.xlu0 %v2973_v14 }
 0x8d7   : > { %v6730_v29 = vpop.eup %5468  ;;  %v3312_v18 = vsub.f32 %v6673_v50, %v3302_v34 }
 0x8d8   : > { %v3318_v58 = vmul.f32 1.442695, %v3313_v9  ;;  %v2982_v0 = vsel %vm838_vm0, %v6730_v29, 0.0  ;;  %v6735_v8 = vpop.eup %5470 }
 0x8d9   : > { %v3316_v45 = vmul.f32 1.442695, %v3312_v18  ;;  %v3311_v46 = vpop.xlane.xlu1 %3310  ;;  %2983 = vadd.xlane.f32.xlu1 %v2982_v0  ;;  %v2979_v51 = vsel %vm838_vm0, %v6735_v8, 0.0 }
 0x8da   : > { %5480 = vpow2.f32 %v3318_v58  ;;  %v3315_v19 = vsub.f32 %v6679_v38, %v3311_v46  ;;  %v3308_v13 = vpop.xlane.xlu0 %3307  ;;  %2980 = vadd.xlane.f32.xlu0 %v2979_v51 }
 0x8db   : > { %v6740_v54 = vpop.eup %5472  ;;  %5482 = vpow2.f32 %v3316_v45  ;;  %v3314_v50 = vsub.f32 %v6685_v60, %v3308_v13 }
 0x8dc   : > { %v3322_v59 = vmul.f32 1.442695, %v3315_v19  ;;  %v2819_v15 = vsel %vm838_vm0, %v6740_v54, 0.0  ;;  %v6745_v61 = vpop.eup %5474 }
 0x8dd   : > { %v3320_v2 = vmul.f32 1.442695, %v3314_v50  ;;  %2820 = vadd.xlane.f32.xlu1 %v2819_v15  ;;  %v2816_v38 = vsel %vm838_vm0, %v6745_v61, 0.0 }
 0x8de   : > { %5484 = vpow2.f32 %v3322_v59  ;;  %2817 = vadd.xlane.f32.xlu0 %v2816_v38 }
 0x8df   : > { %v6749_v1 = vpop.eup %5476  ;;  %5486 = vpow2.f32 %v3320_v2 }
 0x8e0   : > { %v2825_v60 = vsel %vm838_vm0, %v6749_v1, 0.0  ;;  %v6753_v48 = vpop.eup %5478 }
 0x8e1   : > { %2826 = vadd.xlane.f32.xlu1 %v2825_v60  ;;  %v2822_v3 = vsel %vm838_vm0, %v6753_v48, 0.0 }
 0x8e2   : > { %2823 = vadd.xlane.f32.xlu0 %v2822_v3 }
 0x8e4   : > { %v6757_v56 = vpop.eup %5480 }
 0x8e5   : > { %v6759_v55 = vpop.eup %5482  ;;  %v3563_v10 = vpop.xlane.xlu1 %3562  ;;  %v3327_v6 = vsel %vm838_vm0, %v6757_v56, 0.0 }
 0x8e6   : > { %v3571_v31 = vsub.f32 %v6691_v49, %v3563_v10  ;;  %3328 = vadd.xlane.f32.xlu1 %v3327_v6  ;;  %v3560_v7 = vpop.xlane.xlu0 %3559  ;;  %v3324_v20 = vsel %vm838_vm0, %v6759_v55, 0.0 }
 0x8e7   : > { %v3570_v12 = vsub.f32 %v6697_v24, %v3560_v7  ;;  %3325 = vadd.xlane.f32.xlu0 %v3324_v20 }
 0x8e8   : > { %v6767_v17 = vpop.eup %5484  ;;  %v3576_v42 = vmul.f32 1.442695, %v3571_v31 }
 0x8e9   : > { %v6769_v43 = vpop.eup %5486  ;;  %v3574_v22 = vmul.f32 1.442695, %v3570_v12  ;;  %v3569_v25 = vpop.xlane.xlu1 %3568  ;;  %v3333_v47 = vsel %vm838_vm0, %v6767_v17, 0.0 }
 0x8ea   : > { %5488 = vpow2.f32 %v3576_v42  ;;  %v3573_v49 = vsub.f32 %v6703_v11, %v3569_v25  ;;  %3334 = vadd.xlane.f32.xlu1 %v3333_v47  ;;  %v3566_v26 = vpop.xlane.xlu0 %3565  ;;  %v3330_v16 = vsel %vm838_vm0, %v6769_v43, 0.0 }
 0x8eb   : > { %5490 = vpow2.f32 %v3574_v22  ;;  %v3572_v24 = vsub.f32 %v6709_v32, %v3566_v26  ;;  %3331 = vadd.xlane.f32.xlu0 %v3330_v16 }
 0x8ec   : > { %v3580_v5 = vmul.f32 1.442695, %v3573_v49 }
 0x8ed   : > { %v3578_v4 = vmul.f32 1.442695, %v3572_v24 }
 0x8ee   : > { %5492 = vpow2.f32 %v3580_v5 }
 0x8ef   : > { %5494 = vpow2.f32 %v3578_v4 }
 0x8f4   : > { %v6777_v53 = vpop.eup %5488 }
 0x8f5   : > { %v6779_v63 = vpop.eup %5490  ;;  %v3585_v11 = vsel %vm838_vm0, %v6777_v53, 0.0 }
 0x8f6   : > { %3586 = vadd.xlane.f32.xlu1 %v3585_v11  ;;  %v3582_v52 = vsel %vm838_vm0, %v6779_v63, 0.0 }
 0x8f7   : > { %3583 = vadd.xlane.f32.xlu0 %v3582_v52 }
 0x8f8   : > { %v6785_v62 = vpop.eup %5492 }
 0x8f9   : > { %v6787_v32 = vpop.eup %5494  ;;  %v3591_v21 = vsel %vm838_vm0, %v6785_v62, 0.0 }
 0x8fa   : > { %3592 = vadd.xlane.f32.xlu1 %v3591_v21  ;;  %v3588_v37 = vsel %vm838_vm0, %v6787_v32, 0.0 }
 0x8fb   : > { %3589 = vadd.xlane.f32.xlu0 %v3588_v37 }
 0x962   : > { %v2978_v9 = vpop.xlane.xlu1 %2977 }
 0x963   : > { %5496 = vrcp.f32 %v2978_v9  ;;  %v2975_v34 = vpop.xlane.xlu0 %2974 }
 0x964   : > { %5498 = vrcp.f32 %v2975_v34 }
 0x966   : > { %v2984_v14 = vpop.xlane.xlu1 %2983 }
 0x967   : > { %5500 = vrcp.f32 %v2984_v14  ;;  %v2981_v18 = vpop.xlane.xlu0 %2980 }
 0x968   : > { %5502 = vrcp.f32 %v2981_v18 }
 0x96a   : > { %v2821_v58 = vpop.xlane.xlu1 %2820 }
 0x96b   : > { %5504 = vrcp.f32 %v2821_v58  ;;  %v2818_v0 = vpop.xlane.xlu0 %2817 }
 0x96c   : > { %5506 = vrcp.f32 %v2818_v0 }
 0x96d   : > { %v5497_v45 = vpop.eup %5496 }
 0x96e   : > { %v2827_v46 = vpop.xlane.xlu1 %2826  ;;  %v5499_v19 = vpop.eup %5498  ;;  %v2990_v50 = vmul.f32 %v5497_v45, %v6720_v40 }
 0x96f   : > { %5508 = vrcp.f32 %v2827_v46  ;;  %v2824_v13 = vpop.xlane.xlu0 %2823  ;;  %v2989_v51 = vmul.f32 %v5499_v19, %v6725_v41 }
 0x970   : > { %5510 = vrcp.f32 %v2824_v13 }
 0x971   : > { %v5501_v59 = vpop.eup %5500  ;;  %4954 = vmatprep.mubr.msk.f32.mxu1 %vm838_vm0, %v2989_v51 }
 0x972   : > { %v5503_v15 = vpop.eup %5502  ;;  %4955 = vmatmul.mubr.msk.f32.vlgmr.msra.gmra.mrb[24].mxu1 %vm838_vm0, %v2990_v50  ;;  %v2992_v41 = vmul.f32 %v5501_v59, %v6730_v29 }
 0x973   : > { %v3329_v2 = vpop.xlane.xlu1 %3328  ;;  %5251 = vmatpush3.bf16.msra.mxu1 %v6517_v39  ;;  %v2991_v60 = vmul.f32 %v5503_v15, %v6735_v8 }
 0x974   : > { %5512 = vrcp.f32 %v3329_v2  ;;  %v3326_v38 = vpop.xlane.xlu0 %3325  ;;  %5253 = vmatprep.subr.bf16.mxu1 %v6542_v28 }
 0x975   : > { %5514 = vrcp.f32 %v3326_v38  ;;  %v5505_v40 = vpop.eup %5504  ;;  %4957 = vmatprep.mubr.msk.f32.mxu1 %vm838_vm0, %v2991_v60 }
 0x976   : > { %v5507_v3 = vpop.eup %5506  ;;  %4958 = vmatmul.mubr.msk.f32.gmra.mrb[26].mxu1 %vm838_vm0, %v2992_v41  ;;  %v2833_v8 = vmul.f32 %v5505_v40, %v6740_v54 }
 0x977   : > { %v3335_v10 = vpop.xlane.xlu1 %3334  ;;  %5255 = vmatpush3.bf16.msra.mxu1 %v6542_v28  ;;  %v2832_v39 = vmul.f32 %v5507_v3, %v6745_v61 }
 0x978   : > { %5516 = vrcp.f32 %v3335_v10  ;;  %v3332_v6 = vpop.xlane.xlu0 %3331  ;;  %5269 = vmatprep.subr.bf16.mxu1 %v6519_v33 }
 0x979   : > { %5518 = vrcp.f32 %v3332_v6  ;;  %v5509_v31 = vpop.eup %5508  ;;  %4968 = vmatprep.mubr.msk.f32.mxu1 %vm838_vm0, %v2832_v39 }
 0x97a   : > { %v5511_v29 = vpop.eup %5510  ;;  %4969 = vmatmul.mubr.msk.f32.vlgmr.msra.gmra.mrb[24].mxu1 %vm838_vm0, %v2833_v8  ;;  %v2835_v28 = vmul.f32 %v5509_v31, %v6749_v1  ;;  %v3707_v1 = vld [vmem:[%s6965_s10] sm:$0xff] }
 0x97b   : > { %5271 = vmatpush3.bf16.msra.mxu1 %v6519_v33  ;;  %v2834_v7 = vmul.f32 %v5511_v29, %v6753_v48  ;;  %v3708_v48 = vld [vmem:[%s6965_s10 + $0x8] sm:$0xff] }
 0x97c   : > { %5273 = vmatprep.subr.bf16.mxu1 %v6544_v30  ;;  %v5296_v25 = vpack.c.bf16 %v3708_v48, %v3707_v1  ;;  %v3895_v48 = vld [vmem:[%s6969_s14 + $0x10] sm:$0xff] }
 0x97d   : > { %4971 = vmatprep.mubr.msk.f32.mxu1 %vm838_vm0, %v2834_v7 }
 0x97e   : > { %v5513_v61 = vpop.eup %5512  ;;  %4972 = vmatmul.mubr.msk.f32.gmra.mrb[26].mxu1 %vm838_vm0, %v2835_v28 }
 0x97f   : > { %v5515_v54 = vpop.eup %5514  ;;  %5275 = vmatpush3.bf16.msra.mxu1 %v6544_v30  ;;  %v3341_v12 = vmul.f32 %v5513_v61, %v6757_v56 }
 0x980   : > { %v3340_v20 = vmul.f32 %v5515_v54, %v6759_v55  ;;  %5289 = vmatprep.subr.bf16.mxu1 %v6524_v44 }
 0x982   : > { %v5517_v33 = vpop.eup %5516  ;;  %4996 = vmatprep.mubr.msk.f32.mxu1 %vm838_vm0, %v3340_v20 }
 0x983   : > { %v5519_v42 = vpop.eup %5518  ;;  %v3587_v22 = vpop.xlane.xlu1 %3586  ;;  %4997 = vmatmul.mubr.msk.f32.vlgmr.msra.gmra.mrb[24].mxu1 %vm838_vm0, %v3341_v12  ;;  %v3343_v55 = vmul.f32 %v5517_v33, %v6767_v17  ;;  %v3710_v17 = vld [vmem:[%s6965_s10 + $0x18] sm:$0xff]  ;;  %v3893_v12 = vld [vmem:[%s6969_s14] sm:$0xff]  ;;  %v3894_v33 = vld [vmem:[%s6969_s14 + $0x8] sm:$0xff] }
 0x984   : > { %5520 = vrcp.f32 %v3587_v22  ;;  %5291 = vmatpush3.bf16.msra.mxu1 %v6524_v44  ;;  %v3584_v30 = vpop.xlane.xlu0 %3583  ;;  %v3342_v56 = vmul.f32 %v5519_v42, %v6769_v43  ;;  %v3709_v43 = vld [vmem:[%s6965_s10 + $0x10] sm:$0xff]  ;;  %v5304_v1 = vpack.c.bf16 %v3894_v33, %v3893_v12  ;;  %v3896_v42 = vld [vmem:[%s6969_s14 + $0x18] sm:$0xff] }
 0x985   : > { %5293 = vmatprep.subr.bf16.mxu1 %v6546_v35  ;;  %5522 = vrcp.f32 %v3584_v30  ;;  %v5300_v5 = vpack.c.bf16 %v3710_v17, %v3709_v43  ;;  %v5308_v22 = vpack.c.bf16 %v3896_v42, %v3895_v48  ;;  %v4005_v30 = vld [vmem:[%s6971_s16] sm:$0xff]  ;;  %v4010_v43 = vld [vmem:[%s6971_s16 + $0x28] sm:$0xff] }
 0x986   : > { %4999 = vmatprep.mubr.msk.f32.mxu1 %vm838_vm0, %v3342_v56  ;;  %5305 = vmatprep.subr.bf16.mxu0 %v5304_v1  ;;  %v4006_v56 = vld [vmem:[%s6971_s16 + $0x8] sm:$0xff] }
 0x987   : > { %v3593_v47 = vpop.xlane.xlu1 %3592  ;;  %5000 = vmatmul.mubr.msk.f32.gmra.mrb[26].mxu1 %vm838_vm0, %v3343_v55  ;;  %5307 = vmatpush3.bf16.msra.mxu0 %v5304_v1  ;;  %v4007_v55 = vld [vmem:[%s6971_s16 + $0x10] sm:$0xff] }
 0x988   : > { %5524 = vrcp.f32 %v3593_v47  ;;  %5295 = vmatpush3.bf16.msra.mxu1 %v6546_v35  ;;  %v3590_v49 = vpop.xlane.xlu0 %3589  ;;  %5309 = vmatprep.subr.bf16.mxu0 %v5308_v22  ;;  %v4008_v47 = vld [vmem:[%s6971_s16 + $0x18] sm:$0xff] }
 0x989   : > { %5526 = vrcp.f32 %v3590_v49  ;;  %5297 = vmatprep.subr.bf16.mxu1 %v5296_v25  ;;  %v5316_v49 = vpack.c.bf16 %v4008_v47, %v4007_v55 }
 0x98b   : > { %5311 = vmatpush3.bf16.msra.mxu0 %v5308_v22 }
 0x98e   : > { %v5521_v44 = vpop.eup %5520 }
 0x98f   : > { %v5523_v26 = vpop.eup %5522  ;;  %v3599_v24 = vmul.f32 %v5521_v44, %v6777_v53  ;;  %v4009_v44 = vld [vmem:[%s6971_s16 + $0x20] sm:$0xff] }
 0x990   : > { %v3598_v16 = vmul.f32 %v5523_v26, %v6779_v63  ;;  %v5320_v17 = vpack.c.bf16 %v4010_v43, %v4009_v44 }
 0x992   : > { %v5525_v4 = vpop.eup %5524  ;;  %5024 = vmatprep.mubr.msk.f32.mxu1 %vm838_vm0, %v3598_v16 }
 0x993   : > { %v5527_v35 = vpop.eup %5526  ;;  %5025 = vmatmul.mubr.msk.f32.vlgmr.msra.gmra.mrb[24].mxu1 %vm838_vm0, %v3599_v24  ;;  %v3601_v52 = vmul.f32 %v5525_v4, %v6785_v62  ;;  %v4472_v62 = vld [vmem:[%s6966_s11] ss:$0 sm:$0xff] }
 0x994   : > { %v3600_v11 = vmul.f32 %v5527_v35, %v6787_v32  ;;  %5299 = vmatpush3.bf16.msra.mxu1 %v5296_v25  ;;  %v5312_v25 = vpack.c.bf16 %v4006_v56, %v4005_v30 }
 0x995   : > { %5301 = vmatprep.subr.bf16.mxu1 %v5300_v5 }
 0x996   : > { %5027 = vmatprep.mubr.msk.f32.mxu1 %vm838_vm0, %v3600_v11 }
 0x997   : > { %5028 = vmatmul.mubr.msk.f32.gmra.mrb[26].mxu1 %vm838_vm0, %v3601_v52 }
 0x998   : > { %5303 = vmatpush3.bf16.msra.mxu1 %v5300_v5 }
 0x999   : > { %5313 = vmatprep.subr.bf16.mxu1 %v5312_v25 }
 0xa66   : > { %v5026_v63 = vpop.f32.mrb[24].mxu1 }
 0xa67   : > { %v3684_v53 = vpop.f32.mrb[25].mxu1 }
 0xa68   : > { %5038 = vmatprep.mubr.msk.f32.mxu1 %vm838_vm0, %v3684_v53 }
 0xa69   : > { %5039 = vmatmul.mubr.msk.f32.vlgmr.msra.gmra.mrb[28].mxu1 %vm838_vm0, %v5026_v63 }
 0xa6a   : > { %v5029_v21 = vpop.f32.mrb[26].mxu1  ;;  %5315 = vmatpush3.bf16.msra.mxu1 %v5312_v25 }
 0xa6b   : > { %v3694_v37 = vpop.f32.mrb[27].mxu1  ;;  %5317 = vmatprep.subr.bf16.mxu1 %v5316_v49 }
 0xa6c   : > { %5041 = vmatprep.mubr.msk.f32.mxu1 %vm838_vm0, %v3694_v37 }
 0xa6d   : > { %5042 = vmatmul.mubr.msk.f32.gmra.mrb[30].mxu1 %vm838_vm0, %v5029_v21 }
 0xa6e   : > { %5319 = vmatpush3.bf16.msra.mxu1 %v5316_v49 }
 0xa6f   : > { %5321 = vmatprep.subr.bf16.mxu1 %v5320_v17 }
 0xa72   : > { %5323 = vmatpush3.bf16.msra.mxu1 %v5320_v17 }
 0xb3c   : > { %v5040_v32 = vpop.f32.mrb[28].mxu1 }
 0xb3d   : > { %v3802_v9 = vadd.f32 %v5040_v32, %v4472_v62  ;;  %v3796_v34 = vpop.f32.mrb[29].mxu1  ;;  %v4477_v32 = vld [vmem:[%s6967_s12] ss:$0 sm:$0xff] }
 0xb3e   : > { %v3797_v14 = vadd.f32 %v4472_v62, %v3796_v34 }
 0xb3f   : > { %v3816_v18 = vadd.f32 %v3802_v9, %v6437_v23 }
 0xb40   : > { %v5043_v58 = vpop.f32.mrb[30].mxu1  ;;  %v3815_v0 = vadd.f32 %v3797_v14, %v6434_v27 }
 0xb41   : > { %v3812_v45 = vadd.f32 %v5043_v58, %v4472_v62  ;;  %v3806_v46 = vpop.f32.mrb[31].mxu1  ;;  %v3824_v19 = vsel %vm838_vm0, %v3816_v18, 0.0 }
 0xb42   : > { %v3807_v13 = vadd.f32 %v4472_v62, %v3806_v46  ;;  %3825 = vadd.xlane.f32.xlu1 %v3824_v19  ;;  %v3821_v51 = vsel %vm838_vm0, %v3815_v0, 0.0 }
 0xb43   : > { %3822 = vadd.xlane.f32.xlu0 %v3821_v51  ;;  %v3818_v50 = vadd.f32 %v3812_v45, %v6449_v57 }
 0xb44   : > { %v3817_v59 = vadd.f32 %v3807_v13, %v6447_v36 }
 0xb45   : > { %v3830_v15 = vsel %vm838_vm0, %v3818_v50, 0.0 }
 0xb46   : > { %3831 = vadd.xlane.f32.xlu1 %v3830_v15  ;;  %v3827_v23 = vsel %vm838_vm0, %v3817_v59, 0.0 }
 0xb47   : > { %3828 = vadd.xlane.f32.xlu0 %v3827_v23 }
 0xbcf   : > { %v3826_v27 = vpop.xlane.xlu1 %3825 }
 0xbd0   : > { %v3834_v2 = vmul.f32 0.03125, %v3826_v27  ;;  %v3823_v38 = vpop.xlane.xlu0 %3822 }
 0xbd1   : > { %v3833_v60 = vmul.f32 0.03125, %v3823_v38  ;;  %v4012_v38 = vld [vmem:[%s6971_s16 + $0x38] sm:$0xff] }
 0xbd2   : > { %v6863_v41 = vsub.f32 %v3816_v18, %v3834_v2  ;;  %v4478_v18 = vld [vmem:[%s6968_s13] ss:$0 sm:$0xff]  ;;  %v4011_v2 = vld [vmem:[%s6971_s16 + $0x30] sm:$0xff] }
 0xbd3   : > { %v6865_v40 = vsub.f32 %v3815_v0, %v3833_v60  ;;  %v3832_v3 = vpop.xlane.xlu1 %3831  ;;  %v5324_v60 = vpack.c.bf16 %v4012_v38, %v4011_v2 }
 0xbd4   : > { %v3836_v10 = vmul.f32 0.03125, %v3832_v3  ;;  %v3829_v6 = vpop.xlane.xlu0 %3828  ;;  %v3842_v36 = vmul.f32 %v6863_v41, %v6863_v41 }
 0xbd5   : > { %v3835_v57 = vmul.f32 0.03125, %v3829_v6  ;;  %v3841_v39 = vmul.f32 %v6865_v40, %v6865_v40  ;;  %5325 = vmatprep.subr.bf16.mxu1 %v5324_v60 }
 0xbd6   : > { %v6871_v8 = vsub.f32 %v3818_v50, %v3836_v10  ;;  %v3848_v31 = vsel %vm838_vm0, %v3842_v36, 0.0  ;;  %5327 = vmatpush3.bf16.msra.mxu1 %v5324_v60  ;;  %v4489_v60 = vld [vmem:[#allocation4] ss:$0 sm:$0xff] }
 0xbd7   : > { %v6874_v29 = vsub.f32 %v3817_v59, %v3835_v57  ;;  %3849 = vadd.xlane.f32.xlu1 %v3848_v31  ;;  %v3845_v7 = vsel %vm838_vm0, %v3841_v39, 0.0 }
 0xbd8   : > { %3846 = vadd.xlane.f32.xlu0 %v3845_v7  ;;  %v3844_v28 = vmul.f32 %v6871_v8, %v6871_v8 }
 0xbd9   : > { %v3843_v61 = vmul.f32 %v6874_v29, %v6874_v29 }
 0xbda   : > { %v3854_v54 = vsel %vm838_vm0, %v3844_v28, 0.0 }
 0xbdb   : > { %3855 = vadd.xlane.f32.xlu1 %v3854_v54  ;;  %v3851_v20 = vsel %vm838_vm0, %v3843_v61, 0.0  ;;  %v4484_v61 = vld [vmem:[#allocation2] ss:$0 sm:$0xff] }
 0xbdc   : > { %3852 = vadd.xlane.f32.xlu0 %v3851_v20 }
 0xc64   : > { %v3850_v26 = vpop.xlane.xlu1 %3849 }
 0xc65   : > { %v3858_v16 = vmul.f32 0.03125, %v3850_v26  ;;  %v3847_v24 = vpop.xlane.xlu0 %3846 }
 0xc66   : > { %v3857_v5 = vmul.f32 0.03125, %v3847_v24 }
 0xc67   : > { %v3862_v4 = vadd.f32 1e-05, %v3858_v16 }
 0xc68   : > { %v3861_v35 = vadd.f32 1e-05, %v3857_v5  ;;  %v3856_v11 = vpop.xlane.xlu1 %3855 }
 0xc69   : > { %5528 = vrsqrt.f32 %v3862_v4  ;;  %v3860_v52 = vmul.f32 0.03125, %v3856_v11  ;;  %v3853_v63 = vpop.xlane.xlu0 %3852 }
 0xc6a   : > { %5530 = vrsqrt.f32 %v3861_v35  ;;  %v3859_v53 = vmul.f32 0.03125, %v3853_v63 }
 0xc6b   : > { %v3864_v21 = vadd.f32 1e-05, %v3860_v52 }
 0xc6c   : > { %v3863_v37 = vadd.f32 1e-05, %v3859_v53 }
 0xc6d   : > { %5532 = vrsqrt.f32 %v3864_v21 }
 0xc6e   : > { %5534 = vrsqrt.f32 %v3863_v37 }
 0xc73   : > { %v5529_v62 = vpop.eup %5528 }
 0xc74   : > { %v5531_v9 = vpop.eup %5530  ;;  %v3870_v34 = vmul.f32 %v5529_v62, %v6863_v41  ;;  %v4479_v41 = vld [vmem:[%s6970_s15] ss:$0 sm:$0xff] }
 0xc75   : > { %v3869_v14 = vmul.f32 %v5531_v9, %v6865_v40 }
 0xc76   : > { %v3880_v58 = vmul.f32 %v4477_v32, %v3870_v34 }
 0xc77   : > { %v5533_v0 = vpop.eup %5532  ;;  %v3879_v45 = vmul.f32 %v4477_v32, %v3869_v14 }
 0xc78   : > { %v5535_v46 = vpop.eup %5534  ;;  %v3872_v19 = vmul.f32 %v5533_v0, %v6871_v8  ;;  %v3890_v50 = vadd.f32 %v4478_v18, %v3880_v58 }
 0xc79   : > { %v3889_v13 = vadd.f32 %v4478_v18, %v3879_v45  ;;  %v3871_v51 = vmul.f32 %v5535_v46, %v6874_v29 }
 0xc7a   : > { %v3882_v59 = vmul.f32 %v4477_v32, %v3872_v19 }
 0xc7b   : > { %5052 = vmatprep.mubr.msk.f32.mxu0 %vm838_vm0, %v3889_v13  ;;  %v3881_v15 = vmul.f32 %v4477_v32, %v3871_v51 }
 0xc7c   : > { %5053 = vmatmul.mubr.msk.f32.vlgmr.msra.gmra.mrb[40].mxu0 %vm838_vm0, %v3890_v50  ;;  %v3892_v27 = vadd.f32 %v4478_v18, %v3882_v59 }
 0xc7d   : > { %v3891_v23 = vadd.f32 %v4478_v18, %v3881_v15 }
 0xc7f   : > { %5055 = vmatprep.mubr.msk.f32.mxu0 %vm838_vm0, %v3891_v23 }
 0xc80   : > { %5056 = vmatmul.mubr.msk.f32.gmra.mrb[42].mxu0 %vm838_vm0, %v3892_v27 }
 0xd4f   : > { %v5054_v40 = vpop.f32.mrb[40].mxu0 }
 0xd50   : > { %v3988_v3 = vadd.f32 %v5054_v40, %v4479_v41  ;;  %v3982_v10 = vpop.f32.mrb[41].mxu0 }
 0xd51   : > { %v3983_v6 = vadd.f32 %v4479_v41, %v3982_v10 }
 0xd52   : > { %v4002_v39 = vmax.f32 %v3988_v3, 0.0  ;;  %v4490_v3 = vld [vmem:[#allocation6] ss:$0 sm:$0xff] }
 0xd53   : > { %v4001_v36 = vmax.f32 %v3983_v6, 0.0  ;;  %v5057_v57 = vpop.f32.mrb[42].mxu0 }
 0xd54   : > { %v3998_v8 = vadd.f32 %v5057_v57, %v4479_v41  ;;  %v3992_v31 = vpop.f32.mrb[43].mxu0 }
 0xd55   : > { %v3993_v29 = vadd.f32 %v4479_v41, %v3992_v31  ;;  %5074 = vmatprep.mubr.msk.f32.mxu1 %vm4020_vm1, %v4001_v36 }
 0xd56   : > { %5075 = vmatmul.mubr.msk.f32.vlgmr.msra.gmra.mrb[32].mxu1 %vm4020_vm1, %v4002_v39  ;;  %v4004_v28 = vmax.f32 %v3998_v8, 0.0 }
 0xd57   : > { %v4003_v7 = vmax.f32 %v3993_v29, 0.0 }
 0xd59   : > { %5077 = vmatprep.mubr.msk.f32.mxu1 %vm4020_vm1, %v4003_v7 }
 0xd5a   : > { %5078 = vmatmul.mubr.msk.f32.gmra.mrb[34].mxu1 %vm4020_vm1, %v4004_v28 }
 0xe29   : > { %v5076_v54 = vpop.f32.mrb[32].mxu1 }
 0xe2a   : > { %v4105_v20 = vadd.f32 %v5076_v54, %v4484_v61  ;;  %v4099_v12 = vpop.f32.mrb[33].mxu1 }
 0xe2b   : > { %v4100_v33 = vadd.f32 %v4484_v61, %v4099_v12 }
 0xe2c   : > { %v4119_v1 = vadd.f32 %v4105_v20, %v3890_v50 }
 0xe2d   : > { %v5079_v48 = vpop.f32.mrb[34].mxu1  ;;  %v4118_v42 = vadd.f32 %v4100_v33, %v3889_v13 }
 0xe2e   : > { %v4115_v22 = vadd.f32 %v5079_v48, %v4484_v61  ;;  %v4109_v30 = vpop.f32.mrb[35].mxu1  ;;  %v4127_v56 = vsel %vm838_vm0, %v4119_v1, 0.0 }
 0xe2f   : > { %v4110_v55 = vadd.f32 %v4484_v61, %v4109_v30  ;;  %4128 = vadd.xlane.f32.xlu1 %v4127_v56  ;;  %v4124_v25 = vsel %vm838_vm0, %v4118_v42, 0.0 }
 0xe30   : > { %4125 = vadd.xlane.f32.xlu0 %v4124_v25  ;;  %v4121_v47 = vadd.f32 %v4115_v22, %v3892_v27 }
 0xe31   : > { %v4120_v49 = vadd.f32 %v4110_v55, %v3891_v23 }
 0xe32   : > { %v4133_v44 = vsel %vm838_vm0, %v4121_v47, 0.0 }
 0xe33   : > { %4134 = vadd.xlane.f32.xlu1 %v4133_v44  ;;  %v4130_v43 = vsel %vm838_vm0, %v4120_v49, 0.0 }
 0xe34   : > { %4131 = vadd.xlane.f32.xlu0 %v4130_v43 }
 0xebc   : > { %v4129_v17 = vpop.xlane.xlu1 %4128 }
 0xebd   : > { %v4137_v26 = vmul.f32 0.03125, %v4129_v17  ;;  %v4126_v16 = vpop.xlane.xlu0 %4125 }
 0xebe   : > { %v4136_v24 = vmul.f32 0.03125, %v4126_v16 }
 0xebf   : > { %v4141_v5 = vsub.f32 %v4119_v1, %v4137_v26 }
 0xec0   : > { %v4140_v4 = vsub.f32 %v4118_v42, %v4136_v24  ;;  %v4135_v35 = vpop.xlane.xlu1 %4134 }
 0xec1   : > { %v4139_v11 = vmul.f32 0.03125, %v4135_v35  ;;  %v4132_v52 = vpop.xlane.xlu0 %4131  ;;  %v4145_v63 = vmul.f32 %v4141_v5, %v4141_v5 }
 0xec2   : > { %v4138_v53 = vmul.f32 0.03125, %v4132_v52  ;;  %v4144_v21 = vmul.f32 %v4140_v4, %v4140_v4 }
 0xec3   : > { %v4143_v37 = vsub.f32 %v4121_v47, %v4139_v11  ;;  %v4151_v62 = vsel %vm838_vm0, %v4145_v63, 0.0 }
 0xec4   : > { %v4142_v32 = vsub.f32 %v4120_v49, %v4138_v53  ;;  %4152 = vadd.xlane.f32.xlu1 %v4151_v62  ;;  %v4148_v9 = vsel %vm838_vm0, %v4144_v21, 0.0 }
 0xec5   : > { %4149 = vadd.xlane.f32.xlu0 %v4148_v9  ;;  %v4147_v34 = vmul.f32 %v4143_v37, %v4143_v37 }
 0xec6   : > { %v4146_v14 = vmul.f32 %v4142_v32, %v4142_v32 }
 0xec7   : > { %v4157_v18 = vsel %vm838_vm0, %v4147_v34, 0.0 }
 0xec8   : > { %4158 = vadd.xlane.f32.xlu1 %v4157_v18  ;;  %v4154_v58 = vsel %vm838_vm0, %v4146_v14, 0.0 }
 0xec9   : > { %4155 = vadd.xlane.f32.xlu0 %v4154_v58 }
 0xf51   : > { %v4153_v0 = vpop.xlane.xlu1 %4152 }
 0xf52   : > { %v4161_v45 = vmul.f32 0.03125, %v4153_v0  ;;  %v4150_v46 = vpop.xlane.xlu0 %4149 }
 0xf53   : > { %v4160_v19 = vmul.f32 0.03125, %v4150_v46 }
 0xf54   : > { %v4165_v13 = vadd.f32 1e-06, %v4161_v45 }
 0xf55   : > { %v4164_v51 = vadd.f32 1e-06, %v4160_v19  ;;  %v4159_v50 = vpop.xlane.xlu1 %4158 }
 0xf56   : > { %5536 = vrsqrt.f32 %v4165_v13  ;;  %v4163_v59 = vmul.f32 0.03125, %v4159_v50  ;;  %v4156_v15 = vpop.xlane.xlu0 %4155 }
 0xf57   : > { %5538 = vrsqrt.f32 %v4164_v51  ;;  %v4162_v23 = vmul.f32 0.03125, %v4156_v15 }
 0xf58   : > { %v4167_v27 = vadd.f32 1e-06, %v4163_v59 }
 0xf59   : > { %v4166_v2 = vadd.f32 1e-06, %v4162_v23 }
 0xf5a   : > { %5540 = vrsqrt.f32 %v4167_v27 }
 0xf5b   : > { %5542 = vrsqrt.f32 %v4166_v2 }
 0xf60   : > { %v5537_v38 = vpop.eup %5536 }
 0xf61   : > { %v5539_v41 = vpop.eup %5538  ;;  %v4173_v40 = vmul.f32 %v5537_v38, %v4141_v5 }
 0xf62   : > { %v4172_v10 = vmul.f32 %v5539_v41, %v4140_v4 }
 0xf63   : > { %v4183_v6 = vmul.f32 %v4489_v60, %v4173_v40 }
 0xf64   : > { %v5541_v36 = vpop.eup %5540  ;;  %v4182_v57 = vmul.f32 %v4489_v60, %v4172_v10 }
 0xf65   : > { %v5543_v39 = vpop.eup %5542  ;;  %v4193_v8 = vadd.f32 %v4490_v3, %v4183_v6  ;;  %v4175_v31 = vmul.f32 %v5541_v36, %v4143_v37 }
 0xf66   : > { %v4192_v29 = vadd.f32 %v4490_v3, %v4182_v57  ;;  %v4174_v7 = vmul.f32 %v5543_v39, %v4142_v32 }
 0xf67   : > { %4197 = vst.msk [vmem:[%s687_s28 + $0x8] sm:$0xff] %vm838_vm0, %v4193_v8  ;;  %v4185_v28 = vmul.f32 %v4489_v60, %v4175_v31 }
 0xf68   : > { %4196 = vst.msk [vmem:[%s687_s28] sm:$0xff] %vm838_vm0, %v4192_v29  ;;  %v4184_v61 = vmul.f32 %v4489_v60, %v4174_v7 }
 0xf69   : > { %v4195_v54 = vadd.f32 %v4490_v3, %v4185_v28 }
 0xf6a   : > { %v4194_v20 = vadd.f32 %v4490_v3, %v4184_v61 }
 0xf6b   : > { %4199 = vst.msk [vmem:[%s687_s28 + $0x18] sm:$0xff] %vm838_vm0, %v4195_v54 }
 0xf6c   : > { %4198 = vst.msk [vmem:[%s687_s28 + $0x10] sm:$0xff] %vm838_vm0, %v4194_v20 }
 0xf6d PF: > { %s7011_s27 = sld [smem:[#allocation9_spill]] }
 0xf73   : > { %s32_s1 = sadd.s32 1, %s7011_s27  }
 0xf74   : > { %p29_p5 = scmp.ge.s32.totalorder %s32_s1, 4  }
 0xf76   :  { %31 = sbr.rel (!%p29_p5) target bundleno = 9 (0x9), region = 154 }
 0xf7d   :  { %4221 = vsyncpa [#allocation3], 1 }
 0xf7e   :  { %4223 = vsyncpa [#allocation3 + $0x1], 1 }
 0xf7f   :  { %4224 = vsyncpa [#allocation5], 1 }

// kernel: seq2seq_forward.9
= control target key start
LH: loop header
LB: loop body
LE: loop exit
PB: predicated region body
PF: predicated region fallthrough
CT: control target
= control target key end

     0   :  { %s5580_s27 = smov 0   ;;  %s6707_s0 = inlined_call_operand.vmem [shape: f32[8,2], index: 0, kind: input, shape index: {}]   ;;  %s6708_s1 = inlined_call_operand.vmem [shape: f32[2,8,60], index: 1, kind: input, shape index: {}]   ;;  %s6709_s2 = inlined_call_operand.vmem [shape: f32[3,2,60], index: 2, kind: input, shape index: {}]   ;;  %s6710_s3 = inlined_call_operand.vmem [shape: f32[3,60,60], index: 3, kind: input, shape index: {}]   ;;  %s6711_s4 = inlined_call_operand.vmem [shape: f32[6,1,60], index: 4, kind: input, shape index: {}]   ;;  %s6712_s5 = inlined_call_operand.vmem [shape: f32[3,60,60], index: 5, kind: input, shape index: {}]   ;;  %s6713_s6 = inlined_call_operand.vmem [shape: f32[3,60,60], index: 6, kind: input, shape index: {}]   ;;  %s6714_s7 = inlined_call_operand.vmem [shape: f32[6,1,60], index: 7, kind: input, shape index: {}]   ;;  %s6715_s8 = inlined_call_operand.vmem [shape: f32[60,2], index: 8, kind: input, shape index: {}]   ;;  %s6716_s9 = inlined_call_operand.vmem [shape: f32[1,2], index: 9, kind: input, shape index: {}]   ;;  %s6717_s10 = inlined_call_operand.vmem [shape: f32[12,60,60], index: 10, kind: input, shape index: {}]   ;;  %s6718_s11 = inlined_call_operand.vmem [shape: f32[6,1,60], index: 11, kind: input, shape index: {}]   ;;  %s6719_s12 = inlined_call_operand.vmem [shape: f32[4,60,60], index: 12, kind: input, shape index: {}]   ;;  %s6720_s13 = inlined_call_operand.vmem [shape: f32[2,1,60], index: 13, kind: input, shape index: {}]   ;;  %s6721_s14 = inlined_call_operand.vmem [shape: f32[2,1,60], index: 14, kind: input, shape index: {}]   ;;  %s6722_s15 = inlined_call_operand.vmem [shape: f32[2,1,60], index: 15, kind: input, shape index: {}]   ;;  %s6723_s16 = inlined_call_operand.vmem [shape: f32[1,60], index: 16, kind: input, shape index: {}]   ;;  %s6724_s17 = inlined_call_operand.vmem [shape: f32[1,60], index: 17, kind: input, shape index: {}]   ;;  %s6725_s18 = inlined_call_operand.vmem [shape: f32[4,8,2], index: 18, kind: output, shape index: {}]  }
   0x1   :  { %6728 = sst [smem:[#allocation4_spill]] %s6707_s0 }
   0x2   :  { %6729 = sst [smem:[#allocation5_spill]] %s6708_s1 }
   0x3   :  { %6730 = sst [smem:[#allocation6_spill]] %s6709_s2 }
   0x4 LB: > { %s3964_s28 = sadd.s32 4294967295, %s5479_s27   ;;  %p3966_p0 = scmp.ge.s32.totalorder %s5479_s27, 1  ;;  %s5479_s27 = sphi %s5580_s27, %s28_s27  }
   0x5   : > { %p497_p1 = scmp.lt.s32.totalorder %s5479_s27, 5 }
   0x7   : > { %p498_p2 = pnand %p3966_p0, %p497_p1 }
   0x8   : > { %p3967_p3 = scmp.ne.s32.totalorder (!%p498_p2), %s3964_s28, 0 }
   0x9   : > { %501 = sbr.rel (%p498_p2) target bundleno = 2507 (0x9cb), region = 92 }
  0x10   : > { %544 = sbr.rel (%p3967_p3) target bundleno = 25 (0x19), region = 96  ;;  %s6731_s0 = sld [smem:[#allocation4_spill]] (!%p3967_p3)  ;;  %vm546_vm0 = vcmask (!%p3967_p3), 15360   ;;  %vm550_vm1 = vcmask (!%p3967_p3), 490496  }
  0x11   : > { %s6732_s20 = sld [smem:[#allocation5_spill]] (!%p3967_p3) }
  0x16   : > { %v545_v0 = vld [vmem:[%s6731_s0] sm:$0xff] (!%p3967_p3) }
  0x17   : > { %v548_v1 = vld [vmem:[%s6732_s20] sm:$0xff]  ;;  %v549_v2 = vld [vmem:[%s6732_s20 + $0x8] sm:$0xff]  ;;  %547 = vst.msk [vmem:[#allocation2] sm:$0xff] %vm546_vm0, %v545_v0 }
  0x18   : > { %551 = vst.msk [vmem:[#allocation3] sm:$0xff] %vm550_vm1, %v548_v1  ;;  %552 = vst.msk [vmem:[#allocation3 + $0x8] sm:$0xff] %vm550_vm1, %v549_v2 }
  0x19 PF: > { %s6733_s24 = sld [smem:[#allocation6_spill]]  ;;  %vm567_vm2 = vcmask 1041408   ;;  %v5481_v5 = vmov 0.0   ;;  %vm563_vm3 = vcmask 15360   ;;  %vm5482_vm4 = vmmov 0   ;;  %v3985_v8 = vld [vmem:[%s6710_s3 + $0x40] sm:$0xff] }
  0x1a   : > { %4510 = vmatprep.subr.mxu0 %v5481_v5  ;;  %4515 = vmatprep.subr.mxu1 %v5481_v5  ;;  %v3986_v9 = vld [vmem:[%s6710_s3 + $0x48] sm:$0xff]  ;;  %v807_v10 = vld [vmem:[%s6710_s3] sm:$0xff]  ;;  %v3987_v13 = vld [vmem:[%s6710_s3 + $0x50] sm:$0xff]  ;;  %v5483_v15 = vmov 0.0|0.0   ;;  %vm827_vm5 = vcmask 1043456   ;;  %vm5484_vm6 = vmmov 1  }
  0x1b   : > { %4512 = vmatprep.mubr.msk.f32.mxu0 %vm5482_vm4, %v5481_v5  ;;  %v5073_v11 = vpack.c.bf16 %v3986_v9, %v3985_v8  ;;  %v808_v12 = vld [vmem:[%s6710_s3 + $0x8] sm:$0xff]  ;;  %v3988_v14 = vld [vmem:[%s6710_s3 + $0x58] sm:$0xff]  ;;  %4517 = vmatprep.mubr.msk.f32.mxu1 %vm5482_vm4, %v5481_v5  ;;  %v809_v18 = vld [vmem:[%s6710_s3 + $0x10] sm:$0xff]  ;;  %vm823_vm8 = vcmask 490496   ;;  %s4071_s22 = sshll.u32 %s3964_s28, 3 }
  0x1c   : > { %v5060_v16 = vpack.c.bf16 %v808_v12, %v807_v10  ;;  %v5076_v17 = vpack.c.bf16 %v3988_v14, %v3987_v13  ;;  %v810_v19 = vld [vmem:[%s6710_s3 + $0x18] sm:$0xff]  ;;  %v3989_v20 = vld [vmem:[%s6710_s3 + $0x60] sm:$0xff]  ;;  %v3990_v21 = vld [vmem:[%s6710_s3 + $0x68] sm:$0xff]  ;;  %s1761_s25 = scalar_lea.vmem %s6725_s18, %s4071_s22 }
  0x1d   : > { %v5063_v22 = vpack.c.bf16 %v810_v19, %v809_v18  ;;  %v5079_v23 = vpack.c.bf16 %v3990_v21, %v3989_v20  ;;  %v811_v24 = vld [vmem:[%s6710_s3 + $0x20] sm:$0xff]  ;;  %v812_v25 = vld [vmem:[%s6710_s3 + $0x28] sm:$0xff]  ;;  %v3991_v26 = vld [vmem:[%s6710_s3 + $0x70] sm:$0xff] }
  0x1e   : > { %v3992_v27 = vld [vmem:[%s6710_s3 + $0x78] sm:$0xf]  ;;  %v5066_v28 = vpack.c.bf16 %v812_v25, %v811_v24  ;;  %v813_v30 = vld [vmem:[%s6710_s3 + $0x30] sm:$0xff]  ;;  %vm5682_vm7 = vmpackc.low %vm827_vm5, %vm5484_vm6 }
  0x1f   : > { %v555_v3 = vld [vmem:[%s6733_s24] sm:$0x3]  ;;  %v3971_v6 = vld [vmem:[%s6733_s24 + $0x2] sm:$0x3]  ;;  %v3976_v7 = vld [vmem:[%s6733_s24 + $0x4] sm:$0x3]  ;;  %v5082_v29 = vpack.c.bf16 %v3992_v27, %v3991_v26 }
  0x20   : > { %v553_v4 = vld [vmem:[#allocation2] sm:$0xff]  ;;  %4511 = vmatpush3.msk.msra.mxu0 %vm567_vm2, %v555_v3  ;;  %4516 = vmatpush3.msk.msra.mxu1 %vm567_vm2, %v3971_v6  ;;  %v814_v31 = vld [vmem:[%s6710_s3 + $0x38] sm:$0xf]  ;;  %v3998_v34 = vld [vmem:[%s6710_s3 + $0x88] sm:$0xff] }
  0x21   : > { %4513 = vmatmul.mubr.msk.f32.vlgmr.msra.gmra.mrb[0].mxu0 %vm563_vm3, %v553_v4  ;;  %4520 = vmatprep.subr.mxu0 %v5481_v5  ;;  %v3997_v33 = vld [vmem:[%s6710_s3 + $0x80] sm:$0xff]  ;;  %v5069_v35 = vpack.c.bf16 %v814_v31, %v813_v30  ;;  %v5695_v36 = vld [vmem:[#allocation3] sm:$0xff]  ;;  %v3999_v38 = vld [vmem:[%s6710_s3 + $0x90] sm:$0xff] }
  0x22   : > { %5072 = vmatprep.subr.bf16.mxu1 %v5483_v15  ;;  %4518 = vmatmul.mubr.msk.f32.vlgmr.msra.gmra.mrb[0].mxu1 %vm563_vm3, %v553_v4  ;;  %v5086_v37 = vpack.c.bf16 %v3998_v34, %v3997_v33  ;;  %v4000_v39 = vld [vmem:[%s6710_s3 + $0x98] sm:$0xff]  ;;  %v4001_v41 = vld [vmem:[%s6710_s3 + $0xa0] sm:$0xff]  ;;  %v4002_v42 = vld [vmem:[%s6710_s3 + $0xa8] sm:$0xff] }
  0x23   : > { %4521 = vmatpush3.msk.msra.mxu0 %vm567_vm2, %v3976_v7  ;;  %5074 = vmatpush3.bf16.msra.mxu1 %v5073_v11  ;;  %v5089_v40 = vpack.c.bf16 %v4000_v39, %v3999_v38  ;;  %v5092_v43 = vpack.c.bf16 %v4002_v42, %v4001_v41  ;;  %v4003_v44 = vld [vmem:[%s6710_s3 + $0xb0] sm:$0xff]  ;;  %v4004_v45 = vld [vmem:[%s6710_s3 + $0xb8] sm:$0xf]  ;;  %v1104_v47 = vld [vmem:[%s6712_s5] sm:$0xff] }
  0x24   : > { %4522 = vmatprep.mubr.msk.f32.mxu0 %vm5482_vm4, %v5481_v5  ;;  %5059 = vmatprep.subr.bf16.mxu0 %v5483_v15  ;;  %v5095_v46 = vpack.c.bf16 %v4004_v45, %v4003_v44  ;;  %v1105_v48 = vld [vmem:[%s6712_s5 + $0x8] sm:$0xff]  ;;  %v4014_v49 = vld [vmem:[%s6712_s5 + $0x40] sm:$0xff]  ;;  %v1106_v53 = vld [vmem:[%s6712_s5 + $0x10] sm:$0xff] }
  0x25   : > { %4523 = vmatmul.mubr.msk.f32.vlgmr.msra.gmra.mrb[2].mxu0 %vm563_vm3, %v553_v4  ;;  %5075 = vmatprep.subr.bf16.mxu1 %v5483_v15  ;;  %v5099_v50 = vpack.c.bf16 %v1105_v48, %v1104_v47  ;;  %v4015_v51 = vld [vmem:[%s6712_s5 + $0x48] sm:$0xff]  ;;  %v1107_v54 = vld [vmem:[%s6712_s5 + $0x18] sm:$0xff]  ;;  %v4016_v55 = vld [vmem:[%s6712_s5 + $0x50] sm:$0xff] }
  0x26   : > { %5061 = vmatpush3.bf16.msra.mxu0 %v5060_v16  ;;  %4560 = vmatprep.mubr.msk.f32.mxu1 %vm5482_vm4, %v5481_v5  ;;  %v5112_v52 = vpack.c.bf16 %v4015_v51, %v4014_v49  ;;  %v5102_v56 = vpack.c.bf16 %v1107_v54, %v1106_v53  ;;  %v4017_v57 = vld [vmem:[%s6712_s5 + $0x58] sm:$0xff]  ;;  %v1108_v59 = vld [vmem:[%s6712_s5 + $0x20] sm:$0xff]  ;;  %v1109_v60 = vld [vmem:[%s6712_s5 + $0x28] sm:$0xff] }
  0x27   : > { %5077 = vmatpush3.bf16.msra.mxu1 %v5076_v17  ;;  %5062 = vmatprep.subr.bf16.mxu0 %v5483_v15  ;;  %v5115_v58 = vpack.c.bf16 %v4017_v57, %v4016_v55  ;;  %v4018_v61 = vld [vmem:[%s6712_s5 + $0x60] sm:$0xff]  ;;  %v5105_v62 = vpack.c.bf16 %v1109_v60, %v1108_v59  ;;  %v4019_v63 = vld [vmem:[%s6712_s5 + $0x68] sm:$0xff]  ;;  %v1110_v1 = vld [vmem:[%s6712_s5 + $0x30] sm:$0xff] }
  0x28   : > { %5078 = vmatprep.subr.bf16.mxu1 %v5483_v15  ;;  %4541 = vmatprep.mubr.msk.f32.mxu0 %vm5482_vm4, %v5481_v5  ;;  %v5118_v0 = vpack.c.bf16 %v4019_v63, %v4018_v61  ;;  %v1111_v2 = vld [vmem:[%s6712_s5 + $0x38] sm:$0xf]  ;;  %v4020_v3 = vld [vmem:[%s6712_s5 + $0x70] sm:$0xff]  ;;  %v3968_v10 = vld [vmem:[%s6711_s4] ss:$0 sm:$0xff] }
  0x29   : > { %v5108_v4 = vpack.c.bf16 %v1111_v2, %v1110_v1  ;;  %v4021_v6 = vld [vmem:[%s6712_s5 + $0x78] sm:$0xf]  ;;  %v3982_v11 = vld [vmem:[%s6711_s4 + $0x3] ss:$0 sm:$0xff]  ;;  %v3973_v12 = vld [vmem:[%s6711_s4 + $0x1] ss:$0 sm:$0xff] }
  0x2a   : > { %5064 = vmatpush3.bf16.msra.mxu0 %v5063_v22  ;;  %v5121_v7 = vpack.c.bf16 %v4021_v6, %v4020_v3  ;;  %v3994_v13 = vld [vmem:[%s6711_s4 + $0x4] ss:$0 sm:$0xff]  ;;  %v5397_v16 = vadd.f32 %v3982_v11, %v3968_v10  ;;  %v4006_v30 = vld [vmem:[%s6711_s4 + $0x5] ss:$0 sm:$0xff]  ;;  %v3978_v34 = vld [vmem:[%s6711_s4 + $0x2] ss:$0 sm:$0xff] }
  0x2b   : > { %5080 = vmatpush3.bf16.msra.mxu1 %v5079_v23  ;;  %5065 = vmatprep.subr.bf16.mxu0 %v5483_v15  ;;  %v5399_v18 = vadd.f32 %v3994_v13, %v3973_v12  ;;  %v4026_v41 = vld [vmem:[%s6712_s5 + $0x80] sm:$0xff]  ;;  %v4043_v45 = vld [vmem:[%s6713_s6 + $0x48] sm:$0xff]  ;;  %v4028_v51 = vld [vmem:[%s6712_s5 + $0x90] sm:$0xff] }
  0x2c   : > { %5081 = vmatprep.subr.bf16.mxu1 %v5483_v15  ;;  %v4042_v44 = vld [vmem:[%s6713_s6 + $0x40] sm:$0xff]  ;;  %v4029_v53 = vld [vmem:[%s6712_s5 + $0x98] sm:$0xff]  ;;  %v4044_v54 = vld [vmem:[%s6713_s6 + $0x50] sm:$0xff] }
  0x2d   : > { %v5128_v55 = vpack.c.bf16 %v4029_v53, %v4028_v51  ;;  %v4030_v57 = vld [vmem:[%s6712_s5 + $0xa0] sm:$0xff]  ;;  %v4047_v60 = vld [vmem:[%s6713_s6 + $0x68] sm:$0xff]  ;;  %v4032_v63 = vld [vmem:[%s6712_s5 + $0xb0] sm:$0xff] }
  0x2e   : > { %5067 = vmatpush3.bf16.msra.mxu0 %v5066_v28  ;;  %v4046_v59 = vld [vmem:[%s6713_s6 + $0x60] sm:$0xff]  ;;  %v4048_v1 = vld [vmem:[%s6713_s6 + $0x70] sm:$0xff]  ;;  %v4049_v2 = vld [vmem:[%s6713_s6 + $0x78] sm:$0xf] }
  0x2f   : > { %5084 = vmatpush3.bf16.msk.msra.mxu1 %vm5682_vm7, %v5082_v29  ;;  %5068 = vmatprep.subr.bf16.mxu0 %v5483_v15  ;;  %v1375_v6 = vld [vmem:[%s6713_s6] sm:$0xff]  ;;  %v5896_v10 = vld [vmem:[#allocation3 + $0x8] sm:$0xff]  ;;  %v1378_v13 = vld [vmem:[%s6713_s6 + $0x18] sm:$0xff] }
  0x30   : > { %5085 = vmatprep.subr.bf16.mxu1 %v5483_v15  ;;  %v1377_v12 = vld [vmem:[%s6713_s6 + $0x10] sm:$0xff] }
  0x31   : > { %v1674_v53 = vld [vmem:[%s6715_s8 + $0x30] sm:$0xff] }
  0x32   : > { %5071 = vmatpush3.bf16.msk.msra.mxu0 %vm5682_vm7, %v5069_v35  ;;  %4561 = vmatmul.mubr.msk.f32.vlgmr.msra.gmra.mrb[0].mxu1 %vm823_vm8, %v5695_v36 }
  0x33   : > { %5087 = vmatpush3.bf16.msra.mxu1 %v5086_v37  ;;  %4579 = vmatprep.mubr.msk.f32.mxu1 %vm5482_vm4, %v5481_v5 }
  0x34   : > { %5088 = vmatprep.subr.bf16.mxu1 %v5483_v15  ;;  %5098 = vmatprep.subr.bf16.mxu0 %v5483_v15 }
  0x35   : > { %4542 = vmatmul.mubr.msk.f32.vlgmr.msra.gmra.mrb[0].mxu0 %vm823_vm8, %v5695_v36 }
  0x36   : > { %4598 = vmatprep.mubr.msk.f32.mxu0 %vm5482_vm4, %v5481_v5  ;;  %5100 = vmatpush3.bf16.msra.mxu0 %v5099_v50  ;;  %v5151_v50 = vpack.c.bf16 %v4043_v45, %v4042_v44  ;;  %v4075_v44 = vld [vmem:[%s6717_s10 + $0x98] sm:$0xff] }
  0x37   : > { %5090 = vmatpush3.bf16.msra.mxu1 %v5089_v40  ;;  %5101 = vmatprep.subr.bf16.mxu0 %v5483_v15 }
  0x38   : > { %5091 = vmatprep.subr.bf16.mxu1 %v5483_v15 }
  0x3a   : > { %5103 = vmatpush3.bf16.msra.mxu0 %v5102_v56 }
  0x3b   : > { %5093 = vmatpush3.bf16.msra.mxu1 %v5092_v43  ;;  %5104 = vmatprep.subr.bf16.mxu0 %v5483_v15  ;;  %v4027_v43 = vld [vmem:[%s6712_s5 + $0x88] sm:$0xff] }
  0x3c   : > { %5094 = vmatprep.subr.bf16.mxu1 %v5483_v15  ;;  %v5125_v49 = vpack.c.bf16 %v4027_v43, %v4026_v41  ;;  %v1671_v41 = vld [vmem:[%s6715_s8 + $0x18] sm:$0xff] }
  0x3e   : > { %5106 = vmatpush3.bf16.msra.mxu0 %v5105_v62  ;;  %v5157_v62 = vpack.c.bf16 %v4047_v60, %v4046_v59 }
  0x3f   : > { %5097 = vmatpush3.bf16.msk.msra.mxu1 %vm5682_vm7, %v5095_v46  ;;  %5107 = vmatprep.subr.bf16.mxu0 %v5483_v15 }
  0x40   : > { %5111 = vmatprep.subr.bf16.mxu1 %v5483_v15 }
  0x42   : > { %4580 = vmatmul.mubr.msk.f32.vlgmr.msra.gmra.mrb[2].mxu1 %vm823_vm8, %v5695_v36  ;;  %5110 = vmatpush3.bf16.msk.msra.mxu0 %vm5682_vm7, %v5108_v4  ;;  %v5160_v4 = vpack.c.bf16 %v4049_v2, %v4048_v1  ;;  %v4051_v1 = vld [vmem:[%s6714_s7 + $0x4] ss:$0 sm:$0xff] }
  0x43   : > { %4617 = vmatprep.mubr.msk.f32.mxu1 %vm5482_vm4, %v5481_v5  ;;  %5113 = vmatpush3.bf16.msra.mxu1 %v5112_v52 }
  0x44   : > { %5114 = vmatprep.subr.bf16.mxu1 %v5483_v15  ;;  %5124 = vmatprep.subr.bf16.mxu0 %v5483_v15 }
  0x47   : > { %5116 = vmatpush3.bf16.msra.mxu1 %v5115_v58  ;;  %v4031_v58 = vld [vmem:[%s6712_s5 + $0xa8] sm:$0xff] }
  0x48   : > { %5117 = vmatprep.subr.bf16.mxu1 %v5483_v15  ;;  %v5131_v61 = vpack.c.bf16 %v4031_v58, %v4030_v57 }
  0x4b   : > { %5119 = vmatpush3.bf16.msra.mxu1 %v5118_v0  ;;  %v4033_v0 = vld [vmem:[%s6712_s5 + $0xb8] sm:$0xf] }
  0x4c   : > { %5120 = vmatprep.subr.bf16.mxu1 %v5483_v15  ;;  %v5134_v3 = vpack.c.bf16 %v4033_v0, %v4032_v63  ;;  %v4039_v63 = vld [vmem:[%s6714_s7 + $0x3] ss:$0 sm:$0xff]  ;;  %v4023_v0 = vld [vmem:[%s6714_s7 + $0x1] ss:$0 sm:$0xff] }
  0x4f   : > { %5123 = vmatpush3.bf16.msk.msra.mxu1 %vm5682_vm7, %v5121_v7  ;;  %v1376_v7 = vld [vmem:[%s6713_s6 + $0x8] sm:$0xff] }
  0x50   : > { %5150 = vmatprep.subr.bf16.mxu1 %v5483_v15  ;;  %v5138_v11 = vpack.c.bf16 %v1376_v7, %v1375_v6 }
  0xf8   : > { %v803_v8 = vpop.f32.mrb[2].mxu0 }
  0xf9   : > { %v4524_v9 = vpop.f32.mrb[3].mxu0  ;;  %v804_v37 = vadd.f32 %v3978_v34, %v803_v8  ;;  %v4054_v8 = vld [vmem:[%s6713_s6 + $0x80] sm:$0xff]  ;;  %v1669_v34 = vld [vmem:[%s6715_s8 + $0x8] sm:$0xff] }
  0xfa   : > { %v4055_v9 = vld [vmem:[%s6713_s6 + $0x88] sm:$0xff] }
 0x105   : > { %v987_v14 = vpop.f32.mrb[0].mxu1 }
 0x106   : > { %v4562_v17 = vpop.f32.mrb[1].mxu1  ;;  %v5400_v23 = vadd.f32 %v5399_v18, %v987_v14  ;;  %v5164_v14 = vpack.c.bf16 %v4055_v9, %v4054_v8  ;;  %v5141_v18 = vpack.c.bf16 %v1378_v13, %v1377_v12 }
 0x107   : > { %v4057_v17 = vld [vmem:[%s6713_s6 + $0x98] sm:$0xff] }
 0x108   : > { %v897_v19 = vpop.f32.mrb[0].mxu0  ;;  %v4010_v24 = vmul.f32 -1.442695, %v5400_v23  ;;  %v4059_v23 = vld [vmem:[%s6713_s6 + $0xa8] sm:$0xff] }
 0x109   : > { %v5398_v20 = vadd.f32 %v5397_v16, %v897_v19  ;;  %v4543_v21 = vpop.f32.mrb[1].mxu0  ;;  %v4056_v16 = vld [vmem:[%s6713_s6 + $0x90] sm:$0xff]  ;;  %v1379_v19 = vld [vmem:[%s6713_s6 + $0x20] sm:$0xff] }
 0x10a   : > { %v5167_v21 = vpack.c.bf16 %v4057_v17, %v4056_v16 }
 0x10b   : > { %v4009_v22 = vmul.f32 -1.442695, %v5398_v20  ;;  %v1380_v20 = vld [vmem:[%s6713_s6 + $0x28] sm:$0xff] }
 0x10d   : > { %5429 = vpow2.f32 %v4009_v22  ;;  %v4058_v22 = vld [vmem:[%s6713_s6 + $0xa0] sm:$0xff] }
 0x10e   : > { %5431 = vpow2.f32 %v4010_v24  ;;  %v5144_v24 = vpack.c.bf16 %v1380_v20, %v1379_v19 }
 0x115   : > { %v1077_v25 = vpop.f32.mrb[2].mxu1 }
 0x116   : > { %v4581_v26 = vpop.f32.mrb[3].mxu1  ;;  %v1078_v33 = vadd.f32 %v4006_v30, %v1077_v25  ;;  %v1381_v25 = vld [vmem:[%s6713_s6 + $0x30] sm:$0xff] }
 0x117   : > { %v5430_v27 = vpop.eup %5429  ;;  %v1382_v26 = vld [vmem:[%s6713_s6 + $0x38] sm:$0xf] }
 0x118   : > { %v1085_v28 = vadd.f32 1.0, %v5430_v27  ;;  %v5432_v29 = vpop.eup %5431  ;;  %v5170_v27 = vpack.c.bf16 %v4059_v23, %v4058_v22  ;;  %v5147_v30 = vpack.c.bf16 %v1382_v26, %v1381_v25 }
 0x119   : > { %v1092_v31 = vadd.f32 1.0, %v5432_v29  ;;  %v4061_v29 = vld [vmem:[%s6713_s6 + $0xb8] sm:$0xf] }
 0x11a   : > { %5433 = vrcp.f32 %v1085_v28  ;;  %v4060_v28 = vld [vmem:[%s6713_s6 + $0xb0] sm:$0xff] }
 0x11b   : > { %5435 = vrcp.f32 %v1092_v31  ;;  %v5173_v31 = vpack.c.bf16 %v4061_v29, %v4060_v28  ;;  %v1792_v29 = vld [vmem:[%s6717_s10 + $0x8] sm:$0xff] }
 0x124   : > { %v5434_v35 = vpop.eup %5433 }
 0x125   : > { %v1095_v38 = vmul.f32 %v5434_v35, %v1078_v33  ;;  %v5436_v40 = vpop.eup %5435  ;;  %v1668_v33 = vld [vmem:[%s6715_s8] sm:$0xff] }
 0x126   : > { %v1098_v42 = vsub.f32 1.0, %v5436_v40  ;;  %v1100_v47 = vmul.f32 %v5436_v40, %v5695_v36  ;;  %v4045_v36 = vld [vmem:[%s6713_s6 + $0x58] sm:$0xff]  ;;  %v4072_v35 = vld [vmem:[%s6717_s10 + $0x80] sm:$0xff]  ;;  %v1670_v40 = vld [vmem:[%s6715_s8 + $0x10] sm:$0xff] }
 0x127   : > { %v1096_v39 = vadd.f32 %v1095_v38, %v804_v37  ;;  %v5154_v56 = vpack.c.bf16 %v4045_v36, %v4044_v54  ;;  %v5177_v37 = vpack.c.bf16 %v1669_v34, %v1668_v33  ;;  %v4073_v38 = vld [vmem:[%s6717_s10 + $0x88] sm:$0xff]  ;;  %v5180_v43 = vpack.c.bf16 %v1671_v41, %v1670_v40  ;;  %v1675_v54 = vld [vmem:[%s6715_s8 + $0x38] sm:$0xf]  ;;  %v4078_v36 = vld [vmem:[%s6717_s10 + $0xb0] sm:$0xff] }
 0x128   : > { %v1794_v41 = vld [vmem:[%s6717_s10 + $0x18] sm:$0xff] }
 0x129   : > { %5437 = vtanh.f32 %v1096_v39  ;;  %v5190_v39 = vpack.c.bf16 %v4073_v38, %v4072_v35 }
 0x133   : > { %v5438_v46 = vpop.eup %5437 }
 0x134   : > { %v1099_v48 = vmul.f32 %v5438_v46, %v1098_v42  ;;  %v4074_v42 = vld [vmem:[%s6717_s10 + $0x90] sm:$0xff]  ;;  %v1672_v46 = vld [vmem:[%s6715_s8 + $0x20] sm:$0xff] }
 0x135   : > { %v5193_v45 = vpack.c.bf16 %v4075_v44, %v4074_v42  ;;  %v4095_v42 = vld [vmem:[%s6717_s10 + $0xd0] sm:$0xff] }
 0x136   : > { %v5831_v52 = vadd.f32 %v1100_v47, %v1099_v48  ;;  %v1673_v47 = vld [vmem:[%s6715_s8 + $0x28] sm:$0xff]  ;;  %v4076_v48 = vld [vmem:[%s6717_s10 + $0xa0] sm:$0xff] }
 0x138   : > { %4599 = vmatmul.mubr.msk.f32.vlgmr.msra.gmra.mrb[4].mxu0 %vm823_vm8, %v5831_v52  ;;  %4618 = vmatmul.mubr.msk.f32.vlgmr.msra.gmra.mrb[4].mxu1 %vm823_vm8, %v5831_v52 }
 0x139   : > { %5126 = vmatpush3.bf16.msra.mxu0 %v5125_v49  ;;  %5152 = vmatpush3.bf16.msra.mxu1 %v5151_v50  ;;  %v5183_v49 = vpack.c.bf16 %v1673_v47, %v1672_v46  ;;  %v4077_v50 = vld [vmem:[%s6717_s10 + $0xa8] sm:$0xff]  ;;  %v4097_v47 = vld [vmem:[%s6717_s10 + $0xe0] sm:$0xff] }
 0x13a   : > { %5127 = vmatprep.subr.bf16.mxu0 %v5483_v15  ;;  %5153 = vmatprep.subr.bf16.mxu1 %v5483_v15  ;;  %v5196_v51 = vpack.c.bf16 %v4077_v50, %v4076_v48  ;;  %v1796_v46 = vld [vmem:[%s6717_s10 + $0x28] sm:$0xff] }
 0x13b   : > { %4636 = vmatprep.mubr.msk.f32.mxu0 %vm5482_vm4, %v5481_v5  ;;  %4674 = vmatprep.mubr.msk.f32.mxu1 %vm5482_vm4, %v5481_v5  ;;  %v4098_v48 = vld [vmem:[%s6717_s10 + $0xe8] sm:$0xff] }
 0x13c   : > { %v5222_v50 = vpack.c.bf16 %v4098_v48, %v4097_v47  ;;  %v4130_v47 = vld [vmem:[%s6717_s10 + $0x148] sm:$0xff]  ;;  %v4159_v48 = vld [vmem:[%s6717_s10 + $0x280] sm:$0xff] }
 0x13d   : > { %5129 = vmatpush3.bf16.msra.mxu0 %v5128_v55  ;;  %5155 = vmatpush3.bf16.msra.mxu1 %v5154_v56  ;;  %v5186_v55 = vpack.c.bf16 %v1675_v54, %v1674_v53  ;;  %v4079_v56 = vld [vmem:[%s6717_s10 + $0xb8] sm:$0xf]  ;;  %v4099_v54 = vld [vmem:[%s6717_s10 + $0xf0] sm:$0xff] }
 0x13e   : > { %5130 = vmatprep.subr.bf16.mxu0 %v5483_v15  ;;  %5156 = vmatprep.subr.bf16.mxu1 %v5483_v15  ;;  %v5199_v57 = vpack.c.bf16 %v4079_v56, %v4078_v36  ;;  %v1798_v53 = vld [vmem:[%s6717_s10 + $0x38] sm:$0xf] }
 0x13f   : > { %v4100_v36 = vld [vmem:[%s6717_s10 + $0xf8] sm:$0xf] }
 0x140   : > { %v5225_v56 = vpack.c.bf16 %v4100_v36, %v4099_v54  ;;  %v4132_v54 = vld [vmem:[%s6717_s10 + $0x158] sm:$0xff]  ;;  %v4161_v36 = vld [vmem:[%s6717_s10 + $0x290] sm:$0xff] }
 0x141   : > { %5132 = vmatpush3.bf16.msra.mxu0 %v5131_v61  ;;  %5158 = vmatpush3.bf16.msra.mxu1 %v5157_v62  ;;  %v4011_v62 = vld [vmem:[%s6714_s7] ss:$0 sm:$0xff] }
 0x142   : > { %5133 = vmatprep.subr.bf16.mxu0 %v5483_v15  ;;  %5159 = vmatprep.subr.bf16.mxu1 %v5483_v15  ;;  %v5401_v2 = vadd.f32 %v4039_v63, %v4011_v62  ;;  %v4087_v63 = vld [vmem:[%s6717_s10 + $0x50] sm:$0xff] }
 0x145   : > { %5136 = vmatpush3.bf16.msk.msra.mxu0 %vm5682_vm7, %v5134_v3  ;;  %5162 = vmatpush3.bf16.msk.msra.mxu1 %vm5682_vm7, %v5160_v4  ;;  %v5403_v3 = vadd.f32 %v4051_v1, %v4023_v0  ;;  %v4088_v0 = vld [vmem:[%s6717_s10 + $0x58] sm:$0xff]  ;;  %v4117_v1 = vld [vmem:[%s6717_s10 + $0x190] sm:$0xff] }
 0x146   : > { %5137 = vmatprep.subr.bf16.mxu0 %v5483_v15  ;;  %5163 = vmatprep.subr.bf16.mxu1 %v5483_v15 }
 0x148   : > { %4637 = vmatmul.mubr.msk.f32.vlgmr.msra.gmra.mrb[6].mxu0 %vm823_vm8, %v5831_v52  ;;  %4675 = vmatmul.mubr.msk.f32.vlgmr.msra.gmra.mrb[4].mxu1 %vm823_vm8, %v5896_v10 }
 0x149   : > { %5139 = vmatpush3.bf16.msra.mxu0 %v5138_v11  ;;  %4655 = vmatprep.mubr.msk.f32.mxu0 %vm5482_vm4, %v5481_v5 }
 0x14a   : > { %5140 = vmatprep.subr.bf16.mxu0 %v5483_v15  ;;  %5165 = vmatpush3.bf16.msra.mxu1 %v5164_v14 }
 0x14b   : > { %5166 = vmatprep.subr.bf16.mxu1 %v5483_v15  ;;  %4693 = vmatprep.mubr.msk.f32.mxu1 %vm5482_vm4, %v5481_v5 }
 0x14d   : > { %5142 = vmatpush3.bf16.msra.mxu0 %v5141_v18  ;;  %v4063_v18 = vld [vmem:[%s6714_s7 + $0x5] ss:$0 sm:$0xff] }
 0x14e   : > { %5143 = vmatprep.subr.bf16.mxu0 %v5483_v15  ;;  %5168 = vmatpush3.bf16.msra.mxu1 %v5167_v21  ;;  %v4035_v21 = vld [vmem:[%s6714_s7 + $0x2] ss:$0 sm:$0xff] }
 0x14f   : > { %5169 = vmatprep.subr.bf16.mxu1 %v5483_v15 }
 0x151   : > { %5145 = vmatpush3.bf16.msra.mxu0 %v5144_v24 }
 0x152   : > { %5146 = vmatprep.subr.bf16.mxu0 %v5483_v15  ;;  %5171 = vmatpush3.bf16.msra.mxu1 %v5170_v27  ;;  %v1791_v27 = vld [vmem:[%s6717_s10] sm:$0xff] }
 0x153   : > { %5172 = vmatprep.subr.bf16.mxu1 %v5483_v15 }
 0x155   : > { %5149 = vmatpush3.bf16.msk.msra.mxu0 %vm5682_vm7, %v5147_v30  ;;  %v4093_v30 = vld [vmem:[%s6717_s10 + $0xc0] sm:$0xff] }
 0x156   : > { %5175 = vmatpush3.bf16.msk.msra.mxu1 %vm5682_vm7, %v5173_v31  ;;  %5176 = vmatprep.subr.bf16.mxu0 %v5483_v15  ;;  %v4094_v31 = vld [vmem:[%s6717_s10 + $0xc8] sm:$0xff] }
 0x157   : > { %5189 = vmatprep.subr.bf16.mxu1 %v5483_v15  ;;  %v5216_v38 = vpack.c.bf16 %v4094_v31, %v4093_v30 }
 0x158   : > { %4656 = vmatmul.mubr.msk.f32.vlgmr.msra.gmra.mrb[4].mxu0 %vm823_vm8, %v5896_v10 }
 0x159   : > { %4694 = vmatmul.mubr.msk.f32.vlgmr.msra.gmra.mrb[6].mxu1 %vm823_vm8, %v5896_v10  ;;  %4712 = vmatprep.mubr.msk.f32.mxu0 %vm5482_vm4, %v5481_v5 }
 0x15a   : > { %4731 = vmatprep.mubr.msk.f32.mxu1 %vm5482_vm4, %v5481_v5  ;;  %5178 = vmatpush3.bf16.msra.mxu0 %v5177_v37  ;;  %v5203_v37 = vpack.c.bf16 %v1792_v29, %v1791_v27  ;;  %v4110_v27 = vld [vmem:[%s6717_s10 + $0x118] sm:$0xff] }
 0x15b   : > { %5191 = vmatpush3.bf16.msra.mxu1 %v5190_v39  ;;  %5179 = vmatprep.subr.bf16.mxu0 %v5483_v15  ;;  %v1793_v39 = vld [vmem:[%s6717_s10 + $0x10] sm:$0xff]  ;;  %v4140_v29 = vld [vmem:[%s6717_s10 + $0x1d8] sm:$0xff] }
 0x15c   : > { %5192 = vmatprep.subr.bf16.mxu1 %v5483_v15 }
 0x15e   : > { %5181 = vmatpush3.bf16.msra.mxu0 %v5180_v43  ;;  %v5206_v43 = vpack.c.bf16 %v1794_v41, %v1793_v39  ;;  %v4113_v41 = vld [vmem:[%s6717_s10 + $0x130] sm:$0xff] }
 0x15f   : > { %5194 = vmatpush3.bf16.msra.mxu1 %v5193_v45  ;;  %5182 = vmatprep.subr.bf16.mxu0 %v5483_v15  ;;  %v1795_v45 = vld [vmem:[%s6717_s10 + $0x20] sm:$0xff] }
 0x160   : > { %5195 = vmatprep.subr.bf16.mxu1 %v5483_v15 }
 0x162   : > { %5184 = vmatpush3.bf16.msra.mxu0 %v5183_v49  ;;  %v5209_v49 = vpack.c.bf16 %v1796_v46, %v1795_v45  ;;  %v4129_v46 = vld [vmem:[%s6717_s10 + $0x140] sm:$0xff] }
 0x163   : > { %5197 = vmatpush3.bf16.msra.mxu1 %v5196_v51  ;;  %5185 = vmatprep.subr.bf16.mxu0 %v5483_v15  ;;  %v1797_v51 = vld [vmem:[%s6717_s10 + $0x30] sm:$0xff] }
 0x164   : > { %5198 = vmatprep.subr.bf16.mxu1 %v5483_v15 }
 0x166   : > { %5188 = vmatpush3.bf16.msk.msra.mxu0 %vm5682_vm7, %v5186_v55  ;;  %v5212_v55 = vpack.c.bf16 %v1798_v53, %v1797_v51  ;;  %v4131_v53 = vld [vmem:[%s6717_s10 + $0x150] sm:$0xff] }
 0x167   : > { %5201 = vmatpush3.bf16.msk.msra.mxu1 %vm5682_vm7, %v5199_v57  ;;  %5202 = vmatprep.subr.bf16.mxu0 %v5483_v15  ;;  %v4085_v57 = vld [vmem:[%s6717_s10 + $0x40] sm:$0xff] }
 0x168   : > { %5215 = vmatprep.subr.bf16.mxu1 %v5483_v15 }
 0x21b   : > { %v1371_v58 = vpop.f32.mrb[6].mxu0  ;;  %v1553_v59 = vpop.f32.mrb[4].mxu1 }
 0x21c   : > { %v4638_v60 = vpop.f32.mrb[7].mxu0  ;;  %v4676_v61 = vpop.f32.mrb[5].mxu1  ;;  %v5404_v12 = vadd.f32 %v5403_v3, %v1553_v59  ;;  %v1372_v23 = vadd.f32 %v4035_v21, %v1371_v58  ;;  %v4086_v58 = vld [vmem:[%s6717_s10 + $0x48] sm:$0xff]  ;;  %v4115_v59 = vld [vmem:[%s6717_s10 + $0x180] sm:$0xff]  ;;  %v5232_v3 = vpack.c.bf16 %v4088_v0, %v4087_v63  ;;  %v4135_v0 = vld [vmem:[%s6717_s10 + $0x170] sm:$0xff] }
 0x21d   : > { %v4116_v60 = vld [vmem:[%s6717_s10 + $0x188] sm:$0xff]  ;;  %v5229_v61 = vpack.c.bf16 %v4086_v58, %v4085_v57  ;;  %v4133_v58 = vld [vmem:[%s6717_s10 + $0x160] sm:$0xff] }
 0x21e   : > { %v4067_v13 = vmul.f32 -1.442695, %v5404_v12  ;;  %v5242_v62 = vpack.c.bf16 %v4116_v60, %v4115_v59  ;;  %v4108_v21 = vld [vmem:[%s6717_s10 + $0x108] sm:$0xff]  ;;  %v4163_v60 = vld [vmem:[%s6717_s10 + $0x2a0] sm:$0xff] }
 0x21f   : > { %v4134_v59 = vld [vmem:[%s6717_s10 + $0x168] sm:$0xff] }
 0x22b   : > { %v1463_v4 = vpop.f32.mrb[4].mxu0 }
 0x22c   : > { %v5402_v6 = vadd.f32 %v5401_v2, %v1463_v4  ;;  %v4657_v7 = vpop.f32.mrb[5].mxu0  ;;  %v1643_v8 = vpop.f32.mrb[6].mxu1  ;;  %v4118_v2 = vld [vmem:[%s6717_s10 + $0x198] sm:$0xff] }
 0x22d   : > { %v4695_v9 = vpop.f32.mrb[7].mxu1  ;;  %v1644_v20 = vadd.f32 %v4063_v18, %v1643_v8  ;;  %v5245_v4 = vpack.c.bf16 %v4118_v2, %v4117_v1  ;;  %v4090_v7 = vld [vmem:[%s6717_s10 + $0x68] sm:$0xff]  ;;  %v4119_v8 = vld [vmem:[%s6717_s10 + $0x1a0] sm:$0xff]  ;;  %v4136_v1 = vld [vmem:[%s6717_s10 + $0x178] sm:$0xf] }
 0x22e   : > { %v4066_v11 = vmul.f32 -1.442695, %v5402_v6  ;;  %v4089_v6 = vld [vmem:[%s6717_s10 + $0x60] sm:$0xff]  ;;  %v4120_v9 = vld [vmem:[%s6717_s10 + $0x1a8] sm:$0xff]  ;;  %v4165_v2 = vld [vmem:[%s6717_s10 + $0x2b0] sm:$0xff] }
 0x22f   : > { %v5248_v12 = vpack.c.bf16 %v4120_v9, %v4119_v8  ;;  %v4152_v8 = vld [vmem:[%s6717_s10 + $0x208] sm:$0xff]  ;;  %v4181_v9 = vld [vmem:[%s6717_s10 + $0x2c0] sm:$0xff] }
 0x230   : > { %5439 = vpow2.f32 %v4066_v11  ;;  %v5235_v11 = vpack.c.bf16 %v4090_v7, %v4089_v6  ;;  %v4151_v7 = vld [vmem:[%s6717_s10 + $0x200] sm:$0xff] }
 0x231   : > { %5441 = vpow2.f32 %v4067_v13  ;;  %v4091_v13 = vld [vmem:[%s6717_s10 + $0x70] sm:$0xff] }
 0x23a   : > { %v5440_v14 = vpop.eup %5439 }
 0x23b   : > { %v1651_v16 = vadd.f32 1.0, %v5440_v14  ;;  %v5442_v17 = vpop.eup %5441  ;;  %v4092_v14 = vld [vmem:[%s6717_s10 + $0x78] sm:$0xf] }
 0x23c   : > { %v1658_v19 = vadd.f32 1.0, %v5442_v17  ;;  %v4122_v17 = vld [vmem:[%s6717_s10 + $0x1b8] sm:$0xf]  ;;  %v5238_v18 = vpack.c.bf16 %v4092_v14, %v4091_v13  ;;  %v4153_v14 = vld [vmem:[%s6717_s10 + $0x210] sm:$0xff] }
 0x23d   : > { %5443 = vrcp.f32 %v1651_v16  ;;  %v4121_v16 = vld [vmem:[%s6717_s10 + $0x1b0] sm:$0xff] }
 0x23e   : > { %5445 = vrcp.f32 %v1658_v19  ;;  %v5251_v19 = vpack.c.bf16 %v4122_v17, %v4121_v16  ;;  %v4154_v16 = vld [vmem:[%s6717_s10 + $0x218] sm:$0xff]  ;;  %v4183_v17 = vld [vmem:[%s6717_s10 + $0x2d0] sm:$0xff] }
 0x247   : > { %v5444_v22 = vpop.eup %5443 }
 0x248   : > { %v1661_v24 = vmul.f32 %v5444_v22, %v1644_v20  ;;  %v5446_v26 = vpop.eup %5445  ;;  %v4107_v20 = vld [vmem:[%s6717_s10 + $0x100] sm:$0xff] }
 0x249   : > { %v1664_v28 = vsub.f32 1.0, %v5446_v26  ;;  %v1666_v34 = vmul.f32 %v5446_v26, %v5896_v10  ;;  %v4096_v10 = vld [vmem:[%s6717_s10 + $0xd8] sm:$0xff]  ;;  %v4137_v22 = vld [vmem:[%s6717_s10 + $0x1c0] sm:$0xff]  ;;  %v4109_v26 = vld [vmem:[%s6717_s10 + $0x110] sm:$0xff] }
 0x24a   : > { %v1662_v25 = vadd.f32 %v1661_v24, %v1372_v23  ;;  %v5219_v44 = vpack.c.bf16 %v4096_v10, %v4095_v42  ;;  %v4138_v23 = vld [vmem:[%s6717_s10 + $0x1c8] sm:$0xff]  ;;  %v5255_v24 = vpack.c.bf16 %v4108_v21, %v4107_v20  ;;  %v5258_v30 = vpack.c.bf16 %v4110_v27, %v4109_v26  ;;  %v4114_v42 = vld [vmem:[%s6717_s10 + $0x138] sm:$0xf]  ;;  %v4143_v10 = vld [vmem:[%s6717_s10 + $0x1f0] sm:$0xff] }
 0x24b   : > { %v4155_v21 = vld [vmem:[%s6717_s10 + $0x220] sm:$0xff]  ;;  %v4157_v27 = vld [vmem:[%s6717_s10 + $0x230] sm:$0xff] }
 0x24c   : > { %5447 = vtanh.f32 %v1662_v25  ;;  %v5268_v25 = vpack.c.bf16 %v4138_v23, %v4137_v22  ;;  %v4156_v22 = vld [vmem:[%s6717_s10 + $0x228] sm:$0xff]  ;;  %v4185_v23 = vld [vmem:[%s6717_s10 + $0x2e0] sm:$0xff] }
 0x256   : > { %v5448_v33 = vpop.eup %5447 }
 0x257   : > { %v1665_v35 = vmul.f32 %v5448_v33, %v1664_v28  ;;  %v4139_v28 = vld [vmem:[%s6717_s10 + $0x1d0] sm:$0xff]  ;;  %v4111_v33 = vld [vmem:[%s6717_s10 + $0x120] sm:$0xff] }
 0x258   : > { %v5271_v31 = vpack.c.bf16 %v4140_v29, %v4139_v28  ;;  %v4158_v28 = vld [vmem:[%s6717_s10 + $0x238] sm:$0xf]  ;;  %v4187_v29 = vld [vmem:[%s6717_s10 + $0x2f0] sm:$0xff] }
 0x259   : > { %v6058_v40 = vadd.f32 %v1666_v34, %v1665_v35  ;;  %v4112_v34 = vld [vmem:[%s6717_s10 + $0x128] sm:$0xff]  ;;  %v4141_v35 = vld [vmem:[%s6717_s10 + $0x1e0] sm:$0xff] }
 0x25b   : > { %4713 = vmatmul.mubr.msk.f32.vlgmr.msra.gmra.mrb[8].mxu0 %vm823_vm8, %v6058_v40  ;;  %4732 = vmatmul.mubr.msk.f32.vlgmr.msra.gmra.mrb[8].mxu1 %vm823_vm8, %v6058_v40 }
 0x25c   : > { %5204 = vmatpush3.bf16.msra.mxu0 %v5203_v37  ;;  %5217 = vmatpush3.bf16.msra.mxu1 %v5216_v38  ;;  %v4142_v37 = vld [vmem:[%s6717_s10 + $0x1e8] sm:$0xff]  ;;  %v5261_v38 = vpack.c.bf16 %v4112_v34, %v4111_v33  ;;  %v4173_v34 = vld [vmem:[%s6717_s10 + $0x240] sm:$0xff] }
 0x25d   : > { %5205 = vmatprep.subr.bf16.mxu0 %v5483_v15  ;;  %5218 = vmatprep.subr.bf16.mxu1 %v5483_v15  ;;  %v5274_v39 = vpack.c.bf16 %v4142_v37, %v4141_v35  ;;  %v4174_v35 = vld [vmem:[%s6717_s10 + $0x248] sm:$0xff] }
 0x25e   : > { %4750 = vmatprep.mubr.msk.f32.mxu0 %vm5482_vm4, %v5481_v5  ;;  %4769 = vmatprep.mubr.msk.f32.mxu1 %vm5482_vm4, %v5481_v5  ;;  %v5333_v37 = vpack.c.bf16 %v4174_v35, %v4173_v34 }
 0x260   : > { %5207 = vmatpush3.bf16.msra.mxu0 %v5206_v43  ;;  %5220 = vmatpush3.bf16.msra.mxu1 %v5219_v44  ;;  %v4144_v43 = vld [vmem:[%s6717_s10 + $0x1f8] sm:$0xf]  ;;  %v5264_v44 = vpack.c.bf16 %v4114_v42, %v4113_v41  ;;  %v4177_v42 = vld [vmem:[%s6717_s10 + $0x260] sm:$0xff] }
 0x261   : > { %5208 = vmatprep.subr.bf16.mxu0 %v5483_v15  ;;  %5221 = vmatprep.subr.bf16.mxu1 %v5483_v15  ;;  %v5277_v45 = vpack.c.bf16 %v4144_v43, %v4143_v10  ;;  %v4178_v10 = vld [vmem:[%s6717_s10 + $0x268] sm:$0xff] }
 0x262   : > { %v5339_v43 = vpack.c.bf16 %v4178_v10, %v4177_v42 }
 0x264   : > { %5210 = vmatpush3.bf16.msra.mxu0 %v5209_v49  ;;  %5223 = vmatpush3.bf16.msra.mxu1 %v5222_v50  ;;  %v4160_v49 = vld [vmem:[%s6717_s10 + $0x288] sm:$0xff]  ;;  %v5281_v50 = vpack.c.bf16 %v4130_v47, %v4129_v46  ;;  %v4068_v47 = vld [vmem:[%s6716_s9] ss:$0 sm:$0xff] }
 0x265   : > { %5211 = vmatprep.subr.bf16.mxu0 %v5483_v15  ;;  %5224 = vmatprep.subr.bf16.mxu1 %v5483_v15  ;;  %v5294_v51 = vpack.c.bf16 %v4160_v49, %v4159_v48 }
 0x268   : > { %5214 = vmatpush3.bf16.msk.msra.mxu0 %vm5682_vm7, %v5212_v55  ;;  %5227 = vmatpush3.bf16.msk.msra.mxu1 %vm5682_vm7, %v5225_v56  ;;  %v4162_v55 = vld [vmem:[%s6717_s10 + $0x298] sm:$0xff]  ;;  %v5284_v56 = vpack.c.bf16 %v4132_v54, %v4131_v53 }
 0x269   : > { %5228 = vmatprep.subr.bf16.mxu0 %v5483_v15  ;;  %5241 = vmatprep.subr.bf16.mxu1 %v5483_v15  ;;  %v5297_v57 = vpack.c.bf16 %v4162_v55, %v4161_v36 }
 0x26b   : > { %4751 = vmatmul.mubr.msk.f32.vlgmr.msra.gmra.mrb[10].mxu0 %vm823_vm8, %v5831_v52  ;;  %4770 = vmatmul.mubr.msk.f32.vlgmr.msra.gmra.mrb[10].mxu1 %vm823_vm8, %v6058_v40 }
 0x26c   : > { %5230 = vmatpush3.bf16.msra.mxu0 %v5229_v61  ;;  %5243 = vmatpush3.bf16.msra.mxu1 %v5242_v62  ;;  %v4164_v61 = vld [vmem:[%s6717_s10 + $0x2a8] sm:$0xff]  ;;  %v5287_v62 = vpack.c.bf16 %v4134_v59, %v4133_v58 }
 0x26d   : > { %5231 = vmatprep.subr.bf16.mxu0 %v5483_v15  ;;  %5244 = vmatprep.subr.bf16.mxu1 %v5483_v15  ;;  %v5300_v63 = vpack.c.bf16 %v4164_v61, %v4163_v60 }
 0x26e   : > { %4788 = vmatprep.mubr.msk.f32.mxu0 %vm5482_vm4, %v5481_v5  ;;  %4807 = vmatprep.mubr.msk.f32.mxu1 %vm5482_vm4, %v5481_v5 }
 0x270   : > { %5233 = vmatpush3.bf16.msra.mxu0 %v5232_v3  ;;  %5246 = vmatpush3.bf16.msra.mxu1 %v5245_v4  ;;  %v4166_v3 = vld [vmem:[%s6717_s10 + $0x2b8] sm:$0xf]  ;;  %v5290_v4 = vpack.c.bf16 %v4136_v1, %v4135_v0  ;;  %v1764_v0 = vlaneseq }
 0x271   : > { %5234 = vmatprep.subr.bf16.mxu0 %v5483_v15  ;;  %5247 = vmatprep.subr.bf16.mxu1 %v5483_v15  ;;  %v5303_v6 = vpack.c.bf16 %v4166_v3, %v4165_v2  ;;  %v4084_v2 = vld [vmem:[%s6718_s11] ss:$0 sm:$0xff] }
 0x272   : > { %v6437_v1 = vand.u32 127, %v1764_v0  ;;  %v1765_v10 = vshrl.u32 %v1764_v0, 7 }
 0x274   : > { %5236 = vmatpush3.bf16.msra.mxu0 %v5235_v11  ;;  %5249 = vmatpush3.bf16.msra.mxu1 %v5248_v12  ;;  %v4182_v11 = vld [vmem:[%s6717_s10 + $0x2c8] sm:$0xff]  ;;  %v5307_v12 = vpack.c.bf16 %v4152_v8, %v4151_v7  ;;  %vm2923_vm9 = vcmp.ge.s32.totalorder %v6437_v1, 30  ;;  %vm2924_vm10 = vcmp.lt.s32.totalorder %v6437_v1, 60  ;;  %vm2827_vm11 = vcmp.lt.s32.totalorder %v6437_v1, 30 }
 0x275   : > { %5237 = vmatprep.subr.bf16.mxu0 %v5483_v15  ;;  %5250 = vmatprep.subr.bf16.mxu1 %v5483_v15  ;;  %v5320_v13 = vpack.c.bf16 %v4182_v11, %v4181_v9  ;;  %vm2925_vm12 = vmand %vm2923_vm9, %vm2924_vm10  ;;  %vm1782_vm13 = vcmp.ge.s32.totalorder %v6437_v1, 4  ;;  %vm1783_vm14 = vcmp.lt.s32.totalorder %v6437_v1, 8  ;;  %vm1769_vm15 = vcmp.lt.s32.totalorder %v1765_v10, 4 }
 0x276   : > { %vm1772_vm0 = vcmp.lt.s32.totalorder %v6437_v1, 4  ;;  %vm1779_vm1 = vcmp.ge.s32.totalorder %v1765_v10, 4  ;;  %vm1784_vm2 = vmand %vm1782_vm13, %vm1783_vm14  ;;  %vm2910_vm9 = vcmask 64512  }
 0x277   : > { %vm1789_vm5 = vmand %vm1779_vm1, %vm1784_vm2 }
 0x278   : > { %5240 = vmatpush3.bf16.msk.msra.mxu0 %vm5682_vm7, %v5238_v18  ;;  %5253 = vmatpush3.bf16.msk.msra.mxu1 %vm5682_vm7, %v5251_v19  ;;  %v4184_v18 = vld [vmem:[%s6717_s10 + $0x2d8] sm:$0xff]  ;;  %v5310_v19 = vpack.c.bf16 %v4154_v16, %v4153_v14 }
 0x279   : > { %5254 = vmatprep.subr.bf16.mxu0 %v5483_v15  ;;  %5267 = vmatprep.subr.bf16.mxu1 %v5483_v15  ;;  %v5323_v20 = vpack.c.bf16 %v4184_v18, %v4183_v17  ;;  %v4106_v18 = vld [vmem:[%s6718_s11 + $0x1] ss:$0 sm:$0xff] }
 0x27b   : > { %4789 = vmatmul.mubr.msk.f32.vlgmr.msra.gmra.mrb[12].mxu0 %vm823_vm8, %v5831_v52  ;;  %4808 = vmatmul.mubr.msk.f32.vlgmr.msra.gmra.mrb[12].mxu1 %vm823_vm8, %v6058_v40 }
 0x27c   : > { %5256 = vmatpush3.bf16.msra.mxu0 %v5255_v24  ;;  %5269 = vmatpush3.bf16.msra.mxu1 %v5268_v25  ;;  %v4186_v24 = vld [vmem:[%s6717_s10 + $0x2e8] sm:$0xff]  ;;  %v5313_v25 = vpack.c.bf16 %v4156_v22, %v4155_v21 }
 0x27d   : > { %5257 = vmatprep.subr.bf16.mxu0 %v5483_v15  ;;  %5270 = vmatprep.subr.bf16.mxu1 %v5483_v15  ;;  %v5326_v26 = vpack.c.bf16 %v4186_v24, %v4185_v23 }
 0x27e   : > { %4826 = vmatprep.mubr.msk.f32.mxu0 %vm5482_vm4, %v5481_v5  ;;  %4845 = vmatprep.mubr.msk.f32.mxu1 %vm5482_vm4, %v5481_v5 }
 0x280   : > { %5259 = vmatpush3.bf16.msra.mxu0 %v5258_v30  ;;  %5272 = vmatpush3.bf16.msra.mxu1 %v5271_v31  ;;  %v4188_v30 = vld [vmem:[%s6717_s10 + $0x2f8] sm:$0xf]  ;;  %v5316_v31 = vpack.c.bf16 %v4158_v28, %v4157_v27 }
 0x281   : > { %5260 = vmatprep.subr.bf16.mxu0 %v5483_v15  ;;  %5273 = vmatprep.subr.bf16.mxu1 %v5483_v15  ;;  %v5329_v33 = vpack.c.bf16 %v4188_v30, %v4187_v29  ;;  %v4172_v30 = vld [vmem:[%s6718_s11 + $0x4] ss:$0 sm:$0xff] }
 0x284   : > { %5262 = vmatpush3.bf16.msra.mxu0 %v5261_v38  ;;  %5275 = vmatpush3.bf16.msra.mxu1 %v5274_v39  ;;  %v4175_v38 = vld [vmem:[%s6717_s10 + $0x250] sm:$0xff]  ;;  %v4176_v39 = vld [vmem:[%s6717_s10 + $0x258] sm:$0xff] }
 0x285   : > { %5263 = vmatprep.subr.bf16.mxu0 %v5483_v15  ;;  %5276 = vmatprep.subr.bf16.mxu1 %v5483_v15  ;;  %v5336_v41 = vpack.c.bf16 %v4176_v39, %v4175_v38 }
 0x288   : > { %5266 = vmatpush3.bf16.msk.msra.mxu0 %vm5682_vm7, %v5264_v44  ;;  %5279 = vmatpush3.bf16.msk.msra.mxu1 %vm5682_vm7, %v5277_v45  ;;  %v4179_v44 = vld [vmem:[%s6717_s10 + $0x270] sm:$0xff]  ;;  %v4180_v45 = vld [vmem:[%s6717_s10 + $0x278] sm:$0xf] }
 0x289   : > { %5280 = vmatprep.subr.bf16.mxu0 %v5483_v15  ;;  %5293 = vmatprep.subr.bf16.mxu1 %v5483_v15  ;;  %v5342_v46 = vpack.c.bf16 %v4180_v45, %v4179_v44 }
 0x28b   : > { %4827 = vmatmul.mubr.msk.f32.vlgmr.msra.gmra.mrb[14].mxu0 %vm823_vm8, %v5831_v52  ;;  %4846 = vmatmul.mubr.msk.f32.vlgmr.msra.gmra.mrb[14].mxu1 %vm823_vm8, %v6058_v40 }
 0x28c   : > { %5282 = vmatpush3.bf16.msra.mxu0 %v5281_v50  ;;  %5295 = vmatpush3.bf16.msra.mxu1 %v5294_v51 }
 0x28d   : > { %5283 = vmatprep.subr.bf16.mxu0 %v5483_v15  ;;  %5296 = vmatprep.subr.bf16.mxu1 %v5483_v15 }
 0x28e   : > { %4864 = vmatprep.mubr.msk.f32.mxu0 %vm5482_vm4, %v5481_v5  ;;  %4883 = vmatprep.mubr.msk.f32.mxu1 %vm5482_vm4, %v5481_v5 }
 0x290   : > { %5285 = vmatpush3.bf16.msra.mxu0 %v5284_v56  ;;  %5298 = vmatpush3.bf16.msra.mxu1 %v5297_v57 }
 0x291   : > { %5286 = vmatprep.subr.bf16.mxu0 %v5483_v15  ;;  %5299 = vmatprep.subr.bf16.mxu1 %v5483_v15 }
 0x294   : > { %5288 = vmatpush3.bf16.msra.mxu0 %v5287_v62  ;;  %5301 = vmatpush3.bf16.msra.mxu1 %v5300_v63 }
 0x295   : > { %5289 = vmatprep.subr.bf16.mxu0 %v5483_v15  ;;  %5302 = vmatprep.subr.bf16.mxu1 %v5483_v15 }
 0x298   : > { %5292 = vmatpush3.bf16.msk.msra.mxu0 %vm5682_vm7, %v5290_v4  ;;  %5305 = vmatpush3.bf16.msk.msra.mxu1 %vm5682_vm7, %v5303_v6  ;;  %v4128_v4 = vld [vmem:[%s6718_s11 + $0x2] ss:$0 sm:$0xff] }
 0x299   : > { %5306 = vmatprep.subr.bf16.mxu0 %v5483_v15  ;;  %5319 = vmatprep.subr.bf16.mxu1 %v5483_v15 }
 0x29b   : > { %4865 = vmatmul.mubr.msk.f32.vlgmr.msra.gmra.mrb[16].mxu0 %vm823_vm8, %v5831_v52  ;;  %4884 = vmatmul.mubr.msk.f32.vlgmr.msra.gmra.mrb[16].mxu1 %vm823_vm8, %v6058_v40 }
 0x29c   : > { %5308 = vmatpush3.bf16.msra.mxu0 %v5307_v12  ;;  %5321 = vmatpush3.bf16.msra.mxu1 %v5320_v13  ;;  %v6449_v12 = vsel %vm2827_vm11, 1.0, %v5481_v5  ;;  %v6452_v13 = vsel %vm2925_vm12, 1.0, %v5481_v5 }
 0x29d   : > { %5309 = vmatprep.subr.bf16.mxu0 %v5483_v15  ;;  %5322 = vmatprep.subr.bf16.mxu1 %v5483_v15 }
 0x29e   : > { %4902 = vmatprep.mubr.msk.f32.mxu0 %vm5482_vm4, %v5481_v5  ;;  %4921 = vmatprep.mubr.msk.f32.mxu1 %vm5482_vm4, %v5481_v5 }
 0x2a0   : > { %5311 = vmatpush3.bf16.msra.mxu0 %v5310_v19  ;;  %5324 = vmatpush3.bf16.msra.mxu1 %v5323_v20  ;;  %v4150_v20 = vld [vmem:[%s6718_s11 + $0x3] ss:$0 sm:$0xff] }
 0x2a1   : > { %5312 = vmatprep.subr.bf16.mxu0 %v5483_v15  ;;  %5325 = vmatprep.subr.bf16.mxu1 %v5483_v15 }
 0x2a4   : > { %5314 = vmatpush3.bf16.msra.mxu0 %v5313_v25  ;;  %5327 = vmatpush3.bf16.msra.mxu1 %v5326_v26 }
 0x2a5   : > { %5315 = vmatprep.subr.bf16.mxu0 %v5483_v15  ;;  %5328 = vmatprep.subr.bf16.mxu1 %v5483_v15 }
 0x2a8   : > { %5318 = vmatpush3.bf16.msk.msra.mxu0 %vm5682_vm7, %v5316_v31  ;;  %5331 = vmatpush3.bf16.msk.msra.mxu1 %vm5682_vm7, %v5329_v33 }
 0x2a9   : > { %5332 = vmatprep.subr.bf16.mxu0 %v5483_v15  ;;  %4943 = vmatprep.subr.mxu1 %v5481_v5 }
 0x2ab   : > { %4903 = vmatmul.mubr.msk.f32.vlgmr.msra.gmra.mrb[18].mxu0 %vm823_vm8, %v5831_v52  ;;  %4922 = vmatmul.mubr.msk.f32.vlgmr.msra.gmra.mrb[18].mxu1 %vm823_vm8, %v6058_v40 }
 0x2ac   : > { %5334 = vmatpush3.bf16.msra.mxu0 %v5333_v37  ;;  %4940 = vmatprep.mubr.msk.f32.mxu0 %vm5482_vm4, %v5481_v5 }
 0x2ad   : > { %5335 = vmatprep.subr.bf16.mxu0 %v5483_v15  ;;  %4945 = vmatprep.mubr.msk.f32.mxu1 %vm5482_vm4, %v5481_v5 }
 0x2b0   : > { %5337 = vmatpush3.bf16.msra.mxu0 %v5336_v41 }
 0x2b1   : > { %5338 = vmatprep.subr.bf16.mxu0 %v5483_v15 }
 0x2b4   : > { %5340 = vmatpush3.bf16.msra.mxu0 %v5339_v43 }
 0x2b5   : > { %5341 = vmatprep.subr.bf16.mxu0 %v5483_v15 }
 0x2b8   : > { %5344 = vmatpush3.bf16.msk.msra.mxu0 %vm5682_vm7, %v5342_v46 }
 0x2b9   : > { %4948 = vmatprep.subr.mxu0 %v5481_v5 }
 0x2bb   : > { %4941 = vmatmul.mubr.msk.f32.vlgmr.msra.gmra.mrb[20].mxu0 %vm823_vm8, %v5831_v52 }
 0x2bc   : > { %4950 = vmatprep.mubr.msk.f32.mxu0 %vm5482_vm4, %v5481_v5 }
 0x32e   : > { %v1755_v48 = vpop.f32.mrb[8].mxu0  ;;  %v1877_v49 = vpop.f32.mrb[8].mxu1 }
 0x32f   : > { %v1756_v50 = vadd.f32 %v4068_v47, %v1755_v48  ;;  %v4714_v51 = vpop.f32.mrb[9].mxu0  ;;  %v4733_v53 = vpop.f32.mrb[9].mxu1 }
 0x331   : > { %5449 = vtanh.f32 %v1756_v50 }
 0x33b   : > { %v5450_v54 = vpop.eup %5449 }
 0x33c   : > { %1762 = vst.msk [vmem:[%s1761_s25] sm:$0xff] %vm563_vm3, %v5450_v54  ;;  %1763 = vst.msk [vmem:[#allocation2] sm:$0xff] %vm563_vm3, %v5450_v54 }
 0x33d   : > { %vm1778_vm3 = vmand %vm1769_vm15, %vm1772_vm0 }
 0x33e   : > { %v1950_v36 = vpop.f32.mrb[10].mxu0  ;;  %v2049_v55 = vpop.f32.mrb[10].mxu1  ;;  %vm6497_vm6 = vmor %vm1778_vm3, %vm1789_vm5 }
 0x33f   : > { %v1951_v56 = vadd.f32 %v1950_v36, %v1877_v49  ;;  %v4752_v57 = vpop.f32.mrb[11].mxu0  ;;  %v4771_v58 = vpop.f32.mrb[11].mxu1 }
 0x341   : > { %v1961_v11 = vadd.f32 %v4084_v2, %v1951_v56 }
 0x343   : > { %v2831_v16 = vmul.f32 %v6449_v12, %v1961_v11  ;;  %v2928_v17 = vmul.f32 %v6452_v13, %v1961_v11 }
 0x34e   : > { %v2122_v59 = vpop.f32.mrb[12].mxu0  ;;  %v2222_v60 = vpop.f32.mrb[12].mxu1 }
 0x34f   : > { %v2123_v61 = vadd.f32 %v2122_v59, %v2049_v55  ;;  %v4790_v62 = vpop.f32.mrb[13].mxu0  ;;  %v4809_v63 = vpop.f32.mrb[13].mxu1 }
 0x351   : > { %v2134_v25 = vadd.f32 %v4106_v18, %v2123_v61 }
 0x353   : > { %v3162_v27 = vmul.f32 %v6449_v12, %v2134_v25  ;;  %v3253_v28 = vmul.f32 %v6452_v13, %v2134_v25 }
 0x35e   : > { %v2295_v3 = vpop.f32.mrb[14].mxu0  ;;  %v2395_v6 = vpop.f32.mrb[14].mxu1 }
 0x35f   : > { %v2296_v7 = vadd.f32 %v2295_v3, %v2222_v60  ;;  %v4828_v8 = vpop.f32.mrb[15].mxu0  ;;  %v4847_v9 = vpop.f32.mrb[15].mxu1 }
 0x361   : > { %v2307_v14 = vadd.f32 %v4128_v4, %v2296_v7 }
 0x363   : > { %4944 = vmatpush3.xpose.msk.msra.mxu1 %vm823_vm8, %v2307_v14  ;;  %4949 = vmatpush3.xpose.msk.msra.mxu0 %vm823_vm8, %v2307_v14 }
 0x364   : > { %4963 = vmatprep.subr.mxu0 %v5481_v5  ;;  %4953 = vmatprep.subr.mxu1 %v5481_v5 }
 0x366   : > { %4946 = vmatmul.mubr.msk.f32.vlgmr.msra.gmra.mrb[20].mxu1 %vm823_vm8, %v2831_v16  ;;  %4951 = vmatmul.mubr.msk.f32.vlgmr.msra.gmra.mrb[22].mxu0 %vm823_vm8, %v2928_v17 }
 0x367   : > { %4965 = vmatprep.mubr.msk.f32.mxu0 %vm5482_vm4, %v5481_v5  ;;  %4955 = vmatprep.mubr.msk.f32.mxu1 %vm5482_vm4, %v5481_v5 }
 0x36e   : > { %v2468_v19 = vpop.f32.mrb[16].mxu0  ;;  %v2568_v21 = vpop.f32.mrb[16].mxu1 }
 0x36f   : > { %v2469_v22 = vadd.f32 %v2468_v19, %v2395_v6  ;;  %v4866_v23 = vpop.f32.mrb[17].mxu0  ;;  %v4885_v24 = vpop.f32.mrb[17].mxu1 }
 0x371   : > { %v2480_v26 = vadd.f32 %v4150_v20, %v2469_v22 }
 0x373   : > { %4964 = vmatpush3.xpose.msk.msra.mxu0 %vm823_vm8, %v2480_v26 }
 0x374   : > { %4968 = vmatprep.subr.mxu0 %v5481_v5 }
 0x376   : > { %4966 = vmatmul.mubr.msk.f32.vlgmr.msra.gmra.mrb[24].mxu0 %vm823_vm8, %v3162_v27 }
 0x377   : > { %4969 = vmatpush3.xpose.msk.msra.mxu0 %vm823_vm8, %v2480_v26  ;;  %4970 = vmatprep.mubr.msk.f32.mxu0 %vm5482_vm4, %v5481_v5 }
 0x378   : > { %5345 = vmatprep.subr.bf16.mxu0 %v5483_v15 }
 0x37a   : > { %4971 = vmatmul.mubr.msk.f32.vlgmr.msra.gmra.mrb[26].mxu0 %vm823_vm8, %v3253_v28 }
 0x37b   : > { %4999 = vmatprep.mubr.msk.f32.mxu0 %vm5482_vm4, %v5481_v5 }
 0x37e   : > { %v2641_v29 = vpop.f32.mrb[18].mxu0  ;;  %v2741_v31 = vpop.f32.mrb[18].mxu1 }
 0x37f   : > { %v2642_v33 = vadd.f32 %v2641_v29, %v2568_v21  ;;  %v4904_v34 = vpop.f32.mrb[19].mxu0  ;;  %v4923_v35 = vpop.f32.mrb[19].mxu1 }
 0x381   : > { %v6487_v37 = vadd.f32 %v4172_v30, %v2642_v33  ;;  %v4194_v30 = vld [vmem:[%s6718_s11 + $0x5] ss:$0 sm:$0xff] }
 0x383   : > { %v3015_v38 = vmul.f32 %v6452_v13, %v6487_v37  ;;  %v2922_v29 = vmul.f32 %v6449_v12, %v6487_v37 }
 0x385   : > { %4954 = vmatpush3.msra.mxu1 %v3015_v38 }
 0x386   : > { %4958 = vmatprep.subr.mxu1 %v5481_v5 }
 0x38e   : > { %v2814_v39 = vpop.f32.mrb[20].mxu0 }
 0x38f   : > { %v6492_v41 = vadd.f32 %v2814_v39, %v2741_v31  ;;  %v4942_v42 = vpop.f32.mrb[21].mxu0 }
 0x391   : > { %v2826_v33 = vadd.f32 %v4194_v30, %v6492_v41  ;;  %v3488_v41 = vld [vmem:[%s6719_s12 + $0x8] sm:$0xff] }
 0x392   : > { %v4235_v30 = vld [vmem:[%s6719_s12 + $0xe8] sm:$0xff] }
 0x393   : > { %v3340_v38 = vmul.f32 %v6452_v13, %v2826_v33  ;;  %v3252_v10 = vmul.f32 %v6449_v12, %v2826_v33  ;;  %v3487_v13 = vld [vmem:[%s6719_s12] sm:$0xff]  ;;  %v3489_v12 = vld [vmem:[%s6719_s12 + $0x10] sm:$0xff] }
 0x394   : > { %v4236_v33 = vld [vmem:[%s6719_s12 + $0xf0] sm:$0xff] }
 0x439   : > { %v2904_v43 = vpop.f32.mrb[20].mxu1  ;;  %v2998_v44 = vpop.f32.mrb[22].mxu0 }
 0x43a   : > { %v2908_v46 = vmul.f32 0.18257418, %v2904_v43  ;;  %v3002_v47 = vmul.f32 0.18257418, %v2998_v44  ;;  %v4947_v48 = vpop.f32.mrb[21].mxu1  ;;  %v4952_v49 = vpop.f32.mrb[23].mxu0  ;;  %v5359_v44 = vpack.c.bf16 %v3488_v41, %v3487_v13 }
 0x43b   : > { %v3491_v48 = vld [vmem:[%s6719_s12 + $0x20] sm:$0xff]  ;;  %v3492_v49 = vld [vmem:[%s6719_s12 + $0x28] sm:$0xff] }
 0x43c   : > { %v3003_v50 = vsel %vm6497_vm6, %v3002_v47, -1e+09  ;;  %v2909_v53 = vsel %vm6497_vm6, %v2908_v46, -1e+09  ;;  %v3490_v46 = vld [vmem:[%s6719_s12 + $0x18] sm:$0xff] }
 0x43d   : > { %v3004_v51 = vsel %vm2910_vm9, %v3003_v50, -inf  ;;  %v2911_v54 = vsel %vm2910_vm9, %v2909_v53, -inf  ;;  %v5362_v47 = vpack.c.bf16 %v3490_v46, %v3489_v12 }
 0x43e   : > { %3005 = vmax.xlane.f32.xlu0 %v3004_v51  ;;  %v3493_v51 = vld [vmem:[%s6719_s12 + $0x30] sm:$0xff] }
 0x442   : > { %2912 = vmax.xlane.f32.xlu0 %v2911_v54 }
 0x449   : > { %v3235_v36 = vpop.f32.mrb[24].mxu0 }
 0x44a   : > { %v4967_v55 = vpop.f32.mrb[25].mxu0  ;;  %v3239_v57 = vmul.f32 0.18257418, %v3235_v36  ;;  %v4209_v36 = vld [vmem:[%s6719_s12 + $0x80] sm:$0xff] }
 0x44b   : > { %v4210_v55 = vld [vmem:[%s6719_s12 + $0x88] sm:$0xff] }
 0x44c   : > { %v3240_v62 = vsel %vm6497_vm6, %v3239_v57, -1e+09  ;;  %v4211_v57 = vld [vmem:[%s6719_s12 + $0x90] sm:$0xff] }
 0x44d   : > { %v3323_v56 = vpop.f32.mrb[26].mxu0  ;;  %v3241_v63 = vsel %vm2910_vm9, %v3240_v62, -inf }
 0x44e   : > { %v3327_v58 = vmul.f32 0.18257418, %v3323_v56  ;;  %v4972_v59 = vpop.f32.mrb[27].mxu0  ;;  %v5346_v56 = vpack.c.bf16 %v4210_v55, %v4209_v36 }
 0x450   : > { %v3328_v60 = vsel %vm6497_vm6, %v3327_v58, -1e+09  ;;  %5347 = vmatpush3.bf16.msra.mxu0 %v5346_v56  ;;  %v4212_v58 = vld [vmem:[%s6719_s12 + $0x98] sm:$0xff] }
 0x451   : > { %v3329_v61 = vsel %vm2910_vm9, %v3328_v60, -inf  ;;  %5348 = vmatprep.subr.bf16.mxu0 %v5483_v15  ;;  %v5349_v59 = vpack.c.bf16 %v4212_v58, %v4211_v57 }
 0x452   : > { %3330 = vmax.xlane.f32.xlu1 %v3329_v61  ;;  %v4214_v61 = vld [vmem:[%s6719_s12 + $0xa8] sm:$0xff] }
 0x454   : > { %5350 = vmatpush3.bf16.msra.mxu0 %v5349_v59 }
 0x455   : > { %5351 = vmatprep.subr.bf16.mxu0 %v5483_v15 }
 0x456   : > { %3242 = vmax.xlane.f32.xlu1 %v3241_v63  ;;  %v4215_v63 = vld [vmem:[%s6719_s12 + $0xb0] sm:$0xff] }
 0x4cb   : > { %v3006_v0 = vpop.xlane.xlu0 %3005 }
 0x4cc   : > { %v3007_v1 = vsub.f32 %v3003_v50, %v3006_v0  ;;  %v5365_v50 = vpack.c.bf16 %v3492_v49, %v3491_v48  ;;  %v4216_v0 = vld [vmem:[%s6719_s12 + $0xb8] sm:$0xf] }
 0x4ce   : > { %v3008_v2 = vmul.f32 1.442695, %v3007_v1  ;;  %v5355_v1 = vpack.c.bf16 %v4216_v0, %v4215_v63 }
 0x4cf   : > { %v2913_v3 = vpop.xlane.xlu0 %2912 }
 0x4d0   : > { %5451 = vpow2.f32 %v3008_v2  ;;  %v2914_v4 = vsub.f32 %v2909_v53, %v2913_v3  ;;  %v3494_v53 = vld [vmem:[%s6719_s12 + $0x38] sm:$0xf]  ;;  %v4222_v2 = vld [vmem:[%s6719_s12 + $0x40] sm:$0xff]  ;;  %v4223_v3 = vld [vmem:[%s6719_s12 + $0x48] sm:$0xff] }
 0x4d1   : > { %v5368_v54 = vpack.c.bf16 %v3494_v53, %v3493_v51 }
 0x4d2   : > { %v2915_v6 = vmul.f32 1.442695, %v2914_v4  ;;  %v5385_v4 = vpack.c.bf16 %v4223_v3, %v4222_v2  ;;  %v4247_v2 = vld [vmem:[%s6721_s14 + $0x1] ss:$0 sm:$0xff]  ;;  %v4244_v3 = vld [vmem:[%s6721_s14] ss:$0 sm:$0xff] }
 0x4d4   : > { %5453 = vpow2.f32 %v2915_v6  ;;  %v4224_v6 = vld [vmem:[%s6719_s12 + $0x50] sm:$0xff] }
 0x4da   : > { %v5452_v7 = vpop.eup %5451 }
 0x4db   : > { %v3010_v8 = vsel %vm2910_vm9, %v5452_v7, 0.0 }
 0x4dc   : > { %3011 = vadd.xlane.f32.xlu0 %v3010_v8 }
 0x4de   : > { %v5454_v9 = vpop.eup %5453 }
 0x4df   : > { %v3331_v11 = vpop.xlane.xlu1 %3330  ;;  %v2917_v14 = vsel %vm2910_vm9, %v5454_v9, 0.0 }
 0x4e0   : > { %v3332_v16 = vsub.f32 %v3328_v60, %v3331_v11  ;;  %2918 = vadd.xlane.f32.xlu1 %v2917_v14  ;;  %v4213_v60 = vld [vmem:[%s6719_s12 + $0xa0] sm:$0xff] }
 0x4e1   : > { %v4226_v14 = vld [vmem:[%s6719_s12 + $0x60] sm:$0xff] }
 0x4e2   : > { %v3333_v17 = vmul.f32 1.442695, %v3332_v16  ;;  %v4227_v16 = vld [vmem:[%s6719_s12 + $0x68] sm:$0xff] }
 0x4e3   : > { %v3243_v18 = vpop.xlane.xlu1 %3242 }
 0x4e4   : > { %5455 = vpow2.f32 %v3333_v17  ;;  %v3244_v19 = vsub.f32 %v3240_v62, %v3243_v18  ;;  %v5352_v62 = vpack.c.bf16 %v4214_v61, %v4213_v60  ;;  %v5391_v17 = vpack.c.bf16 %v4227_v16, %v4226_v14  ;;  %v4228_v18 = vld [vmem:[%s6719_s12 + $0x70] sm:$0xff] }
 0x4e6   : > { %v3245_v20 = vmul.f32 1.442695, %v3244_v19  ;;  %5353 = vmatpush3.bf16.msra.mxu0 %v5352_v62  ;;  %v4229_v19 = vld [vmem:[%s6719_s12 + $0x78] sm:$0xf] }
 0x4e7   : > { %5354 = vmatprep.subr.bf16.mxu0 %v5483_v15 }
 0x4e8   : > { %5457 = vpow2.f32 %v3245_v20  ;;  %v5394_v20 = vpack.c.bf16 %v4229_v19, %v4228_v18 }
 0x4ea   : > { %5357 = vmatpush3.bf16.msk.msra.mxu0 %vm5682_vm7, %v5355_v1 }
 0x4eb   : > { %5371 = vmatprep.subr.bf16.mxu0 %v5483_v15 }
 0x4ee   : > { %v5456_v21 = vpop.eup %5455 }
 0x4ef   : > { %v3335_v22 = vsel %vm2910_vm9, %v5456_v21, 0.0 }
 0x4f0   : > { %3336 = vadd.xlane.f32.xlu0 %v3335_v22  ;;  %v4231_v22 = vld [vmem:[%s6719_s12 + $0xc8] sm:$0xff] }
 0x4f2   : > { %v5458_v23 = vpop.eup %5457 }
 0x4f3   : > { %v3247_v24 = vsel %vm2910_vm9, %v5458_v23, 0.0 }
 0x4f4   : > { %3248 = vadd.xlane.f32.xlu1 %v3247_v24  ;;  %v4232_v24 = vld [vmem:[%s6719_s12 + $0xd0] sm:$0xff] }
 0x569   : > { %v3012_v25 = vpop.xlane.xlu0 %3011 }
 0x56a   : > { %5459 = vrcp.f32 %v3012_v25  ;;  %v4233_v25 = vld [vmem:[%s6719_s12 + $0xd8] sm:$0xff] }
 0x56d   : > { %v2919_v26 = vpop.xlane.xlu1 %2918 }
 0x56e   : > { %5461 = vrcp.f32 %v2919_v26 }
 0x574   : > { %v5460_v27 = vpop.eup %5459 }
 0x575   : > { %v3014_v28 = vmul.f32 %v5460_v27, %v5452_v7  ;;  %v4225_v7 = vld [vmem:[%s6719_s12 + $0x58] sm:$0xff] }
 0x576   : > { %v5388_v11 = vpack.c.bf16 %v4225_v7, %v4224_v6  ;;  %v4249_v7 = vld [vmem:[%s6722_s15 + $0x1] ss:$0 sm:$0xff] }
 0x577   : > { %4956 = vmatmul.mubr.msk.f32.vlgmr.msra.gmra.mrb[22].mxu1 %vm2910_vm9, %v3014_v28  ;;  %v5375_v28 = vpack.c.bf16 %v4233_v25, %v4232_v24 }
 0x578   : > { %4959 = vmatpush3.msra.mxu1 %v2922_v29  ;;  %4960 = vmatprep.mubr.msk.f32.mxu1 %vm5482_vm4, %v5481_v5  ;;  %v5462_v31 = vpop.eup %5461  ;;  %v4234_v29 = vld [vmem:[%s6719_s12 + $0xe0] sm:$0xff] }
 0x579   : > { %4973 = vmatprep.subr.mxu1 %v5481_v5  ;;  %v2921_v34 = vmul.f32 %v5462_v31, %v5454_v9  ;;  %v5378_v31 = vpack.c.bf16 %v4235_v30, %v4234_v29 }
 0x57d   : > { %v3337_v35 = vpop.xlane.xlu0 %3336 }
 0x57e   : > { %5463 = vrcp.f32 %v3337_v35 }
 0x57f   : > { %4961 = vmatmul.mubr.msk.f32.vlgmr.msra.gmra.mrb[22].mxu1 %vm2910_vm9, %v2921_v34 }
 0x580   : > { %4974 = vmatpush3.msra.mxu1 %v3340_v38  ;;  %4975 = vmatprep.mubr.msk.f32.mxu1 %vm5482_vm4, %v5481_v5 }
 0x581   : > { %v3249_v37 = vpop.xlane.xlu1 %3248  ;;  %4978 = vmatprep.subr.mxu1 %v5481_v5 }
 0x582   : > { %5465 = vrcp.f32 %v3249_v37 }
 0x588   : > { %v5464_v39 = vpop.eup %5463 }
 0x589   : > { %v3339_v42 = vmul.f32 %v5464_v39, %v5456_v21  ;;  %v4230_v21 = vld [vmem:[%s6719_s12 + $0xc0] sm:$0xff] }
 0x58b   : > { %4976 = vmatmul.mubr.msk.f32.vlgmr.msra.gmra.mrb[24].mxu1 %vm2910_vm9, %v3339_v42 }
 0x58c   : > { %4979 = vmatpush3.msra.mxu1 %v3252_v10  ;;  %4980 = vmatprep.mubr.msk.f32.mxu1 %vm5482_vm4, %v5481_v5  ;;  %v5466_v43 = vpop.eup %5465  ;;  %v4221_v10 = vld [vmem:[%s6720_s13] ss:$0 sm:$0xff] }
 0x58d   : > { %5358 = vmatprep.subr.bf16.mxu1 %v5483_v15  ;;  %v3251_v45 = vmul.f32 %v5466_v43, %v5458_v23  ;;  %v5372_v23 = vpack.c.bf16 %v4231_v22, %v4230_v21 }
 0x593   : > { %4981 = vmatmul.mubr.msk.f32.vlgmr.msra.gmra.mrb[24].mxu1 %vm2910_vm9, %v3251_v45  ;;  %v4243_v45 = vld [vmem:[%s6720_s13 + $0x1] ss:$0 sm:$0xff] }
 0x594   : > { %5360 = vmatpush3.bf16.msra.mxu1 %v5359_v44  ;;  %5018 = vmatprep.mubr.msk.f32.mxu1 %vm5482_vm4, %v5481_v5 }
 0x595   : > { %5361 = vmatprep.subr.bf16.mxu1 %v5483_v15 }
 0x598   : > { %5363 = vmatpush3.bf16.msra.mxu1 %v5362_v47 }
 0x599   : > { %5364 = vmatprep.subr.bf16.mxu1 %v5483_v15 }
 0x59c   : > { %5366 = vmatpush3.bf16.msra.mxu1 %v5365_v50 }
 0x59d   : > { %5367 = vmatprep.subr.bf16.mxu1 %v5483_v15 }
 0x5a0   : > { %5370 = vmatpush3.bf16.msk.msra.mxu1 %vm5682_vm7, %v5368_v54 }
 0x5a1   : > { %5384 = vmatprep.subr.bf16.mxu1 %v5483_v15 }
 0x652   : > { %v3158_v8 = vpop.f32.mrb[22].mxu1 }
 0x653   : > { %v4962_v9 = vpop.f32.mrb[23].mxu1  ;;  %5019 = vmatmul.mubr.msk.f32.vlgmr.msra.gmra.mrb[26].mxu1 %vm823_vm8, %v3158_v8 }
 0x654   : > { %5386 = vmatpush3.bf16.msra.mxu1 %v5385_v4  ;;  %5056 = vmatprep.mubr.msk.f32.mxu1 %vm5482_vm4, %v5481_v5 }
 0x655   : > { %5387 = vmatprep.subr.bf16.mxu1 %v5483_v15 }
 0x658   : > { %5389 = vmatpush3.bf16.msra.mxu1 %v5388_v11 }
 0x659   : > { %5390 = vmatprep.subr.bf16.mxu1 %v5483_v15 }
 0x65c   : > { %5392 = vmatpush3.bf16.msra.mxu1 %v5391_v17 }
 0x65d   : > { %5393 = vmatprep.subr.bf16.mxu1 %v5483_v15 }
 0x660   : > { %5396 = vmatpush3.bf16.msk.msra.mxu1 %vm5682_vm7, %v5394_v20 }
 0x663   : > { %5057 = vmatmul.mubr.msk.f32.vlgmr.msra.gmra.mrb[28].mxu1 %vm823_vm8, %v3158_v8  ;;  %v4245_v8 = vld [vmem:[%s6722_s15] ss:$0 sm:$0xff] }
 0x666   : > { %v3483_v26 = vpop.f32.mrb[24].mxu1 }
 0x667   : > { %v4982_v27 = vpop.f32.mrb[25].mxu1  ;;  %5000 = vmatmul.mubr.msk.f32.vlgmr.msra.gmra.mrb[28].mxu0 %vm823_vm8, %v3483_v26 }
 0x668   : > { %5373 = vmatpush3.bf16.msra.mxu0 %v5372_v23  ;;  %5037 = vmatprep.mubr.msk.f32.mxu0 %vm5482_vm4, %v5481_v5  ;;  %v4237_v5 = vld [vmem:[%s6719_s12 + $0xf8] sm:$0xf] }
 0x669   : > { %5374 = vmatprep.subr.bf16.mxu0 %v5483_v15  ;;  %v5381_v34 = vpack.c.bf16 %v4237_v5, %v4236_v33 }
 0x66c   : > { %5376 = vmatpush3.bf16.msra.mxu0 %v5375_v28 }
 0x66d   : > { %5377 = vmatprep.subr.bf16.mxu0 %v5483_v15 }
 0x670   : > { %5379 = vmatpush3.bf16.msra.mxu0 %v5378_v31 }
 0x671   : > { %5380 = vmatprep.subr.bf16.mxu0 %v5483_v15 }
 0x674   : > { %5383 = vmatpush3.bf16.msk.msra.mxu0 %vm5682_vm7, %v5381_v34 }
 0x677   : > { %5038 = vmatmul.mubr.msk.f32.vlgmr.msra.gmra.mrb[30].mxu0 %vm823_vm8, %v3483_v26 }
 0x726   : > { %v3652_v35 = vpop.f32.mrb[26].mxu1 }
 0x727   : > { %v5020_v38 = vpop.f32.mrb[27].mxu1 }
 0x728   : > { %v4250_v38 = vld [vmem:[%s6723_s16] ss:$0 sm:$0xff] }
 0x736   : > { %v3825_v37 = vpop.f32.mrb[28].mxu1 }
 0x737   : > { %v5058_v39 = vpop.f32.mrb[29].mxu1 }
 0x73a   : > { %v3576_v42 = vpop.f32.mrb[28].mxu0 }
 0x73b   : > { %v3653_v13 = vadd.f32 %v3652_v35, %v3576_v42  ;;  %v5001_v41 = vpop.f32.mrb[29].mxu0  ;;  %v4251_v42 = vld [vmem:[%s6724_s17] ss:$0 sm:$0xff] }
 0x73d   : > { %v3663_v43 = vadd.f32 %v4221_v10, %v3653_v13 }
 0x73f   : > { %v3664_v44 = vadd.f32 %v3663_v43, %v5831_v52 }
 0x741   : > { %v3839_v15 = vsel %vm823_vm8, %v3664_v44, 0.0 }
 0x742   : > { %3840 = vadd.xlane.f32.xlu0 %v3839_v15 }
 0x74a   : > { %v3752_v32 = vpop.f32.mrb[30].mxu0 }
 0x74b   : > { %v3826_v12 = vadd.f32 %v3825_v37, %v3752_v32  ;;  %v5039_v46 = vpop.f32.mrb[31].mxu0 }
 0x74d   : > { %v3837_v47 = vadd.f32 %v4243_v45, %v3826_v12 }
 0x74f   : > { %v3838_v48 = vadd.f32 %v3837_v47, %v6058_v40 }
 0x751   : > { %v3842_v49 = vsel %vm823_vm8, %v3838_v48, 0.0 }
 0x752   : > { %3843 = vadd.xlane.f32.xlu1 %v3842_v49 }
 0x7cf   : > { %v3841_v50 = vpop.xlane.xlu0 %3840 }
 0x7df   : > { %v3844_v51 = vpop.xlane.xlu1 %3843 }
 0x7e0   : > { %v3845_v53 = vadd.f32 %v3844_v51, %v3841_v50 }
 0x7e2   : > { %v3846_v54 = vmul.f32 0.008333334, %v3845_v53 }
 0x7e4   : > { %v3847_v36 = vsub.f32 %v3664_v44, %v3846_v54  ;;  %v3852_v55 = vsub.f32 %v3838_v48, %v3846_v54 }
 0x7e6   : > { %v3853_v56 = vmul.f32 %v3852_v55, %v3852_v55  ;;  %v3848_v57 = vmul.f32 %v3847_v36, %v3847_v36 }
 0x7e8   : > { %v3854_v58 = vsel %vm823_vm8, %v3853_v56, 0.0  ;;  %v3849_v59 = vsel %vm823_vm8, %v3848_v57, 0.0 }
 0x7e9   : > { %3855 = vadd.xlane.f32.xlu1 %v3854_v58  ;;  %3850 = vadd.xlane.f32.xlu0 %v3849_v59 }
 0x876   : > { %v3856_v60 = vpop.xlane.xlu1 %3855  ;;  %v3851_v61 = vpop.xlane.xlu0 %3850 }
 0x877   : > { %v3857_v62 = vadd.f32 %v3856_v60, %v3851_v61 }
 0x879   : > { %v3858_v63 = vmul.f32 0.008333334, %v3857_v62 }
 0x87b   : > { %v3859_v0 = vadd.f32 1e-05, %v3858_v63 }
 0x87d   : > { %5467 = vrsqrt.f32 %v3859_v0 }
 0x887   : > { %v5468_v1 = vpop.eup %5467 }
 0x888   : > { %v3878_v4 = vmul.f32 %v5468_v1, %v3852_v55  ;;  %v3861_v6 = vmul.f32 %v5468_v1, %v3847_v36 }
 0x88a   : > { %v3887_v9 = vmul.f32 %v4247_v2, %v3878_v4  ;;  %v3869_v11 = vmul.f32 %v4244_v3, %v3861_v6 }
 0x88c   : > { %v3896_v14 = vadd.f32 %v4249_v7, %v3887_v9  ;;  %v3877_v16 = vadd.f32 %v4245_v8, %v3869_v11 }
 0x88e   : > { %v3928_v17 = vadd.f32 %v3896_v14, %v6058_v40  ;;  %v3897_v18 = vadd.f32 %v3877_v16, %v5831_v52 }
 0x890   : > { %v3929_v19 = vsel %vm823_vm8, %v3928_v17, 0.0  ;;  %v3898_v20 = vsel %vm823_vm8, %v3897_v18, 0.0 }
 0x891   : > { %3930 = vadd.xlane.f32.xlu1 %v3929_v19  ;;  %3899 = vadd.xlane.f32.xlu0 %v3898_v20 }
 0x91e   : > { %v3931_v21 = vpop.xlane.xlu1 %3930  ;;  %v3900_v22 = vpop.xlane.xlu0 %3899 }
 0x91f   : > { %v3932_v23 = vmul.f32 0.016666668, %v3931_v21  ;;  %v3902_v24 = vmul.f32 0.016666668, %v3900_v22 }
 0x921   : > { %v3933_v25 = vsub.f32 %v3928_v17, %v3932_v23  ;;  %v3903_v26 = vsub.f32 %v3897_v18, %v3902_v24 }
 0x923   : > { %v3934_v27 = vmul.f32 %v3933_v25, %v3933_v25  ;;  %v3904_v28 = vmul.f32 %v3903_v26, %v3903_v26 }
 0x925   : > { %v3935_v29 = vsel %vm823_vm8, %v3934_v27, 0.0  ;;  %v3905_v40 = vsel %vm823_vm8, %v3904_v28, 0.0 }
 0x926   : > { %3936 = vadd.xlane.f32.xlu1 %v3935_v29  ;;  %3906 = vadd.xlane.f32.xlu0 %v3905_v40 }
 0x9b3   : > { %v3937_v52 = vpop.xlane.xlu1 %3936  ;;  %v3907_v30 = vpop.xlane.xlu0 %3906 }
 0x9b4   : > { %v3938_v31 = vmul.f32 0.016666668, %v3937_v52  ;;  %v3908_v33 = vmul.f32 0.016666668, %v3907_v30 }
 0x9b6   : > { %v3939_v5 = vadd.f32 1e-05, %v3938_v31  ;;  %v3909_v34 = vadd.f32 1e-05, %v3908_v33 }
 0x9b8   : > { %5469 = vrsqrt.f32 %v3939_v5 }
 0x9b9   : > { %5471 = vrsqrt.f32 %v3909_v34 }
 0x9c2   : > { %v5470_v35 = vpop.eup %5469 }
 0x9c3   : > { %v5472_v37 = vpop.eup %5471  ;;  %v3941_v39 = vmul.f32 %v5470_v35, %v3933_v25 }
 0x9c4   : > { %v3911_v10 = vmul.f32 %v5472_v37, %v3903_v26 }
 0x9c5   : > { %v3942_v13 = vmul.f32 %v4250_v38, %v3941_v39 }
 0x9c6   : > { %v3919_v41 = vmul.f32 %v4250_v38, %v3911_v10 }
 0x9c7   : > { %v3943_v43 = vadd.f32 %v4251_v42, %v3942_v13 }
 0x9c8   : > { %v3927_v44 = vadd.f32 %v4251_v42, %v3919_v41 }
 0x9c9   : > { %3945 = vst.msk [vmem:[#allocation3 + $0x8] sm:$0xff] %vm823_vm8, %v3943_v43 }
 0x9ca   : > { %3944 = vst.msk [vmem:[#allocation3] sm:$0xff] %vm823_vm8, %v3927_v44 }
 0x9cb PF: > { %s28_s27 = sadd.s32 1, %s5479_s27  }
 0x9cc   : > { %p25_p4 = scmp.ge.s32.totalorder %s28_s27, 6  }
 0x9ce   :  { %27 = sbr.rel (!%p25_p4) target bundleno = 4 (0x4), region = 161 }

</bundles_post_ra>
